<compile_context>
chip_gen: v6e
topology: v6e:2x2x1
jax: 0.10.0
libtpu: 0.0.40
codegen_flags: <defaults>
</compile_context>

<pallas_src>
import functools
import math

import jax
import jax.numpy as jnp
from jax.experimental import pallas as pl
from jax.experimental.pallas import tpu as pltpu


_VMEM_LIMIT = 32 * 1024 * 1024  # honest budget; fits v7x's 64 MiB physical VMEM


def _round_up(x, m):
    return ((x + m - 1) // m) * m


# ----------------------------------------------------------------------------
# Kernel 1: M-tiled  act(scale * x @ w + b)   (the three conv matmuls)
# ----------------------------------------------------------------------------
def _matmul_bias_act_kernel(x_ref, w_ref, b_ref, o_ref, *, scale, relu):
    acc = jnp.dot(x_ref[...], w_ref[...], preferred_element_type=jnp.float32)
    if scale != 1.0:
        acc = acc * scale            # conv1's /255, folded into the f32 accumulator
    acc = acc + b_ref[...]           # (1, N) broadcast over rows
    if relu:
        acc = jnp.maximum(acc, 0.0)
    o_ref[...] = acc.astype(o_ref.dtype)


def linear(x, w, b, *, scale=1.0, relu=True, out_dtype=jnp.bfloat16, tm=256):
    """o = act(scale * x @ w + b), tiled over rows with a real grid."""
    M, K = x.shape
    K2, N = w.shape
    assert K == K2
    if M >= tm:
        Mp = _round_up(M, tm)
    else:                             # single block covering the (padded) array
        Mp = _round_up(max(M, 16), 16)
        tm = Mp
    if Mp != M:
        x = jnp.pad(x, ((0, Mp - M), (0, 0)))
    kernel = functools.partial(_matmul_bias_act_kernel, scale=scale, relu=relu)
    out = pl.pallas_call(
        kernel,
        out_shape=jax.ShapeDtypeStruct((Mp, N), out_dtype),
        grid=(Mp // tm,),
        in_specs=[pl.BlockSpec((tm, K), lambda i: (i, 0)),
                  pl.BlockSpec((K, N), lambda i: (0, 0)),
                  pl.BlockSpec((1, N), lambda i: (0, 0))],
        out_specs=pl.BlockSpec((tm, N), lambda i: (i, 0)),
        compiler_params=pltpu.CompilerParams(
            dimension_semantics=("parallel",),         # shards M tiles on v7x's 2 TCs
            vmem_limit_bytes=_VMEM_LIMIT),
    )(x, w, b.reshape(1, N))
    return out if Mp == M else out[:M]


# ----------------------------------------------------------------------------
# Kernel 2: fused  fc(+ReLU) -> [pi | val] head -> Categorical log-softmax
# ----------------------------------------------------------------------------
def _fc_heads_kernel(feat_ref, wf_ref, bf_ref, wh_ref, bh_ref,
                     raw_ref, logp_ref, *, num_actions):
    h = jnp.dot(feat_ref[...], wf_ref[...], preferred_element_type=jnp.float32)
    h = jnp.maximum(h + bf_ref[...], 0.0)              # fc + ReLU; h stays in VMEM
    raw = jnp.dot(h, wh_ref[...], preferred_element_type=jnp.float32) + bh_ref[...]
    raw_ref[...] = raw                                 # cols [0:A) = logits, col A = value
    # Categorical(logits=...) normalization: masked logsumexp over the A real columns.
    col = jax.lax.broadcasted_iota(jnp.int32, raw.shape, 1)
    masked = jnp.where(col < num_actions, raw, -jnp.inf)
    m = jnp.max(masked, axis=-1, keepdims=True)
    lse = jnp.log(jnp.sum(jnp.exp(masked - m), axis=-1, keepdims=True)) + m
    logp_ref[...] = raw - lse


def fc_heads(feat, fc_w, fc_b, head_w, head_b, *, num_actions):
    B, K = feat.shape
    H = fc_w.shape[1]
    Np = head_w.shape[1]                               # lane-dense padded head width (128)
    Bp = _round_up(max(B, 16), 16)                     # avoid degenerate sub-sublane tiles
    if Bp != B:
        feat = jnp.pad(feat, ((0, Bp - B), (0, 0)))
    kernel = functools.partial(_fc_heads_kernel, num_actions=num_actions)
    raw, logp = pl.pallas_call(
        kernel,
        out_shape=(jax.ShapeDtypeStruct((Bp, Np), jnp.float32),
                   jax.ShapeDtypeStruct((Bp, Np), jnp.float32)),
        grid=(1,),
        in_specs=[pl.BlockSpec((Bp, K), lambda i: (0, 0)),
                  pl.BlockSpec((K, H), lambda i: (0, 0)),
                  pl.BlockSpec((1, H), lambda i: (0, 0)),
                  pl.BlockSpec((H, Np), lambda i: (0, 0)),
                  pl.BlockSpec((1, Np), lambda i: (0, 0))],
        out_specs=(pl.BlockSpec((Bp, Np), lambda i: (0, 0)),
                   pl.BlockSpec((Bp, Np), lambda i: (0, 0))),
        compiler_params=pltpu.CompilerParams(vmem_limit_bytes=_VMEM_LIMIT),
    )(feat, fc_w, fc_b.reshape(1, H), head_w, head_b.reshape(1, Np))
    logits = raw[:B, :num_actions]
    log_probs = logp[:B, :num_actions]
    value = raw[:B, num_actions:num_actions + 1]
    return logits, log_probs, value


# ----------------------------------------------------------------------------
# Plain-JAX glue: im2col patch extraction (data movement only)
# ----------------------------------------------------------------------------
# TODO(synk): pulling im2col inside the conv kernels (kh*kw shifted matmuls
# accumulated in VMEM) would remove the 4-9x patch duplication in HBM; strided
# window gathers are not expressible with BlockSpec index maps, so it stays
# as XLA glue for now.
def im2col_nhwc(x, kh, kw, stride):
    B, H, W, C = x.shape
    oh = (H - kh) // stride + 1
    ow = (W - kw) // stride + 1
    cols = []
    for i in range(kh):
        for j in range(kw):
            cols.append(x[:, i:i + stride * (oh - 1) + 1:stride,
                             j:j + stride * (ow - 1) + 1:stride, :])
    patches = jnp.stack(cols, axis=3)                    # (B, oh, ow, kh*kw, C)
    return patches.reshape(B * oh * ow, kh * kw * C), oh, ow


# ----------------------------------------------------------------------------
# Parameters
# ----------------------------------------------------------------------------
def init_params(key, *, output_size=6, input_size=4, hidden_size=512,
                emb_size=32, history_size=64):
    # TODO(synk): init_ortho (orthogonal init) helper is not provided in the
    # reference; replaced with deterministically-seeded scaled Gaussian init.
    keys = jax.random.split(key, 6)

    def dense(k, fan_in, fan_out, gain):
        w = jax.random.normal(k, (fan_in, fan_out), jnp.float32) * (gain / math.sqrt(fan_in))
        b = jnp.zeros((fan_out,), jnp.float32)
        return w, b

    relu_gain = math.sqrt(2.0)
    p = {}
    # Conv weights stored pre-flattened as (kh*kw*Cin, Cout) (HWIO order),
    # matching the NHWC im2col patch ordering.
    p["conv1_w"], p["conv1_b"] = dense(keys[0], input_size * 8 * 8, 32, relu_gain)
    p["conv2_w"], p["conv2_b"] = dense(keys[1], 32 * 4 * 4, 64, relu_gain)
    p["conv3_w"], p["conv3_b"] = dense(keys[2], 64 * 3 * 3, 64, relu_gain)
    conv_out = 64 * 7 * 7
    emb_out = emb_size * history_size
    # fc_w follows the PyTorch convention here: the first conv_out rows are in
    # NCHW (C,H,W) flatten order.  prepare_params() permutes them offline.
    p["fc_w"], p["fc_b"] = dense(keys[3], conv_out + emb_out, hidden_size, relu_gain)
    p["pi_w"], p["pi_b"] = dense(keys[4], hidden_size, output_size, 0.01)
    p["val_w"], p["val_b"] = dense(keys[5], hidden_size, 1, 1.0)
    return p


def prepare_params(p, *, output_size, conv_shape=(64, 7, 7)):
    """One-time offline transformation into the kernel-friendly layout:
       * fc_w conv rows permuted from NCHW flatten order to NHWC flatten order
         (kills the runtime transpose of the conv feature map),
       * pi/val fused into one lane-dense (hidden, 128) head weight
         (cols [0:A) = pi, col A = value, rest zero; sliced off in the wrapper),
       * matmul operands cast to bf16 (f32 accumulation in-kernel).
    """
    C, H, W = conv_shape
    conv_out = C * H * W
    # NHWC-flatten position q reads NCHW-flatten row perm[q].
    perm = jnp.transpose(jnp.arange(conv_out).reshape(C, H, W), (1, 2, 0)).reshape(-1)
    fc_w = jnp.concatenate([p["fc_w"][:conv_out][perm], p["fc_w"][conv_out:]], axis=0)

    hidden = p["pi_w"].shape[0]
    A = output_size
    n_pad = _round_up(A + 1, 128)
    head_w = jnp.zeros((hidden, n_pad), jnp.float32)
    head_w = head_w.at[:, :A].set(p["pi_w"]).at[:, A].set(p["val_w"][:, 0])
    head_b = jnp.zeros((n_pad,), jnp.float32)
    head_b = head_b.at[:A].set(p["pi_b"]).at[A].set(p["val_b"][0])

    bf16 = jnp.bfloat16
    return {
        "conv1_w": p["conv1_w"].astype(bf16), "conv1_b": p["conv1_b"],
        "conv2_w": p["conv2_w"].astype(bf16), "conv2_b": p["conv2_b"],
        "conv3_w": p["conv3_w"].astype(bf16), "conv3_b": p["conv3_b"],
        "fc_w": fc_w.astype(bf16), "fc_b": p["fc_b"],
        "head_w": head_w, "head_b": head_b,
    }


# ----------------------------------------------------------------------------
# Forward pass
# ----------------------------------------------------------------------------
def actor_critic_forward(params, x, x_emb, *, output_size):
    B = x.shape[0]
    # uint8 -> bf16 is exact for 0..255; the /255 is applied to the f32
    # accumulator inside conv1's kernel.
    x = jnp.transpose(x, (0, 2, 3, 1)).astype(jnp.bfloat16)      # NCHW -> NHWC

    cols, oh, ow = im2col_nhwc(x, 8, 8, 4)                       # conv1: 8x8 s4, 4->32
    h = linear(cols, params["conv1_w"], params["conv1_b"], scale=1.0 / 255.0)
    h = h.reshape(B, oh, ow, 32)

    cols, oh, ow = im2col_nhwc(h, 4, 4, 2)                       # conv2: 4x4 s2, 32->64
    h = linear(cols, params["conv2_w"], params["conv2_b"])
    h = h.reshape(B, oh, ow, 64)

    cols, oh, ow = im2col_nhwc(h, 3, 3, 1)                       # conv3: 3x3 s1, 64->64
    h = linear(cols, params["conv3_w"], params["conv3_b"])
    h = h.reshape(B, oh, ow, 64)

    # NHWC flatten (fc_w rows were pre-permuted offline to this order, so no
    # runtime transpose is needed and the result matches nn.Flatten on NCHW).
    conv_feat = h.reshape(B, -1)

    # emb_hidden_size is None -> emb_fc is Flatten only.  The PyTorch
    # `(x_emb == 0).all()` branch is a semantic no-op in that case
    # (flatten of zeros == zeros), so it is omitted entirely.
    emb_flat = x_emb.reshape(B, -1).astype(jnp.bfloat16)

    feat = jnp.concatenate([conv_feat, emb_flat], axis=-1)       # (B, 3136 + 2048)

    # fc + ReLU + pi head + Categorical log-softmax + value head, one kernel.
    return fc_heads(feat, params["fc_w"], params["fc_b"],
                    params["head_w"], params["head_b"], num_actions=output_size)


if __name__ == "__main__":
    key = jax.random.PRNGKey(0)
    kx, ke = jax.random.split(key, 2)

    B, C, S = 2, 4, 84                 # 84x84 input is implied by the 64*7*7 fc shape
    output_size = 6
    x = jax.random.randint(kx, (B, C, S, S), 0, 256, dtype=jnp.int32).astype(jnp.uint8)
    x_emb = jax.random.normal(ke, (B, 64, 32), dtype=jnp.float32)   # (B, history, emb)

    raw_params = init_params(jax.random.PRNGKey(1), output_size=output_size)
    params = prepare_params(raw_params, output_size=output_size)

    fwd = jax.jit(functools.partial(actor_critic_forward, output_size=output_size))
    logits, log_probs, value = fwd(params, x, x_emb)
    jax.block_until_ready((logits, log_probs, value))

    assert logits.shape == (B, output_size)
    assert log_probs.shape == (B, output_size)
    assert value.shape == (B, 1)
    assert bool(jnp.all(jnp.isfinite(logits)))
    assert bool(jnp.all(jnp.isfinite(log_probs)))
    assert bool(jnp.all(jnp.isfinite(value)))
    # Categorical sanity: normalized probabilities sum to 1.
    probs_sum = jnp.sum(jnp.exp(log_probs), axis=-1)
    assert bool(jnp.all(jnp.abs(probs_sum - 1.0) < 1e-3))
    print("KERNEL_OK")
</pallas_src>

<mosaic_0001>
module attributes {stable_mosaic.version = 11 : i64} {
  func.func @_matmul_bias_act_kernel(%arg0: i32, %arg1: memref<256x256xbf16, #tpu.memory_space<vmem>>, %arg2: memref<256x32xbf16, #tpu.memory_space<vmem>>, %arg3: memref<1x32xf32, #tpu.memory_space<vmem>>, %arg4: memref<256x32xbf16, #tpu.memory_space<vmem>>) attributes {dimension_semantics = [#tpu.dimension_semantics<parallel>], iteration_bounds = array<i64: 4>, scalar_prefetch = 0 : i64, scratch_operands = 0 : i64, tpu.core_type = #tpu.core_type<tc>, window_params = [{transform_indices = @transform_0, window_bounds = array<i64: 256, 256>}, {pipeline_mode = #tpu.pipeline_mode<synchronous>, transform_indices = @transform_1, window_bounds = array<i64: 256, 32>}, {pipeline_mode = #tpu.pipeline_mode<synchronous>, transform_indices = @transform_2, window_bounds = array<i64: 1, 32>}, {transform_indices = @transform_3, window_bounds = array<i64: 256, 32>}]} {
    %c0 = arith.constant 0 : index
    %c0_0 = arith.constant 0 : index
    %0 = vector.load %arg1[%c0, %c0_0] : memref<256x256xbf16, #tpu.memory_space<vmem>>, vector<256x256xbf16>
    %c0_1 = arith.constant 0 : index
    %c0_2 = arith.constant 0 : index
    %1 = vector.load %arg2[%c0_1, %c0_2] : memref<256x32xbf16, #tpu.memory_space<vmem>>, vector<256x32xbf16>
    %cst = arith.constant dense<0.000000e+00> : vector<256x32xf32>
    %2 = tpu.matmul %0, %1, %cst {dimension_numbers = #tpu.dot_dimension_numbers<[1], [0], [0], [1], [0, 0, 1, 1], [], []>} : vector<256x256xbf16>, vector<256x32xbf16>, vector<256x32xf32> -> vector<256x32xf32>
    %cst_3 = arith.constant 0.00392156886 : f32
    %3 = vector.broadcast %cst_3 : f32 to vector<256x32xf32>
    %4 = arith.mulf %2, %3 : vector<256x32xf32>
    %c0_4 = arith.constant 0 : index
    %c0_5 = arith.constant 0 : index
    %5 = vector.load %arg3[%c0_4, %c0_5] : memref<1x32xf32, #tpu.memory_space<vmem>>, vector<1x32xf32>
    %6 = vector.broadcast %5 : vector<1x32xf32> to vector<256x32xf32>
    %7 = arith.addf %4, %6 : vector<256x32xf32>
    %cst_6 = arith.constant 0.000000e+00 : f32
    %8 = vector.broadcast %cst_6 : f32 to vector<256x32xf32>
    %9 = arith.maximumf %7, %8 : vector<256x32xf32>
    %10 = arith.truncf %9 : vector<256x32xf32> to vector<256x32xbf16>
    %c0_7 = arith.constant 0 : index
    %c0_8 = arith.constant 0 : index
    %11 = vector.load %arg4[%c0_7, %c0_8] : memref<256x32xbf16, #tpu.memory_space<vmem>>, vector<256x32xbf16>
    tpu.vector_store %arg4[%c0_7, %c0_8], %10 {strides = array<i32>} : memref<256x32xbf16, #tpu.memory_space<vmem>>, vector<256x32xbf16>,
    return
  }
  func.func @transform_0(%arg0: i32) -> (i32, i32) {
    %c0_i32 = arith.constant 0 : i32
    %c0_i32_0 = arith.constant 0 : i32
    return %arg0, %c0_i32 : i32, i32
  }
  func.func @transform_1(%arg0: i32) -> (i32, i32) {
    %c0_i32 = arith.constant 0 : i32
    %c0_i32_0 = arith.constant 0 : i32
    %c0_i32_1 = arith.constant 0 : i32
    return %c0_i32, %c0_i32_0 : i32, i32
  }
  func.func @transform_2(%arg0: i32) -> (i32, i32) {
    %c0_i32 = arith.constant 0 : i32
    %c0_i32_0 = arith.constant 0 : i32
    %c0_i32_1 = arith.constant 0 : i32
    return %c0_i32, %c0_i32_0 : i32, i32
  }
  func.func @transform_3(%arg0: i32) -> (i32, i32) {
    %c0_i32 = arith.constant 0 : i32
    %c0_i32_0 = arith.constant 0 : i32
    return %arg0, %c0_i32 : i32, i32
  }
}

module attributes {stable_mosaic.version = 11 : i64} {
  func.func @_matmul_bias_act_kernel(%arg0: i32, %arg1: memref<176x512xbf16, #tpu.memory_space<vmem>>, %arg2: memref<512x64xbf16, #tpu.memory_space<vmem>>, %arg3: memref<1x64xf32, #tpu.memory_space<vmem>>, %arg4: memref<176x64xbf16, #tpu.memory_space<vmem>>) attributes {dimension_semantics = [#tpu.dimension_semantics<parallel>], iteration_bounds = array<i64: 1>, scalar_prefetch = 0 : i64, scratch_operands = 0 : i64, tpu.core_type = #tpu.core_type<tc>, window_params = [{transform_indices = @transform_0, window_bounds = array<i64: 176, 512>}, {pipeline_mode = #tpu.pipeline_mode<synchronous>, transform_indices = @transform_1, window_bounds = array<i64: 512, 64>}, {pipeline_mode = #tpu.pipeline_mode<synchronous>, transform_indices = @transform_2, window_bounds = array<i64: 1, 64>}, {transform_indices = @transform_3, window_bounds = array<i64: 176, 64>}]} {
    %c0 = arith.constant 0 : index
    %c0_0 = arith.constant 0 : index
    %0 = vector.load %arg1[%c0, %c0_0] : memref<176x512xbf16, #tpu.memory_space<vmem>>, vector<176x512xbf16>
    %c0_1 = arith.constant 0 : index
    %c0_2 = arith.constant 0 : index
    %1 = vector.load %arg2[%c0_1, %c0_2] : memref<512x64xbf16, #tpu.memory_space<vmem>>, vector<512x64xbf16>
    %cst = arith.constant dense<0.000000e+00> : vector<176x64xf32>
    %2 = tpu.matmul %0, %1, %cst {dimension_numbers = #tpu.dot_dimension_numbers<[1], [0], [0], [1], [0, 0, 1, 1], [], []>} : vector<176x512xbf16>, vector<512x64xbf16>, vector<176x64xf32> -> vector<176x64xf32>
    %c0_3 = arith.constant 0 : index
    %c0_4 = arith.constant 0 : index
    %3 = vector.load %arg3[%c0_3, %c0_4] : memref<1x64xf32, #tpu.memory_space<vmem>>, vector<1x64xf32>
    %4 = vector.broadcast %3 : vector<1x64xf32> to vector<176x64xf32>
    %5 = arith.addf %2, %4 : vector<176x64xf32>
    %cst_5 = arith.constant 0.000000e+00 : f32
    %6 = vector.broadcast %cst_5 : f32 to vector<176x64xf32>
    %7 = arith.maximumf %5, %6 : vector<176x64xf32>
    %8 = arith.truncf %7 : vector<176x64xf32> to vector<176x64xbf16>
    %c0_6 = arith.constant 0 : index
    %c0_7 = arith.constant 0 : index
    %9 = vector.load %arg4[%c0_6, %c0_7] : memref<176x64xbf16, #tpu.memory_space<vmem>>, vector<176x64xbf16>
    tpu.vector_store %arg4[%c0_6, %c0_7], %8 {strides = array<i32>} : memref<176x64xbf16, #tpu.memory_space<vmem>>, vector<176x64xbf16>,
    return
  }
  func.func @transform_0(%arg0: i32) -> (i32, i32) {
    %c0_i32 = arith.constant 0 : i32
    %c0_i32_0 = arith.constant 0 : i32
    return %arg0, %c0_i32 : i32, i32
  }
  func.func @transform_1(%arg0: i32) -> (i32, i32) {
    %c0_i32 = arith.constant 0 : i32
    %c0_i32_0 = arith.constant 0 : i32
    %c0_i32_1 = arith.constant 0 : i32
    return %c0_i32, %c0_i32_0 : i32, i32
  }
  func.func @transform_2(%arg0: i32) -> (i32, i32) {
    %c0_i32 = arith.constant 0 : i32
    %c0_i32_0 = arith.constant 0 : i32
    %c0_i32_1 = arith.constant 0 : i32
    return %c0_i32, %c0_i32_0 : i32, i32
  }
  func.func @transform_3(%arg0: i32) -> (i32, i32) {
    %c0_i32 = arith.constant 0 : i32
    %c0_i32_0 = arith.constant 0 : i32
    return %arg0, %c0_i32 : i32, i32
  }
}

module attributes {stable_mosaic.version = 11 : i64} {
  func.func @_matmul_bias_act_kernel(%arg0: i32, %arg1: memref<112x576xbf16, #tpu.memory_space<vmem>>, %arg2: memref<576x64xbf16, #tpu.memory_space<vmem>>, %arg3: memref<1x64xf32, #tpu.memory_space<vmem>>, %arg4: memref<112x64xbf16, #tpu.memory_space<vmem>>) attributes {dimension_semantics = [#tpu.dimension_semantics<parallel>], iteration_bounds = array<i64: 1>, scalar_prefetch = 0 : i64, scratch_operands = 0 : i64, tpu.core_type = #tpu.core_type<tc>, window_params = [{transform_indices = @transform_0, window_bounds = array<i64: 112, 576>}, {pipeline_mode = #tpu.pipeline_mode<synchronous>, transform_indices = @transform_1, window_bounds = array<i64: 576, 64>}, {pipeline_mode = #tpu.pipeline_mode<synchronous>, transform_indices = @transform_2, window_bounds = array<i64: 1, 64>}, {transform_indices = @transform_3, window_bounds = array<i64: 112, 64>}]} {
    %c0 = arith.constant 0 : index
    %c0_0 = arith.constant 0 : index
    %0 = vector.load %arg1[%c0, %c0_0] : memref<112x576xbf16, #tpu.memory_space<vmem>>, vector<112x576xbf16>
    %c0_1 = arith.constant 0 : index
    %c0_2 = arith.constant 0 : index
    %1 = vector.load %arg2[%c0_1, %c0_2] : memref<576x64xbf16, #tpu.memory_space<vmem>>, vector<576x64xbf16>
    %cst = arith.constant dense<0.000000e+00> : vector<112x64xf32>
    %2 = tpu.matmul %0, %1, %cst {dimension_numbers = #tpu.dot_dimension_numbers<[1], [0], [0], [1], [0, 0, 1, 1], [], []>} : vector<112x576xbf16>, vector<576x64xbf16>, vector<112x64xf32> -> vector<112x64xf32>
    %c0_3 = arith.constant 0 : index
    %c0_4 = arith.constant 0 : index
    %3 = vector.load %arg3[%c0_3, %c0_4] : memref<1x64xf32, #tpu.memory_space<vmem>>, vector<1x64xf32>
    %4 = vector.broadcast %3 : vector<1x64xf32> to vector<112x64xf32>
    %5 = arith.addf %2, %4 : vector<112x64xf32>
    %cst_5 = arith.constant 0.000000e+00 : f32
    %6 = vector.broadcast %cst_5 : f32 to vector<112x64xf32>
    %7 = arith.maximumf %5, %6 : vector<112x64xf32>
    %8 = arith.truncf %7 : vector<112x64xf32> to vector<112x64xbf16>
    %c0_6 = arith.constant 0 : index
    %c0_7 = arith.constant 0 : index
    %9 = vector.load %arg4[%c0_6, %c0_7] : memref<112x64xbf16, #tpu.memory_space<vmem>>, vector<112x64xbf16>
    tpu.vector_store %arg4[%c0_6, %c0_7], %8 {strides = array<i32>} : memref<112x64xbf16, #tpu.memory_space<vmem>>, vector<112x64xbf16>,
    return
  }
  func.func @transform_0(%arg0: i32) -> (i32, i32) {
    %c0_i32 = arith.constant 0 : i32
    %c0_i32_0 = arith.constant 0 : i32
    return %arg0, %c0_i32 : i32, i32
  }
  func.func @transform_1(%arg0: i32) -> (i32, i32) {
    %c0_i32 = arith.constant 0 : i32
    %c0_i32_0 = arith.constant 0 : i32
    %c0_i32_1 = arith.constant 0 : i32
    return %c0_i32, %c0_i32_0 : i32, i32
  }
  func.func @transform_2(%arg0: i32) -> (i32, i32) {
    %c0_i32 = arith.constant 0 : i32
    %c0_i32_0 = arith.constant 0 : i32
    %c0_i32_1 = arith.constant 0 : i32
    return %c0_i32, %c0_i32_0 : i32, i32
  }
  func.func @transform_3(%arg0: i32) -> (i32, i32) {
    %c0_i32 = arith.constant 0 : i32
    %c0_i32_0 = arith.constant 0 : i32
    return %arg0, %c0_i32 : i32, i32
  }
}

module attributes {stable_mosaic.version = 11 : i64} {
  func.func @_fc_heads_kernel(%arg0: i32, %arg1: memref<16x5184xbf16, #tpu.memory_space<vmem>>, %arg2: memref<5184x512xbf16, #tpu.memory_space<vmem>>, %arg3: memref<1x512xf32, #tpu.memory_space<vmem>>, %arg4: memref<512x128xf32, #tpu.memory_space<vmem>>, %arg5: memref<1x128xf32, #tpu.memory_space<vmem>>, %arg6: memref<16x128xf32, #tpu.memory_space<vmem>>, %arg7: memref<16x128xf32, #tpu.memory_space<vmem>>) attributes {dimension_semantics = [#tpu.dimension_semantics<arbitrary>], iteration_bounds = array<i64: 1>, scalar_prefetch = 0 : i64, scratch_operands = 0 : i64, tpu.core_type = #tpu.core_type<tc>, window_params = [{pipeline_mode = #tpu.pipeline_mode<synchronous>, transform_indices = @transform_0, window_bounds = array<i64: 16, 5184>}, {pipeline_mode = #tpu.pipeline_mode<synchronous>, transform_indices = @transform_1, window_bounds = array<i64: 5184, 512>}, {pipeline_mode = #tpu.pipeline_mode<synchronous>, transform_indices = @transform_2, window_bounds = array<i64: 1, 512>}, {pipeline_mode = #tpu.pipeline_mode<synchronous>, transform_indices = @transform_3, window_bounds = array<i64: 512, 128>}, {pipeline_mode = #tpu.pipeline_mode<synchronous>, transform_indices = @transform_4, window_bounds = array<i64: 1, 128>}, {pipeline_mode = #tpu.pipeline_mode<synchronous>, transform_indices = @transform_5, window_bounds = array<i64: 16, 128>}, {pipeline_mode = #tpu.pipeline_mode<synchronous>, transform_indices = @transform_6, window_bounds = array<i64: 16, 128>}]} {
    %c0 = arith.constant 0 : index
    %c0_0 = arith.constant 0 : index
    %0 = vector.load %arg1[%c0, %c0_0] : memref<16x5184xbf16, #tpu.memory_space<vmem>>, vector<16x5184xbf16>
    %c0_1 = arith.constant 0 : index
    %c0_2 = arith.constant 0 : index
    %1 = vector.load %arg2[%c0_1, %c0_2] : memref<5184x512xbf16, #tpu.memory_space<vmem>>, vector<5184x512xbf16>
    %cst = arith.constant dense<0.000000e+00> : vector<16x512xf32>
    %2 = tpu.matmul %0, %1, %cst {dimension_numbers = #tpu.dot_dimension_numbers<[1], [0], [0], [1], [0, 0, 1, 1], [], []>} : vector<16x5184xbf16>, vector<5184x512xbf16>, vector<16x512xf32> -> vector<16x512xf32>
    %c0_3 = arith.constant 0 : index
    %c0_4 = arith.constant 0 : index
    %3 = vector.load %arg3[%c0_3, %c0_4] : memref<1x512xf32, #tpu.memory_space<vmem>>, vector<1x512xf32>
    %4 = vector.broadcast %3 : vector<1x512xf32> to vector<16x512xf32>
    %5 = arith.addf %2, %4 : vector<16x512xf32>
    %cst_5 = arith.constant 0.000000e+00 : f32
    %6 = vector.broadcast %cst_5 : f32 to vector<16x512xf32>
    %7 = arith.maximumf %5, %6 : vector<16x512xf32>
    %c0_6 = arith.constant 0 : index
    %c0_7 = arith.constant 0 : index
    %8 = vector.load %arg4[%c0_6, %c0_7] : memref<512x128xf32, #tpu.memory_space<vmem>>, vector<512x128xf32>
    %cst_8 = arith.constant dense<0.000000e+00> : vector<16x128xf32>
    %9 = tpu.matmul %7, %8, %cst_8 {dimension_numbers = #tpu.dot_dimension_numbers<[1], [0], [0], [1], [0, 0, 1, 1], [], []>} : vector<16x512xf32>, vector<512x128xf32>, vector<16x128xf32> -> vector<16x128xf32>
    %c0_9 = arith.constant 0 : index
    %c0_10 = arith.constant 0 : index
    %10 = vector.load %arg5[%c0_9, %c0_10] : memref<1x128xf32, #tpu.memory_space<vmem>>, vector<1x128xf32>
    %11 = vector.broadcast %10 : vector<1x128xf32> to vector<16x128xf32>
    %12 = arith.addf %9, %11 : vector<16x128xf32>
    %c0_11 = arith.constant 0 : index
    %c0_12 = arith.constant 0 : index
    %13 = vector.load %arg6[%c0_11, %c0_12] : memref<16x128xf32, #tpu.memory_space<vmem>>, vector<16x128xf32>
    tpu.vector_store %arg6[%c0_11, %c0_12], %12 {strides = array<i32>} : memref<16x128xf32, #tpu.memory_space<vmem>>, vector<16x128xf32>,
    %14 = tpu.iota {dimensions = array<i32: 1>} : vector<16x128xi32>
    %c6_i32 = arith.constant 6 : i32
    %15 = vector.broadcast %c6_i32 : i32 to vector<16x128xi32>
    %16 = arith.cmpi slt, %14, %15 : vector<16x128xi32>
    %cst_13 = arith.constant 0xFF800000 : f32
    %17 = vector.broadcast %cst_13 : f32 to vector<16x128xf32>
    %18 = arith.select %16, %12, %17 : vector<16x128xi1>, vector<16x128xf32>
    %cst_14 = arith.constant dense<0xFF800000> : vector<16xf32>
    %19 = vector.multi_reduction <maximumf>, %18, %cst_14 [1] : vector<16x128xf32> to vector<16xf32>
    %20 = vector.shape_cast %19 : vector<16xf32> to vector<16x1xf32>
    %21 = vector.broadcast %20 : vector<16x1xf32> to vector<16x128xf32>
    %22 = arith.subf %18, %21 : vector<16x128xf32>
    %23 = math.exp %22 : vector<16x128xf32>
    %cst_15 = arith.constant dense<0.000000e+00> : vector<16xf32>
    %24 = vector.multi_reduction <add>, %23, %cst_15 [1] : vector<16x128xf32> to vector<16xf32>
    %25 = vector.shape_cast %24 : vector<16xf32> to vector<16x1xf32>
    %26 = math.log %25 : vector<16x1xf32>
    %27 = arith.addf %26, %20 : vector<16x1xf32>
    %28 = vector.broadcast %27 : vector<16x1xf32> to vector<16x128xf32>
    %29 = arith.subf %12, %28 : vector<16x128xf32>
    %c0_16 = arith.constant 0 : index
    %c0_17 = arith.constant 0 : index
    %30 = vector.load %arg7[%c0_16, %c0_17] : memref<16x128xf32, #tpu.memory_space<vmem>>, vector<16x128xf32>
    tpu.vector_store %arg7[%c0_16, %c0_17], %29 {strides = array<i32>} : memref<16x128xf32, #tpu.memory_space<vmem>>, vector<16x128xf32>,
    return
  }
  func.func @transform_0(%arg0: i32) -> (i32, i32) {
    %c0_i32 = arith.constant 0 : i32
    %c0_i32_0 = arith.constant 0 : i32
    %c0_i32_1 = arith.constant 0 : i32
    return %c0_i32, %c0_i32_0 : i32, i32
  }
  func.func @transform_1(%arg0: i32) -> (i32, i32) {
    %c0_i32 = arith.constant 0 : i32
    %c0_i32_0 = arith.constant 0 : i32
    %c0_i32_1 = arith.constant 0 : i32
    return %c0_i32, %c0_i32_0 : i32, i32
  }
  func.func @transform_2(%arg0: i32) -> (i32, i32) {
    %c0_i32 = arith.constant 0 : i32
    %c0_i32_0 = arith.constant 0 : i32
    %c0_i32_1 = arith.constant 0 : i32
    return %c0_i32, %c0_i32_0 : i32, i32
  }
  func.func @transform_3(%arg0: i32) -> (i32, i32) {
    %c0_i32 = arith.constant 0 : i32
    %c0_i32_0 = arith.constant 0 : i32
    %c0_i32_1 = arith.constant 0 : i32
    return %c0_i32, %c0_i32_0 : i32, i32
  }
  func.func @transform_4(%arg0: i32) -> (i32, i32) {
    %c0_i32 = arith.constant 0 : i32
    %c0_i32_0 = arith.constant 0 : i32
    %c0_i32_1 = arith.constant 0 : i32
    return %c0_i32, %c0_i32_0 : i32, i32
  }
  func.func @transform_5(%arg0: i32) -> (i32, i32) {
    %c0_i32 = arith.constant 0 : i32
    %c0_i32_0 = arith.constant 0 : i32
    %c0_i32_1 = arith.constant 0 : i32
    return %c0_i32, %c0_i32_0 : i32, i32
  }
  func.func @transform_6(%arg0: i32) -> (i32, i32) {
    %c0_i32 = arith.constant 0 : i32
    %c0_i32_0 = arith.constant 0 : i32
    %c0_i32_1 = arith.constant 0 : i32
    return %c0_i32, %c0_i32_0 : i32, i32
  }
}

</mosaic_0001>

<bundles_post_ra>
// kernel: actor_critic_forward.4
= control target key start
LH: loop header
LB: loop body
LE: loop exit
PB: predicated region body
PF: predicated region fallthrough
CT: control target
= control target key end

     0   :  { %s1333_s12 = smov 0   ;;  %s1539_s0 = inlined_call_operand.vmem [shape: bf16[1024,256], index: 0, kind: input, shape index: {}]   ;;  %s1540_s1 = inlined_call_operand.vmem [shape: bf16[256,32], index: 1, kind: input, shape index: {}]   ;;  %s1541_s2 = inlined_call_operand.vmem [shape: f32[1,32], index: 2, kind: input, shape index: {}]   ;;  %s1542_s3 = inlined_call_operand.vmem [shape: bf16[1024,32], index: 3, kind: output, shape index: {}]  }
   0x1 LB: > { %s979_s13 = sadd.s32 4294967295, %s1311_s12   ;;  %p983_p0 = scmp.ge.s32.totalorder %s1311_s12, 1  ;;  %s1311_s12 = sphi %s1333_s12, %s13_s12  }
   0x2   : > { %p139_p1 = scmp.lt.s32.totalorder %s1311_s12, 5 }
   0x4   : > { %p140_p2 = pnand %p983_p0, %p139_p1 }
   0x5   : > { %s984_s16 = sshll.u32 (!%p140_p2), %s979_s13, 5 }
   0x6   : > { %143 = sbr.rel (%p140_p2) target bundleno = 311 (0x137), region = 32  ;;  %p165_p3 = scmp.lt.s32.totalorder (!%p140_p2), %s984_s16, 127 }
   0xb   : > { %v1241_v0 = vld [vmem:[%s1540_s1 + $0x78] sm:$0xff]   ;;  %v1243_v2 = vld [vmem:[%s1540_s1 + $0x70] sm:$0xff]   ;;  %v1245_v4 = vld [vmem:[%s1540_s1 + $0x68] sm:$0xff]   ;;  %s1544_s16 = smov (!%p165_p3, %s984_s16), 127  ;;  %vm890_vm0 = vcmask 257024  }
   0xc   : > { %v1242_v1 = vld [vmem:[%s1540_s1 + $0x38] sm:$0xff]   ;;  %1105 = vmatprep.subr.bf16.mxu0 %v1241_v0  ;;  %1217 = vmatprep.subr.bf16.mxu1 %v1241_v0  ;;  %v1244_v3 = vld [vmem:[%s1540_s1 + $0x30] sm:$0xff]   ;;  %v1246_v5 = vld [vmem:[%s1540_s1 + $0x28] sm:$0xff]   ;;  %s1072_s4 = sshll.u32 %s1544_s16, 3  ;;  %s988_s28 = sshll.u32 %s1544_s16, 2 }
   0xd   : > { %1106 = vmatpush3.bf16.msra.mxu0 %v1242_v1  ;;  %1225 = vmatpush3.bf16.msra.mxu1 %v1242_v1  ;;  %v1247_v6 = vld [vmem:[%s1540_s1 + $0x60] sm:$0xff]   ;;  %v1249_v8 = vld [vmem:[%s1540_s1 + $0x58] sm:$0xff]   ;;  %s1374_s9 = scalar_lea.vmem %s1539_s0, %s1072_s4  ;;  %v1251_v10 = vld [vmem:[%s1540_s1 + $0x50] sm:$0xff]   ;;  %s1440_s4 = scalar_lea.vmem %s1542_s3, %s988_s28 }
   0xe   : > { %1107 = vmatprep.subr.bf16.mxu0 %v1243_v2  ;;  %1218 = vmatprep.subr.bf16.mxu1 %v1243_v2  ;;  %v1248_v7 = vld [vmem:[%s1540_s1 + $0x20] sm:$0xff]   ;;  %v1250_v9 = vld [vmem:[%s1540_s1 + $0x18] sm:$0xff]   ;;  %v1252_v13 = vld [vmem:[%s1540_s1 + $0x10] sm:$0xff]  }
   0xf   : > { %v1259_v11 = vld [vmem:[%s1374_s9 + $0x4] ss:$8 sps:$4 sm:$0xff]   ;;  %v1257_v18 = vld [vmem:[%s1374_s9] ss:$8 sps:$4 sm:$0xff]   ;;  %v1263_v20 = vld [vmem:[%s1374_s9 + $0x14] ss:$8 sps:$4 sm:$0xff]  }
  0x10   : > { %v1262_v12 = vld [vmem:[%s1374_s9 + $0x84] ss:$8 sps:$4 sm:$0xff]   ;;  %530 = vmatprep.mubr.bf16.mxu0 %v1259_v11  ;;  %v1260_v19 = vld [vmem:[%s1374_s9 + $0x80] ss:$8 sps:$4 sm:$0xff]   ;;  %v1265_v21 = vld [vmem:[%s1374_s9 + $0x94] ss:$8 sps:$4 sm:$0xff]  }
  0x11   : > { %1108 = vmatpush3.bf16.msra.mxu0 %v1244_v3  ;;  %1226 = vmatpush3.bf16.msra.mxu1 %v1244_v3  ;;  %v1253_v14 = vld [vmem:[%s1540_s1 + $0x48] sm:$0xff]   ;;  %v1255_v16 = vld [vmem:[%s1540_s1 + $0x40] sm:$0xff]   ;;  %v1267_v22 = vld [vmem:[%s1374_s9 + $0x10] ss:$8 sps:$4 sm:$0xff]  }
  0x12   : > { %1109 = vmatprep.subr.bf16.mxu0 %v1245_v4  ;;  %1219 = vmatprep.subr.bf16.mxu1 %v1245_v4  ;;  %v1254_v15 = vld [vmem:[%s1540_s1 + $0x8] sm:$0xff]   ;;  %v1256_v17 = vld [vmem:[%s1540_s1] sm:$0xff]   ;;  %v1268_v23 = vld [vmem:[%s1374_s9 + $0x90] ss:$8 sps:$4 sm:$0xff]  }
  0x13   : > { %594 = vmatprep.mubr.bf16.mxu1 %v1262_v12  ;;  %v1269_v24 = vld [vmem:[%s1374_s9 + $0x24] ss:$8 sps:$4 sm:$0xff]   ;;  %v1273_v26 = vld [vmem:[%s1374_s9 + $0x20] ss:$8 sps:$4 sm:$0xff]   ;;  %v1275_v28 = vld [vmem:[%s1374_s9 + $0x34] ss:$8 sps:$4 sm:$0xff]  }
  0x14   : > { %v1271_v25 = vld [vmem:[%s1374_s9 + $0xa4] ss:$8 sps:$4 sm:$0xff]   ;;  %v1274_v27 = vld [vmem:[%s1374_s9 + $0xa0] ss:$8 sps:$4 sm:$0xff]   ;;  %v1277_v29 = vld [vmem:[%s1374_s9 + $0xb4] ss:$8 sps:$4 sm:$0xff]  }
  0x15   : > { %1110 = vmatpush3.bf16.msra.mxu0 %v1246_v5  ;;  %1227 = vmatpush3.bf16.msra.mxu1 %v1246_v5  ;;  %v1279_v30 = vld [vmem:[%s1374_s9 + $0x30] ss:$8 sps:$4 sm:$0xff]   ;;  %v1281_v32 = vld [vmem:[%s1374_s9 + $0x44] ss:$8 sps:$4 sm:$0xff]   ;;  %v1285_v34 = vld [vmem:[%s1374_s9 + $0x40] ss:$8 sps:$4 sm:$0xff]  }
  0x16   : > { %1111 = vmatprep.subr.bf16.mxu0 %v1247_v6  ;;  %1220 = vmatprep.subr.bf16.mxu1 %v1247_v6  ;;  %v1280_v31 = vld [vmem:[%s1374_s9 + $0xb0] ss:$8 sps:$4 sm:$0xff]   ;;  %v1283_v33 = vld [vmem:[%s1374_s9 + $0xc4] ss:$8 sps:$4 sm:$0xff]   ;;  %v1286_v35 = vld [vmem:[%s1374_s9 + $0xc0] ss:$8 sps:$4 sm:$0xff]  }
  0x17   : > { %v1287_v36 = vld [vmem:[%s1374_s9 + $0x54] ss:$8 sps:$4 sm:$0xff]   ;;  %v1291_v38 = vld [vmem:[%s1374_s9 + $0x50] ss:$8 sps:$4 sm:$0xff]   ;;  %v1293_v40 = vld [vmem:[%s1374_s9 + $0x64] ss:$8 sps:$4 sm:$0xff]  }
  0x18   : > { %v1289_v37 = vld [vmem:[%s1374_s9 + $0xd4] ss:$8 sps:$4 sm:$0xff]   ;;  %v1292_v39 = vld [vmem:[%s1374_s9 + $0xd0] ss:$8 sps:$4 sm:$0xff]   ;;  %v1295_v41 = vld [vmem:[%s1374_s9 + $0xe4] ss:$8 sps:$4 sm:$0xff]  }
  0x19   : > { %1112 = vmatpush3.bf16.msra.mxu0 %v1248_v7  ;;  %1228 = vmatpush3.bf16.msra.mxu1 %v1248_v7  ;;  %v1297_v42 = vld [vmem:[%s1374_s9 + $0x60] ss:$8 sps:$4 sm:$0xff]   ;;  %v1299_v44 = vld [vmem:[%s1374_s9 + $0x74] ss:$8 sps:$4 sm:$0xff]   ;;  %v1303_v46 = vld [vmem:[%s1374_s9 + $0x70] ss:$8 sps:$4 sm:$0xff]  }
  0x1a   : > { %1113 = vmatprep.subr.bf16.mxu0 %v1249_v8  ;;  %1221 = vmatprep.subr.bf16.mxu1 %v1249_v8  ;;  %v1298_v43 = vld [vmem:[%s1374_s9 + $0xe0] ss:$8 sps:$4 sm:$0xff]   ;;  %v1301_v45 = vld [vmem:[%s1374_s9 + $0xf4] ss:$8 sps:$4 sm:$0xff]   ;;  %v1304_v47 = vld [vmem:[%s1374_s9 + $0xf0] ss:$8 sps:$4 sm:$0xff]  }
  0x1b   : > { %v1432_v54 = vld [vmem:[%s1541_s2] ss:$0 sm:$0xff] }
  0x1d   : > { %1114 = vmatpush3.bf16.msra.mxu0 %v1250_v9  ;;  %1229 = vmatpush3.bf16.msra.mxu1 %v1250_v9 }
  0x1e   : > { %1115 = vmatprep.subr.bf16.mxu0 %v1251_v10  ;;  %1222 = vmatprep.subr.bf16.mxu1 %v1251_v10 }
  0x21   : > { %1116 = vmatpush3.bf16.msra.mxu0 %v1252_v13  ;;  %1230 = vmatpush3.bf16.msra.mxu1 %v1252_v13 }
  0x22   : > { %1117 = vmatprep.subr.bf16.mxu0 %v1253_v14  ;;  %1223 = vmatprep.subr.bf16.mxu1 %v1253_v14 }
  0x25   : > { %1118 = vmatpush3.bf16.msra.mxu0 %v1254_v15  ;;  %1231 = vmatpush3.bf16.msra.mxu1 %v1254_v15 }
  0x26   : > { %1119 = vmatprep.subr.bf16.mxu0 %v1255_v16  ;;  %1224 = vmatprep.subr.bf16.mxu1 %v1255_v16 }
  0x29   : > { %1120 = vmatpush3.bf16.msra.mxu0 %v1256_v17  ;;  %1232 = vmatpush3.bf16.msra.mxu1 %v1256_v17 }
  0x2c   : > { %531 = vmatmul.mubr.bf16.vlgmr.msra.gmra.mxu0 %v1257_v18  ;;  %595 = vmatmul.mubr.bf16.vlgmr.msra.gmra.mxu1 %v1260_v19 }
  0x2d   : > { %538 = vmatprep.mubr.bf16.mxu0 %v1263_v20  ;;  %602 = vmatprep.mubr.bf16.mxu1 %v1265_v21 }
  0x34   : > { %539 = vmatmul.mubr.bf16.gmra.mxu0 %v1267_v22  ;;  %603 = vmatmul.mubr.bf16.gmra.mxu1 %v1268_v23 }
  0x35   : > { %546 = vmatprep.mubr.bf16.mxu0 %v1269_v24  ;;  %610 = vmatprep.mubr.bf16.mxu1 %v1271_v25 }
  0x3c   : > { %547 = vmatmul.mubr.bf16.gmra.mxu0 %v1273_v26  ;;  %611 = vmatmul.mubr.bf16.gmra.mxu1 %v1274_v27 }
  0x3d   : > { %554 = vmatprep.mubr.bf16.mxu0 %v1275_v28  ;;  %618 = vmatprep.mubr.bf16.mxu1 %v1277_v29 }
  0x44   : > { %555 = vmatmul.mubr.bf16.gmra.mxu0 %v1279_v30  ;;  %619 = vmatmul.mubr.bf16.gmra.mxu1 %v1280_v31 }
  0x45   : > { %562 = vmatprep.mubr.bf16.mxu0 %v1281_v32  ;;  %626 = vmatprep.mubr.bf16.mxu1 %v1283_v33 }
  0x4c   : > { %563 = vmatmul.mubr.bf16.gmra.mxu0 %v1285_v34  ;;  %627 = vmatmul.mubr.bf16.gmra.mxu1 %v1286_v35 }
  0x4d   : > { %570 = vmatprep.mubr.bf16.mxu0 %v1287_v36  ;;  %634 = vmatprep.mubr.bf16.mxu1 %v1289_v37 }
  0x54   : > { %571 = vmatmul.mubr.bf16.gmra.mxu0 %v1291_v38  ;;  %635 = vmatmul.mubr.bf16.gmra.mxu1 %v1292_v39 }
  0x55   : > { %578 = vmatprep.mubr.bf16.mxu0 %v1293_v40  ;;  %642 = vmatprep.mubr.bf16.mxu1 %v1295_v41 }
  0x5c   : > { %579 = vmatmul.mubr.bf16.gmra.mxu0 %v1297_v42  ;;  %643 = vmatmul.mubr.bf16.gmra.mxu1 %v1298_v43 }
  0x5d   : > { %586 = vmatprep.mubr.bf16.mxu0 %v1299_v44  ;;  %650 = vmatprep.mubr.bf16.mxu1 %v1301_v45 }
  0x64   : > { %587 = vmatmul.mubr.bf16.gmra.mxu0 %v1303_v46  ;;  %651 = vmatmul.mubr.bf16.gmra.mxu1 %v1304_v47 }
  0xec   : > { %v1121_v48 = vpop.f32.mrf.mxu0  ;;  %v1169_v49 = vpop.f32.mrf.mxu1 }
  0xee   : > { %v1122_v50 = vpop.f32.mrf.mxu0  ;;  %v1170_v51 = vpop.f32.mrf.mxu1 }
  0xef   : > { %v1123_v52 = vadd.f32 %v1122_v50, %v1121_v48  ;;  %v1171_v53 = vadd.f32 %v1170_v51, %v1169_v49 }
  0xf0   : > { %v1124_v55 = vpop.f32.mrf.mxu0  ;;  %v1172_v56 = vpop.f32.mrf.mxu1 }
  0xf1   : > { %v659_v57 = vmul.f32 0.003921569, %v1123_v52  ;;  %v675_v58 = vmul.f32 0.003921569, %v1171_v53 }
  0xf2   : > { %v1125_v59 = vpop.f32.mrf.mxu0  ;;  %v1173_v60 = vpop.f32.mrf.mxu1 }
  0xf3   : > { %v698_v61 = vadd.f32 %v1432_v54, %v659_v57  ;;  %v714_v62 = vadd.f32 %v1432_v54, %v675_v58  ;;  %v1126_v63 = vadd.f32 %v1125_v59, %v1124_v55  ;;  %v1174_v0 = vadd.f32 %v1173_v60, %v1172_v56 }
  0xf4   : > { %v1127_v1 = vpop.f32.mrf.mxu0  ;;  %v1175_v2 = vpop.f32.mrf.mxu1 }
  0xf5   : > { %v730_v3 = vmax.f32 %v698_v61, 0.0  ;;  %v746_v4 = vmax.f32 %v714_v62, 0.0  ;;  %v660_v5 = vmul.f32 0.003921569, %v1126_v63  ;;  %v676_v6 = vmul.f32 0.003921569, %v1174_v0 }
  0xf6   : > { %v1128_v7 = vpop.f32.mrf.mxu0  ;;  %v1176_v8 = vpop.f32.mrf.mxu1 }
  0xf7   : > { %v1073_v9 = vpack.c.bf16 %v730_v3, %v730_v3  ;;  %v1089_v10 = vpack.c.bf16 %v746_v4, %v746_v4  ;;  %v699_v11 = vadd.f32 %v1432_v54, %v660_v5  ;;  %v715_v12 = vadd.f32 %v1432_v54, %v676_v6 }
  0xf8   : > { %v1129_v13 = vadd.f32 %v1128_v7, %v1127_v1  ;;  %v1177_v14 = vadd.f32 %v1176_v8, %v1175_v2  ;;  %v1130_v15 = vpop.f32.mrf.mxu0  ;;  %v1178_v16 = vpop.f32.mrf.mxu1 }
  0xf9   : > { %891 = vst.msk [vmem:[%s1440_s4] sm:$0xf] %vm890_vm0, %v1073_v9  ;;  %907 = vst.msk [vmem:[%s1440_s4 + $0x40] sm:$0xf] %vm890_vm0, %v1089_v10  ;;  %v731_v17 = vmax.f32 %v699_v11, 0.0  ;;  %v747_v18 = vmax.f32 %v715_v12, 0.0 }
  0xfa   : > { %v661_v19 = vmul.f32 0.003921569, %v1129_v13  ;;  %v677_v20 = vmul.f32 0.003921569, %v1177_v14  ;;  %v1131_v21 = vpop.f32.mrf.mxu0  ;;  %v1179_v22 = vpop.f32.mrf.mxu1 }
  0xfb   : > { %v1074_v23 = vpack.c.bf16 %v731_v17, %v731_v17  ;;  %v1090_v24 = vpack.c.bf16 %v747_v18, %v747_v18  ;;  %v1132_v25 = vadd.f32 %v1131_v21, %v1130_v15  ;;  %v1180_v26 = vadd.f32 %v1179_v22, %v1178_v16 }
  0xfc   : > { %v700_v27 = vadd.f32 %v1432_v54, %v661_v19  ;;  %v716_v28 = vadd.f32 %v1432_v54, %v677_v20  ;;  %v1133_v29 = vpop.f32.mrf.mxu0  ;;  %v1181_v30 = vpop.f32.mrf.mxu1 }
  0xfd   : > { %892 = vst.msk [vmem:[%s1440_s4 + $0x4] sm:$0xf] %vm890_vm0, %v1074_v23  ;;  %908 = vst.msk [vmem:[%s1440_s4 + $0x44] sm:$0xf] %vm890_vm0, %v1090_v24  ;;  %v662_v31 = vmul.f32 0.003921569, %v1132_v25 }
  0xfe   : > { %v678_v32 = vmul.f32 0.003921569, %v1180_v26  ;;  %v732_v33 = vmax.f32 %v700_v27, 0.0  ;;  %v748_v34 = vmax.f32 %v716_v28, 0.0  ;;  %v1134_v35 = vpop.f32.mrf.mxu0  ;;  %v1182_v36 = vpop.f32.mrf.mxu1 }
  0xff   : > { %v701_v37 = vadd.f32 %v1432_v54, %v662_v31  ;;  %v1135_v39 = vadd.f32 %v1134_v35, %v1133_v29  ;;  %v1183_v40 = vadd.f32 %v1182_v36, %v1181_v30 }
 0x100   : > { %v717_v38 = vadd.f32 %v1432_v54, %v678_v32  ;;  %v1075_v41 = vpack.c.bf16 %v732_v33, %v732_v33  ;;  %v1091_v42 = vpack.c.bf16 %v748_v34, %v748_v34  ;;  %v1136_v43 = vpop.f32.mrf.mxu0  ;;  %v1184_v44 = vpop.f32.mrf.mxu1 }
 0x101   : > { %v733_v45 = vmax.f32 %v701_v37, 0.0  ;;  %v663_v47 = vmul.f32 0.003921569, %v1135_v39  ;;  %v679_v48 = vmul.f32 0.003921569, %v1183_v40 }
 0x102   : > { %v749_v46 = vmax.f32 %v717_v38, 0.0  ;;  %893 = vst.msk [vmem:[%s1440_s4 + $0x8] sm:$0xf] %vm890_vm0, %v1075_v41  ;;  %909 = vst.msk [vmem:[%s1440_s4 + $0x48] sm:$0xf] %vm890_vm0, %v1091_v42  ;;  %v1137_v49 = vpop.f32.mrf.mxu0  ;;  %v1185_v50 = vpop.f32.mrf.mxu1 }
 0x103   : > { %v1076_v51 = vpack.c.bf16 %v733_v45, %v733_v45  ;;  %v702_v53 = vadd.f32 %v1432_v54, %v663_v47  ;;  %v718_v55 = vadd.f32 %v1432_v54, %v679_v48  ;;  %v1138_v56 = vadd.f32 %v1137_v49, %v1136_v43 }
 0x104   : > { %v1092_v52 = vpack.c.bf16 %v749_v46, %v749_v46  ;;  %v1186_v57 = vadd.f32 %v1185_v50, %v1184_v44  ;;  %v1139_v58 = vpop.f32.mrf.mxu0  ;;  %v1187_v59 = vpop.f32.mrf.mxu1 }
 0x105   : > { %894 = vst.msk [vmem:[%s1440_s4 + $0xc] sm:$0xf] %vm890_vm0, %v1076_v51  ;;  %v734_v60 = vmax.f32 %v702_v53, 0.0  ;;  %v750_v61 = vmax.f32 %v718_v55, 0.0  ;;  %v664_v62 = vmul.f32 0.003921569, %v1138_v56 }
 0x106   : > { %910 = vst.msk [vmem:[%s1440_s4 + $0x4c] sm:$0xf] %vm890_vm0, %v1092_v52  ;;  %v680_v63 = vmul.f32 0.003921569, %v1186_v57  ;;  %v1140_v0 = vpop.f32.mrf.mxu0  ;;  %v1188_v1 = vpop.f32.mrf.mxu1 }
 0x107   : > { %v1077_v2 = vpack.c.bf16 %v734_v60, %v734_v60  ;;  %v1093_v3 = vpack.c.bf16 %v750_v61, %v750_v61  ;;  %v1141_v4 = vadd.f32 %v1140_v0, %v1139_v58  ;;  %v1189_v5 = vadd.f32 %v1188_v1, %v1187_v59 }
 0x108   : > { %v703_v6 = vadd.f32 %v1432_v54, %v664_v62  ;;  %v719_v7 = vadd.f32 %v1432_v54, %v680_v63  ;;  %v1142_v8 = vpop.f32.mrf.mxu0  ;;  %v1190_v9 = vpop.f32.mrf.mxu1 }
 0x109   : > { %895 = vst.msk [vmem:[%s1440_s4 + $0x10] sm:$0xf] %vm890_vm0, %v1077_v2  ;;  %911 = vst.msk [vmem:[%s1440_s4 + $0x50] sm:$0xf] %vm890_vm0, %v1093_v3  ;;  %v665_v10 = vmul.f32 0.003921569, %v1141_v4 }
 0x10a   : > { %v681_v11 = vmul.f32 0.003921569, %v1189_v5  ;;  %v735_v12 = vmax.f32 %v703_v6, 0.0  ;;  %v751_v13 = vmax.f32 %v719_v7, 0.0  ;;  %v1143_v14 = vpop.f32.mrf.mxu0  ;;  %v1191_v15 = vpop.f32.mrf.mxu1 }
 0x10b   : > { %v704_v16 = vadd.f32 %v1432_v54, %v665_v10  ;;  %v1144_v18 = vadd.f32 %v1143_v14, %v1142_v8  ;;  %v1192_v19 = vadd.f32 %v1191_v15, %v1190_v9 }
 0x10c   : > { %v720_v17 = vadd.f32 %v1432_v54, %v681_v11  ;;  %v1078_v20 = vpack.c.bf16 %v735_v12, %v735_v12  ;;  %v1094_v21 = vpack.c.bf16 %v751_v13, %v751_v13  ;;  %v1145_v22 = vpop.f32.mrf.mxu0  ;;  %v1193_v23 = vpop.f32.mrf.mxu1 }
 0x10d   : > { %v736_v24 = vmax.f32 %v704_v16, 0.0  ;;  %v666_v26 = vmul.f32 0.003921569, %v1144_v18  ;;  %v682_v27 = vmul.f32 0.003921569, %v1192_v19 }
 0x10e   : > { %v752_v25 = vmax.f32 %v720_v17, 0.0  ;;  %896 = vst.msk [vmem:[%s1440_s4 + $0x14] sm:$0xf] %vm890_vm0, %v1078_v20  ;;  %912 = vst.msk [vmem:[%s1440_s4 + $0x54] sm:$0xf] %vm890_vm0, %v1094_v21  ;;  %v1146_v28 = vpop.f32.mrf.mxu0  ;;  %v1194_v29 = vpop.f32.mrf.mxu1 }
 0x10f   : > { %v1079_v30 = vpack.c.bf16 %v736_v24, %v736_v24  ;;  %v705_v32 = vadd.f32 %v1432_v54, %v666_v26  ;;  %v721_v33 = vadd.f32 %v1432_v54, %v682_v27  ;;  %v1147_v34 = vadd.f32 %v1146_v28, %v1145_v22 }
 0x110   : > { %v1095_v31 = vpack.c.bf16 %v752_v25, %v752_v25  ;;  %v1195_v35 = vadd.f32 %v1194_v29, %v1193_v23  ;;  %v1148_v36 = vpop.f32.mrf.mxu0  ;;  %v1196_v37 = vpop.f32.mrf.mxu1 }
 0x111   : > { %897 = vst.msk [vmem:[%s1440_s4 + $0x18] sm:$0xf] %vm890_vm0, %v1079_v30  ;;  %v737_v38 = vmax.f32 %v705_v32, 0.0  ;;  %v753_v39 = vmax.f32 %v721_v33, 0.0  ;;  %v667_v40 = vmul.f32 0.003921569, %v1147_v34 }
 0x112   : > { %913 = vst.msk [vmem:[%s1440_s4 + $0x58] sm:$0xf] %vm890_vm0, %v1095_v31  ;;  %v683_v41 = vmul.f32 0.003921569, %v1195_v35  ;;  %v1149_v42 = vpop.f32.mrf.mxu0  ;;  %v1197_v43 = vpop.f32.mrf.mxu1 }
 0x113   : > { %v1080_v44 = vpack.c.bf16 %v737_v38, %v737_v38  ;;  %v1096_v45 = vpack.c.bf16 %v753_v39, %v753_v39  ;;  %v1150_v46 = vadd.f32 %v1149_v42, %v1148_v36  ;;  %v1198_v47 = vadd.f32 %v1197_v43, %v1196_v37 }
 0x114   : > { %v706_v48 = vadd.f32 %v1432_v54, %v667_v40  ;;  %v722_v49 = vadd.f32 %v1432_v54, %v683_v41  ;;  %v1151_v50 = vpop.f32.mrf.mxu0  ;;  %v1199_v51 = vpop.f32.mrf.mxu1 }
 0x115   : > { %898 = vst.msk [vmem:[%s1440_s4 + $0x1c] sm:$0xf] %vm890_vm0, %v1080_v44  ;;  %914 = vst.msk [vmem:[%s1440_s4 + $0x5c] sm:$0xf] %vm890_vm0, %v1096_v45  ;;  %v668_v52 = vmul.f32 0.003921569, %v1150_v46 }
 0x116   : > { %v684_v53 = vmul.f32 0.003921569, %v1198_v47  ;;  %v738_v55 = vmax.f32 %v706_v48, 0.0  ;;  %v754_v56 = vmax.f32 %v722_v49, 0.0  ;;  %v1152_v57 = vpop.f32.mrf.mxu0  ;;  %v1200_v58 = vpop.f32.mrf.mxu1 }
 0x117   : > { %v707_v59 = vadd.f32 %v1432_v54, %v668_v52  ;;  %v1153_v61 = vadd.f32 %v1152_v57, %v1151_v50  ;;  %v1201_v62 = vadd.f32 %v1200_v58, %v1199_v51 }
 0x118   : > { %v723_v60 = vadd.f32 %v1432_v54, %v684_v53  ;;  %v1081_v63 = vpack.c.bf16 %v738_v55, %v738_v55  ;;  %v1097_v0 = vpack.c.bf16 %v754_v56, %v754_v56  ;;  %v1154_v1 = vpop.f32.mrf.mxu0  ;;  %v1202_v2 = vpop.f32.mrf.mxu1 }
 0x119   : > { %v739_v3 = vmax.f32 %v707_v59, 0.0  ;;  %v669_v5 = vmul.f32 0.003921569, %v1153_v61  ;;  %v685_v6 = vmul.f32 0.003921569, %v1201_v62 }
 0x11a   : > { %v755_v4 = vmax.f32 %v723_v60, 0.0  ;;  %899 = vst.msk [vmem:[%s1440_s4 + $0x20] sm:$0xf] %vm890_vm0, %v1081_v63  ;;  %915 = vst.msk [vmem:[%s1440_s4 + $0x60] sm:$0xf] %vm890_vm0, %v1097_v0  ;;  %v1155_v7 = vpop.f32.mrf.mxu0  ;;  %v1203_v8 = vpop.f32.mrf.mxu1 }
 0x11b   : > { %v1082_v9 = vpack.c.bf16 %v739_v3, %v739_v3  ;;  %v708_v11 = vadd.f32 %v1432_v54, %v669_v5  ;;  %v724_v12 = vadd.f32 %v1432_v54, %v685_v6  ;;  %v1156_v13 = vadd.f32 %v1155_v7, %v1154_v1 }
 0x11c   : > { %v1098_v10 = vpack.c.bf16 %v755_v4, %v755_v4  ;;  %v1204_v14 = vadd.f32 %v1203_v8, %v1202_v2  ;;  %v1157_v15 = vpop.f32.mrf.mxu0  ;;  %v1205_v16 = vpop.f32.mrf.mxu1 }
 0x11d   : > { %900 = vst.msk [vmem:[%s1440_s4 + $0x24] sm:$0xf] %vm890_vm0, %v1082_v9  ;;  %v740_v17 = vmax.f32 %v708_v11, 0.0  ;;  %v756_v18 = vmax.f32 %v724_v12, 0.0  ;;  %v670_v19 = vmul.f32 0.003921569, %v1156_v13 }
 0x11e   : > { %916 = vst.msk [vmem:[%s1440_s4 + $0x64] sm:$0xf] %vm890_vm0, %v1098_v10  ;;  %v686_v20 = vmul.f32 0.003921569, %v1204_v14  ;;  %v1158_v21 = vpop.f32.mrf.mxu0  ;;  %v1206_v22 = vpop.f32.mrf.mxu1 }
 0x11f   : > { %v1083_v23 = vpack.c.bf16 %v740_v17, %v740_v17  ;;  %v1099_v24 = vpack.c.bf16 %v756_v18, %v756_v18  ;;  %v1159_v25 = vadd.f32 %v1158_v21, %v1157_v15  ;;  %v1207_v26 = vadd.f32 %v1206_v22, %v1205_v16 }
 0x120   : > { %v709_v27 = vadd.f32 %v1432_v54, %v670_v19  ;;  %v725_v28 = vadd.f32 %v1432_v54, %v686_v20  ;;  %v1160_v29 = vpop.f32.mrf.mxu0  ;;  %v1208_v30 = vpop.f32.mrf.mxu1 }
 0x121   : > { %901 = vst.msk [vmem:[%s1440_s4 + $0x28] sm:$0xf] %vm890_vm0, %v1083_v23  ;;  %917 = vst.msk [vmem:[%s1440_s4 + $0x68] sm:$0xf] %vm890_vm0, %v1099_v24  ;;  %v671_v31 = vmul.f32 0.003921569, %v1159_v25 }
 0x122   : > { %v687_v32 = vmul.f32 0.003921569, %v1207_v26  ;;  %v741_v33 = vmax.f32 %v709_v27, 0.0  ;;  %v757_v34 = vmax.f32 %v725_v28, 0.0  ;;  %v1161_v35 = vpop.f32.mrf.mxu0  ;;  %v1209_v36 = vpop.f32.mrf.mxu1 }
 0x123   : > { %v710_v37 = vadd.f32 %v1432_v54, %v671_v31  ;;  %v1162_v39 = vadd.f32 %v1161_v35, %v1160_v29  ;;  %v1210_v40 = vadd.f32 %v1209_v36, %v1208_v30 }
 0x124   : > { %v726_v38 = vadd.f32 %v1432_v54, %v687_v32  ;;  %v1084_v41 = vpack.c.bf16 %v741_v33, %v741_v33  ;;  %v1100_v42 = vpack.c.bf16 %v757_v34, %v757_v34  ;;  %v1163_v43 = vpop.f32.mrf.mxu0  ;;  %v1211_v44 = vpop.f32.mrf.mxu1 }
 0x125   : > { %v742_v45 = vmax.f32 %v710_v37, 0.0  ;;  %v672_v47 = vmul.f32 0.003921569, %v1162_v39  ;;  %v688_v48 = vmul.f32 0.003921569, %v1210_v40 }
 0x126   : > { %v758_v46 = vmax.f32 %v726_v38, 0.0  ;;  %902 = vst.msk [vmem:[%s1440_s4 + $0x2c] sm:$0xf] %vm890_vm0, %v1084_v41  ;;  %918 = vst.msk [vmem:[%s1440_s4 + $0x6c] sm:$0xf] %vm890_vm0, %v1100_v42  ;;  %v1164_v49 = vpop.f32.mrf.mxu0  ;;  %v1212_v50 = vpop.f32.mrf.mxu1 }
 0x127   : > { %v1085_v51 = vpack.c.bf16 %v742_v45, %v742_v45  ;;  %v711_v53 = vadd.f32 %v1432_v54, %v672_v47  ;;  %v727_v55 = vadd.f32 %v1432_v54, %v688_v48  ;;  %v1165_v56 = vadd.f32 %v1164_v49, %v1163_v43 }
 0x128   : > { %v1101_v52 = vpack.c.bf16 %v758_v46, %v758_v46  ;;  %v1213_v57 = vadd.f32 %v1212_v50, %v1211_v44  ;;  %v1166_v58 = vpop.f32.mrf.mxu0  ;;  %v1214_v59 = vpop.f32.mrf.mxu1 }
 0x129   : > { %903 = vst.msk [vmem:[%s1440_s4 + $0x30] sm:$0xf] %vm890_vm0, %v1085_v51  ;;  %v743_v60 = vmax.f32 %v711_v53, 0.0  ;;  %v759_v61 = vmax.f32 %v727_v55, 0.0  ;;  %v673_v62 = vmul.f32 0.003921569, %v1165_v56 }
 0x12a   : > { %919 = vst.msk [vmem:[%s1440_s4 + $0x70] sm:$0xf] %vm890_vm0, %v1101_v52  ;;  %v689_v63 = vmul.f32 0.003921569, %v1213_v57  ;;  %v1167_v0 = vpop.f32.mrf.mxu0  ;;  %v1215_v1 = vpop.f32.mrf.mxu1 }
 0x12b   : > { %v1086_v2 = vpack.c.bf16 %v743_v60, %v743_v60  ;;  %v1102_v3 = vpack.c.bf16 %v759_v61, %v759_v61  ;;  %v1168_v4 = vadd.f32 %v1167_v0, %v1166_v58  ;;  %v1216_v5 = vadd.f32 %v1215_v1, %v1214_v59 }
 0x12c   : > { %v712_v6 = vadd.f32 %v1432_v54, %v673_v62  ;;  %v728_v7 = vadd.f32 %v1432_v54, %v689_v63 }
 0x12d   : > { %904 = vst.msk [vmem:[%s1440_s4 + $0x34] sm:$0xf] %vm890_vm0, %v1086_v2  ;;  %920 = vst.msk [vmem:[%s1440_s4 + $0x74] sm:$0xf] %vm890_vm0, %v1102_v3  ;;  %v674_v8 = vmul.f32 0.003921569, %v1168_v4 }
 0x12e   : > { %v690_v9 = vmul.f32 0.003921569, %v1216_v5  ;;  %v744_v10 = vmax.f32 %v712_v6, 0.0  ;;  %v760_v11 = vmax.f32 %v728_v7, 0.0 }
 0x12f   : > { %v713_v12 = vadd.f32 %v1432_v54, %v674_v8 }
 0x130   : > { %v729_v13 = vadd.f32 %v1432_v54, %v690_v9  ;;  %v1087_v14 = vpack.c.bf16 %v744_v10, %v744_v10  ;;  %v1103_v15 = vpack.c.bf16 %v760_v11, %v760_v11 }
 0x131   : > { %v745_v16 = vmax.f32 %v713_v12, 0.0 }
 0x132   : > { %v761_v17 = vmax.f32 %v729_v13, 0.0  ;;  %905 = vst.msk [vmem:[%s1440_s4 + $0x38] sm:$0xf] %vm890_vm0, %v1087_v14  ;;  %921 = vst.msk [vmem:[%s1440_s4 + $0x78] sm:$0xf] %vm890_vm0, %v1103_v15 }
 0x133   : > { %v1088_v18 = vpack.c.bf16 %v745_v16, %v745_v16 }
 0x134   : > { %v1104_v19 = vpack.c.bf16 %v761_v17, %v761_v17 }
 0x135   : > { %906 = vst.msk [vmem:[%s1440_s4 + $0x3c] sm:$0xf] %vm890_vm0, %v1088_v18 }
 0x136   : > { %922 = vst.msk [vmem:[%s1440_s4 + $0x7c] sm:$0xf] %vm890_vm0, %v1104_v19 }
 0x137 PF: > { %s13_s12 = sadd.s32 1, %s1311_s12  }
 0x138   : > { %p10_p4 = scmp.ge.s32.totalorder %s13_s12, 6  }
 0x13a   :  { %12 = sbr.rel (!%p10_p4) target bundleno = 1 (0x1), region = 62 }

// kernel: actor_critic_forward.5
= control target key start
LH: loop header
LB: loop body
LE: loop exit
PB: predicated region body
PF: predicated region fallthrough
CT: control target
= control target key end

     0   :  { %vm894_vm0 = vcmask 519168   ;;  %s1667_s1 = inlined_call_operand.vmem [shape: bf16[512,64], index: 1, kind: input, shape index: {}]   ;;  %s1668_s0 = inlined_call_operand.vmem [shape: bf16[176,512], index: 0, kind: input, shape index: {}]   ;;  %s1669_s2 = inlined_call_operand.vmem [shape: f32[1,64], index: 2, kind: input, shape index: {}]   ;;  %s1670_s3 = inlined_call_operand.vmem [shape: bf16[176,64], index: 3, kind: output, shape index: {}]  }
   0x1   :  { %v1206_v0 = vld [vmem:[%s1667_s1 + $0x78] sm:$0xff]   ;;  %v1210_v4 = vld [vmem:[%s1667_s1 + $0x70] sm:$0xff]   ;;  %v1214_v8 = vld [vmem:[%s1667_s1 + $0x68] sm:$0xff]  }
   0x2   :  { %v1207_v1 = vld [vmem:[%s1667_s1 + $0xf8] sm:$0xff]   ;;  %1042 = vmatprep.subr.bf16.mxu0 %v1206_v0  ;;  %v1211_v5 = vld [vmem:[%s1667_s1 + $0xf0] sm:$0xff]   ;;  %v1215_v9 = vld [vmem:[%s1667_s1 + $0xe8] sm:$0xff]  }
   0x3   :  { %v1208_v2 = vld [vmem:[%s1667_s1 + $0x38] sm:$0xff]   ;;  %1124 = vmatprep.subr.bf16.mxu1 %v1207_v1  ;;  %v1212_v6 = vld [vmem:[%s1667_s1 + $0x30] sm:$0xff]   ;;  %v1216_v10 = vld [vmem:[%s1667_s1 + $0x28] sm:$0xff]  }
   0x4   :  { %v1209_v3 = vld [vmem:[%s1667_s1 + $0xb8] sm:$0xff]   ;;  %1043 = vmatpush3.bf16.msra.mxu0 %v1208_v2  ;;  %v1213_v7 = vld [vmem:[%s1667_s1 + $0xb0] sm:$0xff]   ;;  %v1217_v11 = vld [vmem:[%s1667_s1 + $0xa8] sm:$0xff]  }
   0x5   :  { %1125 = vmatpush3.bf16.msra.mxu1 %v1209_v3  ;;  %1044 = vmatprep.subr.bf16.mxu0 %v1210_v4  ;;  %v1218_v12 = vld [vmem:[%s1667_s1 + $0x60] sm:$0xff]   ;;  %v1222_v16 = vld [vmem:[%s1667_s1 + $0x58] sm:$0xff]   ;;  %v1226_v20 = vld [vmem:[%s1667_s1 + $0x50] sm:$0xff]  }
   0x6   :  { %1126 = vmatprep.subr.bf16.mxu1 %v1211_v5  ;;  %v1219_v13 = vld [vmem:[%s1667_s1 + $0xe0] sm:$0xff]   ;;  %v1223_v17 = vld [vmem:[%s1667_s1 + $0xd8] sm:$0xff]   ;;  %v1227_v21 = vld [vmem:[%s1667_s1 + $0xd0] sm:$0xff]  }
   0x7   :  { %v1220_v14 = vld [vmem:[%s1667_s1 + $0x20] sm:$0xff]   ;;  %v1224_v18 = vld [vmem:[%s1667_s1 + $0x18] sm:$0xff]   ;;  %v1228_v22 = vld [vmem:[%s1667_s1 + $0x10] sm:$0xff]  }
   0x8   :  { %1045 = vmatpush3.bf16.msra.mxu0 %v1212_v6  ;;  %v1221_v15 = vld [vmem:[%s1667_s1 + $0xa0] sm:$0xff]   ;;  %v1225_v19 = vld [vmem:[%s1667_s1 + $0x98] sm:$0xff]   ;;  %v1229_v23 = vld [vmem:[%s1667_s1 + $0x90] sm:$0xff]  }
   0x9   :  { %1127 = vmatpush3.bf16.msra.mxu1 %v1213_v7  ;;  %1046 = vmatprep.subr.bf16.mxu0 %v1214_v8  ;;  %v1230_v24 = vld [vmem:[%s1667_s1 + $0x48] sm:$0xff]   ;;  %v1234_v28 = vld [vmem:[%s1667_s1 + $0x40] sm:$0xff]  }
   0xa   :  { %1128 = vmatprep.subr.bf16.mxu1 %v1215_v9  ;;  %v1231_v25 = vld [vmem:[%s1667_s1 + $0xc8] sm:$0xff]   ;;  %v1235_v29 = vld [vmem:[%s1667_s1 + $0xc0] sm:$0xff]  }
   0xb   :  { %v1232_v26 = vld [vmem:[%s1667_s1 + $0x8] sm:$0xff]   ;;  %v1236_v30 = vld [vmem:[%s1667_s1] sm:$0xff]  }
   0xc   :  { %1047 = vmatpush3.bf16.msra.mxu0 %v1216_v10  ;;  %v1233_v27 = vld [vmem:[%s1667_s1 + $0x88] sm:$0xff]   ;;  %v1237_v31 = vld [vmem:[%s1667_s1 + $0x80] sm:$0xff]  }
   0xd   :  { %1129 = vmatpush3.bf16.msra.mxu1 %v1217_v11  ;;  %1048 = vmatprep.subr.bf16.mxu0 %v1218_v12  ;;  %v1238_v32 = vld [vmem:[%s1668_s0] ss:$16 sps:$4 sm:$0xff]   ;;  %v1240_v33 = vld [vmem:[%s1668_s0 + $0x4] ss:$16 sps:$4 sm:$0xff]   ;;  %v1241_v34 = vld [vmem:[%s1668_s0 + $0x8] ss:$16 sps:$4 sm:$0xff]  }
   0xe   :  { %1130 = vmatprep.subr.bf16.mxu1 %v1219_v13  ;;  %v1243_v35 = vld [vmem:[%s1668_s0 + $0xc] ss:$16 sps:$4 sm:$0xff]   ;;  %574 = vmatprep.mubr.bf16.mxu0 %v1240_v33  ;;  %v1244_v36 = vld [vmem:[%s1668_s0 + $0x24] ss:$16 sps:$4 sm:$0xff]   ;;  %v1248_v38 = vld [vmem:[%s1668_s0 + $0x20] ss:$16 sps:$4 sm:$0xff]  }
   0xf   :  { %695 = vmatprep.mubr.bf16.mxu1 %v1243_v35  ;;  %v1246_v37 = vld [vmem:[%s1668_s0 + $0x2c] ss:$16 sps:$4 sm:$0xff]   ;;  %v1249_v39 = vld [vmem:[%s1668_s0 + $0x28] ss:$16 sps:$4 sm:$0xff]   ;;  %v1250_v40 = vld [vmem:[%s1668_s0 + $0x44] ss:$16 sps:$4 sm:$0xff]  }
  0x10   :  { %1049 = vmatpush3.bf16.msra.mxu0 %v1220_v14  ;;  %v1252_v41 = vld [vmem:[%s1668_s0 + $0x4c] ss:$16 sps:$4 sm:$0xff]   ;;  %v1254_v42 = vld [vmem:[%s1668_s0 + $0x40] ss:$16 sps:$4 sm:$0xff]   ;;  %v1255_v43 = vld [vmem:[%s1668_s0 + $0x48] ss:$16 sps:$4 sm:$0xff]  }
  0x11   :  { %1131 = vmatpush3.bf16.msra.mxu1 %v1221_v15  ;;  %1050 = vmatprep.subr.bf16.mxu0 %v1222_v16  ;;  %v1256_v44 = vld [vmem:[%s1668_s0 + $0x64] ss:$16 sps:$4 sm:$0xff]   ;;  %v1258_v45 = vld [vmem:[%s1668_s0 + $0x6c] ss:$16 sps:$4 sm:$0xff]   ;;  %v1260_v46 = vld [vmem:[%s1668_s0 + $0x60] ss:$16 sps:$4 sm:$0xff]  }
  0x12   :  { %1132 = vmatprep.subr.bf16.mxu1 %v1223_v17  ;;  %v1261_v47 = vld [vmem:[%s1668_s0 + $0x68] ss:$16 sps:$4 sm:$0xff]   ;;  %v1262_v48 = vld [vmem:[%s1668_s0 + $0x84] ss:$16 sps:$4 sm:$0xff]   ;;  %v1264_v49 = vld [vmem:[%s1668_s0 + $0x8c] ss:$16 sps:$4 sm:$0xff]  }
  0x13   :  { %v1266_v50 = vld [vmem:[%s1668_s0 + $0x80] ss:$16 sps:$4 sm:$0xff]   ;;  %v1267_v51 = vld [vmem:[%s1668_s0 + $0x88] ss:$16 sps:$4 sm:$0xff]   ;;  %v1268_v52 = vld [vmem:[%s1668_s0 + $0xa4] ss:$16 sps:$4 sm:$0xff]  }
  0x14   :  { %1051 = vmatpush3.bf16.msra.mxu0 %v1224_v18  ;;  %v1270_v53 = vld [vmem:[%s1668_s0 + $0xac] ss:$16 sps:$4 sm:$0xff]   ;;  %v1272_v54 = vld [vmem:[%s1668_s0 + $0xa0] ss:$16 sps:$4 sm:$0xff]   ;;  %v1273_v55 = vld [vmem:[%s1668_s0 + $0xa8] ss:$16 sps:$4 sm:$0xff]  }
  0x15   :  { %1133 = vmatpush3.bf16.msra.mxu1 %v1225_v19  ;;  %1052 = vmatprep.subr.bf16.mxu0 %v1226_v20  ;;  %v1274_v56 = vld [vmem:[%s1668_s0 + $0xc4] ss:$16 sps:$4 sm:$0xff]   ;;  %v1276_v57 = vld [vmem:[%s1668_s0 + $0xcc] ss:$16 sps:$4 sm:$0xff]   ;;  %v1278_v58 = vld [vmem:[%s1668_s0 + $0xc0] ss:$16 sps:$4 sm:$0xff]  }
  0x16   :  { %1134 = vmatprep.subr.bf16.mxu1 %v1227_v21  ;;  %v1279_v59 = vld [vmem:[%s1668_s0 + $0xc8] ss:$16 sps:$4 sm:$0xff]   ;;  %v1280_v60 = vld [vmem:[%s1668_s0 + $0xe4] ss:$16 sps:$4 sm:$0xff]   ;;  %v1282_v61 = vld [vmem:[%s1668_s0 + $0xec] ss:$16 sps:$4 sm:$0xff]  }
  0x17   :  { %v1284_v62 = vld [vmem:[%s1668_s0 + $0xe0] ss:$16 sps:$4 sm:$0xff]   ;;  %v1285_v63 = vld [vmem:[%s1668_s0 + $0xe8] ss:$16 sps:$4 sm:$0xff]   ;;  %v1286_v0 = vld [vmem:[%s1668_s0 + $0x104] ss:$16 sps:$4 sm:$0xff]  }
  0x18   :  { %1053 = vmatpush3.bf16.msra.mxu0 %v1228_v22  ;;  %v1288_v1 = vld [vmem:[%s1668_s0 + $0x10c] ss:$16 sps:$4 sm:$0xff]   ;;  %v1290_v2 = vld [vmem:[%s1668_s0 + $0x100] ss:$16 sps:$4 sm:$0xff]   ;;  %v1291_v3 = vld [vmem:[%s1668_s0 + $0x108] ss:$16 sps:$4 sm:$0xff]  }
  0x19   :  { %1135 = vmatpush3.bf16.msra.mxu1 %v1229_v23  ;;  %1054 = vmatprep.subr.bf16.mxu0 %v1230_v24  ;;  %v1292_v4 = vld [vmem:[%s1668_s0 + $0x124] ss:$16 sps:$4 sm:$0xff]   ;;  %v1294_v5 = vld [vmem:[%s1668_s0 + $0x12c] ss:$16 sps:$4 sm:$0xff]   ;;  %v1296_v6 = vld [vmem:[%s1668_s0 + $0x120] ss:$16 sps:$4 sm:$0xff]  }
  0x1a   :  { %1136 = vmatprep.subr.bf16.mxu1 %v1231_v25  ;;  %v1297_v7 = vld [vmem:[%s1668_s0 + $0x128] ss:$16 sps:$4 sm:$0xff]   ;;  %v1298_v8 = vld [vmem:[%s1668_s0 + $0x144] ss:$16 sps:$4 sm:$0xff]   ;;  %v1300_v9 = vld [vmem:[%s1668_s0 + $0x14c] ss:$16 sps:$4 sm:$0xff]  }
  0x1b   :  { %v1302_v10 = vld [vmem:[%s1668_s0 + $0x140] ss:$16 sps:$4 sm:$0xff]   ;;  %v1303_v11 = vld [vmem:[%s1668_s0 + $0x148] ss:$16 sps:$4 sm:$0xff]  }
  0x1c   :  { %1055 = vmatpush3.bf16.msra.mxu0 %v1232_v26  ;;  %v1555_v14 = vld [vmem:[%s1669_s2] ss:$0 sm:$0xff] }
  0x1d   :  { %1137 = vmatpush3.bf16.msra.mxu1 %v1233_v27  ;;  %1056 = vmatprep.subr.bf16.mxu0 %v1234_v28 }
  0x1e   :  { %1138 = vmatprep.subr.bf16.mxu1 %v1235_v29 }
  0x20   :  { %1057 = vmatpush3.bf16.msra.mxu0 %v1236_v30 }
  0x21   :  { %1139 = vmatpush3.bf16.msra.mxu1 %v1237_v31 }
  0x23   :  { %575 = vmatmul.mubr.bf16.vlgmr.msra.gmra.mxu0 %v1238_v32 }
  0x24   :  { %696 = vmatmul.mubr.bf16.vlgmr.msra.gmra.mxu1 %v1241_v34  ;;  %582 = vmatprep.mubr.bf16.mxu0 %v1244_v36 }
  0x25   :  { %703 = vmatprep.mubr.bf16.mxu1 %v1246_v37 }
  0x2b   :  { %583 = vmatmul.mubr.bf16.gmra.mxu0 %v1248_v38 }
  0x2c   :  { %704 = vmatmul.mubr.bf16.gmra.mxu1 %v1249_v39  ;;  %590 = vmatprep.mubr.bf16.mxu0 %v1250_v40 }
  0x2d   :  { %711 = vmatprep.mubr.bf16.mxu1 %v1252_v41 }
  0x33   :  { %591 = vmatmul.mubr.bf16.gmra.mxu0 %v1254_v42 }
  0x34   :  { %712 = vmatmul.mubr.bf16.gmra.mxu1 %v1255_v43  ;;  %598 = vmatprep.mubr.bf16.mxu0 %v1256_v44 }
  0x35   :  { %719 = vmatprep.mubr.bf16.mxu1 %v1258_v45 }
  0x3b   :  { %599 = vmatmul.mubr.bf16.gmra.mxu0 %v1260_v46 }
  0x3c   :  { %720 = vmatmul.mubr.bf16.gmra.mxu1 %v1261_v47  ;;  %606 = vmatprep.mubr.bf16.mxu0 %v1262_v48 }
  0x3d   :  { %727 = vmatprep.mubr.bf16.mxu1 %v1264_v49 }
  0x43   :  { %607 = vmatmul.mubr.bf16.gmra.mxu0 %v1266_v50 }
  0x44   :  { %728 = vmatmul.mubr.bf16.gmra.mxu1 %v1267_v51  ;;  %614 = vmatprep.mubr.bf16.mxu0 %v1268_v52 }
  0x45   :  { %735 = vmatprep.mubr.bf16.mxu1 %v1270_v53 }
  0x4b   :  { %615 = vmatmul.mubr.bf16.gmra.mxu0 %v1272_v54 }
  0x4c   :  { %736 = vmatmul.mubr.bf16.gmra.mxu1 %v1273_v55  ;;  %622 = vmatprep.mubr.bf16.mxu0 %v1274_v56 }
  0x4d   :  { %743 = vmatprep.mubr.bf16.mxu1 %v1276_v57 }
  0x53   :  { %623 = vmatmul.mubr.bf16.gmra.mxu0 %v1278_v58 }
  0x54   :  { %744 = vmatmul.mubr.bf16.gmra.mxu1 %v1279_v59  ;;  %630 = vmatprep.mubr.bf16.mxu0 %v1280_v60 }
  0x55   :  { %751 = vmatprep.mubr.bf16.mxu1 %v1282_v61 }
  0x5b   :  { %631 = vmatmul.mubr.bf16.gmra.mxu0 %v1284_v62 }
  0x5c   :  { %752 = vmatmul.mubr.bf16.gmra.mxu1 %v1285_v63  ;;  %638 = vmatprep.mubr.bf16.mxu0 %v1286_v0 }
  0x5d   :  { %759 = vmatprep.mubr.bf16.mxu1 %v1288_v1 }
  0x63   :  { %639 = vmatmul.mubr.bf16.gmra.mxu0 %v1290_v2 }
  0x64   :  { %760 = vmatmul.mubr.bf16.gmra.mxu1 %v1291_v3  ;;  %646 = vmatprep.mubr.bf16.mxu0 %v1292_v4 }
  0x65   :  { %767 = vmatprep.mubr.bf16.mxu1 %v1294_v5 }
  0x6b   :  { %647 = vmatmul.mubr.bf16.gmra.mxu0 %v1296_v6 }
  0x6c   :  { %768 = vmatmul.mubr.bf16.gmra.mxu1 %v1297_v7  ;;  %654 = vmatprep.mubr.bf16.mxu0 %v1298_v8 }
  0x6d   :  { %775 = vmatprep.mubr.bf16.mxu1 %v1300_v9 }
  0x73   :  { %655 = vmatmul.mubr.bf16.gmra.mxu0 %v1302_v10 }
  0x74   :  { %776 = vmatmul.mubr.bf16.gmra.mxu1 %v1303_v11 }
  0xe3   :  { %v1058_v12 = vpop.f32.mrf.mxu0 }
  0xe4   :  { %v1140_v13 = vpop.f32.mrf.mxu1 }
  0xe5   :  { %v1059_v15 = vpop.f32.mrf.mxu0 }
  0xe6   :  { %v1060_v16 = vadd.f32 %v1059_v15, %v1058_v12  ;;  %v1141_v17 = vpop.f32.mrf.mxu1 }
  0xe7   :  { %v1061_v18 = vpop.f32.mrf.mxu0  ;;  %v1142_v20 = vadd.f32 %v1141_v17, %v1140_v13 }
  0xe8   :  { %v577_v19 = vadd.f32 %v1060_v16, %v1555_v14  ;;  %v1143_v21 = vpop.f32.mrf.mxu1 }
  0xe9   :  { %v1062_v22 = vpop.f32.mrf.mxu0 }
  0xea   :  { %v698_v23 = vadd.f32 %v1142_v20, %v577_v19  ;;  %v1063_v24 = vadd.f32 %v1062_v22, %v1061_v18  ;;  %v1144_v25 = vpop.f32.mrf.mxu1 }
  0xeb   :  { %v1064_v26 = vpop.f32.mrf.mxu0  ;;  %v1145_v29 = vadd.f32 %v1144_v25, %v1143_v21 }
  0xec   :  { %v784_v27 = vmax.f32 %v698_v23, 0.0  ;;  %v580_v28 = vadd.f32 %v1063_v24, %v1555_v14  ;;  %v1146_v30 = vpop.f32.mrf.mxu1 }
  0xed   :  { %v1065_v31 = vpop.f32.mrf.mxu0 }
  0xee   :  { %v1020_v32 = vpack.c.bf16 %v784_v27, %v784_v27  ;;  %v701_v33 = vadd.f32 %v1145_v29, %v580_v28  ;;  %v1066_v34 = vadd.f32 %v1065_v31, %v1064_v26  ;;  %v1147_v35 = vpop.f32.mrf.mxu1 }
  0xef   :  { %v1067_v36 = vpop.f32.mrf.mxu0  ;;  %v1148_v39 = vadd.f32 %v1147_v35, %v1146_v30 }
  0xf0   :  { %895 = vst.msk [vmem:[%s1670_s3] sm:$0xf] %vm894_vm0, %v1020_v32  ;;  %v785_v37 = vmax.f32 %v701_v33, 0.0  ;;  %v585_v38 = vadd.f32 %v1066_v34, %v1555_v14  ;;  %v1149_v40 = vpop.f32.mrf.mxu1 }
  0xf1   :  { %v1068_v41 = vpop.f32.mrf.mxu0 }
  0xf2   :  { %v1021_v42 = vpack.c.bf16 %v785_v37, %v785_v37  ;;  %v706_v43 = vadd.f32 %v1148_v39, %v585_v38  ;;  %v1069_v44 = vadd.f32 %v1068_v41, %v1067_v36  ;;  %v1150_v45 = vpop.f32.mrf.mxu1 }
  0xf3   :  { %v1070_v46 = vpop.f32.mrf.mxu0  ;;  %v1151_v49 = vadd.f32 %v1150_v45, %v1149_v40 }
  0xf4   :  { %896 = vst.msk [vmem:[%s1670_s3 + $0x4] sm:$0xf] %vm894_vm0, %v1021_v42  ;;  %v786_v47 = vmax.f32 %v706_v43, 0.0  ;;  %v588_v48 = vadd.f32 %v1069_v44, %v1555_v14  ;;  %v1152_v50 = vpop.f32.mrf.mxu1 }
  0xf5   :  { %v1071_v51 = vpop.f32.mrf.mxu0 }
  0xf6   :  { %v1022_v52 = vpack.c.bf16 %v786_v47, %v786_v47  ;;  %v709_v53 = vadd.f32 %v1151_v49, %v588_v48  ;;  %v1072_v54 = vadd.f32 %v1071_v51, %v1070_v46  ;;  %v1153_v55 = vpop.f32.mrf.mxu1 }
  0xf7   :  { %v1073_v56 = vpop.f32.mrf.mxu0  ;;  %v1154_v59 = vadd.f32 %v1153_v55, %v1152_v50 }
  0xf8   :  { %897 = vst.msk [vmem:[%s1670_s3 + $0x8] sm:$0xf] %vm894_vm0, %v1022_v52  ;;  %v787_v57 = vmax.f32 %v709_v53, 0.0  ;;  %v593_v58 = vadd.f32 %v1072_v54, %v1555_v14  ;;  %v1155_v60 = vpop.f32.mrf.mxu1 }
  0xf9   :  { %v1074_v61 = vpop.f32.mrf.mxu0 }
  0xfa   :  { %v1023_v62 = vpack.c.bf16 %v787_v57, %v787_v57  ;;  %v714_v63 = vadd.f32 %v1154_v59, %v593_v58  ;;  %v1075_v0 = vadd.f32 %v1074_v61, %v1073_v56  ;;  %v1156_v1 = vpop.f32.mrf.mxu1 }
  0xfb   :  { %v1076_v2 = vpop.f32.mrf.mxu0  ;;  %v1157_v5 = vadd.f32 %v1156_v1, %v1155_v60 }
  0xfc   :  { %898 = vst.msk [vmem:[%s1670_s3 + $0xc] sm:$0xf] %vm894_vm0, %v1023_v62  ;;  %v788_v3 = vmax.f32 %v714_v63, 0.0  ;;  %v596_v4 = vadd.f32 %v1075_v0, %v1555_v14  ;;  %v1158_v6 = vpop.f32.mrf.mxu1 }
  0xfd   :  { %v1077_v7 = vpop.f32.mrf.mxu0 }
  0xfe   :  { %v1024_v8 = vpack.c.bf16 %v788_v3, %v788_v3  ;;  %v717_v9 = vadd.f32 %v1157_v5, %v596_v4  ;;  %v1078_v10 = vadd.f32 %v1077_v7, %v1076_v2  ;;  %v1159_v11 = vpop.f32.mrf.mxu1 }
  0xff   :  { %v1079_v12 = vpop.f32.mrf.mxu0  ;;  %v1160_v16 = vadd.f32 %v1159_v11, %v1158_v6 }
 0x100   :  { %899 = vst.msk [vmem:[%s1670_s3 + $0x10] sm:$0xf] %vm894_vm0, %v1024_v8  ;;  %v789_v13 = vmax.f32 %v717_v9, 0.0  ;;  %v601_v15 = vadd.f32 %v1078_v10, %v1555_v14  ;;  %v1161_v17 = vpop.f32.mrf.mxu1 }
 0x101   :  { %v1080_v18 = vpop.f32.mrf.mxu0 }
 0x102   :  { %v1025_v19 = vpack.c.bf16 %v789_v13, %v789_v13  ;;  %v722_v20 = vadd.f32 %v1160_v16, %v601_v15  ;;  %v1081_v21 = vadd.f32 %v1080_v18, %v1079_v12  ;;  %v1162_v22 = vpop.f32.mrf.mxu1 }
 0x103   :  { %v1082_v23 = vpop.f32.mrf.mxu0  ;;  %v1163_v26 = vadd.f32 %v1162_v22, %v1161_v17 }
 0x104   :  { %900 = vst.msk [vmem:[%s1670_s3 + $0x14] sm:$0xf] %vm894_vm0, %v1025_v19  ;;  %v790_v24 = vmax.f32 %v722_v20, 0.0  ;;  %v604_v25 = vadd.f32 %v1081_v21, %v1555_v14  ;;  %v1164_v27 = vpop.f32.mrf.mxu1 }
 0x105   :  { %v1083_v28 = vpop.f32.mrf.mxu0 }
 0x106   :  { %v1026_v29 = vpack.c.bf16 %v790_v24, %v790_v24  ;;  %v725_v30 = vadd.f32 %v1163_v26, %v604_v25  ;;  %v1084_v31 = vadd.f32 %v1083_v28, %v1082_v23  ;;  %v1165_v32 = vpop.f32.mrf.mxu1 }
 0x107   :  { %v1085_v33 = vpop.f32.mrf.mxu0  ;;  %v1166_v36 = vadd.f32 %v1165_v32, %v1164_v27 }
 0x108   :  { %901 = vst.msk [vmem:[%s1670_s3 + $0x18] sm:$0xf] %vm894_vm0, %v1026_v29  ;;  %v791_v34 = vmax.f32 %v725_v30, 0.0  ;;  %v609_v35 = vadd.f32 %v1084_v31, %v1555_v14  ;;  %v1167_v37 = vpop.f32.mrf.mxu1 }
 0x109   :  { %v1086_v38 = vpop.f32.mrf.mxu0 }
 0x10a   :  { %v1027_v39 = vpack.c.bf16 %v791_v34, %v791_v34  ;;  %v730_v40 = vadd.f32 %v1166_v36, %v609_v35  ;;  %v1087_v41 = vadd.f32 %v1086_v38, %v1085_v33  ;;  %v1168_v42 = vpop.f32.mrf.mxu1 }
 0x10b   :  { %v1088_v43 = vpop.f32.mrf.mxu0  ;;  %v1169_v46 = vadd.f32 %v1168_v42, %v1167_v37 }
 0x10c   :  { %902 = vst.msk [vmem:[%s1670_s3 + $0x1c] sm:$0xf] %vm894_vm0, %v1027_v39  ;;  %v792_v44 = vmax.f32 %v730_v40, 0.0  ;;  %v612_v45 = vadd.f32 %v1087_v41, %v1555_v14  ;;  %v1170_v47 = vpop.f32.mrf.mxu1 }
 0x10d   :  { %v1089_v48 = vpop.f32.mrf.mxu0 }
 0x10e   :  { %v1028_v49 = vpack.c.bf16 %v792_v44, %v792_v44  ;;  %v733_v50 = vadd.f32 %v1169_v46, %v612_v45  ;;  %v1090_v51 = vadd.f32 %v1089_v48, %v1088_v43  ;;  %v1171_v52 = vpop.f32.mrf.mxu1 }
 0x10f   :  { %v1091_v53 = vpop.f32.mrf.mxu0  ;;  %v1172_v56 = vadd.f32 %v1171_v52, %v1170_v47 }
 0x110   :  { %903 = vst.msk [vmem:[%s1670_s3 + $0x20] sm:$0xf] %vm894_vm0, %v1028_v49  ;;  %v793_v54 = vmax.f32 %v733_v50, 0.0  ;;  %v617_v55 = vadd.f32 %v1090_v51, %v1555_v14  ;;  %v1173_v57 = vpop.f32.mrf.mxu1 }
 0x111   :  { %v1092_v58 = vpop.f32.mrf.mxu0 }
 0x112   :  { %v1029_v59 = vpack.c.bf16 %v793_v54, %v793_v54  ;;  %v738_v60 = vadd.f32 %v1172_v56, %v617_v55  ;;  %v1093_v61 = vadd.f32 %v1092_v58, %v1091_v53  ;;  %v1174_v62 = vpop.f32.mrf.mxu1 }
 0x113   :  { %v1094_v63 = vpop.f32.mrf.mxu0  ;;  %v1175_v2 = vadd.f32 %v1174_v62, %v1173_v57 }
 0x114   :  { %904 = vst.msk [vmem:[%s1670_s3 + $0x24] sm:$0xf] %vm894_vm0, %v1029_v59  ;;  %v794_v0 = vmax.f32 %v738_v60, 0.0  ;;  %v620_v1 = vadd.f32 %v1093_v61, %v1555_v14  ;;  %v1176_v3 = vpop.f32.mrf.mxu1 }
 0x115   :  { %v1095_v4 = vpop.f32.mrf.mxu0 }
 0x116   :  { %v1030_v5 = vpack.c.bf16 %v794_v0, %v794_v0  ;;  %v741_v6 = vadd.f32 %v1175_v2, %v620_v1  ;;  %v1096_v7 = vadd.f32 %v1095_v4, %v1094_v63  ;;  %v1177_v8 = vpop.f32.mrf.mxu1 }
 0x117   :  { %v1097_v9 = vpop.f32.mrf.mxu0  ;;  %v1178_v12 = vadd.f32 %v1177_v8, %v1176_v3 }
 0x118   :  { %905 = vst.msk [vmem:[%s1670_s3 + $0x28] sm:$0xf] %vm894_vm0, %v1030_v5  ;;  %v795_v10 = vmax.f32 %v741_v6, 0.0  ;;  %v625_v11 = vadd.f32 %v1096_v7, %v1555_v14  ;;  %v1179_v13 = vpop.f32.mrf.mxu1 }
 0x119   :  { %v1098_v15 = vpop.f32.mrf.mxu0 }
 0x11a   :  { %v1031_v16 = vpack.c.bf16 %v795_v10, %v795_v10  ;;  %v746_v17 = vadd.f32 %v1178_v12, %v625_v11  ;;  %v1099_v18 = vadd.f32 %v1098_v15, %v1097_v9  ;;  %v1180_v19 = vpop.f32.mrf.mxu1 }
 0x11b   :  { %v1100_v20 = vpop.f32.mrf.mxu0  ;;  %v1181_v23 = vadd.f32 %v1180_v19, %v1179_v13 }
 0x11c   :  { %906 = vst.msk [vmem:[%s1670_s3 + $0x2c] sm:$0xf] %vm894_vm0, %v1031_v16  ;;  %v796_v21 = vmax.f32 %v746_v17, 0.0  ;;  %v628_v22 = vadd.f32 %v1099_v18, %v1555_v14  ;;  %v1182_v24 = vpop.f32.mrf.mxu1 }
 0x11d   :  { %v1101_v25 = vpop.f32.mrf.mxu0 }
 0x11e   :  { %v1032_v26 = vpack.c.bf16 %v796_v21, %v796_v21  ;;  %v749_v27 = vadd.f32 %v1181_v23, %v628_v22  ;;  %v1102_v28 = vadd.f32 %v1101_v25, %v1100_v20  ;;  %v1183_v29 = vpop.f32.mrf.mxu1 }
 0x11f   :  { %v1103_v30 = vpop.f32.mrf.mxu0  ;;  %v1184_v33 = vadd.f32 %v1183_v29, %v1182_v24 }
 0x120   :  { %907 = vst.msk [vmem:[%s1670_s3 + $0x30] sm:$0xf] %vm894_vm0, %v1032_v26  ;;  %v797_v31 = vmax.f32 %v749_v27, 0.0  ;;  %v633_v32 = vadd.f32 %v1102_v28, %v1555_v14  ;;  %v1185_v34 = vpop.f32.mrf.mxu1 }
 0x121   :  { %v1104_v35 = vpop.f32.mrf.mxu0 }
 0x122   :  { %v1033_v36 = vpack.c.bf16 %v797_v31, %v797_v31  ;;  %v754_v37 = vadd.f32 %v1184_v33, %v633_v32  ;;  %v1105_v38 = vadd.f32 %v1104_v35, %v1103_v30  ;;  %v1186_v39 = vpop.f32.mrf.mxu1 }
 0x123   :  { %v1106_v40 = vpop.f32.mrf.mxu0  ;;  %v1187_v43 = vadd.f32 %v1186_v39, %v1185_v34 }
 0x124   :  { %908 = vst.msk [vmem:[%s1670_s3 + $0x34] sm:$0xf] %vm894_vm0, %v1033_v36  ;;  %v798_v41 = vmax.f32 %v754_v37, 0.0  ;;  %v636_v42 = vadd.f32 %v1105_v38, %v1555_v14  ;;  %v1188_v44 = vpop.f32.mrf.mxu1 }
 0x125   :  { %v1107_v45 = vpop.f32.mrf.mxu0 }
 0x126   :  { %v1034_v46 = vpack.c.bf16 %v798_v41, %v798_v41  ;;  %v757_v47 = vadd.f32 %v1187_v43, %v636_v42  ;;  %v1108_v48 = vadd.f32 %v1107_v45, %v1106_v40  ;;  %v1189_v49 = vpop.f32.mrf.mxu1 }
 0x127   :  { %v1109_v50 = vpop.f32.mrf.mxu0  ;;  %v1190_v53 = vadd.f32 %v1189_v49, %v1188_v44 }
 0x128   :  { %909 = vst.msk [vmem:[%s1670_s3 + $0x38] sm:$0xf] %vm894_vm0, %v1034_v46  ;;  %v799_v51 = vmax.f32 %v757_v47, 0.0  ;;  %v641_v52 = vadd.f32 %v1108_v48, %v1555_v14  ;;  %v1191_v54 = vpop.f32.mrf.mxu1 }
 0x129   :  { %v1110_v55 = vpop.f32.mrf.mxu0 }
 0x12a   :  { %v1035_v56 = vpack.c.bf16 %v799_v51, %v799_v51  ;;  %v762_v57 = vadd.f32 %v1190_v53, %v641_v52  ;;  %v1111_v58 = vadd.f32 %v1110_v55, %v1109_v50  ;;  %v1192_v59 = vpop.f32.mrf.mxu1 }
 0x12b   :  { %v1112_v60 = vpop.f32.mrf.mxu0  ;;  %v1193_v63 = vadd.f32 %v1192_v59, %v1191_v54 }
 0x12c   :  { %910 = vst.msk [vmem:[%s1670_s3 + $0x3c] sm:$0xf] %vm894_vm0, %v1035_v56  ;;  %v800_v61 = vmax.f32 %v762_v57, 0.0  ;;  %v644_v62 = vadd.f32 %v1111_v58, %v1555_v14  ;;  %v1194_v0 = vpop.f32.mrf.mxu1 }
 0x12d   :  { %v1113_v1 = vpop.f32.mrf.mxu0 }
 0x12e   :  { %v1036_v2 = vpack.c.bf16 %v800_v61, %v800_v61  ;;  %v765_v3 = vadd.f32 %v1193_v63, %v644_v62  ;;  %v1114_v4 = vadd.f32 %v1113_v1, %v1112_v60  ;;  %v1195_v5 = vpop.f32.mrf.mxu1 }
 0x12f   :  { %v1115_v6 = vpop.f32.mrf.mxu0  ;;  %v1196_v9 = vadd.f32 %v1195_v5, %v1194_v0 }
 0x130   :  { %911 = vst.msk [vmem:[%s1670_s3 + $0x40] sm:$0xf] %vm894_vm0, %v1036_v2  ;;  %v801_v7 = vmax.f32 %v765_v3, 0.0  ;;  %v649_v8 = vadd.f32 %v1114_v4, %v1555_v14  ;;  %v1197_v10 = vpop.f32.mrf.mxu1 }
 0x131   :  { %v1116_v11 = vpop.f32.mrf.mxu0 }
 0x132   :  { %v1037_v12 = vpack.c.bf16 %v801_v7, %v801_v7  ;;  %v770_v13 = vadd.f32 %v1196_v9, %v649_v8  ;;  %v1117_v15 = vadd.f32 %v1116_v11, %v1115_v6  ;;  %v1198_v16 = vpop.f32.mrf.mxu1 }
 0x133   :  { %v1118_v17 = vpop.f32.mrf.mxu0  ;;  %v1199_v20 = vadd.f32 %v1198_v16, %v1197_v10 }
 0x134   :  { %912 = vst.msk [vmem:[%s1670_s3 + $0x44] sm:$0xf] %vm894_vm0, %v1037_v12  ;;  %v802_v18 = vmax.f32 %v770_v13, 0.0  ;;  %v652_v19 = vadd.f32 %v1117_v15, %v1555_v14  ;;  %v1200_v21 = vpop.f32.mrf.mxu1 }
 0x135   :  { %v1119_v22 = vpop.f32.mrf.mxu0 }
 0x136   :  { %v1038_v23 = vpack.c.bf16 %v802_v18, %v802_v18  ;;  %v773_v24 = vadd.f32 %v1199_v20, %v652_v19  ;;  %v1120_v25 = vadd.f32 %v1119_v22, %v1118_v17  ;;  %v1201_v26 = vpop.f32.mrf.mxu1 }
 0x137   :  { %v1121_v27 = vpop.f32.mrf.mxu0  ;;  %v1202_v30 = vadd.f32 %v1201_v26, %v1200_v21 }
 0x138   :  { %913 = vst.msk [vmem:[%s1670_s3 + $0x48] sm:$0xf] %vm894_vm0, %v1038_v23  ;;  %v803_v28 = vmax.f32 %v773_v24, 0.0  ;;  %v657_v29 = vadd.f32 %v1120_v25, %v1555_v14  ;;  %v1203_v31 = vpop.f32.mrf.mxu1 }
 0x139   :  { %v1122_v32 = vpop.f32.mrf.mxu0 }
 0x13a   :  { %v1039_v33 = vpack.c.bf16 %v803_v28, %v803_v28  ;;  %v778_v34 = vadd.f32 %v1202_v30, %v657_v29  ;;  %v1123_v35 = vadd.f32 %v1122_v32, %v1121_v27  ;;  %v1204_v36 = vpop.f32.mrf.mxu1 }
 0x13b   :  { %v1205_v39 = vadd.f32 %v1204_v36, %v1203_v31 }
 0x13c   :  { %914 = vst.msk [vmem:[%s1670_s3 + $0x4c] sm:$0xf] %vm894_vm0, %v1039_v33  ;;  %v804_v37 = vmax.f32 %v778_v34, 0.0  ;;  %v660_v38 = vadd.f32 %v1123_v35, %v1555_v14 }
 0x13e   :  { %v1040_v40 = vpack.c.bf16 %v804_v37, %v804_v37  ;;  %v781_v41 = vadd.f32 %v1205_v39, %v660_v38 }
 0x140   :  { %915 = vst.msk [vmem:[%s1670_s3 + $0x50] sm:$0xf] %vm894_vm0, %v1040_v40  ;;  %v805_v42 = vmax.f32 %v781_v41, 0.0 }
 0x142   :  { %v1041_v43 = vpack.c.bf16 %v805_v42, %v805_v42 }
 0x144   :  { %916 = vst.msk [vmem:[%s1670_s3 + $0x54] sm:$0xf] %vm894_vm0, %v1041_v43 }

// kernel: actor_critic_forward.6
= control target key start
LH: loop header
LB: loop body
LE: loop exit
PB: predicated region body
PF: predicated region fallthrough
CT: control target
= control target key end

     0   :  { %v1270_v34 = vmov 0.0   ;;  %vm1271_vm0 = vmmov 0   ;;  %vm527_vm1 = vcmask 523264   ;;  %vm886_vm2 = vcmask 519168   ;;  %s1693_s1 = inlined_call_operand.vmem [shape: bf16[576,64], index: 1, kind: input, shape index: {}]   ;;  %s1694_s0 = inlined_call_operand.vmem [shape: bf16[112,576], index: 0, kind: input, shape index: {}]   ;;  %s1695_s2 = inlined_call_operand.vmem [shape: f32[1,64], index: 2, kind: input, shape index: {}]   ;;  %s1696_s3 = inlined_call_operand.vmem [shape: bf16[112,64], index: 3, kind: output, shape index: {}]  }
   0x1   :  { %v1185_v0 = vld [vmem:[%s1693_s1 + $0x78] sm:$0xff]   ;;  %v1189_v4 = vld [vmem:[%s1693_s1 + $0x70] sm:$0xff]   ;;  %v1193_v8 = vld [vmem:[%s1693_s1 + $0x68] sm:$0xff]  }
   0x2   :  { %v1186_v1 = vld [vmem:[%s1693_s1 + $0xf8] sm:$0xff]   ;;  %1012 = vmatprep.subr.bf16.mxu0 %v1185_v0  ;;  %v1190_v5 = vld [vmem:[%s1693_s1 + $0xf0] sm:$0xff]   ;;  %v1194_v9 = vld [vmem:[%s1693_s1 + $0xe8] sm:$0xff]  }
   0x3   :  { %v1187_v2 = vld [vmem:[%s1693_s1 + $0x38] sm:$0xff]   ;;  %1070 = vmatprep.subr.bf16.mxu1 %v1186_v1  ;;  %v1191_v6 = vld [vmem:[%s1693_s1 + $0x30] sm:$0xff]   ;;  %v1195_v10 = vld [vmem:[%s1693_s1 + $0x28] sm:$0xff]  }
   0x4   :  { %v1188_v3 = vld [vmem:[%s1693_s1 + $0xb8] sm:$0xff]   ;;  %1013 = vmatpush3.bf16.msra.mxu0 %v1187_v2  ;;  %v1192_v7 = vld [vmem:[%s1693_s1 + $0xb0] sm:$0xff]   ;;  %v1196_v11 = vld [vmem:[%s1693_s1 + $0xa8] sm:$0xff]  }
   0x5   :  { %1071 = vmatpush3.bf16.msra.mxu1 %v1188_v3  ;;  %1014 = vmatprep.subr.bf16.mxu0 %v1189_v4  ;;  %v1197_v12 = vld [vmem:[%s1693_s1 + $0x60] sm:$0xff]   ;;  %v1201_v16 = vld [vmem:[%s1693_s1 + $0x58] sm:$0xff]   ;;  %v1205_v20 = vld [vmem:[%s1693_s1 + $0x50] sm:$0xff]  }
   0x6   :  { %1072 = vmatprep.subr.bf16.mxu1 %v1190_v5  ;;  %v1198_v13 = vld [vmem:[%s1693_s1 + $0xe0] sm:$0xff]   ;;  %v1202_v17 = vld [vmem:[%s1693_s1 + $0xd8] sm:$0xff]   ;;  %v1206_v21 = vld [vmem:[%s1693_s1 + $0xd0] sm:$0xff]  }
   0x7   :  { %v1199_v14 = vld [vmem:[%s1693_s1 + $0x20] sm:$0xff]   ;;  %v1203_v18 = vld [vmem:[%s1693_s1 + $0x18] sm:$0xff]   ;;  %v1207_v22 = vld [vmem:[%s1693_s1 + $0x10] sm:$0xff]  }
   0x8   :  { %1015 = vmatpush3.bf16.msra.mxu0 %v1191_v6  ;;  %v1200_v15 = vld [vmem:[%s1693_s1 + $0xa0] sm:$0xff]   ;;  %v1204_v19 = vld [vmem:[%s1693_s1 + $0x98] sm:$0xff]   ;;  %v1208_v23 = vld [vmem:[%s1693_s1 + $0x90] sm:$0xff]  }
   0x9   :  { %1073 = vmatpush3.bf16.msra.mxu1 %v1192_v7  ;;  %1016 = vmatprep.subr.bf16.mxu0 %v1193_v8  ;;  %v1209_v24 = vld [vmem:[%s1693_s1 + $0x48] sm:$0xff]   ;;  %v1213_v28 = vld [vmem:[%s1693_s1 + $0x40] sm:$0xff]   ;;  %v1223_v37 = vld [vmem:[%s1693_s1 + $0x118] sm:$0xff]  }
   0xa   :  { %1074 = vmatprep.subr.bf16.mxu1 %v1194_v9  ;;  %v1210_v25 = vld [vmem:[%s1693_s1 + $0xc8] sm:$0xff]   ;;  %v1214_v29 = vld [vmem:[%s1693_s1 + $0xc0] sm:$0xff]   ;;  %v1234_v43 = vld [vmem:[%s1693_s1 + $0x110] sm:$0xff]  }
   0xb   :  { %v1211_v26 = vld [vmem:[%s1693_s1 + $0x8] sm:$0xff]   ;;  %v1215_v30 = vld [vmem:[%s1693_s1] sm:$0xff]   ;;  %v1232_v44 = vld [vmem:[%s1694_s0 + $0x5c] ss:$20 sps:$4 sm:$0xff]  }
   0xc   :  { %1017 = vmatpush3.bf16.msra.mxu0 %v1195_v10  ;;  %v1212_v27 = vld [vmem:[%s1693_s1 + $0x88] sm:$0xff]   ;;  %v1216_v31 = vld [vmem:[%s1693_s1 + $0x80] sm:$0xff]   ;;  %v1237_v48 = vld [vmem:[%s1694_s0 + $0x7c] ss:$20 sps:$4 sm:$0xff]  }
   0xd   :  { %1075 = vmatpush3.bf16.msra.mxu1 %v1196_v11  ;;  %1018 = vmatprep.subr.bf16.mxu0 %v1197_v12  ;;  %v1217_v32 = vld [vmem:[%s1694_s0] ss:$20 sps:$4 sm:$0xff]   ;;  %v1219_v33 = vld [vmem:[%s1694_s0 + $0x4] ss:$20 sps:$4 sm:$0xff]   ;;  %v1220_v35 = vld [vmem:[%s1694_s0 + $0x8] ss:$20 sps:$4 sm:$0xff]  }
   0xe   :  { %1076 = vmatprep.subr.bf16.mxu1 %v1198_v13  ;;  %v1222_v36 = vld [vmem:[%s1694_s0 + $0xc] ss:$20 sps:$4 sm:$0xff]   ;;  %581 = vmatprep.mubr.bf16.mxu0 %v1219_v33  ;;  %v1226_v39 = vld [vmem:[%s1694_s0 + $0x34] ss:$20 sps:$4 sm:$0xff]   ;;  %v1229_v41 = vld [vmem:[%s1694_s0 + $0x30] ss:$20 sps:$4 sm:$0xff]  }
   0xf   :  { %670 = vmatprep.mubr.bf16.mxu1 %v1222_v36  ;;  %v1224_v38 = vld [vmem:[%s1694_s0 + $0x2c] ss:$20 sps:$4 sm:$0xff]   ;;  %v1228_v40 = vld [vmem:[%s1694_s0 + $0x28] ss:$20 sps:$4 sm:$0xff]   ;;  %v1235_v46 = vld [vmem:[%s1694_s0 + $0x50] ss:$20 sps:$4 sm:$0xff]  }
  0x10   :  { %1019 = vmatpush3.bf16.msra.mxu0 %v1199_v14  ;;  %v1230_v42 = vld [vmem:[%s1694_s0 + $0x54] ss:$20 sps:$4 sm:$0xff]   ;;  %v1236_v47 = vld [vmem:[%s1694_s0 + $0x58] ss:$20 sps:$4 sm:$0xff]   ;;  %v1256_v50 = vld [vmem:[%s1693_s1 + $0x100] sm:$0xff]  }
  0x11   :  { %1077 = vmatpush3.bf16.msra.mxu1 %v1200_v15  ;;  %1020 = vmatprep.subr.bf16.mxu0 %v1201_v16  ;;  %v1243_v45 = vld [vmem:[%s1693_s1 + $0x108] sm:$0xff]   ;;  %v1239_v49 = vld [vmem:[%s1694_s0 + $0x84] ss:$20 sps:$4 sm:$0xff]   ;;  %v1242_v52 = vld [vmem:[%s1694_s0 + $0x80] ss:$20 sps:$4 sm:$0xff]  }
  0x12   :  { %1078 = vmatprep.subr.bf16.mxu1 %v1202_v17  ;;  %v1241_v51 = vld [vmem:[%s1694_s0 + $0x78] ss:$20 sps:$4 sm:$0xff]   ;;  %v1248_v55 = vld [vmem:[%s1694_s0 + $0xa0] ss:$20 sps:$4 sm:$0xff]   ;;  %v1249_v56 = vld [vmem:[%s1694_s0 + $0xa8] ss:$20 sps:$4 sm:$0xff]  }
  0x13   :  { %v1244_v53 = vld [vmem:[%s1694_s0 + $0xa4] ss:$20 sps:$4 sm:$0xff]   ;;  %v1246_v54 = vld [vmem:[%s1694_s0 + $0xac] ss:$20 sps:$4 sm:$0xff]   ;;  %v1252_v58 = vld [vmem:[%s1694_s0 + $0xd4] ss:$20 sps:$4 sm:$0xff]  }
  0x14   :  { %1021 = vmatpush3.bf16.msra.mxu0 %v1203_v18  ;;  %v1250_v57 = vld [vmem:[%s1694_s0 + $0xcc] ss:$20 sps:$4 sm:$0xff]   ;;  %v1254_v59 = vld [vmem:[%s1694_s0 + $0xc8] ss:$20 sps:$4 sm:$0xff]   ;;  %v1255_v60 = vld [vmem:[%s1694_s0 + $0xd0] ss:$20 sps:$4 sm:$0xff]  }
  0x15   :  { %1079 = vmatpush3.bf16.msra.mxu1 %v1204_v19  ;;  %1022 = vmatprep.subr.bf16.mxu0 %v1205_v20  ;;  %v1257_v61 = vld [vmem:[%s1694_s0 + $0xf4] ss:$20 sps:$4 sm:$0xff]   ;;  %v1259_v62 = vld [vmem:[%s1694_s0 + $0xfc] ss:$20 sps:$4 sm:$0xff]   ;;  %v1262_v0 = vld [vmem:[%s1694_s0 + $0xf8] ss:$20 sps:$4 sm:$0xff]  }
  0x16   :  { %1080 = vmatprep.subr.bf16.mxu1 %v1206_v21  ;;  %v1261_v63 = vld [vmem:[%s1694_s0 + $0xf0] ss:$20 sps:$4 sm:$0xff]   ;;  %v1265_v3 = vld [vmem:[%s1694_s0 + $0x38] ss:$20 sps:$4 sm:$0xff]   ;;  %v1267_v5 = vld [vmem:[%s1694_s0 + $0x60] ss:$20 sps:$4 sm:$0xff]  }
  0x17   :  { %v1263_v1 = vld [vmem:[%s1694_s0 + $0x10] ss:$20 sps:$4 sm:$0xff]   ;;  %v1266_v4 = vld [vmem:[%s1694_s0 + $0xd8] ss:$20 sps:$4 sm:$0xff]   ;;  %v1268_v6 = vld [vmem:[%s1694_s0 + $0x100] ss:$20 sps:$4 sm:$0xff]  }
  0x18   :  { %1023 = vmatpush3.bf16.msra.mxu0 %v1207_v22  ;;  %v1264_v2 = vld [vmem:[%s1694_s0 + $0xb0] ss:$20 sps:$4 sm:$0xff]   ;;  %v1269_v7 = vld [vmem:[%s1694_s0 + $0x88] ss:$20 sps:$4 sm:$0xff]  }
  0x19   :  { %1081 = vmatpush3.bf16.msra.mxu1 %v1208_v23  ;;  %1024 = vmatprep.subr.bf16.mxu0 %v1209_v24 }
  0x1a   :  { %1082 = vmatprep.subr.bf16.mxu1 %v1210_v25 }
  0x1c   :  { %1025 = vmatpush3.bf16.msra.mxu0 %v1211_v26 }
  0x1d   :  { %1083 = vmatpush3.bf16.msra.mxu1 %v1212_v27  ;;  %1026 = vmatprep.subr.bf16.mxu0 %v1213_v28 }
  0x1e   :  { %1084 = vmatprep.subr.bf16.mxu1 %v1214_v29 }
  0x20   :  { %1027 = vmatpush3.bf16.msra.mxu0 %v1215_v30 }
  0x21   :  { %1085 = vmatpush3.bf16.msra.mxu1 %v1216_v31  ;;  %1139 = vmatprep.subr.bf16.mxu0 %v1270_v34 }
  0x22   :  { %1175 = vmatprep.subr.bf16.mxu1 %v1270_v34 }
  0x23   :  { %582 = vmatmul.mubr.bf16.vlgmr.msra.gmra.mxu0 %v1217_v32 }
  0x24   :  { %671 = vmatmul.mubr.bf16.vlgmr.msra.gmra.mxu1 %v1220_v35  ;;  %1140 = vmatpush3.bf16.msra.mxu0 %v1223_v37 }
  0x25   :  { %589 = vmatprep.mubr.bf16.mxu0 %v1224_v38  ;;  %1179 = vmatpush3.bf16.msra.mxu1 %v1223_v37 }
  0x26   :  { %678 = vmatprep.mubr.bf16.mxu1 %v1226_v39  ;;  %1141 = vmatprep.subr.bf16.mxu0 %v1270_v34 }
  0x27   :  { %1176 = vmatprep.subr.bf16.mxu1 %v1270_v34 }
  0x28   :  { %1142 = vmatpush3.bf16.msra.mxu0 %v1234_v43 }
  0x29   :  { %1180 = vmatpush3.bf16.msra.mxu1 %v1234_v43  ;;  %1143 = vmatprep.subr.bf16.mxu0 %v1270_v34 }
  0x2a   :  { %1177 = vmatprep.subr.bf16.mxu1 %v1270_v34 }
  0x2b   :  { %590 = vmatmul.mubr.bf16.gmra.mxu0 %v1228_v40 }
  0x2c   :  { %679 = vmatmul.mubr.bf16.gmra.mxu1 %v1229_v41  ;;  %597 = vmatprep.mubr.bf16.mxu0 %v1230_v42 }
  0x2d   :  { %686 = vmatprep.mubr.bf16.mxu1 %v1232_v44  ;;  %1144 = vmatpush3.bf16.msra.mxu0 %v1243_v45 }
  0x2e   :  { %1181 = vmatpush3.bf16.msra.mxu1 %v1243_v45  ;;  %1145 = vmatprep.subr.bf16.mxu0 %v1270_v34 }
  0x2f   :  { %1178 = vmatprep.subr.bf16.mxu1 %v1270_v34 }
  0x31   :  { %1146 = vmatpush3.bf16.msra.mxu0 %v1256_v50 }
  0x32   :  { %1182 = vmatpush3.bf16.msra.mxu1 %v1256_v50 }
  0x33   :  { %598 = vmatmul.mubr.bf16.gmra.mxu0 %v1235_v46 }
  0x34   :  { %687 = vmatmul.mubr.bf16.gmra.mxu1 %v1236_v47  ;;  %605 = vmatprep.mubr.bf16.mxu0 %v1237_v48 }
  0x35   :  { %694 = vmatprep.mubr.bf16.mxu1 %v1239_v49 }
  0x3b   :  { %606 = vmatmul.mubr.bf16.gmra.mxu0 %v1241_v51 }
  0x3c   :  { %695 = vmatmul.mubr.bf16.gmra.mxu1 %v1242_v52  ;;  %613 = vmatprep.mubr.bf16.mxu0 %v1244_v53 }
  0x3d   :  { %702 = vmatprep.mubr.bf16.mxu1 %v1246_v54 }
  0x43   :  { %614 = vmatmul.mubr.bf16.gmra.mxu0 %v1248_v55 }
  0x44   :  { %703 = vmatmul.mubr.bf16.gmra.mxu1 %v1249_v56  ;;  %621 = vmatprep.mubr.bf16.mxu0 %v1250_v57  ;;  %v1581_v57 = vld [vmem:[%s1695_s2] ss:$0 sm:$0xff] }
  0x45   :  { %710 = vmatprep.mubr.bf16.mxu1 %v1252_v58 }
  0x4b   :  { %622 = vmatmul.mubr.bf16.gmra.mxu0 %v1254_v59 }
  0x4c   :  { %711 = vmatmul.mubr.bf16.gmra.mxu1 %v1255_v60  ;;  %629 = vmatprep.mubr.bf16.mxu0 %v1257_v61 }
  0x4d   :  { %718 = vmatprep.mubr.bf16.mxu1 %v1259_v62 }
  0x53   :  { %630 = vmatmul.mubr.bf16.gmra.mxu0 %v1261_v63 }
  0x54   :  { %719 = vmatmul.mubr.bf16.gmra.mxu1 %v1262_v0  ;;  %1147 = vmatprep.mubr.msk.bf16.mxu0 %vm1271_vm0, %v1270_v34 }
  0x55   :  { %1163 = vmatprep.mubr.msk.bf16.mxu1 %vm1271_vm0, %v1270_v34 }
  0x5b   :  { %1148 = vmatmul.mubr.msk.bf16.vlgmr.msra.gmra.mxu0 %vm527_vm1, %v1263_v1 }
  0x5c   :  { %1164 = vmatmul.mubr.msk.bf16.vlgmr.msra.gmra.mxu1 %vm527_vm1, %v1264_v2  ;;  %1151 = vmatprep.mubr.msk.bf16.mxu0 %vm1271_vm0, %v1270_v34 }
  0x5d   :  { %1167 = vmatprep.mubr.msk.bf16.mxu1 %vm1271_vm0, %v1270_v34 }
  0x63   :  { %1152 = vmatmul.mubr.msk.bf16.gmra.mxu0 %vm527_vm1, %v1265_v3 }
  0x64   :  { %1168 = vmatmul.mubr.msk.bf16.gmra.mxu1 %vm527_vm1, %v1266_v4  ;;  %1155 = vmatprep.mubr.msk.bf16.mxu0 %vm1271_vm0, %v1270_v34 }
  0x65   :  { %1171 = vmatprep.mubr.msk.bf16.mxu1 %vm1271_vm0, %v1270_v34 }
  0x6b   :  { %1156 = vmatmul.mubr.msk.bf16.gmra.mxu0 %vm527_vm1, %v1267_v5 }
  0x6c   :  { %1172 = vmatmul.mubr.msk.bf16.gmra.mxu1 %vm527_vm1, %v1268_v6  ;;  %1159 = vmatprep.mubr.msk.bf16.mxu0 %vm1271_vm0, %v1270_v34 }
  0x73   :  { %1160 = vmatmul.mubr.msk.bf16.gmra.mxu0 %vm527_vm1, %v1269_v7 }
  0xe3   :  { %v1028_v8 = vpop.f32.mrf.mxu0 }
  0xe4   :  { %v1086_v9 = vpop.f32.mrf.mxu1 }
  0xe5   :  { %v1029_v10 = vpop.f32.mrf.mxu0 }
  0xe6   :  { %v1087_v11 = vpop.f32.mrf.mxu1  ;;  %v1030_v55 = vadd.f32 %v1029_v10, %v1028_v8 }
  0xe7   :  { %v1031_v12 = vpop.f32.mrf.mxu0  ;;  %v1088_v63 = vadd.f32 %v1087_v11, %v1086_v9 }
  0xe8   :  { %v1089_v13 = vpop.f32.mrf.mxu1  ;;  %v584_v62 = vadd.f32 %v1030_v55, %v1581_v57 }
  0xe9   :  { %v1032_v14 = vpop.f32.mrf.mxu0 }
  0xea   :  { %v1090_v15 = vpop.f32.mrf.mxu1  ;;  %v1033_v0 = vadd.f32 %v1032_v14, %v1031_v12  ;;  %v673_v9 = vadd.f32 %v1088_v63, %v584_v62 }
  0xeb   :  { %v1034_v16 = vpop.f32.mrf.mxu0 }
  0xec   :  { %v1534_v17 = vpop.f32.mrf.mxu1  ;;  %v587_v10 = vadd.f32 %v1033_v0, %v1581_v57 }
  0xed   :  { %v1035_v18 = vpop.f32.mrf.mxu0 }
  0xee   :  { %v1536_v19 = vpop.f32.mrf.mxu1  ;;  %v1036_v6 = vadd.f32 %v1035_v18, %v1034_v16 }
  0xef   :  { %v1538_v20 = vpop.f32.mrf.mxu0  ;;  %v1094_v16 = vadd.f32 %v1536_v19, %v1534_v17 }
  0xf0   :  { %v1540_v21 = vpop.f32.mrf.mxu1 }
  0xf1   :  { %v1542_v22 = vpop.f32.mrf.mxu0 }
  0xf2   :  { %v1544_v23 = vpop.f32.mrf.mxu1 }
  0xf3   :  { %v1546_v24 = vpop.f32.mrf.mxu0 }
  0xf4   :  { %v1548_v25 = vpop.f32.mrf.mxu1 }
  0xf5   :  { %v1550_v26 = vpop.f32.mrf.mxu0 }
  0xf6   :  { %v1552_v27 = vpop.f32.mrf.mxu1 }
  0xf7   :  { %v1554_v28 = vpop.f32.mrf.mxu0 }
  0xf8   :  { %v1556_v29 = vpop.f32.mrf.mxu1 }
  0xf9   :  { %v1558_v30 = vpop.f32.mrf.mxu0 }
  0xfa   :  { %v1560_v31 = vpop.f32.mrf.mxu1 }
  0xfb   :  { %v1562_v32 = vpop.f32.mrf.mxu0 }
  0xfc   :  { %v1564_v33 = vpop.f32.mrf.mxu1 }
  0xfd   :  { %v1566_v34 = vpop.f32.mrf.mxu0 }
  0xfe   :  { %v1568_v35 = vpop.f32.mrf.mxu1 }
  0xff   :  { %v1570_v36 = vpop.f32.mrf.mxu0 }
 0x100   :  { %v1572_v37 = vpop.f32.mrf.mxu1 }
 0x101   :  { %v1574_v38 = vpop.f32.mrf.mxu0 }
 0x102   :  { %v1576_v39 = vpop.f32.mrf.mxu1 }
 0x103   :  { %v1052_v40 = vpop.f32.mrf.mxu0 }
 0x104   :  { %v1110_v41 = vpop.f32.mrf.mxu1 }
 0x105   :  { %v1053_v42 = vpop.f32.mrf.mxu0 }
 0x106   :  { %v1111_v43 = vpop.f32.mrf.mxu1  ;;  %v1054_v58 = vadd.f32 %v1053_v42, %v1052_v40  ;;  %v1091_v40 = vadd.f32 %v1090_v15, %v1089_v13 }
 0x107   :  { %v1055_v44 = vpop.f32.mrf.mxu0  ;;  %v1112_v3 = vadd.f32 %v1111_v43, %v1110_v41  ;;  %v592_v43 = vadd.f32 %v1036_v6, %v1581_v57 }
 0x108   :  { %v1113_v45 = vpop.f32.mrf.mxu1  ;;  %v616_v2 = vadd.f32 %v1054_v58, %v1581_v57 }
 0x109   :  { %v1056_v46 = vpop.f32.mrf.mxu0 }
 0x10a   :  { %v1114_v47 = vpop.f32.mrf.mxu1  ;;  %v1057_v4 = vadd.f32 %v1056_v46, %v1055_v44  ;;  %v705_v41 = vadd.f32 %v1112_v3, %v616_v2  ;;  %v1039_v46 = vadd.f32 %v1542_v22, %v1538_v20  ;;  %v1097_v20 = vadd.f32 %v1544_v23, %v1540_v21 }
 0x10b   :  { %v1058_v48 = vpop.f32.mrf.mxu0  ;;  %v1115_v12 = vadd.f32 %v1114_v47, %v1113_v45  ;;  %v676_v45 = vadd.f32 %v1091_v40, %v587_v10  ;;  %v1042_v10 = vadd.f32 %v1550_v26, %v1546_v24 }
 0x10c   :  { %v1116_v49 = vpop.f32.mrf.mxu1  ;;  %v619_v11 = vadd.f32 %v1057_v4, %v1581_v57  ;;  %v681_v4 = vadd.f32 %v1094_v16, %v592_v43  ;;  %v595_v6 = vadd.f32 %v1039_v46, %v1581_v57 }
 0x10d   :  { %v1059_v50 = vpop.f32.mrf.mxu0 }
 0x10e   :  { %v1117_v51 = vpop.f32.mrf.mxu1  ;;  %v1060_v14 = vadd.f32 %v1059_v50, %v1058_v48  ;;  %v708_v2 = vadd.f32 %v1115_v12, %v619_v11  ;;  %v684_v43 = vadd.f32 %v1097_v20, %v595_v6 }
 0x10f   :  { %v1061_v52 = vpop.f32.mrf.mxu0  ;;  %v1118_v48 = vadd.f32 %v1117_v51, %v1116_v49 }
 0x110   :  { %v1119_v53 = vpop.f32.mrf.mxu1  ;;  %v624_v47 = vadd.f32 %v1060_v14, %v1581_v57 }
 0x111   :  { %v1062_v54 = vpop.f32.mrf.mxu0 }
 0x112   :  { %v1120_v56 = vpop.f32.mrf.mxu1  ;;  %v1063_v58 = vadd.f32 %v1062_v54, %v1061_v52  ;;  %v713_v12 = vadd.f32 %v1118_v48, %v624_v47 }
 0x113   :  { %v1064_v59 = vpop.f32.mrf.mxu0  ;;  %v1121_v51 = vadd.f32 %v1120_v56, %v1119_v53  ;;  %v1045_v53 = vadd.f32 %v1558_v30, %v1554_v28 }
 0x114   :  { %v1583_v60 = vpop.f32.mrf.mxu1  ;;  %v627_v49 = vadd.f32 %v1063_v58, %v1581_v57 }
 0x115   :  { %v1065_v61 = vpop.f32.mrf.mxu0 }
 0x116   :  { %v1586_v1 = vpop.f32.mrf.mxu1  ;;  %v1066_v11 = vadd.f32 %v1065_v61, %v1064_v59  ;;  %v600_v59 = vadd.f32 %v1042_v10, %v1581_v57  ;;  %v1100_v61 = vadd.f32 %v1552_v27, %v1548_v25 }
 0x117   :  { %v1589_v5 = vpop.f32.mrf.mxu0  ;;  %v1124_v28 = vadd.f32 %v1586_v1, %v1583_v60 }
 0x118   :  { %v1591_v7 = vpop.f32.mrf.mxu1  ;;  %v632_v46 = vadd.f32 %v1066_v11, %v1581_v57  ;;  %v689_v48 = vadd.f32 %v1100_v61, %v600_v59  ;;  %v1109_v11 = vadd.f32 %v1576_v39, %v1572_v37 }
 0x119   :  { %v1593_v8 = vpop.f32.mrf.mxu0 }
 0x11a   :  { %v1596_v42 = vpop.f32.mrf.mxu1  ;;  %v1069_v30 = vadd.f32 %v1593_v8, %v1589_v5  ;;  %v1048_v5 = vadd.f32 %v1566_v34, %v1562_v32  ;;  %v721_v32 = vadd.f32 %v1124_v28, %v632_v46 }
 0x11b   :  { %v761_v55 = vpop.f32.mrf.mxu0 }
 0x11c   :  { %v762_v18 = vadd.f32 %v761_v55, %v673_v9  ;;  %v793_v44 = vpop.f32.mrf.mxu1  ;;  %v608_v20 = vadd.f32 %v1048_v5, %v1581_v57 }
 0x11d   :  { %v794_v13 = vadd.f32 %v793_v44, %v705_v41  ;;  %v1149_v15 = vpop.f32.mrf.mxu0  ;;  %v716_v44 = vadd.f32 %v1121_v51, %v627_v49 }
 0x11e   :  { %v816_v62 = vmax.f32 %v762_v18, 0.0  ;;  %v1165_v63 = vpop.f32.mrf.mxu1 }
 0x11f   :  { %v824_v50 = vmax.f32 %v794_v13, 0.0  ;;  %v764_v0 = vpop.f32.mrf.mxu0  ;;  %v1103_v63 = vadd.f32 %v1560_v31, %v1556_v29 }
 0x120   :  { %v998_v3 = vpack.c.bf16 %v816_v62, %v816_v62  ;;  %v765_v17 = vadd.f32 %v764_v0, %v676_v45  ;;  %v796_v19 = vpop.f32.mrf.mxu1  ;;  %v603_v62 = vadd.f32 %v1045_v53, %v1581_v57  ;;  %v1127_v0 = vadd.f32 %v1596_v42, %v1591_v7 }
 0x121   :  { %v1006_v22 = vpack.c.bf16 %v824_v50, %v824_v50  ;;  %v797_v52 = vadd.f32 %v796_v19, %v708_v2  ;;  %v1150_v54 = vpop.f32.mrf.mxu0  ;;  %v635_v50 = vadd.f32 %v1069_v30, %v1581_v57  ;;  %v1106_v7 = vadd.f32 %v1568_v35, %v1564_v33 }
 0x122   :  { %887 = vst.msk [vmem:[%s1696_s3] sm:$0xf] %vm886_vm2, %v998_v3  ;;  %v817_v40 = vmax.f32 %v765_v17, 0.0  ;;  %v1166_v9 = vpop.f32.mrf.mxu1  ;;  %v692_v6 = vadd.f32 %v1103_v63, %v603_v62  ;;  %v1051_v42 = vadd.f32 %v1574_v38, %v1570_v36 }
 0x123   :  { %895 = vst.msk [vmem:[%s1696_s3 + $0x20] sm:$0xf] %vm886_vm2, %v1006_v22  ;;  %v825_v21 = vmax.f32 %v797_v52, 0.0  ;;  %v769_v23 = vpop.f32.mrf.mxu0  ;;  %v724_v49 = vadd.f32 %v1127_v0, %v635_v50 }
 0x124   :  { %v999_v24 = vpack.c.bf16 %v817_v40, %v817_v40  ;;  %v770_v26 = vadd.f32 %v769_v23, %v681_v4  ;;  %v801_v14 = vpop.f32.mrf.mxu1  ;;  %v611_v9 = vadd.f32 %v1051_v42, %v1581_v57  ;;  %v697_v23 = vadd.f32 %v1106_v7, %v608_v20 }
 0x125   :  { %v1007_v56 = vpack.c.bf16 %v825_v21, %v825_v21  ;;  %v802_v55 = vadd.f32 %v801_v14, %v713_v12  ;;  %v1153_v41 = vpop.f32.mrf.mxu0 }
 0x126   :  { %888 = vst.msk [vmem:[%s1696_s3 + $0x4] sm:$0xf] %vm886_vm2, %v999_v24  ;;  %v818_v16 = vmax.f32 %v770_v26, 0.0  ;;  %v1169_v18 = vpop.f32.mrf.mxu1  ;;  %v700_v39 = vadd.f32 %v1109_v11, %v611_v9 }
 0x127   :  { %896 = vst.msk [vmem:[%s1696_s3 + $0x24] sm:$0xf] %vm886_vm2, %v1007_v56  ;;  %v826_v25 = vmax.f32 %v802_v55, 0.0  ;;  %v772_v27 = vpop.f32.mrf.mxu0 }
 0x128   :  { %v1000_v13 = vpack.c.bf16 %v818_v16, %v818_v16  ;;  %v773_v15 = vadd.f32 %v772_v27, %v684_v43  ;;  %v804_v58 = vpop.f32.mrf.mxu1 }
 0x129   :  { %v1008_v45 = vpack.c.bf16 %v826_v25, %v826_v25  ;;  %v805_v60 = vadd.f32 %v804_v58, %v716_v44  ;;  %v1154_v1 = vpop.f32.mrf.mxu0 }
 0x12a   :  { %889 = vst.msk [vmem:[%s1696_s3 + $0x8] sm:$0xf] %vm886_vm2, %v1000_v13  ;;  %v819_v8 = vmax.f32 %v773_v15, 0.0  ;;  %v1170_v47 = vpop.f32.mrf.mxu1 }
 0x12b   :  { %897 = vst.msk [vmem:[%s1696_s3 + $0x28] sm:$0xf] %vm886_vm2, %v1008_v45  ;;  %v827_v29 = vmax.f32 %v805_v60, 0.0  ;;  %v777_v31 = vpop.f32.mrf.mxu0 }
 0x12c   :  { %v1001_v34 = vpack.c.bf16 %v819_v8, %v819_v8  ;;  %v778_v2 = vadd.f32 %v777_v31, %v689_v48  ;;  %v809_v3 = vpop.f32.mrf.mxu1 }
 0x12d   :  { %v1009_v17 = vpack.c.bf16 %v827_v29, %v827_v29  ;;  %v810_v19 = vadd.f32 %v809_v3, %v721_v32  ;;  %v1157_v4 = vpop.f32.mrf.mxu0 }
 0x12e   :  { %890 = vst.msk [vmem:[%s1696_s3 + $0xc] sm:$0xf] %vm886_vm2, %v1001_v34  ;;  %v820_v22 = vmax.f32 %v778_v2, 0.0  ;;  %v1173_v52 = vpop.f32.mrf.mxu1 }
 0x12f   :  { %898 = vst.msk [vmem:[%s1696_s3 + $0x2c] sm:$0xf] %vm886_vm2, %v1009_v17  ;;  %v828_v54 = vmax.f32 %v810_v19, 0.0  ;;  %v780_v10 = vpop.f32.mrf.mxu0 }
 0x130   :  { %v1002_v51 = vpack.c.bf16 %v820_v22, %v820_v22  ;;  %v781_v33 = vadd.f32 %v780_v10, %v692_v6  ;;  %v812_v35 = vpop.f32.mrf.mxu1 }
 0x131   :  { %v1010_v40 = vpack.c.bf16 %v828_v54, %v828_v54  ;;  %v813_v36 = vadd.f32 %v812_v35, %v724_v49  ;;  %v1158_v38 = vpop.f32.mrf.mxu0 }
 0x132   :  { %891 = vst.msk [vmem:[%s1696_s3 + $0x10] sm:$0xf] %vm886_vm2, %v1002_v51  ;;  %v821_v21 = vmax.f32 %v781_v33, 0.0  ;;  %v1174_v12 = vpop.f32.mrf.mxu1 }
 0x133   :  { %899 = vst.msk [vmem:[%s1696_s3 + $0x30] sm:$0xf] %vm886_vm2, %v1010_v40  ;;  %v829_v24 = vmax.f32 %v813_v36, 0.0  ;;  %v785_v26 = vpop.f32.mrf.mxu0 }
 0x134   :  { %v1003_v14 = vpack.c.bf16 %v821_v21, %v821_v21  ;;  %v786_v57 = vadd.f32 %v785_v26, %v697_v23 }
 0x135   :  { %v1011_v53 = vpack.c.bf16 %v829_v24, %v829_v24  ;;  %v1161_v56 = vpop.f32.mrf.mxu0 }
 0x136   :  { %892 = vst.msk [vmem:[%s1696_s3 + $0x14] sm:$0xf] %vm886_vm2, %v1003_v14  ;;  %v822_v37 = vmax.f32 %v786_v57, 0.0 }
 0x137   :  { %900 = vst.msk [vmem:[%s1696_s3 + $0x34] sm:$0xf] %vm886_vm2, %v1011_v53  ;;  %v788_v55 = vpop.f32.mrf.mxu0 }
 0x138   :  { %v1004_v41 = vpack.c.bf16 %v822_v37, %v822_v37  ;;  %v789_v43 = vadd.f32 %v788_v55, %v700_v39 }
 0x139   :  { %v1162_v59 = vpop.f32.mrf.mxu0 }
 0x13a   :  { %893 = vst.msk [vmem:[%s1696_s3 + $0x18] sm:$0xf] %vm886_vm2, %v1004_v41  ;;  %v823_v61 = vmax.f32 %v789_v43, 0.0 }
 0x13c   :  { %v1005_v16 = vpack.c.bf16 %v823_v61, %v823_v61 }
 0x13e   :  { %894 = vst.msk [vmem:[%s1696_s3 + $0x1c] sm:$0xf] %vm886_vm2, %v1005_v16 }

// kernel: actor_critic_forward.7
= control target key start
LH: loop header
LB: loop body
LE: loop exit
PB: predicated region body
PF: predicated region fallthrough
CT: control target
= control target key end

     0   :  { %vm8068_vm0 = vcmask 523264   ;;  %s18398_s1 = inlined_call_operand.vmem [shape: bf16[5184,512], index: 1, kind: input, shape index: {}]   ;;  %s18399_s0 = inlined_call_operand.vmem [shape: bf16[16,5184], index: 0, kind: input, shape index: {}]   ;;  %s18400_s2 = inlined_call_operand.vmem [shape: f32[1,512], index: 2, kind: input, shape index: {}]   ;;  %s18401_s3 = inlined_call_operand.vmem [shape: f32[512,128], index: 3, kind: input, shape index: {}]   ;;  %s18402_s4 = inlined_call_operand.vmem [shape: f32[1,128], index: 4, kind: input, shape index: {}]   ;;  %s18403_s5 = inlined_call_operand.vmem [shape: f32[16,128], index: 5, kind: output, shape index: {0}]   ;;  %s18404_s6 = inlined_call_operand.vmem [shape: f32[16,128], index: 6, kind: output, shape index: {1}]  }
   0x1   :  { %v11563_v0 = vld [vmem:[%s18398_s1 + $0xe4] ss:$16 sps:$4 sm:$0xff]   ;;  %v11567_v2 = vld [vmem:[%s18398_s1 + $0xe0] ss:$16 sps:$4 sm:$0xff]  }
   0x2   :  { %v11565_v1 = vld [vmem:[%s18398_s1 + $0x2e4] ss:$16 sps:$4 sm:$0xff]   ;;  %8072 = vmatprep.subr.bf16.mxu0 %v11563_v0  ;;  %v11568_v3 = vld [vmem:[%s18398_s1 + $0x2e0] ss:$16 sps:$4 sm:$0xff]  }
   0x3   :  { %8115 = vmatprep.subr.bf16.mxu1 %v11565_v1  ;;  %v11569_v4 = vld [vmem:[%s18398_s1 + $0xc4] ss:$16 sps:$4 sm:$0xff]   ;;  %8073 = vmatpush1.bf16.msra.mxu0 %v11567_v2  ;;  %v11573_v6 = vld [vmem:[%s18398_s1 + $0xc0] ss:$16 sps:$4 sm:$0xff]  }
   0x4   :  { %8116 = vmatpush1.bf16.msra.mxu1 %v11568_v3  ;;  %v11571_v5 = vld [vmem:[%s18398_s1 + $0x2c4] ss:$16 sps:$4 sm:$0xff]   ;;  %8074 = vmatprep.subr.bf16.mxu0 %v11569_v4  ;;  %v11574_v7 = vld [vmem:[%s18398_s1 + $0x2c0] ss:$16 sps:$4 sm:$0xff]  }
   0x5   :  { %8117 = vmatprep.subr.bf16.mxu1 %v11571_v5  ;;  %v11575_v8 = vld [vmem:[%s18398_s1 + $0xa4] ss:$16 sps:$4 sm:$0xff]   ;;  %v11579_v10 = vld [vmem:[%s18398_s1 + $0xa0] ss:$16 sps:$4 sm:$0xff]   ;;  %v11662_v5 = vld [vmem:[%s18399_s0 + $0x8] ss:$164 sps:$4 sm:$0xff]  }
   0x6   :  { %v11577_v9 = vld [vmem:[%s18398_s1 + $0x2a4] ss:$16 sps:$4 sm:$0xff]   ;;  %v11580_v11 = vld [vmem:[%s18398_s1 + $0x2a0] ss:$16 sps:$4 sm:$0xff]  }
   0x7   :  { %8075 = vmatpush1.bf16.msra.mxu0 %v11573_v6  ;;  %v11581_v12 = vld [vmem:[%s18398_s1 + $0x84] ss:$16 sps:$4 sm:$0xff]   ;;  %v11585_v14 = vld [vmem:[%s18398_s1 + $0x80] ss:$16 sps:$4 sm:$0xff]  }
   0x8   :  { %8118 = vmatpush1.bf16.msra.mxu1 %v11574_v7  ;;  %8076 = vmatprep.subr.bf16.mxu0 %v11575_v8  ;;  %v11583_v13 = vld [vmem:[%s18398_s1 + $0x284] ss:$16 sps:$4 sm:$0xff]   ;;  %v11586_v15 = vld [vmem:[%s18398_s1 + $0x280] ss:$16 sps:$4 sm:$0xff]  }
   0x9   :  { %8119 = vmatprep.subr.bf16.mxu1 %v11577_v9  ;;  %v11587_v16 = vld [vmem:[%s18398_s1 + $0x64] ss:$16 sps:$4 sm:$0xff]   ;;  %v11591_v18 = vld [vmem:[%s18398_s1 + $0x60] ss:$16 sps:$4 sm:$0xff]  }
   0xa   :  { %v11589_v17 = vld [vmem:[%s18398_s1 + $0x264] ss:$16 sps:$4 sm:$0xff]   ;;  %v11592_v19 = vld [vmem:[%s18398_s1 + $0x260] ss:$16 sps:$4 sm:$0xff]  }
   0xb   :  { %8077 = vmatpush1.bf16.msra.mxu0 %v11579_v10  ;;  %v11593_v20 = vld [vmem:[%s18398_s1 + $0x44] ss:$16 sps:$4 sm:$0xff]   ;;  %v11597_v22 = vld [vmem:[%s18398_s1 + $0x40] ss:$16 sps:$4 sm:$0xff]  }
   0xc   :  { %8120 = vmatpush1.bf16.msra.mxu1 %v11580_v11  ;;  %8078 = vmatprep.subr.bf16.mxu0 %v11581_v12  ;;  %v11595_v21 = vld [vmem:[%s18398_s1 + $0x244] ss:$16 sps:$4 sm:$0xff]   ;;  %v11598_v23 = vld [vmem:[%s18398_s1 + $0x240] ss:$16 sps:$4 sm:$0xff]  }
   0xd   :  { %8121 = vmatprep.subr.bf16.mxu1 %v11583_v13  ;;  %v11599_v24 = vld [vmem:[%s18398_s1 + $0x24] ss:$16 sps:$4 sm:$0xff]   ;;  %v11603_v26 = vld [vmem:[%s18398_s1 + $0x20] ss:$16 sps:$4 sm:$0xff]  }
   0xe   :  { %v11601_v25 = vld [vmem:[%s18398_s1 + $0x224] ss:$16 sps:$4 sm:$0xff]   ;;  %v11604_v27 = vld [vmem:[%s18398_s1 + $0x220] ss:$16 sps:$4 sm:$0xff]  }
   0xf   :  { %8079 = vmatpush1.bf16.msra.mxu0 %v11585_v14  ;;  %v11605_v28 = vld [vmem:[%s18398_s1 + $0x4] ss:$16 sps:$4 sm:$0xff]   ;;  %v11609_v30 = vld [vmem:[%s18398_s1] ss:$16 sps:$4 sm:$0xff]  }
  0x10   :  { %8122 = vmatpush1.bf16.msra.mxu1 %v11586_v15  ;;  %8080 = vmatprep.subr.bf16.mxu0 %v11587_v16  ;;  %v11607_v29 = vld [vmem:[%s18398_s1 + $0x204] ss:$16 sps:$4 sm:$0xff]   ;;  %v11610_v31 = vld [vmem:[%s18398_s1 + $0x200] ss:$16 sps:$4 sm:$0xff]  }
  0x11   :  { %8123 = vmatprep.subr.bf16.mxu1 %v11589_v17  ;;  %v11611_v32 = vld [vmem:[%s18398_s1 + $0x1e4] ss:$16 sps:$4 sm:$0xff]   ;;  %v11615_v34 = vld [vmem:[%s18398_s1 + $0x1e0] ss:$16 sps:$4 sm:$0xff]  }
  0x12   :  { %v11613_v33 = vld [vmem:[%s18398_s1 + $0x3e4] ss:$16 sps:$4 sm:$0xff]   ;;  %v11616_v35 = vld [vmem:[%s18398_s1 + $0x3e0] ss:$16 sps:$4 sm:$0xff]  }
  0x13   :  { %8081 = vmatpush1.bf16.msra.mxu0 %v11591_v18  ;;  %v11617_v36 = vld [vmem:[%s18398_s1 + $0x1c4] ss:$16 sps:$4 sm:$0xff]   ;;  %v11621_v38 = vld [vmem:[%s18398_s1 + $0x1c0] ss:$16 sps:$4 sm:$0xff]  }
  0x14   :  { %8124 = vmatpush1.bf16.msra.mxu1 %v11592_v19  ;;  %8082 = vmatprep.subr.bf16.mxu0 %v11593_v20  ;;  %v11619_v37 = vld [vmem:[%s18398_s1 + $0x3c4] ss:$16 sps:$4 sm:$0xff]   ;;  %v11622_v39 = vld [vmem:[%s18398_s1 + $0x3c0] ss:$16 sps:$4 sm:$0xff]  }
  0x15   :  { %8125 = vmatprep.subr.bf16.mxu1 %v11595_v21  ;;  %v11623_v40 = vld [vmem:[%s18398_s1 + $0x1a4] ss:$16 sps:$4 sm:$0xff]   ;;  %v11627_v42 = vld [vmem:[%s18398_s1 + $0x1a0] ss:$16 sps:$4 sm:$0xff]  }
  0x16   :  { %v11625_v41 = vld [vmem:[%s18398_s1 + $0x3a4] ss:$16 sps:$4 sm:$0xff]   ;;  %v11628_v43 = vld [vmem:[%s18398_s1 + $0x3a0] ss:$16 sps:$4 sm:$0xff]  }
  0x17   :  { %8083 = vmatpush1.bf16.msra.mxu0 %v11597_v22  ;;  %v11629_v44 = vld [vmem:[%s18398_s1 + $0x184] ss:$16 sps:$4 sm:$0xff]   ;;  %v11633_v46 = vld [vmem:[%s18398_s1 + $0x180] ss:$16 sps:$4 sm:$0xff]  }
  0x18   :  { %8126 = vmatpush1.bf16.msra.mxu1 %v11598_v23  ;;  %8084 = vmatprep.subr.bf16.mxu0 %v11599_v24  ;;  %v11631_v45 = vld [vmem:[%s18398_s1 + $0x384] ss:$16 sps:$4 sm:$0xff]   ;;  %v11634_v47 = vld [vmem:[%s18398_s1 + $0x380] ss:$16 sps:$4 sm:$0xff]  }
  0x19   :  { %8127 = vmatprep.subr.bf16.mxu1 %v11601_v25  ;;  %v11635_v48 = vld [vmem:[%s18398_s1 + $0x164] ss:$16 sps:$4 sm:$0xff]   ;;  %v11664_v51 = vld [vmem:[%s18399_s0 + $0xc] ss:$164 sps:$4 sm:$0xff]  }
  0x1a   :  { %v11661_v49 = vld [vmem:[%s18399_s0 + $0x4] ss:$164 sps:$4 sm:$0xff]   ;;  %v11639_v52 = vld [vmem:[%s18398_s1 + $0x160] ss:$16 sps:$4 sm:$0xff]   ;;  %8147 = vmatprep.mubr.bf16.mxu1 %v11664_v51 }
  0x1b   :  { %8085 = vmatpush1.bf16.msra.mxu0 %v11603_v26  ;;  %v11637_v50 = vld [vmem:[%s18398_s1 + $0x364] ss:$16 sps:$4 sm:$0xff]   ;;  %8104 = vmatprep.mubr.bf16.mxu0 %v11661_v49  ;;  %v11640_v53 = vld [vmem:[%s18398_s1 + $0x360] ss:$16 sps:$4 sm:$0xff]  }
  0x1c   :  { %8128 = vmatpush1.bf16.msra.mxu1 %v11604_v27  ;;  %8086 = vmatprep.subr.bf16.mxu0 %v11605_v28  ;;  %v11641_v54 = vld [vmem:[%s18398_s1 + $0x144] ss:$16 sps:$4 sm:$0xff]   ;;  %v11645_v56 = vld [vmem:[%s18398_s1 + $0x140] ss:$16 sps:$4 sm:$0xff]  }
  0x1d   :  { %8129 = vmatprep.subr.bf16.mxu1 %v11607_v29  ;;  %v11643_v55 = vld [vmem:[%s18398_s1 + $0x344] ss:$16 sps:$4 sm:$0xff]   ;;  %v11646_v57 = vld [vmem:[%s18398_s1 + $0x340] ss:$16 sps:$4 sm:$0xff]  }
  0x1e   :  { %v11647_v58 = vld [vmem:[%s18398_s1 + $0x124] ss:$16 sps:$4 sm:$0xff]   ;;  %v11651_v60 = vld [vmem:[%s18398_s1 + $0x120] ss:$16 sps:$4 sm:$0xff]  }
  0x1f   :  { %8087 = vmatpush1.bf16.msra.mxu0 %v11609_v30  ;;  %v11649_v59 = vld [vmem:[%s18398_s1 + $0x324] ss:$16 sps:$4 sm:$0xff]   ;;  %v11652_v61 = vld [vmem:[%s18398_s1 + $0x320] ss:$16 sps:$4 sm:$0xff]  }
  0x20   :  { %8130 = vmatpush1.bf16.msra.mxu1 %v11610_v31  ;;  %8088 = vmatprep.subr.bf16.mxu0 %v11611_v32  ;;  %v11653_v62 = vld [vmem:[%s18398_s1 + $0x104] ss:$16 sps:$4 sm:$0xff]   ;;  %v11657_v0 = vld [vmem:[%s18398_s1 + $0x100] ss:$16 sps:$4 sm:$0xff]  }
  0x21   :  { %8131 = vmatprep.subr.bf16.mxu1 %v11613_v33  ;;  %v11655_v63 = vld [vmem:[%s18398_s1 + $0x304] ss:$16 sps:$4 sm:$0xff]   ;;  %v11658_v1 = vld [vmem:[%s18398_s1 + $0x300] ss:$16 sps:$4 sm:$0xff]  }
  0x22   :  { %v11667_v2 = vld [vmem:[%s18398_s1 + $0x4e4] ss:$16 sps:$4 sm:$0xff]   ;;  %v11665_v6 = vld [vmem:[%s18398_s1 + $0x4e0] ss:$16 sps:$4 sm:$0xff]  }
  0x23   :  { %8089 = vmatpush2.bf16.msra.mxu0 %v11615_v34  ;;  %v11670_v3 = vld [vmem:[%s18398_s1 + $0x6e4] ss:$16 sps:$4 sm:$0xff]   ;;  %v11668_v7 = vld [vmem:[%s18398_s1 + $0x6e0] ss:$16 sps:$4 sm:$0xff]  }
  0x24   :  { %8132 = vmatpush2.bf16.msra.mxu1 %v11616_v35  ;;  %8090 = vmatprep.subr.bf16.mxu0 %v11617_v36  ;;  %v11659_v4 = vld [vmem:[%s18399_s0] ss:$164 sps:$4 sm:$0xff]   ;;  %v11763_v34 = vld [vmem:[%s18399_s0 + $0x14] ss:$164 sps:$4 sm:$0xff]  }
  0x25   :  { %8133 = vmatprep.subr.bf16.mxu1 %v11619_v37  ;;  %v11673_v8 = vld [vmem:[%s18398_s1 + $0x4c4] ss:$16 sps:$4 sm:$0xff]   ;;  %v11671_v10 = vld [vmem:[%s18398_s1 + $0x4c0] ss:$16 sps:$4 sm:$0xff]  }
  0x26   :  { %v11676_v9 = vld [vmem:[%s18398_s1 + $0x6c4] ss:$16 sps:$4 sm:$0xff]   ;;  %v11674_v11 = vld [vmem:[%s18398_s1 + $0x6c0] ss:$16 sps:$4 sm:$0xff]  }
  0x27   :  { %8091 = vmatpush2.bf16.msra.mxu0 %v11621_v38  ;;  %v11679_v12 = vld [vmem:[%s18398_s1 + $0x4a4] ss:$16 sps:$4 sm:$0xff]   ;;  %v11677_v14 = vld [vmem:[%s18398_s1 + $0x4a0] ss:$16 sps:$4 sm:$0xff]  }
  0x28   :  { %8134 = vmatpush2.bf16.msra.mxu1 %v11622_v39  ;;  %8092 = vmatprep.subr.bf16.mxu0 %v11623_v40  ;;  %v11682_v13 = vld [vmem:[%s18398_s1 + $0x6a4] ss:$16 sps:$4 sm:$0xff]   ;;  %v11680_v15 = vld [vmem:[%s18398_s1 + $0x6a0] ss:$16 sps:$4 sm:$0xff]  }
  0x29   :  { %8135 = vmatprep.subr.bf16.mxu1 %v11625_v41  ;;  %v11685_v16 = vld [vmem:[%s18398_s1 + $0x484] ss:$16 sps:$4 sm:$0xff]   ;;  %v11683_v18 = vld [vmem:[%s18398_s1 + $0x480] ss:$16 sps:$4 sm:$0xff]  }
  0x2a   :  { %v11688_v17 = vld [vmem:[%s18398_s1 + $0x684] ss:$16 sps:$4 sm:$0xff]   ;;  %v11686_v19 = vld [vmem:[%s18398_s1 + $0x680] ss:$16 sps:$4 sm:$0xff]  }
  0x2b   :  { %8093 = vmatpush2.bf16.msra.mxu0 %v11627_v42  ;;  %v11691_v20 = vld [vmem:[%s18398_s1 + $0x464] ss:$16 sps:$4 sm:$0xff]   ;;  %v11689_v22 = vld [vmem:[%s18398_s1 + $0x460] ss:$16 sps:$4 sm:$0xff]  }
  0x2c   :  { %8136 = vmatpush2.bf16.msra.mxu1 %v11628_v43  ;;  %8094 = vmatprep.subr.bf16.mxu0 %v11629_v44  ;;  %v11694_v21 = vld [vmem:[%s18398_s1 + $0x664] ss:$16 sps:$4 sm:$0xff]   ;;  %v11692_v23 = vld [vmem:[%s18398_s1 + $0x660] ss:$16 sps:$4 sm:$0xff]  }
  0x2d   :  { %8137 = vmatprep.subr.bf16.mxu1 %v11631_v45  ;;  %v11697_v24 = vld [vmem:[%s18398_s1 + $0x444] ss:$16 sps:$4 sm:$0xff]   ;;  %v11695_v26 = vld [vmem:[%s18398_s1 + $0x440] ss:$16 sps:$4 sm:$0xff]  }
  0x2e   :  { %v11700_v25 = vld [vmem:[%s18398_s1 + $0x644] ss:$16 sps:$4 sm:$0xff]   ;;  %v11698_v27 = vld [vmem:[%s18398_s1 + $0x640] ss:$16 sps:$4 sm:$0xff]  }
  0x2f   :  { %8095 = vmatpush2.bf16.msra.mxu0 %v11633_v46  ;;  %v11703_v28 = vld [vmem:[%s18398_s1 + $0x424] ss:$16 sps:$4 sm:$0xff]   ;;  %v11701_v30 = vld [vmem:[%s18398_s1 + $0x420] ss:$16 sps:$4 sm:$0xff]  }
  0x30   :  { %8138 = vmatpush2.bf16.msra.mxu1 %v11634_v47  ;;  %8096 = vmatprep.subr.bf16.mxu0 %v11635_v48  ;;  %v11706_v29 = vld [vmem:[%s18398_s1 + $0x624] ss:$16 sps:$4 sm:$0xff]   ;;  %v11704_v31 = vld [vmem:[%s18398_s1 + $0x620] ss:$16 sps:$4 sm:$0xff]  }
  0x31   :  { %8139 = vmatprep.subr.bf16.mxu1 %v11637_v50  ;;  %v11709_v32 = vld [vmem:[%s18398_s1 + $0x404] ss:$16 sps:$4 sm:$0xff]   ;;  %v11766_v35 = vld [vmem:[%s18399_s0 + $0x1c] ss:$164 sps:$4 sm:$0xff]  }
  0x32   :  { %v11712_v33 = vld [vmem:[%s18398_s1 + $0x604] ss:$16 sps:$4 sm:$0xff]   ;;  %v11707_v36 = vld [vmem:[%s18398_s1 + $0x400] ss:$16 sps:$4 sm:$0xff]  }
  0x33   :  { %8097 = vmatpush2.bf16.msra.mxu0 %v11639_v52  ;;  %v11710_v37 = vld [vmem:[%s18398_s1 + $0x600] ss:$16 sps:$4 sm:$0xff]   ;;  %v11715_v38 = vld [vmem:[%s18398_s1 + $0x5e4] ss:$16 sps:$4 sm:$0xff]  }
  0x34   :  { %8140 = vmatpush2.bf16.msra.mxu1 %v11640_v53  ;;  %8098 = vmatprep.subr.bf16.mxu0 %v11641_v54  ;;  %v11718_v39 = vld [vmem:[%s18398_s1 + $0x7e4] ss:$16 sps:$4 sm:$0xff]   ;;  %v11713_v40 = vld [vmem:[%s18398_s1 + $0x5e0] ss:$16 sps:$4 sm:$0xff]  }
  0x35   :  { %8141 = vmatprep.subr.bf16.mxu1 %v11643_v55  ;;  %v11716_v41 = vld [vmem:[%s18398_s1 + $0x7e0] ss:$16 sps:$4 sm:$0xff]   ;;  %v11721_v42 = vld [vmem:[%s18398_s1 + $0x5c4] ss:$16 sps:$4 sm:$0xff]  }
  0x36   :  { %v11724_v43 = vld [vmem:[%s18398_s1 + $0x7c4] ss:$16 sps:$4 sm:$0xff]   ;;  %v11719_v44 = vld [vmem:[%s18398_s1 + $0x5c0] ss:$16 sps:$4 sm:$0xff]  }
  0x37   :  { %8099 = vmatpush2.bf16.msra.mxu0 %v11645_v56  ;;  %v11722_v45 = vld [vmem:[%s18398_s1 + $0x7c0] ss:$16 sps:$4 sm:$0xff]   ;;  %v11727_v46 = vld [vmem:[%s18398_s1 + $0x5a4] ss:$16 sps:$4 sm:$0xff]  }
  0x38   :  { %8142 = vmatpush2.bf16.msra.mxu1 %v11646_v57  ;;  %8100 = vmatprep.subr.bf16.mxu0 %v11647_v58  ;;  %v11730_v47 = vld [vmem:[%s18398_s1 + $0x7a4] ss:$16 sps:$4 sm:$0xff]   ;;  %v11725_v48 = vld [vmem:[%s18398_s1 + $0x5a0] ss:$16 sps:$4 sm:$0xff]  }
  0x39   :  { %8143 = vmatprep.subr.bf16.mxu1 %v11649_v59  ;;  %v11728_v49 = vld [vmem:[%s18398_s1 + $0x7a0] ss:$16 sps:$4 sm:$0xff]   ;;  %v11733_v50 = vld [vmem:[%s18398_s1 + $0x584] ss:$16 sps:$4 sm:$0xff]  }
  0x3a   :  { %v11736_v51 = vld [vmem:[%s18398_s1 + $0x784] ss:$16 sps:$4 sm:$0xff]   ;;  %v11731_v52 = vld [vmem:[%s18398_s1 + $0x580] ss:$16 sps:$4 sm:$0xff]  }
  0x3b   :  { %8101 = vmatpush2.bf16.msra.mxu0 %v11651_v60  ;;  %v11734_v53 = vld [vmem:[%s18398_s1 + $0x780] ss:$16 sps:$4 sm:$0xff]   ;;  %v11739_v54 = vld [vmem:[%s18398_s1 + $0x564] ss:$16 sps:$4 sm:$0xff]  }
  0x3c   :  { %8144 = vmatpush2.bf16.msra.mxu1 %v11652_v61  ;;  %8102 = vmatprep.subr.bf16.mxu0 %v11653_v62  ;;  %v11742_v55 = vld [vmem:[%s18398_s1 + $0x764] ss:$16 sps:$4 sm:$0xff]   ;;  %v11737_v56 = vld [vmem:[%s18398_s1 + $0x560] ss:$16 sps:$4 sm:$0xff]  }
  0x3d   :  { %8145 = vmatprep.subr.bf16.mxu1 %v11655_v63  ;;  %v11740_v57 = vld [vmem:[%s18398_s1 + $0x760] ss:$16 sps:$4 sm:$0xff]   ;;  %v11745_v58 = vld [vmem:[%s18398_s1 + $0x544] ss:$16 sps:$4 sm:$0xff]  }
  0x3e   :  { %v11748_v59 = vld [vmem:[%s18398_s1 + $0x744] ss:$16 sps:$4 sm:$0xff]   ;;  %v11743_v60 = vld [vmem:[%s18398_s1 + $0x540] ss:$16 sps:$4 sm:$0xff]  }
  0x3f   :  { %8103 = vmatpush2.bf16.msra.mxu0 %v11657_v0  ;;  %v11746_v61 = vld [vmem:[%s18398_s1 + $0x740] ss:$16 sps:$4 sm:$0xff]   ;;  %v11751_v62 = vld [vmem:[%s18398_s1 + $0x524] ss:$16 sps:$4 sm:$0xff]  }
  0x40   :  { %8146 = vmatpush2.bf16.msra.mxu1 %v11658_v1  ;;  %8158 = vmatprep.subr.bf16.mxu0 %v11667_v2  ;;  %v11754_v63 = vld [vmem:[%s18398_s1 + $0x724] ss:$16 sps:$4 sm:$0xff]   ;;  %v11749_v0 = vld [vmem:[%s18398_s1 + $0x520] ss:$16 sps:$4 sm:$0xff]  }
  0x41   :  { %8201 = vmatprep.subr.bf16.mxu1 %v11670_v3  ;;  %v11752_v1 = vld [vmem:[%s18398_s1 + $0x720] ss:$16 sps:$4 sm:$0xff]   ;;  %v11757_v2 = vld [vmem:[%s18398_s1 + $0x504] ss:$16 sps:$4 sm:$0xff]  }
  0x42   :  { %8105 = vmatmul.mubr.bf16.vlgmr.msra.gmra.mxu0 %v11659_v4  ;;  %v11760_v3 = vld [vmem:[%s18398_s1 + $0x704] ss:$16 sps:$4 sm:$0xff]   ;;  %v11755_v4 = vld [vmem:[%s18398_s1 + $0x500] ss:$16 sps:$4 sm:$0xff]  }
  0x43   :  { %8148 = vmatmul.mubr.bf16.vlgmr.msra.gmra.mxu1 %v11662_v5  ;;  %8159 = vmatpush1.bf16.msra.mxu0 %v11665_v6  ;;  %v11758_v5 = vld [vmem:[%s18398_s1 + $0x700] ss:$16 sps:$4 sm:$0xff]   ;;  %v11769_v6 = vld [vmem:[%s18398_s1 + $0x8e4] ss:$16 sps:$4 sm:$0xff]  }
  0x44   :  { %8202 = vmatpush1.bf16.msra.mxu1 %v11668_v7  ;;  %8160 = vmatprep.subr.bf16.mxu0 %v11673_v8  ;;  %v11772_v7 = vld [vmem:[%s18398_s1 + $0xae4] ss:$16 sps:$4 sm:$0xff]  }
  0x45   :  { %8203 = vmatprep.subr.bf16.mxu1 %v11676_v9  ;;  %8190 = vmatprep.mubr.bf16.mxu0 %v11763_v34  ;;  %v11761_v8 = vld [vmem:[%s18399_s0 + $0x10] ss:$164 sps:$4 sm:$0xff]   ;;  %v11764_v9 = vld [vmem:[%s18399_s0 + $0x18] ss:$164 sps:$4 sm:$0xff]  }
  0x46   :  { %8233 = vmatprep.mubr.bf16.mxu1 %v11766_v35  ;;  %v11805_v34 = vld [vmem:[%s18398_s1 + $0x824] ss:$16 sps:$4 sm:$0xff]  }
  0x47   :  { %8161 = vmatpush1.bf16.msra.mxu0 %v11671_v10  ;;  %v11767_v10 = vld [vmem:[%s18398_s1 + $0x8e0] ss:$16 sps:$4 sm:$0xff]   ;;  %v11808_v35 = vld [vmem:[%s18398_s1 + $0xa24] ss:$16 sps:$4 sm:$0xff]  }
  0x48   :  { %8204 = vmatpush1.bf16.msra.mxu1 %v11674_v11  ;;  %8162 = vmatprep.subr.bf16.mxu0 %v11679_v12  ;;  %v11770_v11 = vld [vmem:[%s18398_s1 + $0xae0] ss:$16 sps:$4 sm:$0xff]   ;;  %v11775_v12 = vld [vmem:[%s18398_s1 + $0x8c4] ss:$16 sps:$4 sm:$0xff]  }
  0x49   :  { %8205 = vmatprep.subr.bf16.mxu1 %v11682_v13  ;;  %v11778_v13 = vld [vmem:[%s18398_s1 + $0xac4] ss:$16 sps:$4 sm:$0xff]  }
  0x4b   :  { %8163 = vmatpush1.bf16.msra.mxu0 %v11677_v14  ;;  %v11773_v14 = vld [vmem:[%s18398_s1 + $0x8c0] ss:$16 sps:$4 sm:$0xff]  }
  0x4c   :  { %8206 = vmatpush1.bf16.msra.mxu1 %v11680_v15  ;;  %8164 = vmatprep.subr.bf16.mxu0 %v11685_v16  ;;  %v11776_v15 = vld [vmem:[%s18398_s1 + $0xac0] ss:$16 sps:$4 sm:$0xff]   ;;  %v11781_v16 = vld [vmem:[%s18398_s1 + $0x8a4] ss:$16 sps:$4 sm:$0xff]  }
  0x4d   :  { %8207 = vmatprep.subr.bf16.mxu1 %v11688_v17  ;;  %v11784_v17 = vld [vmem:[%s18398_s1 + $0xaa4] ss:$16 sps:$4 sm:$0xff]  }
  0x4f   :  { %8165 = vmatpush1.bf16.msra.mxu0 %v11683_v18  ;;  %v11779_v18 = vld [vmem:[%s18398_s1 + $0x8a0] ss:$16 sps:$4 sm:$0xff]  }
  0x50   :  { %8208 = vmatpush1.bf16.msra.mxu1 %v11686_v19  ;;  %8166 = vmatprep.subr.bf16.mxu0 %v11691_v20  ;;  %v11865_v19 = vld [vmem:[%s18399_s0 + $0x24] ss:$164 sps:$4 sm:$0xff]   ;;  %v11782_v20 = vld [vmem:[%s18398_s1 + $0xaa0] ss:$16 sps:$4 sm:$0xff]  }
  0x51   :  { %8209 = vmatprep.subr.bf16.mxu1 %v11694_v21  ;;  %v11868_v21 = vld [vmem:[%s18399_s0 + $0x2c] ss:$164 sps:$4 sm:$0xff]  }
  0x53   :  { %8167 = vmatpush1.bf16.msra.mxu0 %v11689_v22  ;;  %v11787_v22 = vld [vmem:[%s18398_s1 + $0x884] ss:$16 sps:$4 sm:$0xff]  }
  0x54   :  { %8210 = vmatpush1.bf16.msra.mxu1 %v11692_v23  ;;  %8168 = vmatprep.subr.bf16.mxu0 %v11697_v24  ;;  %v11790_v23 = vld [vmem:[%s18398_s1 + $0xa84] ss:$16 sps:$4 sm:$0xff]   ;;  %v11785_v24 = vld [vmem:[%s18398_s1 + $0x880] ss:$16 sps:$4 sm:$0xff]  }
  0x55   :  { %8211 = vmatprep.subr.bf16.mxu1 %v11700_v25  ;;  %v11788_v25 = vld [vmem:[%s18398_s1 + $0xa80] ss:$16 sps:$4 sm:$0xff]  }
  0x57   :  { %8169 = vmatpush1.bf16.msra.mxu0 %v11695_v26  ;;  %v11793_v26 = vld [vmem:[%s18398_s1 + $0x864] ss:$16 sps:$4 sm:$0xff]  }
  0x58   :  { %8212 = vmatpush1.bf16.msra.mxu1 %v11698_v27  ;;  %8170 = vmatprep.subr.bf16.mxu0 %v11703_v28  ;;  %v11796_v27 = vld [vmem:[%s18398_s1 + $0xa64] ss:$16 sps:$4 sm:$0xff]   ;;  %v11791_v28 = vld [vmem:[%s18398_s1 + $0x860] ss:$16 sps:$4 sm:$0xff]  }
  0x59   :  { %8213 = vmatprep.subr.bf16.mxu1 %v11706_v29  ;;  %v11794_v29 = vld [vmem:[%s18398_s1 + $0xa60] ss:$16 sps:$4 sm:$0xff]  }
  0x5b   :  { %8171 = vmatpush1.bf16.msra.mxu0 %v11701_v30  ;;  %v11799_v30 = vld [vmem:[%s18398_s1 + $0x844] ss:$16 sps:$4 sm:$0xff]  }
  0x5c   :  { %8214 = vmatpush1.bf16.msra.mxu1 %v11704_v31  ;;  %8172 = vmatprep.subr.bf16.mxu0 %v11709_v32  ;;  %v11802_v31 = vld [vmem:[%s18398_s1 + $0xa44] ss:$16 sps:$4 sm:$0xff]   ;;  %v11797_v32 = vld [vmem:[%s18398_s1 + $0x840] ss:$16 sps:$4 sm:$0xff]  }
  0x5d   :  { %8215 = vmatprep.subr.bf16.mxu1 %v11712_v33  ;;  %v11800_v33 = vld [vmem:[%s18398_s1 + $0xa40] ss:$16 sps:$4 sm:$0xff]  }
  0x5f   :  { %8173 = vmatpush1.bf16.msra.mxu0 %v11707_v36  ;;  %v11803_v36 = vld [vmem:[%s18398_s1 + $0x820] ss:$16 sps:$4 sm:$0xff]  }
  0x60   :  { %8216 = vmatpush1.bf16.msra.mxu1 %v11710_v37  ;;  %8174 = vmatprep.subr.bf16.mxu0 %v11715_v38  ;;  %v11806_v37 = vld [vmem:[%s18398_s1 + $0xa20] ss:$16 sps:$4 sm:$0xff]   ;;  %v11811_v38 = vld [vmem:[%s18398_s1 + $0x804] ss:$16 sps:$4 sm:$0xff]  }
  0x61   :  { %8217 = vmatprep.subr.bf16.mxu1 %v11718_v39  ;;  %v11814_v39 = vld [vmem:[%s18398_s1 + $0xa04] ss:$16 sps:$4 sm:$0xff]  }
  0x63   :  { %8175 = vmatpush2.bf16.msra.mxu0 %v11713_v40  ;;  %v11809_v40 = vld [vmem:[%s18398_s1 + $0x800] ss:$16 sps:$4 sm:$0xff]  }
  0x64   :  { %8218 = vmatpush2.bf16.msra.mxu1 %v11716_v41  ;;  %8176 = vmatprep.subr.bf16.mxu0 %v11721_v42  ;;  %v11812_v41 = vld [vmem:[%s18398_s1 + $0xa00] ss:$16 sps:$4 sm:$0xff]   ;;  %v11817_v42 = vld [vmem:[%s18398_s1 + $0x9e4] ss:$16 sps:$4 sm:$0xff]  }
  0x65   :  { %8219 = vmatprep.subr.bf16.mxu1 %v11724_v43  ;;  %v11820_v43 = vld [vmem:[%s18398_s1 + $0xbe4] ss:$16 sps:$4 sm:$0xff]  }
  0x67   :  { %8177 = vmatpush2.bf16.msra.mxu0 %v11719_v44  ;;  %v11815_v44 = vld [vmem:[%s18398_s1 + $0x9e0] ss:$16 sps:$4 sm:$0xff]  }
  0x68   :  { %8220 = vmatpush2.bf16.msra.mxu1 %v11722_v45  ;;  %8178 = vmatprep.subr.bf16.mxu0 %v11727_v46  ;;  %v11818_v45 = vld [vmem:[%s18398_s1 + $0xbe0] ss:$16 sps:$4 sm:$0xff]   ;;  %v11823_v46 = vld [vmem:[%s18398_s1 + $0x9c4] ss:$16 sps:$4 sm:$0xff]  }
  0x69   :  { %8221 = vmatprep.subr.bf16.mxu1 %v11730_v47  ;;  %v11826_v47 = vld [vmem:[%s18398_s1 + $0xbc4] ss:$16 sps:$4 sm:$0xff]  }
  0x6b   :  { %8179 = vmatpush2.bf16.msra.mxu0 %v11725_v48  ;;  %v11821_v48 = vld [vmem:[%s18398_s1 + $0x9c0] ss:$16 sps:$4 sm:$0xff]  }
  0x6c   :  { %8222 = vmatpush2.bf16.msra.mxu1 %v11728_v49  ;;  %8180 = vmatprep.subr.bf16.mxu0 %v11733_v50  ;;  %v11824_v49 = vld [vmem:[%s18398_s1 + $0xbc0] ss:$16 sps:$4 sm:$0xff]   ;;  %v11829_v50 = vld [vmem:[%s18398_s1 + $0x9a4] ss:$16 sps:$4 sm:$0xff]  }
  0x6d   :  { %8223 = vmatprep.subr.bf16.mxu1 %v11736_v51  ;;  %v11832_v51 = vld [vmem:[%s18398_s1 + $0xba4] ss:$16 sps:$4 sm:$0xff]  }
  0x6f   :  { %8181 = vmatpush2.bf16.msra.mxu0 %v11731_v52  ;;  %v11827_v52 = vld [vmem:[%s18398_s1 + $0x9a0] ss:$16 sps:$4 sm:$0xff]  }
  0x70   :  { %8224 = vmatpush2.bf16.msra.mxu1 %v11734_v53  ;;  %8182 = vmatprep.subr.bf16.mxu0 %v11739_v54  ;;  %v11830_v53 = vld [vmem:[%s18398_s1 + $0xba0] ss:$16 sps:$4 sm:$0xff]   ;;  %v11835_v54 = vld [vmem:[%s18398_s1 + $0x984] ss:$16 sps:$4 sm:$0xff]  }
  0x71   :  { %8225 = vmatprep.subr.bf16.mxu1 %v11742_v55  ;;  %v11838_v55 = vld [vmem:[%s18398_s1 + $0xb84] ss:$16 sps:$4 sm:$0xff]  }
  0x73   :  { %8183 = vmatpush2.bf16.msra.mxu0 %v11737_v56  ;;  %v11833_v56 = vld [vmem:[%s18398_s1 + $0x980] ss:$16 sps:$4 sm:$0xff]  }
  0x74   :  { %8226 = vmatpush2.bf16.msra.mxu1 %v11740_v57  ;;  %8184 = vmatprep.subr.bf16.mxu0 %v11745_v58  ;;  %v11836_v57 = vld [vmem:[%s18398_s1 + $0xb80] ss:$16 sps:$4 sm:$0xff]   ;;  %v11841_v58 = vld [vmem:[%s18398_s1 + $0x964] ss:$16 sps:$4 sm:$0xff]  }
  0x75   :  { %8227 = vmatprep.subr.bf16.mxu1 %v11748_v59  ;;  %v11844_v59 = vld [vmem:[%s18398_s1 + $0xb64] ss:$16 sps:$4 sm:$0xff]  }
  0x77   :  { %8185 = vmatpush2.bf16.msra.mxu0 %v11743_v60  ;;  %v11839_v60 = vld [vmem:[%s18398_s1 + $0x960] ss:$16 sps:$4 sm:$0xff]  }
  0x78   :  { %8228 = vmatpush2.bf16.msra.mxu1 %v11746_v61  ;;  %8186 = vmatprep.subr.bf16.mxu0 %v11751_v62  ;;  %v11842_v61 = vld [vmem:[%s18398_s1 + $0xb60] ss:$16 sps:$4 sm:$0xff]   ;;  %v11847_v62 = vld [vmem:[%s18398_s1 + $0x944] ss:$16 sps:$4 sm:$0xff]  }
  0x79   :  { %8229 = vmatprep.subr.bf16.mxu1 %v11754_v63  ;;  %v11850_v63 = vld [vmem:[%s18398_s1 + $0xb44] ss:$16 sps:$4 sm:$0xff]  }
  0x7b   :  { %8187 = vmatpush2.bf16.msra.mxu0 %v11749_v0  ;;  %v11845_v0 = vld [vmem:[%s18398_s1 + $0x940] ss:$16 sps:$4 sm:$0xff]  }
  0x7c   :  { %8230 = vmatpush2.bf16.msra.mxu1 %v11752_v1  ;;  %8188 = vmatprep.subr.bf16.mxu0 %v11757_v2  ;;  %v11848_v1 = vld [vmem:[%s18398_s1 + $0xb40] ss:$16 sps:$4 sm:$0xff]   ;;  %v11853_v2 = vld [vmem:[%s18398_s1 + $0x924] ss:$16 sps:$4 sm:$0xff]  }
  0x7d   :  { %8231 = vmatprep.subr.bf16.mxu1 %v11760_v3  ;;  %v11856_v3 = vld [vmem:[%s18398_s1 + $0xb24] ss:$16 sps:$4 sm:$0xff]  }
  0x7f   :  { %8189 = vmatpush2.bf16.msra.mxu0 %v11755_v4  ;;  %v11851_v4 = vld [vmem:[%s18398_s1 + $0x920] ss:$16 sps:$4 sm:$0xff]  }
  0x80   :  { %8232 = vmatpush2.bf16.msra.mxu1 %v11758_v5  ;;  %8244 = vmatprep.subr.bf16.mxu0 %v11769_v6  ;;  %v11854_v5 = vld [vmem:[%s18398_s1 + $0xb20] ss:$16 sps:$4 sm:$0xff]   ;;  %v11859_v6 = vld [vmem:[%s18398_s1 + $0x904] ss:$16 sps:$4 sm:$0xff]  }
  0x81   :  { %8287 = vmatprep.subr.bf16.mxu1 %v11772_v7  ;;  %v11862_v7 = vld [vmem:[%s18398_s1 + $0xb04] ss:$16 sps:$4 sm:$0xff]  }
  0x82   :  { %8191 = vmatmul.mubr.bf16.vlgmr.msra.gmra.mxu0 %v11761_v8  ;;  %v11857_v8 = vld [vmem:[%s18398_s1 + $0x900] ss:$16 sps:$4 sm:$0xff]  }
  0x83   :  { %8234 = vmatmul.mubr.bf16.vlgmr.msra.gmra.mxu1 %v11764_v9  ;;  %8245 = vmatpush1.bf16.msra.mxu0 %v11767_v10  ;;  %v11860_v9 = vld [vmem:[%s18398_s1 + $0xb00] ss:$16 sps:$4 sm:$0xff]   ;;  %v11871_v10 = vld [vmem:[%s18398_s1 + $0xce4] ss:$16 sps:$4 sm:$0xff]  }
  0x84   :  { %8288 = vmatpush1.bf16.msra.mxu1 %v11770_v11  ;;  %8246 = vmatprep.subr.bf16.mxu0 %v11775_v12  ;;  %v11874_v11 = vld [vmem:[%s18398_s1 + $0xee4] ss:$16 sps:$4 sm:$0xff]  }
  0x85   :  { %8289 = vmatprep.subr.bf16.mxu1 %v11778_v13  ;;  %8276 = vmatprep.mubr.bf16.mxu0 %v11865_v19  ;;  %v11863_v12 = vld [vmem:[%s18399_s0 + $0x20] ss:$164 sps:$4 sm:$0xff]   ;;  %v11866_v13 = vld [vmem:[%s18399_s0 + $0x28] ss:$164 sps:$4 sm:$0xff]  }
  0x86   :  { %8319 = vmatprep.mubr.bf16.mxu1 %v11868_v21  ;;  %v11970_v19 = vld [vmem:[%s18399_s0 + $0x3c] ss:$164 sps:$4 sm:$0xff]  }
  0x87   :  { %8247 = vmatpush1.bf16.msra.mxu0 %v11773_v14  ;;  %v11869_v14 = vld [vmem:[%s18398_s1 + $0xce0] ss:$16 sps:$4 sm:$0xff]  }
  0x88   :  { %8290 = vmatpush1.bf16.msra.mxu1 %v11776_v15  ;;  %8248 = vmatprep.subr.bf16.mxu0 %v11781_v16  ;;  %v11872_v15 = vld [vmem:[%s18398_s1 + $0xee0] ss:$16 sps:$4 sm:$0xff]   ;;  %v11877_v16 = vld [vmem:[%s18398_s1 + $0xcc4] ss:$16 sps:$4 sm:$0xff]  }
  0x89   :  { %8291 = vmatprep.subr.bf16.mxu1 %v11784_v17  ;;  %v11880_v17 = vld [vmem:[%s18398_s1 + $0xec4] ss:$16 sps:$4 sm:$0xff]   ;;  %v11878_v21 = vld [vmem:[%s18398_s1 + $0xec0] ss:$16 sps:$4 sm:$0xff]  }
  0x8b   :  { %8249 = vmatpush1.bf16.msra.mxu0 %v11779_v18  ;;  %v11967_v18 = vld [vmem:[%s18399_s0 + $0x34] ss:$164 sps:$4 sm:$0xff]  }
  0x8c   :  { %8292 = vmatpush1.bf16.msra.mxu1 %v11782_v20  ;;  %8250 = vmatprep.subr.bf16.mxu0 %v11787_v22  ;;  %v11875_v20 = vld [vmem:[%s18398_s1 + $0xcc0] ss:$16 sps:$4 sm:$0xff]   ;;  %v11883_v22 = vld [vmem:[%s18398_s1 + $0xca4] ss:$16 sps:$4 sm:$0xff]  }
  0x8d   :  { %8293 = vmatprep.subr.bf16.mxu1 %v11790_v23  ;;  %v11886_v23 = vld [vmem:[%s18398_s1 + $0xea4] ss:$16 sps:$4 sm:$0xff]  }
  0x8f   :  { %8251 = vmatpush1.bf16.msra.mxu0 %v11785_v24  ;;  %v11881_v24 = vld [vmem:[%s18398_s1 + $0xca0] ss:$16 sps:$4 sm:$0xff]  }
  0x90   :  { %8294 = vmatpush1.bf16.msra.mxu1 %v11788_v25  ;;  %8252 = vmatprep.subr.bf16.mxu0 %v11793_v26  ;;  %v11884_v25 = vld [vmem:[%s18398_s1 + $0xea0] ss:$16 sps:$4 sm:$0xff]   ;;  %v11889_v26 = vld [vmem:[%s18398_s1 + $0xc84] ss:$16 sps:$4 sm:$0xff]  }
  0x91   :  { %8295 = vmatprep.subr.bf16.mxu1 %v11796_v27  ;;  %v11892_v27 = vld [vmem:[%s18398_s1 + $0xe84] ss:$16 sps:$4 sm:$0xff]  }
  0x93   :  { %8253 = vmatpush1.bf16.msra.mxu0 %v11791_v28  ;;  %v11887_v28 = vld [vmem:[%s18398_s1 + $0xc80] ss:$16 sps:$4 sm:$0xff]  }
  0x94   :  { %8296 = vmatpush1.bf16.msra.mxu1 %v11794_v29  ;;  %8254 = vmatprep.subr.bf16.mxu0 %v11799_v30  ;;  %v11890_v29 = vld [vmem:[%s18398_s1 + $0xe80] ss:$16 sps:$4 sm:$0xff]   ;;  %v11895_v30 = vld [vmem:[%s18398_s1 + $0xc64] ss:$16 sps:$4 sm:$0xff]  }
  0x95   :  { %8297 = vmatprep.subr.bf16.mxu1 %v11802_v31  ;;  %v11898_v31 = vld [vmem:[%s18398_s1 + $0xe64] ss:$16 sps:$4 sm:$0xff]  }
  0x97   :  { %8255 = vmatpush1.bf16.msra.mxu0 %v11797_v32  ;;  %v11893_v32 = vld [vmem:[%s18398_s1 + $0xc60] ss:$16 sps:$4 sm:$0xff]  }
  0x98   :  { %8298 = vmatpush1.bf16.msra.mxu1 %v11800_v33  ;;  %8256 = vmatprep.subr.bf16.mxu0 %v11805_v34  ;;  %v11896_v33 = vld [vmem:[%s18398_s1 + $0xe60] ss:$16 sps:$4 sm:$0xff]   ;;  %v11901_v34 = vld [vmem:[%s18398_s1 + $0xc44] ss:$16 sps:$4 sm:$0xff]  }
  0x99   :  { %8299 = vmatprep.subr.bf16.mxu1 %v11808_v35  ;;  %v11904_v35 = vld [vmem:[%s18398_s1 + $0xe44] ss:$16 sps:$4 sm:$0xff]  }
  0x9b   :  { %8257 = vmatpush1.bf16.msra.mxu0 %v11803_v36  ;;  %v11899_v36 = vld [vmem:[%s18398_s1 + $0xc40] ss:$16 sps:$4 sm:$0xff]  }
  0x9c   :  { %8300 = vmatpush1.bf16.msra.mxu1 %v11806_v37  ;;  %8258 = vmatprep.subr.bf16.mxu0 %v11811_v38  ;;  %v11902_v37 = vld [vmem:[%s18398_s1 + $0xe40] ss:$16 sps:$4 sm:$0xff]   ;;  %v11907_v38 = vld [vmem:[%s18398_s1 + $0xc24] ss:$16 sps:$4 sm:$0xff]  }
  0x9d   :  { %8301 = vmatprep.subr.bf16.mxu1 %v11814_v39  ;;  %v11910_v39 = vld [vmem:[%s18398_s1 + $0xe24] ss:$16 sps:$4 sm:$0xff]  }
  0x9f   :  { %8259 = vmatpush1.bf16.msra.mxu0 %v11809_v40  ;;  %v11905_v40 = vld [vmem:[%s18398_s1 + $0xc20] ss:$16 sps:$4 sm:$0xff]  }
  0xa0   :  { %8302 = vmatpush1.bf16.msra.mxu1 %v11812_v41  ;;  %8260 = vmatprep.subr.bf16.mxu0 %v11817_v42  ;;  %v11908_v41 = vld [vmem:[%s18398_s1 + $0xe20] ss:$16 sps:$4 sm:$0xff]   ;;  %v11913_v42 = vld [vmem:[%s18398_s1 + $0xc04] ss:$16 sps:$4 sm:$0xff]  }
  0xa1   :  { %8303 = vmatprep.subr.bf16.mxu1 %v11820_v43  ;;  %v11916_v43 = vld [vmem:[%s18398_s1 + $0xe04] ss:$16 sps:$4 sm:$0xff]  }
  0xa3   :  { %8261 = vmatpush2.bf16.msra.mxu0 %v11815_v44  ;;  %v11911_v44 = vld [vmem:[%s18398_s1 + $0xc00] ss:$16 sps:$4 sm:$0xff]  }
  0xa4   :  { %8304 = vmatpush2.bf16.msra.mxu1 %v11818_v45  ;;  %8262 = vmatprep.subr.bf16.mxu0 %v11823_v46  ;;  %v11914_v45 = vld [vmem:[%s18398_s1 + $0xe00] ss:$16 sps:$4 sm:$0xff]   ;;  %v11919_v46 = vld [vmem:[%s18398_s1 + $0xde4] ss:$16 sps:$4 sm:$0xff]  }
  0xa5   :  { %8305 = vmatprep.subr.bf16.mxu1 %v11826_v47  ;;  %v11922_v47 = vld [vmem:[%s18398_s1 + $0xfe4] ss:$16 sps:$4 sm:$0xff]  }
  0xa7   :  { %8263 = vmatpush2.bf16.msra.mxu0 %v11821_v48  ;;  %v11917_v48 = vld [vmem:[%s18398_s1 + $0xde0] ss:$16 sps:$4 sm:$0xff]  }
  0xa8   :  { %8306 = vmatpush2.bf16.msra.mxu1 %v11824_v49  ;;  %8264 = vmatprep.subr.bf16.mxu0 %v11829_v50  ;;  %v11920_v49 = vld [vmem:[%s18398_s1 + $0xfe0] ss:$16 sps:$4 sm:$0xff]   ;;  %v11925_v50 = vld [vmem:[%s18398_s1 + $0xdc4] ss:$16 sps:$4 sm:$0xff]  }
  0xa9   :  { %8307 = vmatprep.subr.bf16.mxu1 %v11832_v51  ;;  %v11928_v51 = vld [vmem:[%s18398_s1 + $0xfc4] ss:$16 sps:$4 sm:$0xff]  }
  0xab   :  { %8265 = vmatpush2.bf16.msra.mxu0 %v11827_v52  ;;  %v11923_v52 = vld [vmem:[%s18398_s1 + $0xdc0] ss:$16 sps:$4 sm:$0xff]  }
  0xac   :  { %8308 = vmatpush2.bf16.msra.mxu1 %v11830_v53  ;;  %8266 = vmatprep.subr.bf16.mxu0 %v11835_v54  ;;  %v11926_v53 = vld [vmem:[%s18398_s1 + $0xfc0] ss:$16 sps:$4 sm:$0xff]   ;;  %v11931_v54 = vld [vmem:[%s18398_s1 + $0xda4] ss:$16 sps:$4 sm:$0xff]  }
  0xad   :  { %8309 = vmatprep.subr.bf16.mxu1 %v11838_v55  ;;  %v11934_v55 = vld [vmem:[%s18398_s1 + $0xfa4] ss:$16 sps:$4 sm:$0xff]  }
  0xaf   :  { %8267 = vmatpush2.bf16.msra.mxu0 %v11833_v56  ;;  %v11929_v56 = vld [vmem:[%s18398_s1 + $0xda0] ss:$16 sps:$4 sm:$0xff]  }
  0xb0   :  { %8310 = vmatpush2.bf16.msra.mxu1 %v11836_v57  ;;  %8268 = vmatprep.subr.bf16.mxu0 %v11841_v58  ;;  %v11932_v57 = vld [vmem:[%s18398_s1 + $0xfa0] ss:$16 sps:$4 sm:$0xff]   ;;  %v11937_v58 = vld [vmem:[%s18398_s1 + $0xd84] ss:$16 sps:$4 sm:$0xff]  }
  0xb1   :  { %8311 = vmatprep.subr.bf16.mxu1 %v11844_v59  ;;  %v11940_v59 = vld [vmem:[%s18398_s1 + $0xf84] ss:$16 sps:$4 sm:$0xff]  }
  0xb3   :  { %8269 = vmatpush2.bf16.msra.mxu0 %v11839_v60  ;;  %v11935_v60 = vld [vmem:[%s18398_s1 + $0xd80] ss:$16 sps:$4 sm:$0xff]  }
  0xb4   :  { %8312 = vmatpush2.bf16.msra.mxu1 %v11842_v61  ;;  %8270 = vmatprep.subr.bf16.mxu0 %v11847_v62  ;;  %v11938_v61 = vld [vmem:[%s18398_s1 + $0xf80] ss:$16 sps:$4 sm:$0xff]   ;;  %v11943_v62 = vld [vmem:[%s18398_s1 + $0xd64] ss:$16 sps:$4 sm:$0xff]  }
  0xb5   :  { %8313 = vmatprep.subr.bf16.mxu1 %v11850_v63  ;;  %v11946_v63 = vld [vmem:[%s18398_s1 + $0xf64] ss:$16 sps:$4 sm:$0xff]  }
  0xb7   :  { %8271 = vmatpush2.bf16.msra.mxu0 %v11845_v0  ;;  %v11941_v0 = vld [vmem:[%s18398_s1 + $0xd60] ss:$16 sps:$4 sm:$0xff]  }
  0xb8   :  { %8314 = vmatpush2.bf16.msra.mxu1 %v11848_v1  ;;  %8272 = vmatprep.subr.bf16.mxu0 %v11853_v2  ;;  %v11944_v1 = vld [vmem:[%s18398_s1 + $0xf60] ss:$16 sps:$4 sm:$0xff]   ;;  %v11949_v2 = vld [vmem:[%s18398_s1 + $0xd44] ss:$16 sps:$4 sm:$0xff]  }
  0xb9   :  { %8315 = vmatprep.subr.bf16.mxu1 %v11856_v3  ;;  %v11952_v3 = vld [vmem:[%s18398_s1 + $0xf44] ss:$16 sps:$4 sm:$0xff]  }
  0xbb   :  { %8273 = vmatpush2.bf16.msra.mxu0 %v11851_v4  ;;  %v11947_v4 = vld [vmem:[%s18398_s1 + $0xd40] ss:$16 sps:$4 sm:$0xff]  }
  0xbc   :  { %8316 = vmatpush2.bf16.msra.mxu1 %v11854_v5  ;;  %8274 = vmatprep.subr.bf16.mxu0 %v11859_v6  ;;  %v11950_v5 = vld [vmem:[%s18398_s1 + $0xf40] ss:$16 sps:$4 sm:$0xff]   ;;  %v18405_v6 = vlaneseq }
  0xbd   :  { %8317 = vmatprep.subr.bf16.mxu1 %v11862_v7  ;;  %v11955_v7 = vld [vmem:[%s18398_s1 + $0xd24] ss:$16 sps:$4 sm:$0xff]  }
  0xbf   :  { %8275 = vmatpush2.bf16.msra.mxu0 %v11857_v8  ;;  %v11958_v8 = vld [vmem:[%s18398_s1 + $0xf24] ss:$16 sps:$4 sm:$0xff]  }
  0xc0   :  { %8318 = vmatpush2.bf16.msra.mxu1 %v11860_v9  ;;  %8330 = vmatprep.subr.bf16.mxu0 %v11871_v10  ;;  %v11953_v9 = vld [vmem:[%s18398_s1 + $0xd20] ss:$16 sps:$4 sm:$0xff]  }
  0xc1   :  { %8373 = vmatprep.subr.bf16.mxu1 %v11874_v11  ;;  %v11956_v10 = vld [vmem:[%s18398_s1 + $0xf20] ss:$16 sps:$4 sm:$0xff]   ;;  %v14453_v11 = vshrl.u32 %v18405_v6, 7 }
  0xc2   :  { %8277 = vmatmul.mubr.bf16.vlgmr.msra.gmra.mxu0 %v11863_v12  ;;  %v11961_v12 = vld [vmem:[%s18398_s1 + $0xd04] ss:$16 sps:$4 sm:$0xff]  }
  0xc3   :  { %8320 = vmatmul.mubr.bf16.vlgmr.msra.gmra.mxu1 %v11866_v13  ;;  %8331 = vmatpush1.bf16.msra.mxu0 %v11869_v14  ;;  %v11964_v13 = vld [vmem:[%s18398_s1 + $0xf04] ss:$16 sps:$4 sm:$0xff]   ;;  %v11959_v14 = vld [vmem:[%s18398_s1 + $0xd00] ss:$16 sps:$4 sm:$0xff]  }
  0xc4   :  { %8374 = vmatpush1.bf16.msra.mxu1 %v11872_v15  ;;  %8332 = vmatprep.subr.bf16.mxu0 %v11877_v16  ;;  %v11962_v15 = vld [vmem:[%s18398_s1 + $0xf00] ss:$16 sps:$4 sm:$0xff]  }
  0xc5   :  { %8375 = vmatprep.subr.bf16.mxu1 %v11880_v17  ;;  %8362 = vmatprep.mubr.bf16.mxu0 %v11967_v18  ;;  %v1361_v16 = vld [vmem:[%s18400_s2] sm:$0xf]  ;;  %v1365_v17 = vsub.s32 0, %v14453_v11  ;;  %v11973_v18 = vld [vmem:[%s18398_s1 + $0x10e4] ss:$16 sps:$4 sm:$0xff]  }
  0xc6   :  { %8405 = vmatprep.mubr.bf16.mxu1 %v11970_v19  ;;  %v11976_v19 = vld [vmem:[%s18398_s1 + $0x12e4] ss:$16 sps:$4 sm:$0xff]  }
  0xc7   :  { %8333 = vmatpush1.bf16.msra.mxu0 %v11875_v20  ;;  %v11965_v20 = vld [vmem:[%s18399_s0 + $0x30] ss:$164 sps:$4 sm:$0xff]  }
  0xc8   :  { %8376 = vmatpush1.bf16.msra.mxu1 %v11878_v21  ;;  %8334 = vmatprep.subr.bf16.mxu0 %v11883_v22  ;;  %v11968_v21 = vld [vmem:[%s18399_s0 + $0x38] ss:$164 sps:$4 sm:$0xff]   ;;  %v11971_v22 = vld [vmem:[%s18398_s1 + $0x10e0] ss:$16 sps:$4 sm:$0xff]  }
  0xc9   :  { %8377 = vmatprep.subr.bf16.mxu1 %v11886_v23  ;;  %v1366_v23 = vrot.slane %v1361_v16, %v1365_v17  ;;  %v12033_v17 = vld [vmem:[%s18398_s1 + $0x11a4] ss:$16 sps:$4 sm:$0xff]  }
  0xcb   :  { %8335 = vmatpush1.bf16.msra.mxu0 %v11881_v24  ;;  %v11974_v24 = vld [vmem:[%s18398_s1 + $0x12e0] ss:$16 sps:$4 sm:$0xff]  }
  0xcc   :  { %8378 = vmatpush1.bf16.msra.mxu1 %v11884_v25  ;;  %8336 = vmatprep.subr.bf16.mxu0 %v11889_v26  ;;  %v11979_v25 = vld [vmem:[%s18398_s1 + $0x10c4] ss:$16 sps:$4 sm:$0xff]  }
  0xcd   :  { %8379 = vmatprep.subr.bf16.mxu1 %v11892_v27  ;;  %v11982_v26 = vld [vmem:[%s18398_s1 + $0x12c4] ss:$16 sps:$4 sm:$0xff]  }
  0xce   :  { %v12069_v27 = vld [vmem:[%s18399_s0 + $0x44] ss:$164 sps:$4 sm:$0xff]  }
  0xcf   :  { %8337 = vmatpush1.bf16.msra.mxu0 %v11887_v28  ;;  %v12072_v28 = vld [vmem:[%s18399_s0 + $0x4c] ss:$164 sps:$4 sm:$0xff]  }
  0xd0   :  { %8380 = vmatpush1.bf16.msra.mxu1 %v11890_v29  ;;  %8338 = vmatprep.subr.bf16.mxu0 %v11895_v30 }
  0xd1   :  { %8381 = vmatprep.subr.bf16.mxu1 %v11898_v31  ;;  %v11977_v31 = vld [vmem:[%s18398_s1 + $0x10c0] ss:$16 sps:$4 sm:$0xff]  }
  0xd3   :  { %8339 = vmatpush1.bf16.msra.mxu0 %v11893_v32 }
  0xd4   :  { %8382 = vmatpush1.bf16.msra.mxu1 %v11896_v33  ;;  %8340 = vmatprep.subr.bf16.mxu0 %v11901_v34  ;;  %v1369_v33 = vsub.s32 1, %v14453_v11  ;;  %v11980_v34 = vld [vmem:[%s18398_s1 + $0x12c0] ss:$16 sps:$4 sm:$0xff]  }
  0xd5   :  { %8383 = vmatprep.subr.bf16.mxu1 %v11904_v35 }
  0xd7   :  { %8341 = vmatpush1.bf16.msra.mxu0 %v11899_v36 }
  0xd8   :  { %8384 = vmatpush1.bf16.msra.mxu1 %v11902_v37  ;;  %8342 = vmatprep.subr.bf16.mxu0 %v11907_v38  ;;  %v11985_v37 = vld [vmem:[%s18398_s1 + $0x10a4] ss:$16 sps:$4 sm:$0xff]  }
  0xd9   :  { %8385 = vmatprep.subr.bf16.mxu1 %v11910_v39  ;;  %v11988_v38 = vld [vmem:[%s18398_s1 + $0x12a4] ss:$16 sps:$4 sm:$0xff]  }
  0xdb   :  { %8343 = vmatpush1.bf16.msra.mxu0 %v11905_v40 }
  0xdc   :  { %8386 = vmatpush1.bf16.msra.mxu1 %v11908_v41  ;;  %8344 = vmatprep.subr.bf16.mxu0 %v11913_v42  ;;  %v11983_v42 = vld [vmem:[%s18398_s1 + $0x10a0] ss:$16 sps:$4 sm:$0xff]  }
  0xdd   :  { %8387 = vmatprep.subr.bf16.mxu1 %v11916_v43  ;;  %v14523_v43 = vrot.slane %v1361_v16, %v1369_v33  ;;  %v12028_v16 = vld [vmem:[%s18398_s1 + $0x13c0] ss:$16 sps:$4 sm:$0xff]   ;;  %v12057_v33 = vld [vmem:[%s18398_s1 + $0x1124] ss:$16 sps:$4 sm:$0xff]  }
  0xdf   :  { %8345 = vmatpush1.bf16.msra.mxu0 %v11911_v44 }
  0xe0   :  { %8388 = vmatpush1.bf16.msra.mxu1 %v11914_v45  ;;  %8346 = vmatprep.subr.bf16.mxu0 %v11919_v46  ;;  %v11986_v45 = vld [vmem:[%s18398_s1 + $0x12a0] ss:$16 sps:$4 sm:$0xff]  }
  0xe1   :  { %8389 = vmatprep.subr.bf16.mxu1 %v11922_v47  ;;  %v11991_v47 = vld [vmem:[%s18398_s1 + $0x1084] ss:$16 sps:$4 sm:$0xff]  }
  0xe3   :  { %8347 = vmatpush2.bf16.msra.mxu0 %v11917_v48  ;;  %v11994_v48 = vld [vmem:[%s18398_s1 + $0x1284] ss:$16 sps:$4 sm:$0xff]  }
  0xe4   :  { %8390 = vmatpush2.bf16.msra.mxu1 %v11920_v49  ;;  %8348 = vmatprep.subr.bf16.mxu0 %v11925_v50 }
  0xe5   :  { %8391 = vmatprep.subr.bf16.mxu1 %v11928_v51 }
  0xe7   :  { %8349 = vmatpush2.bf16.msra.mxu0 %v11923_v52  ;;  %v11989_v52 = vld [vmem:[%s18398_s1 + $0x1080] ss:$16 sps:$4 sm:$0xff]  }
  0xe8   :  { %8392 = vmatpush2.bf16.msra.mxu1 %v11926_v53  ;;  %8350 = vmatprep.subr.bf16.mxu0 %v11931_v54  ;;  %v11992_v54 = vld [vmem:[%s18398_s1 + $0x1280] ss:$16 sps:$4 sm:$0xff]  }
  0xe9   :  { %8393 = vmatprep.subr.bf16.mxu1 %v11934_v55  ;;  %v11997_v55 = vld [vmem:[%s18398_s1 + $0x1064] ss:$16 sps:$4 sm:$0xff]  }
  0xeb   :  { %8351 = vmatpush2.bf16.msra.mxu0 %v11929_v56  ;;  %v12000_v56 = vld [vmem:[%s18398_s1 + $0x1264] ss:$16 sps:$4 sm:$0xff]  }
  0xec   :  { %8394 = vmatpush2.bf16.msra.mxu1 %v11932_v57  ;;  %8352 = vmatprep.subr.bf16.mxu0 %v11937_v58  ;;  %v11995_v57 = vld [vmem:[%s18398_s1 + $0x1060] ss:$16 sps:$4 sm:$0xff]  }
  0xed   :  { %8395 = vmatprep.subr.bf16.mxu1 %v11940_v59  ;;  %v11998_v58 = vld [vmem:[%s18398_s1 + $0x1260] ss:$16 sps:$4 sm:$0xff]   ;;  %v12003_v59 = vld [vmem:[%s18398_s1 + $0x1044] ss:$16 sps:$4 sm:$0xff]  }
  0xef   :  { %8353 = vmatpush2.bf16.msra.mxu0 %v11935_v60  ;;  %v12006_v60 = vld [vmem:[%s18398_s1 + $0x1244] ss:$16 sps:$4 sm:$0xff]  }
  0xf0   :  { %8396 = vmatpush2.bf16.msra.mxu1 %v11938_v61  ;;  %8354 = vmatprep.subr.bf16.mxu0 %v11943_v62  ;;  %v12001_v61 = vld [vmem:[%s18398_s1 + $0x1040] ss:$16 sps:$4 sm:$0xff]  }
  0xf1   :  { %8397 = vmatprep.subr.bf16.mxu1 %v11946_v63  ;;  %v12004_v62 = vld [vmem:[%s18398_s1 + $0x1240] ss:$16 sps:$4 sm:$0xff]   ;;  %v12009_v63 = vld [vmem:[%s18398_s1 + $0x1024] ss:$16 sps:$4 sm:$0xff]  }
  0xf3   :  { %8355 = vmatpush2.bf16.msra.mxu0 %v11941_v0  ;;  %v12012_v0 = vld [vmem:[%s18398_s1 + $0x1224] ss:$16 sps:$4 sm:$0xff]  }
  0xf4   :  { %8398 = vmatpush2.bf16.msra.mxu1 %v11944_v1  ;;  %8356 = vmatprep.subr.bf16.mxu0 %v11949_v2  ;;  %v12007_v1 = vld [vmem:[%s18398_s1 + $0x1020] ss:$16 sps:$4 sm:$0xff]  }
  0xf5   :  { %8399 = vmatprep.subr.bf16.mxu1 %v11952_v3  ;;  %v12010_v2 = vld [vmem:[%s18398_s1 + $0x1220] ss:$16 sps:$4 sm:$0xff]   ;;  %v12015_v3 = vld [vmem:[%s18398_s1 + $0x1004] ss:$16 sps:$4 sm:$0xff]  }
  0xf7   :  { %8357 = vmatpush2.bf16.msra.mxu0 %v11947_v4  ;;  %v12018_v4 = vld [vmem:[%s18398_s1 + $0x1204] ss:$16 sps:$4 sm:$0xff]  }
  0xf8   :  { %8400 = vmatpush2.bf16.msra.mxu1 %v11950_v5  ;;  %8358 = vmatprep.subr.bf16.mxu0 %v11955_v7  ;;  %v12013_v5 = vld [vmem:[%s18398_s1 + $0x1000] ss:$16 sps:$4 sm:$0xff]  }
  0xf9   :  { %8401 = vmatprep.subr.bf16.mxu1 %v11958_v8  ;;  %v12016_v7 = vld [vmem:[%s18398_s1 + $0x1200] ss:$16 sps:$4 sm:$0xff]   ;;  %v12021_v8 = vld [vmem:[%s18398_s1 + $0x11e4] ss:$16 sps:$4 sm:$0xff]  }
  0xfb   :  { %8359 = vmatpush2.bf16.msra.mxu0 %v11953_v9  ;;  %v12024_v9 = vld [vmem:[%s18398_s1 + $0x13e4] ss:$16 sps:$4 sm:$0xff]  }
  0xfc   :  { %8402 = vmatpush2.bf16.msra.mxu1 %v11956_v10  ;;  %8360 = vmatprep.subr.bf16.mxu0 %v11961_v12  ;;  %v12019_v10 = vld [vmem:[%s18398_s1 + $0x11e0] ss:$16 sps:$4 sm:$0xff]  }
  0xfd   :  { %8403 = vmatprep.subr.bf16.mxu1 %v11964_v13  ;;  %v12022_v12 = vld [vmem:[%s18398_s1 + $0x13e0] ss:$16 sps:$4 sm:$0xff]   ;;  %v12027_v13 = vld [vmem:[%s18398_s1 + $0x11c4] ss:$16 sps:$4 sm:$0xff]  }
  0xff   :  { %8361 = vmatpush2.bf16.msra.mxu0 %v11959_v14  ;;  %v12030_v14 = vld [vmem:[%s18398_s1 + $0x13c4] ss:$16 sps:$4 sm:$0xff]  }
 0x100   :  { %8404 = vmatpush2.bf16.msra.mxu1 %v11962_v15  ;;  %8416 = vmatprep.subr.bf16.mxu0 %v11973_v18  ;;  %v12025_v15 = vld [vmem:[%s18398_s1 + $0x11c0] ss:$16 sps:$4 sm:$0xff]   ;;  %v12036_v18 = vld [vmem:[%s18398_s1 + $0x13a4] ss:$16 sps:$4 sm:$0xff]  }
 0x101   :  { %8459 = vmatprep.subr.bf16.mxu1 %v11976_v19  ;;  %v12031_v19 = vld [vmem:[%s18398_s1 + $0x11a0] ss:$16 sps:$4 sm:$0xff]  }
 0x102   :  { %v8106_v29 = vpop.f32.mrf.mxu0  ;;  %8363 = vmatmul.mubr.bf16.vlgmr.msra.gmra.mxu0 %v11965_v20  ;;  %v12034_v20 = vld [vmem:[%s18398_s1 + $0x13a0] ss:$16 sps:$4 sm:$0xff]  }
 0x103   :  { %v8149_v30 = vpop.f32.mrf.mxu1  ;;  %8406 = vmatmul.mubr.bf16.vlgmr.msra.gmra.mxu1 %v11968_v21  ;;  %v8107_v32 = vadd.f32 %v8106_v29, %v1366_v23  ;;  %8417 = vmatpush1.bf16.msra.mxu0 %v11971_v22  ;;  %v12039_v21 = vld [vmem:[%s18398_s1 + $0x1184] ss:$16 sps:$4 sm:$0xff]  }
 0x104   :  { %8460 = vmatpush1.bf16.msra.mxu1 %v11974_v24  ;;  %v14508_v35 = vpop.f32.mrf.mxu0  ;;  %8418 = vmatprep.subr.bf16.mxu0 %v11979_v25  ;;  %v12042_v22 = vld [vmem:[%s18398_s1 + $0x1384] ss:$16 sps:$4 sm:$0xff]   ;;  %v12040_v24 = vld [vmem:[%s18398_s1 + $0x1380] ss:$16 sps:$4 sm:$0xff]  }
 0x105   :  { %v14510_v36 = vpop.f32.mrf.mxu1  ;;  %8461 = vmatprep.subr.bf16.mxu1 %v11982_v26  ;;  %v14518_v39 = vadd.f32 %v8149_v30, %v8107_v32  ;;  %8448 = vmatprep.mubr.bf16.mxu0 %v12069_v27  ;;  %v12045_v25 = vld [vmem:[%s18398_s1 + $0x1164] ss:$16 sps:$4 sm:$0xff]   ;;  %v12043_v27 = vld [vmem:[%s18398_s1 + $0x1160] ss:$16 sps:$4 sm:$0xff]  }
 0x106   :  { %8491 = vmatprep.mubr.bf16.mxu1 %v12072_v28  ;;  %v8110_v40 = vpop.f32.mrf.mxu0  ;;  %v12048_v26 = vld [vmem:[%s18398_s1 + $0x1364] ss:$16 sps:$4 sm:$0xff]   ;;  %v12046_v28 = vld [vmem:[%s18398_s1 + $0x1360] ss:$16 sps:$4 sm:$0xff]  }
 0x107   :  { %v8153_v41 = vpop.f32.mrf.mxu1  ;;  %v8111_v44 = vadd.f32 %v8110_v40, %v1366_v23  ;;  %8419 = vmatpush1.bf16.msra.mxu0 %v11977_v31  ;;  %v12037_v23 = vld [vmem:[%s18398_s1 + $0x1180] ss:$16 sps:$4 sm:$0xff]   ;;  %v12051_v29 = vld [vmem:[%s18398_s1 + $0x1144] ss:$16 sps:$4 sm:$0xff]  }
 0x108   :  { %8462 = vmatpush1.bf16.msra.mxu1 %v11980_v34  ;;  %v8112_v46 = vpop.f32.mrf.mxu0  ;;  %8420 = vmatprep.subr.bf16.mxu0 %v11985_v37  ;;  %v12054_v30 = vld [vmem:[%s18398_s1 + $0x1344] ss:$16 sps:$4 sm:$0xff]   ;;  %v12049_v31 = vld [vmem:[%s18398_s1 + $0x1140] ss:$16 sps:$4 sm:$0xff]  }
 0x109   :  { %8463 = vmatprep.subr.bf16.mxu1 %v11988_v38  ;;  %v14534_v49 = vadd.f32 %v8153_v41, %v8111_v44  ;;  %v8113_v50 = vadd.f32 %v8112_v46, %v14523_v43  ;;  %v8155_v51 = vpop.f32.mrf.mxu1  ;;  %v12052_v32 = vld [vmem:[%s18398_s1 + $0x1340] ss:$16 sps:$4 sm:$0xff]   ;;  %v12060_v34 = vld [vmem:[%s18398_s1 + $0x1324] ss:$16 sps:$4 sm:$0xff]   ;;  %v12070_v46 = vld [vmem:[%s18399_s0 + $0x48] ss:$164 sps:$4 sm:$0xff]  }
 0x10a   :  { %v12055_v37 = vld [vmem:[%s18398_s1 + $0x1120] ss:$16 sps:$4 sm:$0xff]   ;;  %v12063_v40 = vld [vmem:[%s18398_s1 + $0x1104] ss:$16 sps:$4 sm:$0xff]  }
 0x10b   :  { %v14540_v53 = vadd.f32 %v8155_v51, %v8113_v50  ;;  %8421 = vmatpush1.bf16.msra.mxu0 %v11983_v42  ;;  %v12058_v38 = vld [vmem:[%s18398_s1 + $0x1320] ss:$16 sps:$4 sm:$0xff]   ;;  %v12066_v41 = vld [vmem:[%s18398_s1 + $0x1304] ss:$16 sps:$4 sm:$0xff]  }
 0x10c   :  { %8464 = vmatpush1.bf16.msra.mxu1 %v11986_v45  ;;  %8422 = vmatprep.subr.bf16.mxu0 %v11991_v47  ;;  %v12061_v42 = vld [vmem:[%s18398_s1 + $0x1100] ss:$16 sps:$4 sm:$0xff]   ;;  %v12075_v47 = vld [vmem:[%s18398_s1 + $0x14e4] ss:$16 sps:$4 sm:$0xff]  }
 0x10d   :  { %8465 = vmatprep.subr.bf16.mxu1 %v11994_v48  ;;  %v12064_v44 = vld [vmem:[%s18398_s1 + $0x1300] ss:$16 sps:$4 sm:$0xff]   ;;  %v12078_v48 = vld [vmem:[%s18398_s1 + $0x16e4] ss:$16 sps:$4 sm:$0xff]  }
 0x10e   :  { %v12067_v45 = vld [vmem:[%s18399_s0 + $0x40] ss:$164 sps:$4 sm:$0xff]  }
 0x10f   :  { %8423 = vmatpush1.bf16.msra.mxu0 %v11989_v52  ;;  %v12073_v50 = vld [vmem:[%s18398_s1 + $0x14e0] ss:$16 sps:$4 sm:$0xff]   ;;  %v12081_v52 = vld [vmem:[%s18398_s1 + $0x14c4] ss:$16 sps:$4 sm:$0xff]  }
 0x110   :  { %8466 = vmatpush1.bf16.msra.mxu1 %v11992_v54  ;;  %8424 = vmatprep.subr.bf16.mxu0 %v11997_v55  ;;  %v12076_v51 = vld [vmem:[%s18398_s1 + $0x16e0] ss:$16 sps:$4 sm:$0xff]   ;;  %v12084_v54 = vld [vmem:[%s18398_s1 + $0x16c4] ss:$16 sps:$4 sm:$0xff]  }
 0x111   :  { %8467 = vmatprep.subr.bf16.mxu1 %v12000_v56  ;;  %v12079_v55 = vld [vmem:[%s18398_s1 + $0x14c0] ss:$16 sps:$4 sm:$0xff]  }
 0x112   :  { %v12082_v56 = vld [vmem:[%s18398_s1 + $0x16c0] ss:$16 sps:$4 sm:$0xff]  }
 0x113   :  { %8425 = vmatpush1.bf16.msra.mxu0 %v11995_v57  ;;  %v12171_v57 = vld [vmem:[%s18399_s0 + $0x54] ss:$164 sps:$4 sm:$0xff]  }
 0x114   :  { %8468 = vmatpush1.bf16.msra.mxu1 %v11998_v58  ;;  %8426 = vmatprep.subr.bf16.mxu0 %v12003_v59  ;;  %v12174_v58 = vld [vmem:[%s18399_s0 + $0x5c] ss:$164 sps:$4 sm:$0xff]  }
 0x115   :  { %8469 = vmatprep.subr.bf16.mxu1 %v12006_v60 }
 0x117   :  { %8427 = vmatpush1.bf16.msra.mxu0 %v12001_v61 }
 0x118   :  { %8470 = vmatpush1.bf16.msra.mxu1 %v12004_v62  ;;  %8428 = vmatprep.subr.bf16.mxu0 %v12009_v63 }
 0x119   :  { %8471 = vmatprep.subr.bf16.mxu1 %v12012_v0  ;;  %v12087_v0 = vld [vmem:[%s18398_s1 + $0x14a4] ss:$16 sps:$4 sm:$0xff]  }
 0x11b   :  { %8429 = vmatpush1.bf16.msra.mxu0 %v12007_v1  ;;  %v12090_v1 = vld [vmem:[%s18398_s1 + $0x16a4] ss:$16 sps:$4 sm:$0xff]  }
 0x11c   :  { %8472 = vmatpush1.bf16.msra.mxu1 %v12010_v2  ;;  %8430 = vmatprep.subr.bf16.mxu0 %v12015_v3  ;;  %v12088_v3 = vld [vmem:[%s18398_s1 + $0x16a0] ss:$16 sps:$4 sm:$0xff]  }
 0x11d   :  { %8473 = vmatprep.subr.bf16.mxu1 %v12018_v4 }
 0x11f   :  { %8431 = vmatpush1.bf16.msra.mxu0 %v12013_v5 }
 0x120   :  { %8474 = vmatpush1.bf16.msra.mxu1 %v12016_v7  ;;  %8432 = vmatprep.subr.bf16.mxu0 %v12021_v8 }
 0x121   :  { %8475 = vmatprep.subr.bf16.mxu1 %v12024_v9  ;;  %v12093_v9 = vld [vmem:[%s18398_s1 + $0x1484] ss:$16 sps:$4 sm:$0xff]  }
 0x123   :  { %8433 = vmatpush2.bf16.msra.mxu0 %v12019_v10  ;;  %v12096_v10 = vld [vmem:[%s18398_s1 + $0x1684] ss:$16 sps:$4 sm:$0xff]  }
 0x124   :  { %8476 = vmatpush2.bf16.msra.mxu1 %v12022_v12  ;;  %8434 = vmatprep.subr.bf16.mxu0 %v12027_v13 }
 0x125   :  { %8477 = vmatprep.subr.bf16.mxu1 %v12030_v14  ;;  %v12094_v14 = vld [vmem:[%s18398_s1 + $0x1680] ss:$16 sps:$4 sm:$0xff]  }
 0x127   :  { %8435 = vmatpush2.bf16.msra.mxu0 %v12025_v15  ;;  %v12099_v15 = vld [vmem:[%s18398_s1 + $0x1464] ss:$16 sps:$4 sm:$0xff]  }
 0x128   :  { %8478 = vmatpush2.bf16.msra.mxu1 %v12028_v16  ;;  %8436 = vmatprep.subr.bf16.mxu0 %v12033_v17  ;;  %v12097_v16 = vld [vmem:[%s18398_s1 + $0x1460] ss:$16 sps:$4 sm:$0xff]  }
 0x129   :  { %8479 = vmatprep.subr.bf16.mxu1 %v12036_v18  ;;  %v12100_v17 = vld [vmem:[%s18398_s1 + $0x1660] ss:$16 sps:$4 sm:$0xff]   ;;  %v12105_v18 = vld [vmem:[%s18398_s1 + $0x1444] ss:$16 sps:$4 sm:$0xff]  }
 0x12b   :  { %8437 = vmatpush2.bf16.msra.mxu0 %v12031_v19  ;;  %v12108_v19 = vld [vmem:[%s18398_s1 + $0x1644] ss:$16 sps:$4 sm:$0xff]  }
 0x12c   :  { %8480 = vmatpush2.bf16.msra.mxu1 %v12034_v20  ;;  %8438 = vmatprep.subr.bf16.mxu0 %v12039_v21  ;;  %v12103_v20 = vld [vmem:[%s18398_s1 + $0x1440] ss:$16 sps:$4 sm:$0xff]  }
 0x12d   :  { %8481 = vmatprep.subr.bf16.mxu1 %v12042_v22  ;;  %v12106_v21 = vld [vmem:[%s18398_s1 + $0x1640] ss:$16 sps:$4 sm:$0xff]   ;;  %v12111_v22 = vld [vmem:[%s18398_s1 + $0x1424] ss:$16 sps:$4 sm:$0xff]  }
 0x12f   :  { %8439 = vmatpush2.bf16.msra.mxu0 %v12037_v23  ;;  %v12114_v23 = vld [vmem:[%s18398_s1 + $0x1624] ss:$16 sps:$4 sm:$0xff]  }
 0x130   :  { %8482 = vmatpush2.bf16.msra.mxu1 %v12040_v24  ;;  %8440 = vmatprep.subr.bf16.mxu0 %v12045_v25  ;;  %v12109_v24 = vld [vmem:[%s18398_s1 + $0x1420] ss:$16 sps:$4 sm:$0xff]  }
 0x131   :  { %8483 = vmatprep.subr.bf16.mxu1 %v12048_v26  ;;  %v12112_v25 = vld [vmem:[%s18398_s1 + $0x1620] ss:$16 sps:$4 sm:$0xff]   ;;  %v12117_v26 = vld [vmem:[%s18398_s1 + $0x1404] ss:$16 sps:$4 sm:$0xff]  }
 0x133   :  { %8441 = vmatpush2.bf16.msra.mxu0 %v12043_v27  ;;  %v12120_v27 = vld [vmem:[%s18398_s1 + $0x1604] ss:$16 sps:$4 sm:$0xff]  }
 0x134   :  { %8484 = vmatpush2.bf16.msra.mxu1 %v12046_v28  ;;  %8442 = vmatprep.subr.bf16.mxu0 %v12051_v29  ;;  %v12115_v28 = vld [vmem:[%s18398_s1 + $0x1400] ss:$16 sps:$4 sm:$0xff]  }
 0x135   :  { %8485 = vmatprep.subr.bf16.mxu1 %v12054_v30  ;;  %v12118_v29 = vld [vmem:[%s18398_s1 + $0x1600] ss:$16 sps:$4 sm:$0xff]   ;;  %v12123_v30 = vld [vmem:[%s18398_s1 + $0x15e4] ss:$16 sps:$4 sm:$0xff]  }
 0x137   :  { %8443 = vmatpush2.bf16.msra.mxu0 %v12049_v31  ;;  %v12126_v31 = vld [vmem:[%s18398_s1 + $0x17e4] ss:$16 sps:$4 sm:$0xff]  }
 0x138   :  { %8486 = vmatpush2.bf16.msra.mxu1 %v12052_v32  ;;  %8444 = vmatprep.subr.bf16.mxu0 %v12057_v33  ;;  %v12121_v32 = vld [vmem:[%s18398_s1 + $0x15e0] ss:$16 sps:$4 sm:$0xff]  }
 0x139   :  { %8487 = vmatprep.subr.bf16.mxu1 %v12060_v34  ;;  %v12124_v33 = vld [vmem:[%s18398_s1 + $0x17e0] ss:$16 sps:$4 sm:$0xff]   ;;  %v12129_v34 = vld [vmem:[%s18398_s1 + $0x15c4] ss:$16 sps:$4 sm:$0xff]  }
 0x13b   :  { %8445 = vmatpush2.bf16.msra.mxu0 %v12055_v37  ;;  %v12132_v37 = vld [vmem:[%s18398_s1 + $0x17c4] ss:$16 sps:$4 sm:$0xff]  }
 0x13c   :  { %8488 = vmatpush2.bf16.msra.mxu1 %v12058_v38  ;;  %8446 = vmatprep.subr.bf16.mxu0 %v12063_v40  ;;  %v12127_v38 = vld [vmem:[%s18398_s1 + $0x15c0] ss:$16 sps:$4 sm:$0xff]  }
 0x13d   :  { %8489 = vmatprep.subr.bf16.mxu1 %v12066_v41  ;;  %v12130_v40 = vld [vmem:[%s18398_s1 + $0x17c0] ss:$16 sps:$4 sm:$0xff]   ;;  %v12135_v41 = vld [vmem:[%s18398_s1 + $0x15a4] ss:$16 sps:$4 sm:$0xff]  }
 0x13f   :  { %8447 = vmatpush2.bf16.msra.mxu0 %v12061_v42  ;;  %v12138_v42 = vld [vmem:[%s18398_s1 + $0x17a4] ss:$16 sps:$4 sm:$0xff]  }
 0x140   :  { %8490 = vmatpush2.bf16.msra.mxu1 %v12064_v44  ;;  %8502 = vmatprep.subr.bf16.mxu0 %v12075_v47  ;;  %v12133_v44 = vld [vmem:[%s18398_s1 + $0x15a0] ss:$16 sps:$4 sm:$0xff]   ;;  %v12144_v47 = vld [vmem:[%s18398_s1 + $0x1784] ss:$16 sps:$4 sm:$0xff]  }
 0x141   :  { %8545 = vmatprep.subr.bf16.mxu1 %v12078_v48  ;;  %v12139_v48 = vld [vmem:[%s18398_s1 + $0x1580] ss:$16 sps:$4 sm:$0xff]  }
 0x142   :  { %v8192_v59 = vpop.f32.mrf.mxu0  ;;  %8449 = vmatmul.mubr.bf16.vlgmr.msra.gmra.mxu0 %v12067_v45  ;;  %v12136_v45 = vld [vmem:[%s18398_s1 + $0x17a0] ss:$16 sps:$4 sm:$0xff]  }
 0x143   :  { %v8235_v60 = vpop.f32.mrf.mxu1  ;;  %8492 = vmatmul.mubr.bf16.vlgmr.msra.gmra.mxu1 %v12070_v46  ;;  %v8193_v61 = vadd.f32 %v8192_v59, %v14518_v39  ;;  %8503 = vmatpush1.bf16.msra.mxu0 %v12073_v50  ;;  %v12085_v39 = vld [vmem:[%s18398_s1 + $0x14a0] ss:$16 sps:$4 sm:$0xff]   ;;  %v12141_v46 = vld [vmem:[%s18398_s1 + $0x1584] ss:$16 sps:$4 sm:$0xff]  }
 0x144   :  { %8546 = vmatpush1.bf16.msra.mxu1 %v12076_v51  ;;  %v14726_v62 = vpop.f32.mrf.mxu0  ;;  %8504 = vmatprep.subr.bf16.mxu0 %v12081_v52  ;;  %v12142_v50 = vld [vmem:[%s18398_s1 + $0x1780] ss:$16 sps:$4 sm:$0xff]   ;;  %v12147_v51 = vld [vmem:[%s18398_s1 + $0x1564] ss:$16 sps:$4 sm:$0xff]  }
 0x145   :  { %v14728_v63 = vpop.f32.mrf.mxu1  ;;  %8547 = vmatprep.subr.bf16.mxu1 %v12084_v54  ;;  %v14736_v2 = vadd.f32 %v8235_v60, %v8193_v61  ;;  %8534 = vmatprep.mubr.bf16.mxu0 %v12171_v57  ;;  %v12150_v52 = vld [vmem:[%s18398_s1 + $0x1764] ss:$16 sps:$4 sm:$0xff]   ;;  %v12145_v54 = vld [vmem:[%s18398_s1 + $0x1560] ss:$16 sps:$4 sm:$0xff]  }
 0x146   :  { %8577 = vmatprep.mubr.bf16.mxu1 %v12174_v58  ;;  %v8196_v4 = vpop.f32.mrf.mxu0  ;;  %v12156_v57 = vld [vmem:[%s18398_s1 + $0x1744] ss:$16 sps:$4 sm:$0xff]   ;;  %v12151_v58 = vld [vmem:[%s18398_s1 + $0x1540] ss:$16 sps:$4 sm:$0xff]  }
 0x147   :  { %v8197_v5 = vadd.f32 %v8196_v4, %v14534_v49  ;;  %8505 = vmatpush1.bf16.msra.mxu0 %v12079_v55  ;;  %v8239_v7 = vpop.f32.mrf.mxu1  ;;  %v12091_v49 = vld [vmem:[%s18398_s1 + $0x1480] ss:$16 sps:$4 sm:$0xff]   ;;  %v12159_v60 = vld [vmem:[%s18398_s1 + $0x1524] ss:$16 sps:$4 sm:$0xff]  }
 0x148   :  { %8548 = vmatpush1.bf16.msra.mxu1 %v12082_v56  ;;  %v8198_v8 = vpop.f32.mrf.mxu0  ;;  %8506 = vmatprep.subr.bf16.mxu0 %v12087_v0  ;;  %v12148_v55 = vld [vmem:[%s18398_s1 + $0x1760] ss:$16 sps:$4 sm:$0xff]   ;;  %v12153_v56 = vld [vmem:[%s18398_s1 + $0x1544] ss:$16 sps:$4 sm:$0xff]  }
 0x149   :  { %8549 = vmatprep.subr.bf16.mxu1 %v12090_v1  ;;  %v14751_v12 = vadd.f32 %v8239_v7, %v8197_v5  ;;  %v14754_v13 = vadd.f32 %v8198_v8, %v14540_v53  ;;  %v12102_v53 = vld [vmem:[%s18398_s1 + $0x1664] ss:$16 sps:$4 sm:$0xff]   ;;  %v12154_v59 = vld [vmem:[%s18398_s1 + $0x1740] ss:$16 sps:$4 sm:$0xff]   ;;  %v12172_v8 = vld [vmem:[%s18399_s0 + $0x58] ss:$164 sps:$4 sm:$0xff]  }
 0x14a   :  { %v12162_v61 = vld [vmem:[%s18398_s1 + $0x1724] ss:$16 sps:$4 sm:$0xff]   ;;  %v12157_v0 = vld [vmem:[%s18398_s1 + $0x1520] ss:$16 sps:$4 sm:$0xff]  }
 0x14b   :  { %8507 = vmatpush1.bf16.msra.mxu0 %v12085_v39  ;;  %v12160_v1 = vld [vmem:[%s18398_s1 + $0x1720] ss:$16 sps:$4 sm:$0xff]   ;;  %v12165_v39 = vld [vmem:[%s18398_s1 + $0x1504] ss:$16 sps:$4 sm:$0xff]  }
 0x14c   :  { %8550 = vmatpush1.bf16.msra.mxu1 %v12088_v3  ;;  %8508 = vmatprep.subr.bf16.mxu0 %v12093_v9  ;;  %v12168_v3 = vld [vmem:[%s18398_s1 + $0x1704] ss:$16 sps:$4 sm:$0xff]   ;;  %v12163_v4 = vld [vmem:[%s18398_s1 + $0x1500] ss:$16 sps:$4 sm:$0xff]  }
 0x14d   :  { %8551 = vmatprep.subr.bf16.mxu1 %v12096_v10  ;;  %v12166_v5 = vld [vmem:[%s18398_s1 + $0x1700] ss:$16 sps:$4 sm:$0xff]   ;;  %v12177_v9 = vld [vmem:[%s18398_s1 + $0x18e4] ss:$16 sps:$4 sm:$0xff]  }
 0x14e   :  { %v12169_v7 = vld [vmem:[%s18399_s0 + $0x50] ss:$164 sps:$4 sm:$0xff]  }
 0x14f   :  { %8509 = vmatpush1.bf16.msra.mxu0 %v12091_v49  ;;  %v12180_v10 = vld [vmem:[%s18398_s1 + $0x1ae4] ss:$16 sps:$4 sm:$0xff]   ;;  %v12175_v49 = vld [vmem:[%s18398_s1 + $0x18e0] ss:$16 sps:$4 sm:$0xff]  }
 0x150   :  { %8552 = vmatpush1.bf16.msra.mxu1 %v12094_v14  ;;  %8510 = vmatprep.subr.bf16.mxu0 %v12099_v15  ;;  %v12178_v14 = vld [vmem:[%s18398_s1 + $0x1ae0] ss:$16 sps:$4 sm:$0xff]   ;;  %v12183_v15 = vld [vmem:[%s18398_s1 + $0x18c4] ss:$16 sps:$4 sm:$0xff]  }
 0x151   :  { %8553 = vmatprep.subr.bf16.mxu1 %v12102_v53  ;;  %v12186_v53 = vld [vmem:[%s18398_s1 + $0x1ac4] ss:$16 sps:$4 sm:$0xff]  }
 0x153   :  { %8511 = vmatpush1.bf16.msra.mxu0 %v12097_v16  ;;  %v12181_v16 = vld [vmem:[%s18398_s1 + $0x18c0] ss:$16 sps:$4 sm:$0xff]  }
 0x154   :  { %8554 = vmatpush1.bf16.msra.mxu1 %v12100_v17  ;;  %8512 = vmatprep.subr.bf16.mxu0 %v12105_v18  ;;  %v12184_v17 = vld [vmem:[%s18398_s1 + $0x1ac0] ss:$16 sps:$4 sm:$0xff]   ;;  %v12273_v18 = vld [vmem:[%s18399_s0 + $0x64] ss:$164 sps:$4 sm:$0xff]  }
 0x155   :  { %8555 = vmatprep.subr.bf16.mxu1 %v12108_v19  ;;  %v12276_v19 = vld [vmem:[%s18399_s0 + $0x6c] ss:$164 sps:$4 sm:$0xff]  }
 0x157   :  { %8513 = vmatpush1.bf16.msra.mxu0 %v12103_v20 }
 0x158   :  { %8556 = vmatpush1.bf16.msra.mxu1 %v12106_v21  ;;  %8514 = vmatprep.subr.bf16.mxu0 %v12111_v22 }
 0x159   :  { %8557 = vmatprep.subr.bf16.mxu1 %v12114_v23  ;;  %v12189_v23 = vld [vmem:[%s18398_s1 + $0x18a4] ss:$16 sps:$4 sm:$0xff]  }
 0x15b   :  { %8515 = vmatpush1.bf16.msra.mxu0 %v12109_v24  ;;  %v12192_v24 = vld [vmem:[%s18398_s1 + $0x1aa4] ss:$16 sps:$4 sm:$0xff]  }
 0x15c   :  { %8558 = vmatpush1.bf16.msra.mxu1 %v12112_v25  ;;  %8516 = vmatprep.subr.bf16.mxu0 %v12117_v26  ;;  %v12187_v25 = vld [vmem:[%s18398_s1 + $0x18a0] ss:$16 sps:$4 sm:$0xff]  }
 0x15d   :  { %8559 = vmatprep.subr.bf16.mxu1 %v12120_v27 }
 0x15f   :  { %8517 = vmatpush1.bf16.msra.mxu0 %v12115_v28  ;;  %v12195_v28 = vld [vmem:[%s18398_s1 + $0x1884] ss:$16 sps:$4 sm:$0xff]  }
 0x160   :  { %8560 = vmatpush1.bf16.msra.mxu1 %v12118_v29  ;;  %8518 = vmatprep.subr.bf16.mxu0 %v12123_v30  ;;  %v12198_v29 = vld [vmem:[%s18398_s1 + $0x1a84] ss:$16 sps:$4 sm:$0xff]   ;;  %v12193_v30 = vld [vmem:[%s18398_s1 + $0x1880] ss:$16 sps:$4 sm:$0xff]  }
 0x161   :  { %8561 = vmatprep.subr.bf16.mxu1 %v12126_v31  ;;  %v12201_v31 = vld [vmem:[%s18398_s1 + $0x1864] ss:$16 sps:$4 sm:$0xff]  }
 0x163   :  { %8519 = vmatpush2.bf16.msra.mxu0 %v12121_v32  ;;  %v12204_v32 = vld [vmem:[%s18398_s1 + $0x1a64] ss:$16 sps:$4 sm:$0xff]  }
 0x164   :  { %8562 = vmatpush2.bf16.msra.mxu1 %v12124_v33  ;;  %8520 = vmatprep.subr.bf16.mxu0 %v12129_v34  ;;  %v12199_v33 = vld [vmem:[%s18398_s1 + $0x1860] ss:$16 sps:$4 sm:$0xff]  }
 0x165   :  { %8563 = vmatprep.subr.bf16.mxu1 %v12132_v37  ;;  %v12202_v34 = vld [vmem:[%s18398_s1 + $0x1a60] ss:$16 sps:$4 sm:$0xff]   ;;  %v12207_v37 = vld [vmem:[%s18398_s1 + $0x1844] ss:$16 sps:$4 sm:$0xff]  }
 0x167   :  { %8521 = vmatpush2.bf16.msra.mxu0 %v12127_v38  ;;  %v12210_v38 = vld [vmem:[%s18398_s1 + $0x1a44] ss:$16 sps:$4 sm:$0xff]  }
 0x168   :  { %8564 = vmatpush2.bf16.msra.mxu1 %v12130_v40  ;;  %8522 = vmatprep.subr.bf16.mxu0 %v12135_v41  ;;  %v12205_v40 = vld [vmem:[%s18398_s1 + $0x1840] ss:$16 sps:$4 sm:$0xff]  }
 0x169   :  { %8565 = vmatprep.subr.bf16.mxu1 %v12138_v42  ;;  %v12208_v41 = vld [vmem:[%s18398_s1 + $0x1a40] ss:$16 sps:$4 sm:$0xff]   ;;  %v12213_v42 = vld [vmem:[%s18398_s1 + $0x1824] ss:$16 sps:$4 sm:$0xff]  }
 0x16b   :  { %8523 = vmatpush2.bf16.msra.mxu0 %v12133_v44  ;;  %v12216_v44 = vld [vmem:[%s18398_s1 + $0x1a24] ss:$16 sps:$4 sm:$0xff]  }
 0x16c   :  { %8566 = vmatpush2.bf16.msra.mxu1 %v12136_v45  ;;  %8524 = vmatprep.subr.bf16.mxu0 %v12141_v46  ;;  %v12211_v45 = vld [vmem:[%s18398_s1 + $0x1820] ss:$16 sps:$4 sm:$0xff]  }
 0x16d   :  { %8567 = vmatprep.subr.bf16.mxu1 %v12144_v47  ;;  %v12214_v46 = vld [vmem:[%s18398_s1 + $0x1a20] ss:$16 sps:$4 sm:$0xff]   ;;  %v12219_v47 = vld [vmem:[%s18398_s1 + $0x1804] ss:$16 sps:$4 sm:$0xff]  }
 0x16f   :  { %8525 = vmatpush2.bf16.msra.mxu0 %v12139_v48  ;;  %v12222_v48 = vld [vmem:[%s18398_s1 + $0x1a04] ss:$16 sps:$4 sm:$0xff]  }
 0x170   :  { %8568 = vmatpush2.bf16.msra.mxu1 %v12142_v50  ;;  %8526 = vmatprep.subr.bf16.mxu0 %v12147_v51  ;;  %v12217_v50 = vld [vmem:[%s18398_s1 + $0x1800] ss:$16 sps:$4 sm:$0xff]  }
 0x171   :  { %8569 = vmatprep.subr.bf16.mxu1 %v12150_v52  ;;  %v12220_v51 = vld [vmem:[%s18398_s1 + $0x1a00] ss:$16 sps:$4 sm:$0xff]   ;;  %v12225_v52 = vld [vmem:[%s18398_s1 + $0x19e4] ss:$16 sps:$4 sm:$0xff]  }
 0x173   :  { %8527 = vmatpush2.bf16.msra.mxu0 %v12145_v54  ;;  %v12228_v54 = vld [vmem:[%s18398_s1 + $0x1be4] ss:$16 sps:$4 sm:$0xff]  }
 0x174   :  { %8570 = vmatpush2.bf16.msra.mxu1 %v12148_v55  ;;  %8528 = vmatprep.subr.bf16.mxu0 %v12153_v56  ;;  %v12223_v55 = vld [vmem:[%s18398_s1 + $0x19e0] ss:$16 sps:$4 sm:$0xff]  }
 0x175   :  { %8571 = vmatprep.subr.bf16.mxu1 %v12156_v57  ;;  %v12226_v56 = vld [vmem:[%s18398_s1 + $0x1be0] ss:$16 sps:$4 sm:$0xff]   ;;  %v12231_v57 = vld [vmem:[%s18398_s1 + $0x19c4] ss:$16 sps:$4 sm:$0xff]  }
 0x177   :  { %8529 = vmatpush2.bf16.msra.mxu0 %v12151_v58  ;;  %v12234_v58 = vld [vmem:[%s18398_s1 + $0x1bc4] ss:$16 sps:$4 sm:$0xff]  }
 0x178   :  { %8572 = vmatpush2.bf16.msra.mxu1 %v12154_v59  ;;  %8530 = vmatprep.subr.bf16.mxu0 %v12159_v60  ;;  %v12229_v59 = vld [vmem:[%s18398_s1 + $0x19c0] ss:$16 sps:$4 sm:$0xff]  }
 0x179   :  { %8573 = vmatprep.subr.bf16.mxu1 %v12162_v61  ;;  %v12232_v60 = vld [vmem:[%s18398_s1 + $0x1bc0] ss:$16 sps:$4 sm:$0xff]   ;;  %v12237_v61 = vld [vmem:[%s18398_s1 + $0x19a4] ss:$16 sps:$4 sm:$0xff]  }
 0x17b   :  { %8531 = vmatpush2.bf16.msra.mxu0 %v12157_v0  ;;  %v12240_v0 = vld [vmem:[%s18398_s1 + $0x1ba4] ss:$16 sps:$4 sm:$0xff]  }
 0x17c   :  { %8574 = vmatpush2.bf16.msra.mxu1 %v12160_v1  ;;  %8532 = vmatprep.subr.bf16.mxu0 %v12165_v39  ;;  %v12235_v1 = vld [vmem:[%s18398_s1 + $0x19a0] ss:$16 sps:$4 sm:$0xff]  }
 0x17d   :  { %8575 = vmatprep.subr.bf16.mxu1 %v12168_v3  ;;  %v12238_v39 = vld [vmem:[%s18398_s1 + $0x1ba0] ss:$16 sps:$4 sm:$0xff]   ;;  %v12243_v3 = vld [vmem:[%s18398_s1 + $0x1984] ss:$16 sps:$4 sm:$0xff]  }
 0x17f   :  { %8533 = vmatpush2.bf16.msra.mxu0 %v12163_v4  ;;  %v12246_v4 = vld [vmem:[%s18398_s1 + $0x1b84] ss:$16 sps:$4 sm:$0xff]  }
 0x180   :  { %8576 = vmatpush2.bf16.msra.mxu1 %v12166_v5  ;;  %8588 = vmatprep.subr.bf16.mxu0 %v12177_v9  ;;  %v12241_v5 = vld [vmem:[%s18398_s1 + $0x1980] ss:$16 sps:$4 sm:$0xff]   ;;  %v12252_v9 = vld [vmem:[%s18398_s1 + $0x1b64] ss:$16 sps:$4 sm:$0xff]  }
 0x181   :  { %8631 = vmatprep.subr.bf16.mxu1 %v12180_v10  ;;  %v12247_v10 = vld [vmem:[%s18398_s1 + $0x1960] ss:$16 sps:$4 sm:$0xff]  }
 0x182   :  { %v8278_v20 = vpop.f32.mrf.mxu0  ;;  %8535 = vmatmul.mubr.bf16.vlgmr.msra.gmra.mxu0 %v12169_v7  ;;  %v12244_v7 = vld [vmem:[%s18398_s1 + $0x1b80] ss:$16 sps:$4 sm:$0xff]  }
 0x183   :  { %8578 = vmatmul.mubr.bf16.vlgmr.msra.gmra.mxu1 %v12172_v8  ;;  %v14943_v21 = vadd.f32 %v8278_v20, %v14736_v2  ;;  %8589 = vmatpush1.bf16.msra.mxu0 %v12175_v49  ;;  %v12190_v2 = vld [vmem:[%s18398_s1 + $0x1aa0] ss:$16 sps:$4 sm:$0xff]   ;;  %v12249_v8 = vld [vmem:[%s18398_s1 + $0x1964] ss:$16 sps:$4 sm:$0xff]  }
 0x184   :  { %8632 = vmatpush1.bf16.msra.mxu1 %v12178_v14  ;;  %v14945_v22 = vpop.f32.mrf.mxu0  ;;  %8590 = vmatprep.subr.bf16.mxu0 %v12183_v15  ;;  %v12250_v49 = vld [vmem:[%s18398_s1 + $0x1b60] ss:$16 sps:$4 sm:$0xff]   ;;  %v12255_v14 = vld [vmem:[%s18398_s1 + $0x1944] ss:$16 sps:$4 sm:$0xff]  }
 0x185   :  { %8633 = vmatprep.subr.bf16.mxu1 %v12186_v53  ;;  %8620 = vmatprep.mubr.bf16.mxu0 %v12273_v18  ;;  %v12258_v15 = vld [vmem:[%s18398_s1 + $0x1b44] ss:$16 sps:$4 sm:$0xff]   ;;  %v12253_v53 = vld [vmem:[%s18398_s1 + $0x1940] ss:$16 sps:$4 sm:$0xff]  }
 0x186   :  { %8663 = vmatprep.mubr.bf16.mxu1 %v12276_v19  ;;  %v8282_v26 = vpop.f32.mrf.mxu0  ;;  %v12264_v18 = vld [vmem:[%s18398_s1 + $0x1b24] ss:$16 sps:$4 sm:$0xff]   ;;  %v12259_v19 = vld [vmem:[%s18398_s1 + $0x1920] ss:$16 sps:$4 sm:$0xff]  }
 0x187   :  { %v14960_v27 = vadd.f32 %v8282_v26, %v14751_v12  ;;  %8591 = vmatpush1.bf16.msra.mxu0 %v12181_v16  ;;  %v12196_v12 = vld [vmem:[%s18398_s1 + $0x1a80] ss:$16 sps:$4 sm:$0xff]  }
 0x188   :  { %8634 = vmatpush1.bf16.msra.mxu1 %v12184_v17  ;;  %8592 = vmatprep.subr.bf16.mxu0 %v12189_v23  ;;  %v12256_v16 = vld [vmem:[%s18398_s1 + $0x1b40] ss:$16 sps:$4 sm:$0xff]   ;;  %v12261_v17 = vld [vmem:[%s18398_s1 + $0x1924] ss:$16 sps:$4 sm:$0xff]  }
 0x189   :  { %8635 = vmatprep.subr.bf16.mxu1 %v12192_v24  ;;  %v12262_v20 = vld [vmem:[%s18398_s1 + $0x1b20] ss:$16 sps:$4 sm:$0xff]   ;;  %v12267_v23 = vld [vmem:[%s18398_s1 + $0x1904] ss:$16 sps:$4 sm:$0xff]  }
 0x18a   :  { %v12270_v24 = vld [vmem:[%s18398_s1 + $0x1b04] ss:$16 sps:$4 sm:$0xff]  }
 0x18b   :  { %8593 = vmatpush1.bf16.msra.mxu0 %v12187_v25  ;;  %v12265_v25 = vld [vmem:[%s18398_s1 + $0x1900] ss:$16 sps:$4 sm:$0xff]  }
 0x18c   :  { %8636 = vmatpush1.bf16.msra.mxu1 %v12190_v2  ;;  %8594 = vmatprep.subr.bf16.mxu0 %v12195_v28  ;;  %v12268_v2 = vld [vmem:[%s18398_s1 + $0x1b00] ss:$16 sps:$4 sm:$0xff]   ;;  %v12274_v28 = vld [vmem:[%s18399_s0 + $0x68] ss:$164 sps:$4 sm:$0xff]  }
 0x18d   :  { %8637 = vmatprep.subr.bf16.mxu1 %v12198_v29  ;;  %v12271_v26 = vld [vmem:[%s18399_s0 + $0x60] ss:$164 sps:$4 sm:$0xff]  }
 0x18e   :  { %v12279_v29 = vld [vmem:[%s18398_s1 + $0x1ce4] ss:$16 sps:$4 sm:$0xff]  }
 0x18f   :  { %8595 = vmatpush1.bf16.msra.mxu0 %v12193_v30  ;;  %v12282_v30 = vld [vmem:[%s18398_s1 + $0x1ee4] ss:$16 sps:$4 sm:$0xff]  }
 0x190   :  { %8638 = vmatpush1.bf16.msra.mxu1 %v12196_v12  ;;  %8596 = vmatprep.subr.bf16.mxu0 %v12201_v31  ;;  %v12277_v12 = vld [vmem:[%s18398_s1 + $0x1ce0] ss:$16 sps:$4 sm:$0xff]  }
 0x191   :  { %8639 = vmatprep.subr.bf16.mxu1 %v12204_v32  ;;  %v12280_v31 = vld [vmem:[%s18398_s1 + $0x1ee0] ss:$16 sps:$4 sm:$0xff]   ;;  %v12285_v32 = vld [vmem:[%s18398_s1 + $0x1cc4] ss:$16 sps:$4 sm:$0xff]  }
 0x193   :  { %8597 = vmatpush1.bf16.msra.mxu0 %v12199_v33  ;;  %v12288_v33 = vld [vmem:[%s18398_s1 + $0x1ec4] ss:$16 sps:$4 sm:$0xff]  }
 0x194   :  { %8640 = vmatpush1.bf16.msra.mxu1 %v12202_v34  ;;  %8598 = vmatprep.subr.bf16.mxu0 %v12207_v37  ;;  %v12283_v34 = vld [vmem:[%s18398_s1 + $0x1cc0] ss:$16 sps:$4 sm:$0xff]  }
 0x195   :  { %8641 = vmatprep.subr.bf16.mxu1 %v12210_v38  ;;  %v12286_v37 = vld [vmem:[%s18398_s1 + $0x1ec0] ss:$16 sps:$4 sm:$0xff]   ;;  %v12375_v38 = vld [vmem:[%s18399_s0 + $0x74] ss:$164 sps:$4 sm:$0xff]  }
 0x197   :  { %8599 = vmatpush1.bf16.msra.mxu0 %v12205_v40  ;;  %v12378_v40 = vld [vmem:[%s18399_s0 + $0x7c] ss:$164 sps:$4 sm:$0xff]  }
 0x198   :  { %8642 = vmatpush1.bf16.msra.mxu1 %v12208_v41  ;;  %8600 = vmatprep.subr.bf16.mxu0 %v12213_v42  ;;  %v12291_v41 = vld [vmem:[%s18398_s1 + $0x1ca4] ss:$16 sps:$4 sm:$0xff]  }
 0x199   :  { %8643 = vmatprep.subr.bf16.mxu1 %v12216_v44  ;;  %v12294_v42 = vld [vmem:[%s18398_s1 + $0x1ea4] ss:$16 sps:$4 sm:$0xff]   ;;  %v12289_v44 = vld [vmem:[%s18398_s1 + $0x1ca0] ss:$16 sps:$4 sm:$0xff]  }
 0x19b   :  { %8601 = vmatpush1.bf16.msra.mxu0 %v12211_v45  ;;  %v12292_v45 = vld [vmem:[%s18398_s1 + $0x1ea0] ss:$16 sps:$4 sm:$0xff]  }
 0x19c   :  { %8644 = vmatpush1.bf16.msra.mxu1 %v12214_v46  ;;  %8602 = vmatprep.subr.bf16.mxu0 %v12219_v47  ;;  %v12297_v46 = vld [vmem:[%s18398_s1 + $0x1c84] ss:$16 sps:$4 sm:$0xff]  }
 0x19d   :  { %8645 = vmatprep.subr.bf16.mxu1 %v12222_v48  ;;  %v12300_v47 = vld [vmem:[%s18398_s1 + $0x1e84] ss:$16 sps:$4 sm:$0xff]   ;;  %v12295_v48 = vld [vmem:[%s18398_s1 + $0x1c80] ss:$16 sps:$4 sm:$0xff]  }
 0x19f   :  { %8603 = vmatpush1.bf16.msra.mxu0 %v12217_v50  ;;  %v12298_v50 = vld [vmem:[%s18398_s1 + $0x1e80] ss:$16 sps:$4 sm:$0xff]  }
 0x1a0   :  { %8646 = vmatpush1.bf16.msra.mxu1 %v12220_v51  ;;  %8604 = vmatprep.subr.bf16.mxu0 %v12225_v52  ;;  %v12303_v51 = vld [vmem:[%s18398_s1 + $0x1c64] ss:$16 sps:$4 sm:$0xff]  }
 0x1a1   :  { %8647 = vmatprep.subr.bf16.mxu1 %v12228_v54  ;;  %v12306_v52 = vld [vmem:[%s18398_s1 + $0x1e64] ss:$16 sps:$4 sm:$0xff]   ;;  %v12301_v54 = vld [vmem:[%s18398_s1 + $0x1c60] ss:$16 sps:$4 sm:$0xff]  }
 0x1a3   :  { %8605 = vmatpush2.bf16.msra.mxu0 %v12223_v55  ;;  %v12304_v55 = vld [vmem:[%s18398_s1 + $0x1e60] ss:$16 sps:$4 sm:$0xff]  }
 0x1a4   :  { %8648 = vmatpush2.bf16.msra.mxu1 %v12226_v56  ;;  %8606 = vmatprep.subr.bf16.mxu0 %v12231_v57  ;;  %v12309_v56 = vld [vmem:[%s18398_s1 + $0x1c44] ss:$16 sps:$4 sm:$0xff]  }
 0x1a5   :  { %8649 = vmatprep.subr.bf16.mxu1 %v12234_v58  ;;  %v12312_v57 = vld [vmem:[%s18398_s1 + $0x1e44] ss:$16 sps:$4 sm:$0xff]   ;;  %v12307_v58 = vld [vmem:[%s18398_s1 + $0x1c40] ss:$16 sps:$4 sm:$0xff]  }
 0x1a7   :  { %8607 = vmatpush2.bf16.msra.mxu0 %v12229_v59  ;;  %v12310_v59 = vld [vmem:[%s18398_s1 + $0x1e40] ss:$16 sps:$4 sm:$0xff]  }
 0x1a8   :  { %8650 = vmatpush2.bf16.msra.mxu1 %v12232_v60  ;;  %8608 = vmatprep.subr.bf16.mxu0 %v12237_v61  ;;  %v12315_v60 = vld [vmem:[%s18398_s1 + $0x1c24] ss:$16 sps:$4 sm:$0xff]  }
 0x1a9   :  { %8651 = vmatprep.subr.bf16.mxu1 %v12240_v0  ;;  %v12318_v61 = vld [vmem:[%s18398_s1 + $0x1e24] ss:$16 sps:$4 sm:$0xff]   ;;  %v12313_v0 = vld [vmem:[%s18398_s1 + $0x1c20] ss:$16 sps:$4 sm:$0xff]  }
 0x1ab   :  { %8609 = vmatpush2.bf16.msra.mxu0 %v12235_v1  ;;  %v12316_v1 = vld [vmem:[%s18398_s1 + $0x1e20] ss:$16 sps:$4 sm:$0xff]  }
 0x1ac   :  { %8652 = vmatpush2.bf16.msra.mxu1 %v12238_v39  ;;  %8610 = vmatprep.subr.bf16.mxu0 %v12243_v3  ;;  %v12321_v39 = vld [vmem:[%s18398_s1 + $0x1c04] ss:$16 sps:$4 sm:$0xff]  }
 0x1ad   :  { %8653 = vmatprep.subr.bf16.mxu1 %v12246_v4  ;;  %v12324_v3 = vld [vmem:[%s18398_s1 + $0x1e04] ss:$16 sps:$4 sm:$0xff]   ;;  %v12319_v4 = vld [vmem:[%s18398_s1 + $0x1c00] ss:$16 sps:$4 sm:$0xff]  }
 0x1af   :  { %8611 = vmatpush2.bf16.msra.mxu0 %v12241_v5  ;;  %v12322_v5 = vld [vmem:[%s18398_s1 + $0x1e00] ss:$16 sps:$4 sm:$0xff]  }
 0x1b0   :  { %8654 = vmatpush2.bf16.msra.mxu1 %v12244_v7  ;;  %8612 = vmatprep.subr.bf16.mxu0 %v12249_v8  ;;  %v12327_v7 = vld [vmem:[%s18398_s1 + $0x1de4] ss:$16 sps:$4 sm:$0xff]  }
 0x1b1   :  { %8655 = vmatprep.subr.bf16.mxu1 %v12252_v9  ;;  %v12330_v8 = vld [vmem:[%s18398_s1 + $0x1fe4] ss:$16 sps:$4 sm:$0xff]   ;;  %v12325_v9 = vld [vmem:[%s18398_s1 + $0x1de0] ss:$16 sps:$4 sm:$0xff]  }
 0x1b3   :  { %8613 = vmatpush2.bf16.msra.mxu0 %v12247_v10  ;;  %v12328_v10 = vld [vmem:[%s18398_s1 + $0x1fe0] ss:$16 sps:$4 sm:$0xff]  }
 0x1b4   :  { %8656 = vmatpush2.bf16.msra.mxu1 %v12250_v49  ;;  %8614 = vmatprep.subr.bf16.mxu0 %v12255_v14  ;;  %v12333_v49 = vld [vmem:[%s18398_s1 + $0x1dc4] ss:$16 sps:$4 sm:$0xff]  }
 0x1b5   :  { %8657 = vmatprep.subr.bf16.mxu1 %v12258_v15  ;;  %v12336_v14 = vld [vmem:[%s18398_s1 + $0x1fc4] ss:$16 sps:$4 sm:$0xff]   ;;  %v12331_v15 = vld [vmem:[%s18398_s1 + $0x1dc0] ss:$16 sps:$4 sm:$0xff]  }
 0x1b7   :  { %8615 = vmatpush2.bf16.msra.mxu0 %v12253_v53  ;;  %v12334_v53 = vld [vmem:[%s18398_s1 + $0x1fc0] ss:$16 sps:$4 sm:$0xff]  }
 0x1b8   :  { %8658 = vmatpush2.bf16.msra.mxu1 %v12256_v16  ;;  %8616 = vmatprep.subr.bf16.mxu0 %v12261_v17  ;;  %v12339_v16 = vld [vmem:[%s18398_s1 + $0x1da4] ss:$16 sps:$4 sm:$0xff]  }
 0x1b9   :  { %8659 = vmatprep.subr.bf16.mxu1 %v12264_v18  ;;  %v12342_v17 = vld [vmem:[%s18398_s1 + $0x1fa4] ss:$16 sps:$4 sm:$0xff]   ;;  %v12337_v18 = vld [vmem:[%s18398_s1 + $0x1da0] ss:$16 sps:$4 sm:$0xff]  }
 0x1bb   :  { %8617 = vmatpush2.bf16.msra.mxu0 %v12259_v19  ;;  %v12340_v19 = vld [vmem:[%s18398_s1 + $0x1fa0] ss:$16 sps:$4 sm:$0xff]  }
 0x1bc   :  { %8660 = vmatpush2.bf16.msra.mxu1 %v12262_v20  ;;  %8618 = vmatprep.subr.bf16.mxu0 %v12267_v23  ;;  %v12345_v20 = vld [vmem:[%s18398_s1 + $0x1d84] ss:$16 sps:$4 sm:$0xff]  }
 0x1bd   :  { %8661 = vmatprep.subr.bf16.mxu1 %v12270_v24  ;;  %v12348_v23 = vld [vmem:[%s18398_s1 + $0x1f84] ss:$16 sps:$4 sm:$0xff]   ;;  %v12343_v24 = vld [vmem:[%s18398_s1 + $0x1d80] ss:$16 sps:$4 sm:$0xff]  }
 0x1bf   :  { %8619 = vmatpush2.bf16.msra.mxu0 %v12265_v25  ;;  %v12346_v25 = vld [vmem:[%s18398_s1 + $0x1f80] ss:$16 sps:$4 sm:$0xff]  }
 0x1c0   :  { %8662 = vmatpush2.bf16.msra.mxu1 %v12268_v2  ;;  %8674 = vmatprep.subr.bf16.mxu0 %v12279_v29  ;;  %v12351_v2 = vld [vmem:[%s18398_s1 + $0x1d64] ss:$16 sps:$4 sm:$0xff]   ;;  %v12352_v29 = vld [vmem:[%s18398_s1 + $0x1f60] ss:$16 sps:$4 sm:$0xff]  }
 0x1c1   :  { %8717 = vmatprep.subr.bf16.mxu1 %v12282_v30  ;;  %v12357_v30 = vld [vmem:[%s18398_s1 + $0x1d44] ss:$16 sps:$4 sm:$0xff]  }
 0x1c2   :  { %8621 = vmatmul.mubr.bf16.vlgmr.msra.gmra.mxu0 %v12271_v26  ;;  %v12354_v26 = vld [vmem:[%s18398_s1 + $0x1f64] ss:$16 sps:$4 sm:$0xff]  }
 0x1c3   :  { %8664 = vmatmul.mubr.bf16.vlgmr.msra.gmra.mxu1 %v12274_v28  ;;  %8675 = vmatpush1.bf16.msra.mxu0 %v12277_v12  ;;  %v12349_v28 = vld [vmem:[%s18398_s1 + $0x1d60] ss:$16 sps:$4 sm:$0xff]   ;;  %v12360_v12 = vld [vmem:[%s18398_s1 + $0x1f44] ss:$16 sps:$4 sm:$0xff]  }
 0x1c4   :  { %8718 = vmatpush1.bf16.msra.mxu1 %v12280_v31  ;;  %8676 = vmatprep.subr.bf16.mxu0 %v12285_v32  ;;  %v12355_v31 = vld [vmem:[%s18398_s1 + $0x1d40] ss:$16 sps:$4 sm:$0xff]  }
 0x1c5   :  { %8719 = vmatprep.subr.bf16.mxu1 %v12288_v33  ;;  %8706 = vmatprep.mubr.bf16.mxu0 %v12375_v38  ;;  %v12358_v32 = vld [vmem:[%s18398_s1 + $0x1f40] ss:$16 sps:$4 sm:$0xff]   ;;  %v12363_v33 = vld [vmem:[%s18398_s1 + $0x1d24] ss:$16 sps:$4 sm:$0xff]  }
 0x1c6   :  { %8749 = vmatprep.mubr.bf16.mxu1 %v12378_v40  ;;  %v12364_v38 = vld [vmem:[%s18398_s1 + $0x1f20] ss:$16 sps:$4 sm:$0xff]   ;;  %v12369_v40 = vld [vmem:[%s18398_s1 + $0x1d04] ss:$16 sps:$4 sm:$0xff]  }
 0x1c7   :  { %8677 = vmatpush1.bf16.msra.mxu0 %v12283_v34  ;;  %v12366_v34 = vld [vmem:[%s18398_s1 + $0x1f24] ss:$16 sps:$4 sm:$0xff]  }
 0x1c8   :  { %8720 = vmatpush1.bf16.msra.mxu1 %v12286_v37  ;;  %8678 = vmatprep.subr.bf16.mxu0 %v12291_v41  ;;  %v12361_v37 = vld [vmem:[%s18398_s1 + $0x1d20] ss:$16 sps:$4 sm:$0xff]   ;;  %v12372_v41 = vld [vmem:[%s18398_s1 + $0x1f04] ss:$16 sps:$4 sm:$0xff]  }
 0x1c9   :  { %8721 = vmatprep.subr.bf16.mxu1 %v12294_v42  ;;  %v12367_v42 = vld [vmem:[%s18398_s1 + $0x1d00] ss:$16 sps:$4 sm:$0xff]  }
 0x1cb   :  { %8679 = vmatpush1.bf16.msra.mxu0 %v12289_v44  ;;  %v12370_v44 = vld [vmem:[%s18398_s1 + $0x1f00] ss:$16 sps:$4 sm:$0xff]  }
 0x1cc   :  { %8722 = vmatpush1.bf16.msra.mxu1 %v12292_v45  ;;  %8680 = vmatprep.subr.bf16.mxu0 %v12297_v46  ;;  %v12373_v45 = vld [vmem:[%s18399_s0 + $0x70] ss:$164 sps:$4 sm:$0xff]   ;;  %v12376_v46 = vld [vmem:[%s18399_s0 + $0x78] ss:$164 sps:$4 sm:$0xff]  }
 0x1cd   :  { %8723 = vmatprep.subr.bf16.mxu1 %v12300_v47  ;;  %v12381_v47 = vld [vmem:[%s18398_s1 + $0x20e4] ss:$16 sps:$4 sm:$0xff]  }
 0x1cf   :  { %8681 = vmatpush1.bf16.msra.mxu0 %v12295_v48  ;;  %v12384_v48 = vld [vmem:[%s18398_s1 + $0x22e4] ss:$16 sps:$4 sm:$0xff]  }
 0x1d0   :  { %8724 = vmatpush1.bf16.msra.mxu1 %v12298_v50  ;;  %8682 = vmatprep.subr.bf16.mxu0 %v12303_v51  ;;  %v12379_v50 = vld [vmem:[%s18398_s1 + $0x20e0] ss:$16 sps:$4 sm:$0xff]  }
 0x1d1   :  { %8725 = vmatprep.subr.bf16.mxu1 %v12306_v52  ;;  %v12382_v51 = vld [vmem:[%s18398_s1 + $0x22e0] ss:$16 sps:$4 sm:$0xff]   ;;  %v12387_v52 = vld [vmem:[%s18398_s1 + $0x20c4] ss:$16 sps:$4 sm:$0xff]  }
 0x1d3   :  { %8683 = vmatpush1.bf16.msra.mxu0 %v12301_v54  ;;  %v12390_v54 = vld [vmem:[%s18398_s1 + $0x22c4] ss:$16 sps:$4 sm:$0xff]  }
 0x1d4   :  { %8726 = vmatpush1.bf16.msra.mxu1 %v12304_v55  ;;  %8684 = vmatprep.subr.bf16.mxu0 %v12309_v56  ;;  %v12385_v55 = vld [vmem:[%s18398_s1 + $0x20c0] ss:$16 sps:$4 sm:$0xff]  }
 0x1d5   :  { %8727 = vmatprep.subr.bf16.mxu1 %v12312_v57  ;;  %v12388_v56 = vld [vmem:[%s18398_s1 + $0x22c0] ss:$16 sps:$4 sm:$0xff]   ;;  %v12477_v57 = vld [vmem:[%s18399_s0 + $0x84] ss:$164 sps:$4 sm:$0xff]  }
 0x1d7   :  { %8685 = vmatpush1.bf16.msra.mxu0 %v12307_v58  ;;  %v12480_v58 = vld [vmem:[%s18399_s0 + $0x8c] ss:$164 sps:$4 sm:$0xff]  }
 0x1d8   :  { %8728 = vmatpush1.bf16.msra.mxu1 %v12310_v59  ;;  %8686 = vmatprep.subr.bf16.mxu0 %v12315_v60  ;;  %v12393_v59 = vld [vmem:[%s18398_s1 + $0x20a4] ss:$16 sps:$4 sm:$0xff]  }
 0x1d9   :  { %8729 = vmatprep.subr.bf16.mxu1 %v12318_v61  ;;  %v12396_v60 = vld [vmem:[%s18398_s1 + $0x22a4] ss:$16 sps:$4 sm:$0xff]   ;;  %v12391_v61 = vld [vmem:[%s18398_s1 + $0x20a0] ss:$16 sps:$4 sm:$0xff]  }
 0x1db   :  { %8687 = vmatpush1.bf16.msra.mxu0 %v12313_v0  ;;  %v12394_v0 = vld [vmem:[%s18398_s1 + $0x22a0] ss:$16 sps:$4 sm:$0xff]  }
 0x1dc   :  { %8730 = vmatpush1.bf16.msra.mxu1 %v12316_v1  ;;  %8688 = vmatprep.subr.bf16.mxu0 %v12321_v39  ;;  %v12399_v1 = vld [vmem:[%s18398_s1 + $0x2084] ss:$16 sps:$4 sm:$0xff]  }
 0x1dd   :  { %8731 = vmatprep.subr.bf16.mxu1 %v12324_v3  ;;  %v12402_v39 = vld [vmem:[%s18398_s1 + $0x2284] ss:$16 sps:$4 sm:$0xff]   ;;  %v12397_v3 = vld [vmem:[%s18398_s1 + $0x2080] ss:$16 sps:$4 sm:$0xff]  }
 0x1df   :  { %8689 = vmatpush1.bf16.msra.mxu0 %v12319_v4  ;;  %v12400_v4 = vld [vmem:[%s18398_s1 + $0x2280] ss:$16 sps:$4 sm:$0xff]  }
 0x1e0   :  { %8732 = vmatpush1.bf16.msra.mxu1 %v12322_v5  ;;  %8690 = vmatprep.subr.bf16.mxu0 %v12327_v7  ;;  %v12405_v5 = vld [vmem:[%s18398_s1 + $0x2064] ss:$16 sps:$4 sm:$0xff]  }
 0x1e1   :  { %8733 = vmatprep.subr.bf16.mxu1 %v12330_v8  ;;  %v12408_v7 = vld [vmem:[%s18398_s1 + $0x2264] ss:$16 sps:$4 sm:$0xff]   ;;  %v12403_v8 = vld [vmem:[%s18398_s1 + $0x2060] ss:$16 sps:$4 sm:$0xff]  }
 0x1e3   :  { %8691 = vmatpush2.bf16.msra.mxu0 %v12325_v9  ;;  %v12406_v9 = vld [vmem:[%s18398_s1 + $0x2260] ss:$16 sps:$4 sm:$0xff]  }
 0x1e4   :  { %8734 = vmatpush2.bf16.msra.mxu1 %v12328_v10  ;;  %8692 = vmatprep.subr.bf16.mxu0 %v12333_v49  ;;  %v12411_v10 = vld [vmem:[%s18398_s1 + $0x2044] ss:$16 sps:$4 sm:$0xff]  }
 0x1e5   :  { %8735 = vmatprep.subr.bf16.mxu1 %v12336_v14  ;;  %v12414_v49 = vld [vmem:[%s18398_s1 + $0x2244] ss:$16 sps:$4 sm:$0xff]   ;;  %v12409_v14 = vld [vmem:[%s18398_s1 + $0x2040] ss:$16 sps:$4 sm:$0xff]  }
 0x1e7   :  { %8693 = vmatpush2.bf16.msra.mxu0 %v12331_v15  ;;  %v12412_v15 = vld [vmem:[%s18398_s1 + $0x2240] ss:$16 sps:$4 sm:$0xff]  }
 0x1e8   :  { %8736 = vmatpush2.bf16.msra.mxu1 %v12334_v53  ;;  %8694 = vmatprep.subr.bf16.mxu0 %v12339_v16  ;;  %v12417_v53 = vld [vmem:[%s18398_s1 + $0x2024] ss:$16 sps:$4 sm:$0xff]  }
 0x1e9   :  { %8737 = vmatprep.subr.bf16.mxu1 %v12342_v17  ;;  %v12420_v16 = vld [vmem:[%s18398_s1 + $0x2224] ss:$16 sps:$4 sm:$0xff]   ;;  %v12415_v17 = vld [vmem:[%s18398_s1 + $0x2020] ss:$16 sps:$4 sm:$0xff]  }
 0x1eb   :  { %8695 = vmatpush2.bf16.msra.mxu0 %v12337_v18  ;;  %v12418_v18 = vld [vmem:[%s18398_s1 + $0x2220] ss:$16 sps:$4 sm:$0xff]  }
 0x1ec   :  { %8738 = vmatpush2.bf16.msra.mxu1 %v12340_v19  ;;  %8696 = vmatprep.subr.bf16.mxu0 %v12345_v20  ;;  %v12423_v19 = vld [vmem:[%s18398_s1 + $0x2004] ss:$16 sps:$4 sm:$0xff]  }
 0x1ed   :  { %8739 = vmatprep.subr.bf16.mxu1 %v12348_v23  ;;  %v12426_v20 = vld [vmem:[%s18398_s1 + $0x2204] ss:$16 sps:$4 sm:$0xff]   ;;  %v12421_v23 = vld [vmem:[%s18398_s1 + $0x2000] ss:$16 sps:$4 sm:$0xff]  }
 0x1ef   :  { %8697 = vmatpush2.bf16.msra.mxu0 %v12343_v24  ;;  %v12424_v24 = vld [vmem:[%s18398_s1 + $0x2200] ss:$16 sps:$4 sm:$0xff]  }
 0x1f0   :  { %8740 = vmatpush2.bf16.msra.mxu1 %v12346_v25  ;;  %8698 = vmatprep.subr.bf16.mxu0 %v12351_v2  ;;  %v12429_v25 = vld [vmem:[%s18398_s1 + $0x21e4] ss:$16 sps:$4 sm:$0xff]  }
 0x1f1   :  { %8741 = vmatprep.subr.bf16.mxu1 %v12354_v26  ;;  %v12432_v2 = vld [vmem:[%s18398_s1 + $0x23e4] ss:$16 sps:$4 sm:$0xff]   ;;  %v12427_v26 = vld [vmem:[%s18398_s1 + $0x21e0] ss:$16 sps:$4 sm:$0xff]  }
 0x1f3   :  { %8699 = vmatpush2.bf16.msra.mxu0 %v12349_v28  ;;  %v12430_v28 = vld [vmem:[%s18398_s1 + $0x23e0] ss:$16 sps:$4 sm:$0xff]  }
 0x1f4   :  { %8742 = vmatpush2.bf16.msra.mxu1 %v12352_v29  ;;  %8700 = vmatprep.subr.bf16.mxu0 %v12357_v30  ;;  %v12435_v29 = vld [vmem:[%s18398_s1 + $0x21c4] ss:$16 sps:$4 sm:$0xff]  }
 0x1f5   :  { %8743 = vmatprep.subr.bf16.mxu1 %v12360_v12  ;;  %v12438_v30 = vld [vmem:[%s18398_s1 + $0x23c4] ss:$16 sps:$4 sm:$0xff]   ;;  %v12433_v12 = vld [vmem:[%s18398_s1 + $0x21c0] ss:$16 sps:$4 sm:$0xff]  }
 0x1f7   :  { %8701 = vmatpush2.bf16.msra.mxu0 %v12355_v31  ;;  %v12436_v31 = vld [vmem:[%s18398_s1 + $0x23c0] ss:$16 sps:$4 sm:$0xff]  }
 0x1f8   :  { %8744 = vmatpush2.bf16.msra.mxu1 %v12358_v32  ;;  %8702 = vmatprep.subr.bf16.mxu0 %v12363_v33  ;;  %v12441_v32 = vld [vmem:[%s18398_s1 + $0x21a4] ss:$16 sps:$4 sm:$0xff]  }
 0x1f9   :  { %8745 = vmatprep.subr.bf16.mxu1 %v12366_v34  ;;  %v12444_v33 = vld [vmem:[%s18398_s1 + $0x23a4] ss:$16 sps:$4 sm:$0xff]   ;;  %v12439_v34 = vld [vmem:[%s18398_s1 + $0x21a0] ss:$16 sps:$4 sm:$0xff]  }
 0x1fb   :  { %8703 = vmatpush2.bf16.msra.mxu0 %v12361_v37  ;;  %v12442_v37 = vld [vmem:[%s18398_s1 + $0x23a0] ss:$16 sps:$4 sm:$0xff]  }
 0x1fc   :  { %8746 = vmatpush2.bf16.msra.mxu1 %v12364_v38  ;;  %8704 = vmatprep.subr.bf16.mxu0 %v12369_v40  ;;  %v12447_v38 = vld [vmem:[%s18398_s1 + $0x2184] ss:$16 sps:$4 sm:$0xff]  }
 0x1fd   :  { %8747 = vmatprep.subr.bf16.mxu1 %v12372_v41  ;;  %v12450_v40 = vld [vmem:[%s18398_s1 + $0x2384] ss:$16 sps:$4 sm:$0xff]   ;;  %v12445_v41 = vld [vmem:[%s18398_s1 + $0x2180] ss:$16 sps:$4 sm:$0xff]  }
 0x1ff   :  { %8705 = vmatpush2.bf16.msra.mxu0 %v12367_v42  ;;  %v12448_v42 = vld [vmem:[%s18398_s1 + $0x2380] ss:$16 sps:$4 sm:$0xff]  }
 0x200   :  { %8748 = vmatpush2.bf16.msra.mxu1 %v12370_v44  ;;  %8760 = vmatprep.subr.bf16.mxu0 %v12381_v47  ;;  %v12453_v44 = vld [vmem:[%s18398_s1 + $0x2164] ss:$16 sps:$4 sm:$0xff]   ;;  %v12454_v47 = vld [vmem:[%s18398_s1 + $0x2360] ss:$16 sps:$4 sm:$0xff]  }
 0x201   :  { %8803 = vmatprep.subr.bf16.mxu1 %v12384_v48  ;;  %v12459_v48 = vld [vmem:[%s18398_s1 + $0x2144] ss:$16 sps:$4 sm:$0xff]  }
 0x202   :  { %8707 = vmatmul.mubr.bf16.vlgmr.msra.gmra.mxu0 %v12373_v45  ;;  %v12456_v45 = vld [vmem:[%s18398_s1 + $0x2364] ss:$16 sps:$4 sm:$0xff]  }
 0x203   :  { %8750 = vmatmul.mubr.bf16.vlgmr.msra.gmra.mxu1 %v12376_v46  ;;  %8761 = vmatpush1.bf16.msra.mxu0 %v12379_v50  ;;  %v12451_v46 = vld [vmem:[%s18398_s1 + $0x2160] ss:$16 sps:$4 sm:$0xff]   ;;  %v12462_v50 = vld [vmem:[%s18398_s1 + $0x2344] ss:$16 sps:$4 sm:$0xff]  }
 0x204   :  { %8804 = vmatpush1.bf16.msra.mxu1 %v12382_v51  ;;  %8762 = vmatprep.subr.bf16.mxu0 %v12387_v52  ;;  %v12457_v51 = vld [vmem:[%s18398_s1 + $0x2140] ss:$16 sps:$4 sm:$0xff]  }
 0x205   :  { %8805 = vmatprep.subr.bf16.mxu1 %v12390_v54  ;;  %8792 = vmatprep.mubr.bf16.mxu0 %v12477_v57  ;;  %v12460_v52 = vld [vmem:[%s18398_s1 + $0x2340] ss:$16 sps:$4 sm:$0xff]   ;;  %v12465_v54 = vld [vmem:[%s18398_s1 + $0x2124] ss:$16 sps:$4 sm:$0xff]  }
 0x206   :  { %8835 = vmatprep.mubr.bf16.mxu1 %v12480_v58  ;;  %v12466_v57 = vld [vmem:[%s18398_s1 + $0x2320] ss:$16 sps:$4 sm:$0xff]   ;;  %v12471_v58 = vld [vmem:[%s18398_s1 + $0x2104] ss:$16 sps:$4 sm:$0xff]  }
 0x207   :  { %8763 = vmatpush1.bf16.msra.mxu0 %v12385_v55  ;;  %v12468_v55 = vld [vmem:[%s18398_s1 + $0x2324] ss:$16 sps:$4 sm:$0xff]  }
 0x208   :  { %8806 = vmatpush1.bf16.msra.mxu1 %v12388_v56  ;;  %8764 = vmatprep.subr.bf16.mxu0 %v12393_v59  ;;  %v12463_v56 = vld [vmem:[%s18398_s1 + $0x2120] ss:$16 sps:$4 sm:$0xff]   ;;  %v12474_v59 = vld [vmem:[%s18398_s1 + $0x2304] ss:$16 sps:$4 sm:$0xff]  }
 0x209   :  { %8807 = vmatprep.subr.bf16.mxu1 %v12396_v60  ;;  %v12469_v60 = vld [vmem:[%s18398_s1 + $0x2100] ss:$16 sps:$4 sm:$0xff]  }
 0x20b   :  { %8765 = vmatpush1.bf16.msra.mxu0 %v12391_v61  ;;  %v12472_v61 = vld [vmem:[%s18398_s1 + $0x2300] ss:$16 sps:$4 sm:$0xff]  }
 0x20c   :  { %8808 = vmatpush1.bf16.msra.mxu1 %v12394_v0  ;;  %8766 = vmatprep.subr.bf16.mxu0 %v12399_v1  ;;  %v12475_v0 = vld [vmem:[%s18399_s0 + $0x80] ss:$164 sps:$4 sm:$0xff]   ;;  %v12478_v1 = vld [vmem:[%s18399_s0 + $0x88] ss:$164 sps:$4 sm:$0xff]  }
 0x20d   :  { %8809 = vmatprep.subr.bf16.mxu1 %v12402_v39  ;;  %v12483_v39 = vld [vmem:[%s18398_s1 + $0x24e4] ss:$16 sps:$4 sm:$0xff]  }
 0x20f   :  { %8767 = vmatpush1.bf16.msra.mxu0 %v12397_v3  ;;  %v12486_v3 = vld [vmem:[%s18398_s1 + $0x26e4] ss:$16 sps:$4 sm:$0xff]  }
 0x210   :  { %8810 = vmatpush1.bf16.msra.mxu1 %v12400_v4  ;;  %8768 = vmatprep.subr.bf16.mxu0 %v12405_v5  ;;  %v12481_v4 = vld [vmem:[%s18398_s1 + $0x24e0] ss:$16 sps:$4 sm:$0xff]  }
 0x211   :  { %8811 = vmatprep.subr.bf16.mxu1 %v12408_v7  ;;  %v12484_v5 = vld [vmem:[%s18398_s1 + $0x26e0] ss:$16 sps:$4 sm:$0xff]   ;;  %v12489_v7 = vld [vmem:[%s18398_s1 + $0x24c4] ss:$16 sps:$4 sm:$0xff]  }
 0x213   :  { %8769 = vmatpush1.bf16.msra.mxu0 %v12403_v8  ;;  %v12492_v8 = vld [vmem:[%s18398_s1 + $0x26c4] ss:$16 sps:$4 sm:$0xff]  }
 0x214   :  { %8812 = vmatpush1.bf16.msra.mxu1 %v12406_v9  ;;  %8770 = vmatprep.subr.bf16.mxu0 %v12411_v10  ;;  %v12487_v9 = vld [vmem:[%s18398_s1 + $0x24c0] ss:$16 sps:$4 sm:$0xff]  }
 0x215   :  { %8813 = vmatprep.subr.bf16.mxu1 %v12414_v49  ;;  %v12490_v10 = vld [vmem:[%s18398_s1 + $0x26c0] ss:$16 sps:$4 sm:$0xff]   ;;  %v12579_v49 = vld [vmem:[%s18399_s0 + $0x94] ss:$164 sps:$4 sm:$0xff]  }
 0x217   :  { %8771 = vmatpush1.bf16.msra.mxu0 %v12409_v14  ;;  %v12582_v14 = vld [vmem:[%s18399_s0 + $0x9c] ss:$164 sps:$4 sm:$0xff]  }
 0x218   :  { %8814 = vmatpush1.bf16.msra.mxu1 %v12412_v15  ;;  %8772 = vmatprep.subr.bf16.mxu0 %v12417_v53  ;;  %v12495_v15 = vld [vmem:[%s18398_s1 + $0x24a4] ss:$16 sps:$4 sm:$0xff]  }
 0x219   :  { %8815 = vmatprep.subr.bf16.mxu1 %v12420_v16  ;;  %v12498_v53 = vld [vmem:[%s18398_s1 + $0x26a4] ss:$16 sps:$4 sm:$0xff]   ;;  %v12493_v16 = vld [vmem:[%s18398_s1 + $0x24a0] ss:$16 sps:$4 sm:$0xff]  }
 0x21b   :  { %8773 = vmatpush1.bf16.msra.mxu0 %v12415_v17  ;;  %v12496_v17 = vld [vmem:[%s18398_s1 + $0x26a0] ss:$16 sps:$4 sm:$0xff]  }
 0x21c   :  { %8816 = vmatpush1.bf16.msra.mxu1 %v12418_v18  ;;  %8774 = vmatprep.subr.bf16.mxu0 %v12423_v19  ;;  %v12501_v18 = vld [vmem:[%s18398_s1 + $0x2484] ss:$16 sps:$4 sm:$0xff]  }
 0x21d   :  { %8817 = vmatprep.subr.bf16.mxu1 %v12426_v20  ;;  %v12504_v19 = vld [vmem:[%s18398_s1 + $0x2684] ss:$16 sps:$4 sm:$0xff]   ;;  %v12499_v20 = vld [vmem:[%s18398_s1 + $0x2480] ss:$16 sps:$4 sm:$0xff]  }
 0x21f   :  { %8775 = vmatpush1.bf16.msra.mxu0 %v12421_v23  ;;  %v12502_v23 = vld [vmem:[%s18398_s1 + $0x2680] ss:$16 sps:$4 sm:$0xff]  }
 0x220   :  { %8818 = vmatpush1.bf16.msra.mxu1 %v12424_v24  ;;  %8776 = vmatprep.subr.bf16.mxu0 %v12429_v25  ;;  %v12507_v24 = vld [vmem:[%s18398_s1 + $0x2464] ss:$16 sps:$4 sm:$0xff]  }
 0x221   :  { %8819 = vmatprep.subr.bf16.mxu1 %v12432_v2  ;;  %v12510_v25 = vld [vmem:[%s18398_s1 + $0x2664] ss:$16 sps:$4 sm:$0xff]   ;;  %v12505_v2 = vld [vmem:[%s18398_s1 + $0x2460] ss:$16 sps:$4 sm:$0xff]  }
 0x223   :  { %8777 = vmatpush2.bf16.msra.mxu0 %v12427_v26  ;;  %v12508_v26 = vld [vmem:[%s18398_s1 + $0x2660] ss:$16 sps:$4 sm:$0xff]  }
 0x224   :  { %8820 = vmatpush2.bf16.msra.mxu1 %v12430_v28  ;;  %8778 = vmatprep.subr.bf16.mxu0 %v12435_v29  ;;  %v12513_v28 = vld [vmem:[%s18398_s1 + $0x2444] ss:$16 sps:$4 sm:$0xff]  }
 0x225   :  { %8821 = vmatprep.subr.bf16.mxu1 %v12438_v30  ;;  %v12516_v29 = vld [vmem:[%s18398_s1 + $0x2644] ss:$16 sps:$4 sm:$0xff]   ;;  %v12511_v30 = vld [vmem:[%s18398_s1 + $0x2440] ss:$16 sps:$4 sm:$0xff]  }
 0x227   :  { %8779 = vmatpush2.bf16.msra.mxu0 %v12433_v12  ;;  %v12514_v12 = vld [vmem:[%s18398_s1 + $0x2640] ss:$16 sps:$4 sm:$0xff]  }
 0x228   :  { %8822 = vmatpush2.bf16.msra.mxu1 %v12436_v31  ;;  %8780 = vmatprep.subr.bf16.mxu0 %v12441_v32  ;;  %v12519_v31 = vld [vmem:[%s18398_s1 + $0x2424] ss:$16 sps:$4 sm:$0xff]  }
 0x229   :  { %8823 = vmatprep.subr.bf16.mxu1 %v12444_v33  ;;  %v12522_v32 = vld [vmem:[%s18398_s1 + $0x2624] ss:$16 sps:$4 sm:$0xff]   ;;  %v12517_v33 = vld [vmem:[%s18398_s1 + $0x2420] ss:$16 sps:$4 sm:$0xff]  }
 0x22b   :  { %8781 = vmatpush2.bf16.msra.mxu0 %v12439_v34  ;;  %v12520_v34 = vld [vmem:[%s18398_s1 + $0x2620] ss:$16 sps:$4 sm:$0xff]  }
 0x22c   :  { %8824 = vmatpush2.bf16.msra.mxu1 %v12442_v37  ;;  %8782 = vmatprep.subr.bf16.mxu0 %v12447_v38  ;;  %v12525_v37 = vld [vmem:[%s18398_s1 + $0x2404] ss:$16 sps:$4 sm:$0xff]  }
 0x22d   :  { %8825 = vmatprep.subr.bf16.mxu1 %v12450_v40  ;;  %v12528_v38 = vld [vmem:[%s18398_s1 + $0x2604] ss:$16 sps:$4 sm:$0xff]   ;;  %v12523_v40 = vld [vmem:[%s18398_s1 + $0x2400] ss:$16 sps:$4 sm:$0xff]  }
 0x22f   :  { %8783 = vmatpush2.bf16.msra.mxu0 %v12445_v41  ;;  %v12526_v41 = vld [vmem:[%s18398_s1 + $0x2600] ss:$16 sps:$4 sm:$0xff]  }
 0x230   :  { %8826 = vmatpush2.bf16.msra.mxu1 %v12448_v42  ;;  %8784 = vmatprep.subr.bf16.mxu0 %v12453_v44  ;;  %v12531_v42 = vld [vmem:[%s18398_s1 + $0x25e4] ss:$16 sps:$4 sm:$0xff]  }
 0x231   :  { %8827 = vmatprep.subr.bf16.mxu1 %v12456_v45  ;;  %v12534_v44 = vld [vmem:[%s18398_s1 + $0x27e4] ss:$16 sps:$4 sm:$0xff]   ;;  %v12529_v45 = vld [vmem:[%s18398_s1 + $0x25e0] ss:$16 sps:$4 sm:$0xff]  }
 0x233   :  { %8785 = vmatpush2.bf16.msra.mxu0 %v12451_v46  ;;  %v12532_v46 = vld [vmem:[%s18398_s1 + $0x27e0] ss:$16 sps:$4 sm:$0xff]  }
 0x234   :  { %8828 = vmatpush2.bf16.msra.mxu1 %v12454_v47  ;;  %8786 = vmatprep.subr.bf16.mxu0 %v12459_v48  ;;  %v12537_v47 = vld [vmem:[%s18398_s1 + $0x25c4] ss:$16 sps:$4 sm:$0xff]  }
 0x235   :  { %8829 = vmatprep.subr.bf16.mxu1 %v12462_v50  ;;  %v12540_v48 = vld [vmem:[%s18398_s1 + $0x27c4] ss:$16 sps:$4 sm:$0xff]   ;;  %v12535_v50 = vld [vmem:[%s18398_s1 + $0x25c0] ss:$16 sps:$4 sm:$0xff]  }
 0x237   :  { %8787 = vmatpush2.bf16.msra.mxu0 %v12457_v51  ;;  %v12538_v51 = vld [vmem:[%s18398_s1 + $0x27c0] ss:$16 sps:$4 sm:$0xff]  }
 0x238   :  { %8830 = vmatpush2.bf16.msra.mxu1 %v12460_v52  ;;  %8788 = vmatprep.subr.bf16.mxu0 %v12465_v54  ;;  %v12543_v52 = vld [vmem:[%s18398_s1 + $0x25a4] ss:$16 sps:$4 sm:$0xff]  }
 0x239   :  { %8831 = vmatprep.subr.bf16.mxu1 %v12468_v55  ;;  %v12546_v54 = vld [vmem:[%s18398_s1 + $0x27a4] ss:$16 sps:$4 sm:$0xff]   ;;  %v12541_v55 = vld [vmem:[%s18398_s1 + $0x25a0] ss:$16 sps:$4 sm:$0xff]  }
 0x23b   :  { %8789 = vmatpush2.bf16.msra.mxu0 %v12463_v56  ;;  %v12544_v56 = vld [vmem:[%s18398_s1 + $0x27a0] ss:$16 sps:$4 sm:$0xff]  }
 0x23c   :  { %8832 = vmatpush2.bf16.msra.mxu1 %v12466_v57  ;;  %8790 = vmatprep.subr.bf16.mxu0 %v12471_v58  ;;  %v12549_v57 = vld [vmem:[%s18398_s1 + $0x2584] ss:$16 sps:$4 sm:$0xff]  }
 0x23d   :  { %8833 = vmatprep.subr.bf16.mxu1 %v12474_v59  ;;  %v12552_v58 = vld [vmem:[%s18398_s1 + $0x2784] ss:$16 sps:$4 sm:$0xff]   ;;  %v12547_v59 = vld [vmem:[%s18398_s1 + $0x2580] ss:$16 sps:$4 sm:$0xff]  }
 0x23f   :  { %8791 = vmatpush2.bf16.msra.mxu0 %v12469_v60  ;;  %v12550_v60 = vld [vmem:[%s18398_s1 + $0x2780] ss:$16 sps:$4 sm:$0xff]  }
 0x240   :  { %8834 = vmatpush2.bf16.msra.mxu1 %v12472_v61  ;;  %8846 = vmatprep.subr.bf16.mxu0 %v12483_v39  ;;  %v12555_v61 = vld [vmem:[%s18398_s1 + $0x2564] ss:$16 sps:$4 sm:$0xff]   ;;  %v12556_v39 = vld [vmem:[%s18398_s1 + $0x2760] ss:$16 sps:$4 sm:$0xff]  }
 0x241   :  { %8889 = vmatprep.subr.bf16.mxu1 %v12486_v3  ;;  %v12561_v3 = vld [vmem:[%s18398_s1 + $0x2544] ss:$16 sps:$4 sm:$0xff]  }
 0x242   :  { %8793 = vmatmul.mubr.bf16.vlgmr.msra.gmra.mxu0 %v12475_v0  ;;  %v12558_v0 = vld [vmem:[%s18398_s1 + $0x2764] ss:$16 sps:$4 sm:$0xff]  }
 0x243   :  { %8836 = vmatmul.mubr.bf16.vlgmr.msra.gmra.mxu1 %v12478_v1  ;;  %8847 = vmatpush1.bf16.msra.mxu0 %v12481_v4  ;;  %v12553_v1 = vld [vmem:[%s18398_s1 + $0x2560] ss:$16 sps:$4 sm:$0xff]   ;;  %v12564_v4 = vld [vmem:[%s18398_s1 + $0x2744] ss:$16 sps:$4 sm:$0xff]  }
 0x244   :  { %8890 = vmatpush1.bf16.msra.mxu1 %v12484_v5  ;;  %8848 = vmatprep.subr.bf16.mxu0 %v12489_v7  ;;  %v12559_v5 = vld [vmem:[%s18398_s1 + $0x2540] ss:$16 sps:$4 sm:$0xff]  }
 0x245   :  { %8891 = vmatprep.subr.bf16.mxu1 %v12492_v8  ;;  %8878 = vmatprep.mubr.bf16.mxu0 %v12579_v49  ;;  %v12562_v7 = vld [vmem:[%s18398_s1 + $0x2740] ss:$16 sps:$4 sm:$0xff]   ;;  %v12567_v8 = vld [vmem:[%s18398_s1 + $0x2524] ss:$16 sps:$4 sm:$0xff]  }
 0x246   :  { %8921 = vmatprep.mubr.bf16.mxu1 %v12582_v14  ;;  %v12568_v49 = vld [vmem:[%s18398_s1 + $0x2720] ss:$16 sps:$4 sm:$0xff]   ;;  %v12573_v14 = vld [vmem:[%s18398_s1 + $0x2504] ss:$16 sps:$4 sm:$0xff]  }
 0x247   :  { %8849 = vmatpush1.bf16.msra.mxu0 %v12487_v9  ;;  %v12570_v9 = vld [vmem:[%s18398_s1 + $0x2724] ss:$16 sps:$4 sm:$0xff]  }
 0x248   :  { %8892 = vmatpush1.bf16.msra.mxu1 %v12490_v10  ;;  %8850 = vmatprep.subr.bf16.mxu0 %v12495_v15  ;;  %v12565_v10 = vld [vmem:[%s18398_s1 + $0x2520] ss:$16 sps:$4 sm:$0xff]   ;;  %v12576_v15 = vld [vmem:[%s18398_s1 + $0x2704] ss:$16 sps:$4 sm:$0xff]  }
 0x249   :  { %8893 = vmatprep.subr.bf16.mxu1 %v12498_v53  ;;  %v12571_v53 = vld [vmem:[%s18398_s1 + $0x2500] ss:$16 sps:$4 sm:$0xff]  }
 0x24b   :  { %8851 = vmatpush1.bf16.msra.mxu0 %v12493_v16  ;;  %v12574_v16 = vld [vmem:[%s18398_s1 + $0x2700] ss:$16 sps:$4 sm:$0xff]  }
 0x24c   :  { %8894 = vmatpush1.bf16.msra.mxu1 %v12496_v17  ;;  %8852 = vmatprep.subr.bf16.mxu0 %v12501_v18  ;;  %v12577_v17 = vld [vmem:[%s18399_s0 + $0x90] ss:$164 sps:$4 sm:$0xff]   ;;  %v12580_v18 = vld [vmem:[%s18399_s0 + $0x98] ss:$164 sps:$4 sm:$0xff]  }
 0x24d   :  { %8895 = vmatprep.subr.bf16.mxu1 %v12504_v19  ;;  %v12585_v19 = vld [vmem:[%s18398_s1 + $0x2864] ss:$16 sps:$4 sm:$0xff]  }
 0x24f   :  { %8853 = vmatpush1.bf16.msra.mxu0 %v12499_v20  ;;  %v12588_v20 = vld [vmem:[%s18398_s1 + $0xec] ss:$16 sps:$4 sm:$0xff]  }
 0x250   :  { %8896 = vmatpush1.bf16.msra.mxu1 %v12502_v23  ;;  %8854 = vmatprep.subr.bf16.mxu0 %v12507_v24  ;;  %v12583_v23 = vld [vmem:[%s18398_s1 + $0x2860] ss:$16 sps:$4 sm:$0xff]   ;;  %v12586_v24 = vld [vmem:[%s18398_s1 + $0xe8] ss:$16 sps:$4 sm:$0xff]  }
 0x251   :  { %8897 = vmatprep.subr.bf16.mxu1 %v12510_v25  ;;  %v12591_v25 = vld [vmem:[%s18398_s1 + $0x2844] ss:$16 sps:$4 sm:$0xff]  }
 0x253   :  { %8855 = vmatpush1.bf16.msra.mxu0 %v12505_v2  ;;  %v12594_v2 = vld [vmem:[%s18398_s1 + $0xcc] ss:$16 sps:$4 sm:$0xff]  }
 0x254   :  { %8898 = vmatpush1.bf16.msra.mxu1 %v12508_v26  ;;  %8856 = vmatprep.subr.bf16.mxu0 %v12513_v28  ;;  %v12589_v26 = vld [vmem:[%s18398_s1 + $0x2840] ss:$16 sps:$4 sm:$0xff]   ;;  %v12592_v28 = vld [vmem:[%s18398_s1 + $0xc8] ss:$16 sps:$4 sm:$0xff]  }
 0x255   :  { %8899 = vmatprep.subr.bf16.mxu1 %v12516_v29  ;;  %v12597_v29 = vld [vmem:[%s18398_s1 + $0x2824] ss:$16 sps:$4 sm:$0xff]  }
 0x257   :  { %8857 = vmatpush1.bf16.msra.mxu0 %v12511_v30  ;;  %v12600_v30 = vld [vmem:[%s18398_s1 + $0xac] ss:$16 sps:$4 sm:$0xff]  }
 0x258   :  { %8900 = vmatpush1.bf16.msra.mxu1 %v12514_v12  ;;  %8858 = vmatprep.subr.bf16.mxu0 %v12519_v31  ;;  %v12595_v12 = vld [vmem:[%s18398_s1 + $0x2820] ss:$16 sps:$4 sm:$0xff]   ;;  %v12598_v31 = vld [vmem:[%s18398_s1 + $0xa8] ss:$16 sps:$4 sm:$0xff]  }
 0x259   :  { %8901 = vmatprep.subr.bf16.mxu1 %v12522_v32  ;;  %v13618_v32 = vmov 0  }
 0x25b   :  { %8859 = vmatpush1.bf16.msra.mxu0 %v12517_v33  ;;  %v13576_v33 = vld [vmem:[%s18399_s0 + $0x4] ss:$164 sps:$4 sm:$0xff]  }
 0x25c   :  { %8902 = vmatpush1.bf16.msra.mxu1 %v12520_v34  ;;  %8860 = vmatprep.subr.bf16.mxu0 %v12525_v37  ;;  %v12603_v34 = vld [vmem:[%s18398_s1 + $0x2804] ss:$16 sps:$4 sm:$0xff]   ;;  %v12606_v37 = vld [vmem:[%s18398_s1 + $0x8c] ss:$16 sps:$4 sm:$0xff]  }
 0x25d   :  { %8903 = vmatprep.subr.bf16.mxu1 %v12528_v38  ;;  %v12601_v38 = vld [vmem:[%s18398_s1 + $0x2800] ss:$16 sps:$4 sm:$0xff]  }
 0x25f   :  { %8861 = vmatpush1.bf16.msra.mxu0 %v12523_v40  ;;  %v12604_v40 = vld [vmem:[%s18398_s1 + $0x88] ss:$16 sps:$4 sm:$0xff]  }
 0x260   :  { %8904 = vmatpush1.bf16.msra.mxu1 %v12526_v41  ;;  %8862 = vmatprep.subr.bf16.mxu0 %v12531_v42  ;;  %v12607_v41 = vld [vmem:[%s18399_s0 + $0xa0] ss:$164 sps:$4 sm:$0xff]   ;;  %v12610_v42 = vld [vmem:[%s18398_s1 + $0x6c] ss:$16 sps:$4 sm:$0xff]  }
 0x261   :  { %8905 = vmatprep.subr.bf16.mxu1 %v12534_v44  ;;  %v12613_v44 = vld [vmem:[%s18398_s1 + $0x2ec] ss:$16 sps:$4 sm:$0xff]  }
 0x263   :  { %8863 = vmatpush2.bf16.msra.mxu0 %v12529_v45  ;;  %v12608_v45 = vld [vmem:[%s18398_s1 + $0x68] ss:$16 sps:$4 sm:$0xff]  }
 0x264   :  { %8906 = vmatpush2.bf16.msra.mxu1 %v12532_v46  ;;  %8864 = vmatprep.subr.bf16.mxu0 %v12537_v47  ;;  %v12611_v46 = vld [vmem:[%s18398_s1 + $0x2e8] ss:$16 sps:$4 sm:$0xff]   ;;  %v12616_v47 = vld [vmem:[%s18398_s1 + $0x4c] ss:$16 sps:$4 sm:$0xff]  }
 0x265   :  { %8907 = vmatprep.subr.bf16.mxu1 %v12540_v48  ;;  %v12619_v48 = vld [vmem:[%s18398_s1 + $0x2cc] ss:$16 sps:$4 sm:$0xff]  }
 0x267   :  { %8865 = vmatpush2.bf16.msra.mxu0 %v12535_v50  ;;  %v12614_v50 = vld [vmem:[%s18398_s1 + $0x48] ss:$16 sps:$4 sm:$0xff]  }
 0x268   :  { %8908 = vmatpush2.bf16.msra.mxu1 %v12538_v51  ;;  %8866 = vmatprep.subr.bf16.mxu0 %v12543_v52  ;;  %v12617_v51 = vld [vmem:[%s18398_s1 + $0x2c8] ss:$16 sps:$4 sm:$0xff]   ;;  %v12622_v52 = vld [vmem:[%s18398_s1 + $0x2c] ss:$16 sps:$4 sm:$0xff]  }
 0x269   :  { %8909 = vmatprep.subr.bf16.mxu1 %v12546_v54  ;;  %v12625_v54 = vld [vmem:[%s18398_s1 + $0x2ac] ss:$16 sps:$4 sm:$0xff]  }
 0x26b   :  { %8867 = vmatpush2.bf16.msra.mxu0 %v12541_v55  ;;  %v13577_v55 = vld [vmem:[%s18399_s0 + $0xc] ss:$164 sps:$4 sm:$0xff]  }
 0x26c   :  { %8910 = vmatpush2.bf16.msra.mxu1 %v12544_v56  ;;  %8868 = vmatprep.subr.bf16.mxu0 %v12549_v57  ;;  %v12620_v56 = vld [vmem:[%s18398_s1 + $0x28] ss:$16 sps:$4 sm:$0xff]  }
 0x26d   :  { %8911 = vmatprep.subr.bf16.mxu1 %v12552_v58  ;;  %v12623_v57 = vld [vmem:[%s18398_s1 + $0x2a8] ss:$16 sps:$4 sm:$0xff]   ;;  %v12628_v58 = vld [vmem:[%s18398_s1 + $0xc] ss:$16 sps:$4 sm:$0xff]  }
 0x26f   :  { %8869 = vmatpush2.bf16.msra.mxu0 %v12547_v59  ;;  %v12631_v59 = vld [vmem:[%s18398_s1 + $0x28c] ss:$16 sps:$4 sm:$0xff]  }
 0x270   :  { %8912 = vmatpush2.bf16.msra.mxu1 %v12550_v60  ;;  %8870 = vmatprep.subr.bf16.mxu0 %v12555_v61  ;;  %v12626_v60 = vld [vmem:[%s18398_s1 + $0x8] ss:$16 sps:$4 sm:$0xff]  }
 0x271   :  { %8913 = vmatprep.subr.bf16.mxu1 %v12558_v0  ;;  %v12629_v61 = vld [vmem:[%s18398_s1 + $0x288] ss:$16 sps:$4 sm:$0xff]   ;;  %v12634_v0 = vld [vmem:[%s18398_s1 + $0x1ec] ss:$16 sps:$4 sm:$0xff]  }
 0x273   :  { %8871 = vmatpush2.bf16.msra.mxu0 %v12553_v1  ;;  %v12637_v1 = vld [vmem:[%s18398_s1 + $0x26c] ss:$16 sps:$4 sm:$0xff]  }
 0x274   :  { %8914 = vmatpush2.bf16.msra.mxu1 %v12556_v39  ;;  %8872 = vmatprep.subr.bf16.mxu0 %v12561_v3  ;;  %v12632_v39 = vld [vmem:[%s18398_s1 + $0x1e8] ss:$16 sps:$4 sm:$0xff]  }
 0x275   :  { %8915 = vmatprep.subr.bf16.mxu1 %v12564_v4  ;;  %v12635_v3 = vld [vmem:[%s18398_s1 + $0x268] ss:$16 sps:$4 sm:$0xff]   ;;  %v12640_v4 = vld [vmem:[%s18398_s1 + $0x1cc] ss:$16 sps:$4 sm:$0xff]  }
 0x277   :  { %8873 = vmatpush2.bf16.msra.mxu0 %v12559_v5  ;;  %v12643_v5 = vld [vmem:[%s18398_s1 + $0x24c] ss:$16 sps:$4 sm:$0xff]  }
 0x278   :  { %8916 = vmatpush2.bf16.msra.mxu1 %v12562_v7  ;;  %8874 = vmatprep.subr.bf16.mxu0 %v12567_v8  ;;  %v12638_v7 = vld [vmem:[%s18398_s1 + $0x1c8] ss:$16 sps:$4 sm:$0xff]  }
 0x279   :  { %8917 = vmatprep.subr.bf16.mxu1 %v12570_v9  ;;  %v12641_v8 = vld [vmem:[%s18398_s1 + $0x248] ss:$16 sps:$4 sm:$0xff]   ;;  %v12646_v9 = vld [vmem:[%s18398_s1 + $0x1ac] ss:$16 sps:$4 sm:$0xff]  }
 0x27b   :  { %8875 = vmatpush2.bf16.msra.mxu0 %v12565_v10  ;;  %v12649_v10 = vld [vmem:[%s18398_s1 + $0x22c] ss:$16 sps:$4 sm:$0xff]  }
 0x27c   :  { %8918 = vmatpush2.bf16.msra.mxu1 %v12568_v49  ;;  %8876 = vmatprep.subr.bf16.mxu0 %v12573_v14  ;;  %v12644_v49 = vld [vmem:[%s18398_s1 + $0x1a8] ss:$16 sps:$4 sm:$0xff]  }
 0x27d   :  { %8919 = vmatprep.subr.bf16.mxu1 %v12576_v15  ;;  %v12647_v14 = vld [vmem:[%s18398_s1 + $0x228] ss:$16 sps:$4 sm:$0xff]   ;;  %v12652_v15 = vld [vmem:[%s18398_s1 + $0x18c] ss:$16 sps:$4 sm:$0xff]  }
 0x27f   :  { %8877 = vmatpush2.bf16.msra.mxu0 %v12571_v53  ;;  %v12655_v53 = vld [vmem:[%s18398_s1 + $0x20c] ss:$16 sps:$4 sm:$0xff]  }
 0x280   :  { %8920 = vmatpush2.bf16.msra.mxu1 %v12574_v16  ;;  %8940 = vmatprep.subr.bf16.mxu0 %v12585_v19  ;;  %v12650_v16 = vld [vmem:[%s18398_s1 + $0x188] ss:$16 sps:$4 sm:$0xff]   ;;  %v12661_v19 = vld [vmem:[%s18398_s1 + $0x3ec] ss:$16 sps:$4 sm:$0xff]  }
 0x281   :  { %8975 = vmatprep.subr.bf16.mxu1 %v12588_v20  ;;  %v12656_v20 = vld [vmem:[%s18398_s1 + $0x168] ss:$16 sps:$4 sm:$0xff]  }
 0x282   :  { %8879 = vmatmul.mubr.bf16.vlgmr.msra.gmra.mxu0 %v12577_v17  ;;  %v12653_v17 = vld [vmem:[%s18398_s1 + $0x208] ss:$16 sps:$4 sm:$0xff]  }
 0x283   :  { %8922 = vmatmul.mubr.bf16.vlgmr.msra.gmra.mxu1 %v12580_v18  ;;  %8941 = vmatpush1.bf16.msra.mxu0 %v12583_v23  ;;  %v12658_v18 = vld [vmem:[%s18398_s1 + $0x16c] ss:$16 sps:$4 sm:$0xff]   ;;  %v12659_v23 = vld [vmem:[%s18398_s1 + $0x3e8] ss:$16 sps:$4 sm:$0xff]  }
 0x284   :  { %8976 = vmatpush1.bf16.msra.mxu1 %v12586_v24  ;;  %8942 = vmatprep.subr.bf16.mxu0 %v12591_v25  ;;  %v12664_v24 = vld [vmem:[%s18398_s1 + $0x14c] ss:$16 sps:$4 sm:$0xff]  }
 0x285   :  { %8977 = vmatprep.subr.bf16.mxu1 %v12594_v2  ;;  %8964 = vmatprep.mubr.bf16.mxu0 %v13618_v32  ;;  %v12667_v25 = vld [vmem:[%s18398_s1 + $0x3cc] ss:$16 sps:$4 sm:$0xff]   ;;  %v12662_v2 = vld [vmem:[%s18398_s1 + $0x148] ss:$16 sps:$4 sm:$0xff]  }
 0x286   :  { %9007 = vmatprep.mubr.bf16.mxu1 %v13576_v33  ;;  %v12679_v33 = vld [vmem:[%s18398_s1 + $0x38c] ss:$16 sps:$4 sm:$0xff]  }
 0x287   :  { %8943 = vmatpush1.bf16.msra.mxu0 %v12589_v26  ;;  %v12665_v26 = vld [vmem:[%s18398_s1 + $0x3c8] ss:$16 sps:$4 sm:$0xff]  }
 0x288   :  { %8978 = vmatpush1.bf16.msra.mxu1 %v12592_v28  ;;  %8944 = vmatprep.subr.bf16.mxu0 %v12597_v29  ;;  %v12670_v28 = vld [vmem:[%s18398_s1 + $0x12c] ss:$16 sps:$4 sm:$0xff]  }
 0x289   :  { %8979 = vmatprep.subr.bf16.mxu1 %v12600_v30  ;;  %v12673_v29 = vld [vmem:[%s18398_s1 + $0x3ac] ss:$16 sps:$4 sm:$0xff]   ;;  %v12668_v30 = vld [vmem:[%s18398_s1 + $0x128] ss:$16 sps:$4 sm:$0xff]  }
 0x28b   :  { %8945 = vmatpush1.bf16.msra.mxu0 %v12595_v12  ;;  %v12671_v12 = vld [vmem:[%s18398_s1 + $0x3a8] ss:$16 sps:$4 sm:$0xff]  }
 0x28c   :  { %8980 = vmatpush1.bf16.msra.mxu1 %v12598_v31  ;;  %8946 = vmatprep.subr.bf16.mxu0 %v12603_v34  ;;  %v12676_v31 = vld [vmem:[%s18398_s1 + $0x10c] ss:$16 sps:$4 sm:$0xff]   ;;  %v12674_v34 = vld [vmem:[%s18398_s1 + $0x108] ss:$16 sps:$4 sm:$0xff]  }
 0x28d   :  { %8981 = vmatprep.subr.bf16.mxu1 %v12606_v37  ;;  %v12677_v37 = vld [vmem:[%s18398_s1 + $0x388] ss:$16 sps:$4 sm:$0xff]  }
 0x28f   :  { %8947 = vmatpush1.bf16.msra.mxu0 %v12601_v38  ;;  %v12682_v38 = vld [vmem:[%s18398_s1 + $0x36c] ss:$16 sps:$4 sm:$0xff]  }
 0x290   :  { %8982 = vmatpush1.bf16.msra.mxu1 %v12604_v40  ;;  %9018 = vmatprep.subr.bf16.mxu0 %v12613_v44  ;;  %v12685_v40 = vld [vmem:[%s18398_s1 + $0x4ec] ss:$16 sps:$4 sm:$0xff]  }
 0x291   :  { %8983 = vmatprep.subr.bf16.mxu1 %v12610_v42  ;;  %v12683_v42 = vld [vmem:[%s18398_s1 + $0x4e8] ss:$16 sps:$4 sm:$0xff]   ;;  %v12688_v44 = vld [vmem:[%s18398_s1 + $0x34c] ss:$16 sps:$4 sm:$0xff]  }
 0x292   :  { %11483 = vmatmul.mubr.msk.bf16.vlgmr.msra.gmra.mxu0 %vm8068_vm0, %v12607_v41  ;;  %v12680_v41 = vld [vmem:[%s18398_s1 + $0x368] ss:$16 sps:$4 sm:$0xff]  }
 0x293   :  { %9019 = vmatpush1.bf16.msra.mxu0 %v12611_v46  ;;  %9050 = vmatprep.mubr.bf16.mxu0 %v13577_v55  ;;  %v12686_v46 = vld [vmem:[%s18398_s1 + $0x348] ss:$16 sps:$4 sm:$0xff]  }
 0x294   :  { %8984 = vmatpush1.bf16.msra.mxu1 %v12608_v45  ;;  %9020 = vmatprep.subr.bf16.mxu0 %v12619_v48  ;;  %v12691_v45 = vld [vmem:[%s18398_s1 + $0x4cc] ss:$16 sps:$4 sm:$0xff]   ;;  %v13578_v48 = vld [vmem:[%s18399_s0] ss:$164 sps:$4 sm:$0xff]   ;;  %v13579_v55 = vld [vmem:[%s18399_s0 + $0x14] ss:$164 sps:$4 sm:$0xff]  }
 0x295   :  { %8985 = vmatprep.subr.bf16.mxu1 %v12616_v47  ;;  %v12689_v47 = vld [vmem:[%s18398_s1 + $0x4c8] ss:$16 sps:$4 sm:$0xff]  }
 0x297   :  { %9021 = vmatpush1.bf16.msra.mxu0 %v12617_v51  ;;  %v12697_v51 = vld [vmem:[%s18398_s1 + $0x4ac] ss:$16 sps:$4 sm:$0xff]  }
 0x298   :  { %8986 = vmatpush1.bf16.msra.mxu1 %v12614_v50  ;;  %9022 = vmatprep.subr.bf16.mxu0 %v12625_v54  ;;  %v12694_v50 = vld [vmem:[%s18398_s1 + $0x32c] ss:$16 sps:$4 sm:$0xff]   ;;  %v12695_v54 = vld [vmem:[%s18398_s1 + $0x4a8] ss:$16 sps:$4 sm:$0xff]  }
 0x299   :  { %8987 = vmatprep.subr.bf16.mxu1 %v12622_v52  ;;  %v12692_v52 = vld [vmem:[%s18398_s1 + $0x328] ss:$16 sps:$4 sm:$0xff]  }
 0x29b   :  { %9023 = vmatpush1.bf16.msra.mxu0 %v12623_v57  ;;  %v12703_v57 = vld [vmem:[%s18398_s1 + $0x48c] ss:$16 sps:$4 sm:$0xff]  }
 0x29c   :  { %8988 = vmatpush1.bf16.msra.mxu1 %v12620_v56  ;;  %9024 = vmatprep.subr.bf16.mxu0 %v12631_v59  ;;  %v12700_v56 = vld [vmem:[%s18398_s1 + $0x30c] ss:$16 sps:$4 sm:$0xff]   ;;  %v12701_v59 = vld [vmem:[%s18398_s1 + $0x488] ss:$16 sps:$4 sm:$0xff]  }
 0x29d   :  { %8989 = vmatprep.subr.bf16.mxu1 %v12628_v58  ;;  %v12698_v58 = vld [vmem:[%s18398_s1 + $0x308] ss:$16 sps:$4 sm:$0xff]  }
 0x29f   :  { %9025 = vmatpush1.bf16.msra.mxu0 %v12629_v61  ;;  %v12709_v61 = vld [vmem:[%s18398_s1 + $0x6ec] ss:$16 sps:$4 sm:$0xff]  }
 0x2a0   :  { %8990 = vmatpush1.bf16.msra.mxu1 %v12626_v60  ;;  %9026 = vmatprep.subr.bf16.mxu0 %v12637_v1  ;;  %v12706_v60 = vld [vmem:[%s18398_s1 + $0x46c] ss:$16 sps:$4 sm:$0xff]   ;;  %v12707_v1 = vld [vmem:[%s18398_s1 + $0x6e8] ss:$16 sps:$4 sm:$0xff]  }
 0x2a1   :  { %8991 = vmatprep.subr.bf16.mxu1 %v12634_v0  ;;  %v12704_v0 = vld [vmem:[%s18398_s1 + $0x468] ss:$16 sps:$4 sm:$0xff]  }
 0x2a3   :  { %9027 = vmatpush1.bf16.msra.mxu0 %v12635_v3  ;;  %v12715_v3 = vld [vmem:[%s18398_s1 + $0x6cc] ss:$16 sps:$4 sm:$0xff]  }
 0x2a4   :  { %8992 = vmatpush2.bf16.msra.mxu1 %v12632_v39  ;;  %9028 = vmatprep.subr.bf16.mxu0 %v12643_v5  ;;  %v12712_v39 = vld [vmem:[%s18398_s1 + $0x44c] ss:$16 sps:$4 sm:$0xff]   ;;  %v12713_v5 = vld [vmem:[%s18398_s1 + $0x6c8] ss:$16 sps:$4 sm:$0xff]  }
 0x2a5   :  { %8993 = vmatprep.subr.bf16.mxu1 %v12640_v4  ;;  %v12710_v4 = vld [vmem:[%s18398_s1 + $0x448] ss:$16 sps:$4 sm:$0xff]  }
 0x2a7   :  { %9029 = vmatpush1.bf16.msra.mxu0 %v12641_v8  ;;  %v12718_v8 = vld [vmem:[%s18398_s1 + $0x42c] ss:$16 sps:$4 sm:$0xff]  }
 0x2a8   :  { %8994 = vmatpush2.bf16.msra.mxu1 %v12638_v7  ;;  %9030 = vmatprep.subr.bf16.mxu0 %v12649_v10  ;;  %v13580_v7 = vld [vmem:[%s18399_s0 + $0x8] ss:$164 sps:$4 sm:$0xff]  }
 0x2a9   :  { %8995 = vmatprep.subr.bf16.mxu1 %v12646_v9  ;;  %v12721_v9 = vld [vmem:[%s18398_s1 + $0x6ac] ss:$16 sps:$4 sm:$0xff]   ;;  %v12716_v10 = vld [vmem:[%s18398_s1 + $0x428] ss:$16 sps:$4 sm:$0xff]  }
 0x2ab   :  { %9031 = vmatpush1.bf16.msra.mxu0 %v12647_v14  ;;  %v13581_v14 = vld [vmem:[%s18399_s0 + $0x1c] ss:$164 sps:$4 sm:$0xff]  }
 0x2ac   :  { %8996 = vmatpush2.bf16.msra.mxu1 %v12644_v49  ;;  %9032 = vmatprep.subr.bf16.mxu0 %v12655_v53  ;;  %v12719_v49 = vld [vmem:[%s18398_s1 + $0x6a8] ss:$16 sps:$4 sm:$0xff]   ;;  %v12727_v53 = vld [vmem:[%s18398_s1 + $0x68c] ss:$16 sps:$4 sm:$0xff]  }
 0x2ad   :  { %8997 = vmatprep.subr.bf16.mxu1 %v12652_v15  ;;  %v12724_v15 = vld [vmem:[%s18398_s1 + $0x40c] ss:$16 sps:$4 sm:$0xff]  }
 0x2af   :  { %9033 = vmatpush1.bf16.msra.mxu0 %v12653_v17  ;;  %v12725_v17 = vld [vmem:[%s18398_s1 + $0x688] ss:$16 sps:$4 sm:$0xff]  }
 0x2b0   :  { %8998 = vmatpush2.bf16.msra.mxu1 %v12650_v16  ;;  %9034 = vmatprep.subr.bf16.mxu0 %v12661_v19  ;;  %v12722_v16 = vld [vmem:[%s18398_s1 + $0x408] ss:$16 sps:$4 sm:$0xff]   ;;  %v12733_v19 = vld [vmem:[%s18398_s1 + $0x66c] ss:$16 sps:$4 sm:$0xff]  }
 0x2b1   :  { %8999 = vmatprep.subr.bf16.mxu1 %v12658_v18  ;;  %v12730_v18 = vld [vmem:[%s18398_s1 + $0x5ec] ss:$16 sps:$4 sm:$0xff]  }
 0x2b3   :  { %9035 = vmatpush2.bf16.msra.mxu0 %v12659_v23  ;;  %v12731_v23 = vld [vmem:[%s18398_s1 + $0x668] ss:$16 sps:$4 sm:$0xff]  }
 0x2b4   :  { %9000 = vmatpush2.bf16.msra.mxu1 %v12656_v20  ;;  %9036 = vmatprep.subr.bf16.mxu0 %v12667_v25  ;;  %v12728_v20 = vld [vmem:[%s18398_s1 + $0x5e8] ss:$16 sps:$4 sm:$0xff]   ;;  %v12739_v25 = vld [vmem:[%s18398_s1 + $0x64c] ss:$16 sps:$4 sm:$0xff]  }
 0x2b5   :  { %9001 = vmatprep.subr.bf16.mxu1 %v12664_v24  ;;  %v12736_v24 = vld [vmem:[%s18398_s1 + $0x5cc] ss:$16 sps:$4 sm:$0xff]  }
 0x2b7   :  { %9037 = vmatpush2.bf16.msra.mxu0 %v12665_v26  ;;  %v12737_v26 = vld [vmem:[%s18398_s1 + $0x648] ss:$16 sps:$4 sm:$0xff]  }
 0x2b8   :  { %9002 = vmatpush2.bf16.msra.mxu1 %v12662_v2  ;;  %9038 = vmatprep.subr.bf16.mxu0 %v12673_v29  ;;  %v12734_v2 = vld [vmem:[%s18398_s1 + $0x5c8] ss:$16 sps:$4 sm:$0xff]   ;;  %v12745_v29 = vld [vmem:[%s18398_s1 + $0x62c] ss:$16 sps:$4 sm:$0xff]  }
 0x2b9   :  { %9003 = vmatprep.subr.bf16.mxu1 %v12670_v28  ;;  %v12742_v28 = vld [vmem:[%s18398_s1 + $0x5ac] ss:$16 sps:$4 sm:$0xff]  }
 0x2bb   :  { %9039 = vmatpush2.bf16.msra.mxu0 %v12671_v12  ;;  %v12743_v12 = vld [vmem:[%s18398_s1 + $0x628] ss:$16 sps:$4 sm:$0xff]  }
 0x2bc   :  { %9004 = vmatpush2.bf16.msra.mxu1 %v12668_v30  ;;  %9040 = vmatprep.subr.bf16.mxu0 %v12679_v33  ;;  %v12740_v30 = vld [vmem:[%s18398_s1 + $0x5a8] ss:$16 sps:$4 sm:$0xff]   ;;  %v12751_v33 = vld [vmem:[%s18398_s1 + $0x60c] ss:$16 sps:$4 sm:$0xff]  }
 0x2bd   :  { %9005 = vmatprep.subr.bf16.mxu1 %v12676_v31  ;;  %v12748_v31 = vld [vmem:[%s18398_s1 + $0x58c] ss:$16 sps:$4 sm:$0xff]  }
 0x2bf   :  { %9041 = vmatpush2.bf16.msra.mxu0 %v12677_v37  ;;  %v12749_v37 = vld [vmem:[%s18398_s1 + $0x608] ss:$16 sps:$4 sm:$0xff]  }
 0x2c0   :  { %9006 = vmatpush2.bf16.msra.mxu1 %v12674_v34  ;;  %9042 = vmatprep.subr.bf16.mxu0 %v12682_v38  ;;  %v12746_v34 = vld [vmem:[%s18398_s1 + $0x588] ss:$16 sps:$4 sm:$0xff]   ;;  %v12754_v38 = vld [vmem:[%s18398_s1 + $0x56c] ss:$16 sps:$4 sm:$0xff]  }
 0x2c1   :  { %9061 = vmatprep.subr.bf16.mxu1 %v12685_v40  ;;  %v12757_v40 = vld [vmem:[%s18398_s1 + $0x7ec] ss:$16 sps:$4 sm:$0xff]  }
 0x2c3   :  { %9008 = vmatmul.mubr.bf16.vlgmr.msra.gmra.mxu1 %v13578_v48  ;;  %9043 = vmatpush2.bf16.msra.mxu0 %v12680_v41  ;;  %v12752_v41 = vld [vmem:[%s18398_s1 + $0x568] ss:$16 sps:$4 sm:$0xff]   ;;  %v12766_v48 = vld [vmem:[%s18398_s1 + $0x52c] ss:$16 sps:$4 sm:$0xff]  }
 0x2c4   :  { %9062 = vmatpush1.bf16.msra.mxu1 %v12683_v42  ;;  %9044 = vmatprep.subr.bf16.mxu0 %v12688_v44  ;;  %v12755_v42 = vld [vmem:[%s18398_s1 + $0x7e8] ss:$16 sps:$4 sm:$0xff]   ;;  %v12760_v44 = vld [vmem:[%s18398_s1 + $0x54c] ss:$16 sps:$4 sm:$0xff]  }
 0x2c5   :  { %9063 = vmatprep.subr.bf16.mxu1 %v12691_v45  ;;  %9093 = vmatprep.mubr.bf16.mxu1 %v13579_v55  ;;  %v12763_v45 = vld [vmem:[%s18398_s1 + $0x7cc] ss:$16 sps:$4 sm:$0xff]  }
 0x2c6   :  { %v12775_v55 = vld [vmem:[%s18398_s1 + $0x78c] ss:$16 sps:$4 sm:$0xff]  }
 0x2c7   :  { %9045 = vmatpush2.bf16.msra.mxu0 %v12686_v46  ;;  %v12758_v46 = vld [vmem:[%s18398_s1 + $0x548] ss:$16 sps:$4 sm:$0xff]  }
 0x2c8   :  { %9064 = vmatpush1.bf16.msra.mxu1 %v12689_v47  ;;  %9046 = vmatprep.subr.bf16.mxu0 %v12694_v50  ;;  %v12761_v47 = vld [vmem:[%s18398_s1 + $0x7c8] ss:$16 sps:$4 sm:$0xff]   ;;  %v12769_v50 = vld [vmem:[%s18398_s1 + $0x7ac] ss:$16 sps:$4 sm:$0xff]  }
 0x2c9   :  { %9065 = vmatprep.subr.bf16.mxu1 %v12697_v51  ;;  %v12764_v51 = vld [vmem:[%s18398_s1 + $0x528] ss:$16 sps:$4 sm:$0xff]  }
 0x2cb   :  { %9047 = vmatpush2.bf16.msra.mxu0 %v12692_v52  ;;  %v12767_v52 = vld [vmem:[%s18398_s1 + $0x7a8] ss:$16 sps:$4 sm:$0xff]  }
 0x2cc   :  { %9066 = vmatpush1.bf16.msra.mxu1 %v12695_v54  ;;  %9048 = vmatprep.subr.bf16.mxu0 %v12700_v56  ;;  %v12772_v54 = vld [vmem:[%s18398_s1 + $0x50c] ss:$16 sps:$4 sm:$0xff]   ;;  %v12770_v56 = vld [vmem:[%s18398_s1 + $0x508] ss:$16 sps:$4 sm:$0xff]  }
 0x2cd   :  { %9067 = vmatprep.subr.bf16.mxu1 %v12703_v57  ;;  %v12773_v57 = vld [vmem:[%s18398_s1 + $0x788] ss:$16 sps:$4 sm:$0xff]  }
 0x2cf   :  { %9049 = vmatpush2.bf16.msra.mxu0 %v12698_v58  ;;  %v12778_v58 = vld [vmem:[%s18398_s1 + $0x76c] ss:$16 sps:$4 sm:$0xff]  }
 0x2d0   :  { %9068 = vmatpush1.bf16.msra.mxu1 %v12701_v59  ;;  %9104 = vmatprep.subr.bf16.mxu0 %v12709_v61  ;;  %v12781_v59 = vld [vmem:[%s18398_s1 + $0x8ec] ss:$16 sps:$4 sm:$0xff]   ;;  %v12779_v61 = vld [vmem:[%s18398_s1 + $0x8e8] ss:$16 sps:$4 sm:$0xff]  }
 0x2d1   :  { %9069 = vmatprep.subr.bf16.mxu1 %v12706_v60  ;;  %v12776_v60 = vld [vmem:[%s18398_s1 + $0x768] ss:$16 sps:$4 sm:$0xff]  }
 0x2d2   :  { %9051 = vmatmul.mubr.bf16.vlgmr.msra.gmra.mxu0 %v13580_v7  ;;  %v12793_v7 = vld [vmem:[%s18398_s1 + $0x8ac] ss:$16 sps:$4 sm:$0xff]  }
 0x2d3   :  { %9105 = vmatpush1.bf16.msra.mxu0 %v12707_v1  ;;  %9136 = vmatprep.mubr.bf16.mxu0 %v13581_v14  ;;  %v12787_v1 = vld [vmem:[%s18398_s1 + $0x8cc] ss:$16 sps:$4 sm:$0xff]  }
 0x2d4   :  { %9070 = vmatpush1.bf16.msra.mxu1 %v12704_v0  ;;  %9106 = vmatprep.subr.bf16.mxu0 %v12715_v3  ;;  %v12784_v0 = vld [vmem:[%s18398_s1 + $0x74c] ss:$16 sps:$4 sm:$0xff]   ;;  %v12782_v3 = vld [vmem:[%s18398_s1 + $0x748] ss:$16 sps:$4 sm:$0xff]  }
 0x2d5   :  { %9071 = vmatprep.subr.bf16.mxu1 %v12712_v39  ;;  %v13582_v39 = vld [vmem:[%s18399_s0 + $0x10] ss:$164 sps:$4 sm:$0xff]   ;;  %v12799_v14 = vld [vmem:[%s18398_s1 + $0x88c] ss:$16 sps:$4 sm:$0xff]  }
 0x2d7   :  { %9107 = vmatpush1.bf16.msra.mxu0 %v12713_v5  ;;  %v12790_v5 = vld [vmem:[%s18398_s1 + $0x72c] ss:$16 sps:$4 sm:$0xff]  }
 0x2d8   :  { %9072 = vmatpush1.bf16.msra.mxu1 %v12710_v4  ;;  %9108 = vmatprep.subr.bf16.mxu0 %v12721_v9  ;;  %v12785_v4 = vld [vmem:[%s18398_s1 + $0x8c8] ss:$16 sps:$4 sm:$0xff]  }
 0x2d9   :  { %9073 = vmatprep.subr.bf16.mxu1 %v12718_v8  ;;  %v13583_v8 = vld [vmem:[%s18399_s0 + $0x24] ss:$164 sps:$4 sm:$0xff]  }
 0x2da   :  { %v12788_v9 = vld [vmem:[%s18398_s1 + $0x728] ss:$16 sps:$4 sm:$0xff]  }
 0x2db   :  { %9109 = vmatpush1.bf16.msra.mxu0 %v12719_v49  ;;  %v12796_v49 = vld [vmem:[%s18398_s1 + $0x70c] ss:$16 sps:$4 sm:$0xff]  }
 0x2dc   :  { %9074 = vmatpush1.bf16.msra.mxu1 %v12716_v10  ;;  %9110 = vmatprep.subr.bf16.mxu0 %v12727_v53  ;;  %v12791_v10 = vld [vmem:[%s18398_s1 + $0x8a8] ss:$16 sps:$4 sm:$0xff]  }
 0x2dd   :  { %9075 = vmatprep.subr.bf16.mxu1 %v12724_v15  ;;  %v12794_v15 = vld [vmem:[%s18398_s1 + $0x708] ss:$16 sps:$4 sm:$0xff]  }
 0x2de   :  { %v12797_v53 = vld [vmem:[%s18398_s1 + $0x888] ss:$16 sps:$4 sm:$0xff]  }
 0x2df   :  { %9111 = vmatpush1.bf16.msra.mxu0 %v12725_v17  ;;  %v12805_v17 = vld [vmem:[%s18398_s1 + $0xaec] ss:$16 sps:$4 sm:$0xff]  }
 0x2e0   :  { %9076 = vmatpush1.bf16.msra.mxu1 %v12722_v16  ;;  %9112 = vmatprep.subr.bf16.mxu0 %v12733_v19  ;;  %v12802_v16 = vld [vmem:[%s18398_s1 + $0x86c] ss:$16 sps:$4 sm:$0xff]   ;;  %v12803_v19 = vld [vmem:[%s18398_s1 + $0xae8] ss:$16 sps:$4 sm:$0xff]  }
 0x2e1   :  { %9077 = vmatprep.subr.bf16.mxu1 %v12730_v18  ;;  %v12800_v18 = vld [vmem:[%s18398_s1 + $0x868] ss:$16 sps:$4 sm:$0xff]  }
 0x2e3   :  { %9113 = vmatpush1.bf16.msra.mxu0 %v12731_v23  ;;  %v12811_v23 = vld [vmem:[%s18398_s1 + $0xacc] ss:$16 sps:$4 sm:$0xff]  }
 0x2e4   :  { %9078 = vmatpush2.bf16.msra.mxu1 %v12728_v20  ;;  %9114 = vmatprep.subr.bf16.mxu0 %v12739_v25  ;;  %v12808_v20 = vld [vmem:[%s18398_s1 + $0x84c] ss:$16 sps:$4 sm:$0xff]   ;;  %v12806_v25 = vld [vmem:[%s18398_s1 + $0x848] ss:$16 sps:$4 sm:$0xff]  }
 0x2e5   :  { %9079 = vmatprep.subr.bf16.mxu1 %v12736_v24  ;;  %v13584_v24 = vld [vmem:[%s18399_s0 + $0x18] ss:$164 sps:$4 sm:$0xff]  }
 0x2e7   :  { %9115 = vmatpush1.bf16.msra.mxu0 %v12737_v26  ;;  %v12814_v26 = vld [vmem:[%s18398_s1 + $0x82c] ss:$16 sps:$4 sm:$0xff]  }
 0x2e8   :  { %9080 = vmatpush2.bf16.msra.mxu1 %v12734_v2  ;;  %9116 = vmatprep.subr.bf16.mxu0 %v12745_v29  ;;  %v12809_v2 = vld [vmem:[%s18398_s1 + $0xac8] ss:$16 sps:$4 sm:$0xff]   ;;  %v13585_v29 = vld [vmem:[%s18399_s0 + $0x2c] ss:$164 sps:$4 sm:$0xff]  }
 0x2e9   :  { %9081 = vmatprep.subr.bf16.mxu1 %v12742_v28  ;;  %v12817_v28 = vld [vmem:[%s18398_s1 + $0xaac] ss:$16 sps:$4 sm:$0xff]  }
 0x2eb   :  { %9117 = vmatpush1.bf16.msra.mxu0 %v12743_v12  ;;  %v12815_v12 = vld [vmem:[%s18398_s1 + $0xaa8] ss:$16 sps:$4 sm:$0xff]  }
 0x2ec   :  { %9082 = vmatpush2.bf16.msra.mxu1 %v12740_v30  ;;  %9118 = vmatprep.subr.bf16.mxu0 %v12751_v33  ;;  %v12812_v30 = vld [vmem:[%s18398_s1 + $0x828] ss:$16 sps:$4 sm:$0xff]   ;;  %v12823_v33 = vld [vmem:[%s18398_s1 + $0xa8c] ss:$16 sps:$4 sm:$0xff]  }
 0x2ed   :  { %9083 = vmatprep.subr.bf16.mxu1 %v12748_v31  ;;  %v12820_v31 = vld [vmem:[%s18398_s1 + $0x80c] ss:$16 sps:$4 sm:$0xff]  }
 0x2ef   :  { %9119 = vmatpush1.bf16.msra.mxu0 %v12749_v37  ;;  %v12821_v37 = vld [vmem:[%s18398_s1 + $0xa88] ss:$16 sps:$4 sm:$0xff]  }
 0x2f0   :  { %9084 = vmatpush2.bf16.msra.mxu1 %v12746_v34  ;;  %9120 = vmatprep.subr.bf16.mxu0 %v12757_v40  ;;  %v12818_v34 = vld [vmem:[%s18398_s1 + $0x808] ss:$16 sps:$4 sm:$0xff]   ;;  %v12829_v40 = vld [vmem:[%s18398_s1 + $0xa6c] ss:$16 sps:$4 sm:$0xff]  }
 0x2f1   :  { %9085 = vmatprep.subr.bf16.mxu1 %v12754_v38  ;;  %v12826_v38 = vld [vmem:[%s18398_s1 + $0x9ec] ss:$16 sps:$4 sm:$0xff]  }
 0x2f3   :  { %9121 = vmatpush2.bf16.msra.mxu0 %v12755_v42  ;;  %v12827_v42 = vld [vmem:[%s18398_s1 + $0xa68] ss:$16 sps:$4 sm:$0xff]  }
 0x2f4   :  { %9086 = vmatpush2.bf16.msra.mxu1 %v12752_v41  ;;  %9122 = vmatprep.subr.bf16.mxu0 %v12763_v45  ;;  %v12824_v41 = vld [vmem:[%s18398_s1 + $0x9e8] ss:$16 sps:$4 sm:$0xff]   ;;  %v12835_v45 = vld [vmem:[%s18398_s1 + $0xa4c] ss:$16 sps:$4 sm:$0xff]  }
 0x2f5   :  { %9087 = vmatprep.subr.bf16.mxu1 %v12760_v44  ;;  %v12832_v44 = vld [vmem:[%s18398_s1 + $0x9cc] ss:$16 sps:$4 sm:$0xff]  }
 0x2f7   :  { %9123 = vmatpush2.bf16.msra.mxu0 %v12761_v47  ;;  %v12833_v47 = vld [vmem:[%s18398_s1 + $0xa48] ss:$16 sps:$4 sm:$0xff]  }
 0x2f8   :  { %9088 = vmatpush2.bf16.msra.mxu1 %v12758_v46  ;;  %9124 = vmatprep.subr.bf16.mxu0 %v12769_v50  ;;  %v12830_v46 = vld [vmem:[%s18398_s1 + $0x9c8] ss:$16 sps:$4 sm:$0xff]   ;;  %v12841_v50 = vld [vmem:[%s18398_s1 + $0xa2c] ss:$16 sps:$4 sm:$0xff]  }
 0x2f9   :  { %9089 = vmatprep.subr.bf16.mxu1 %v12766_v48  ;;  %v12838_v48 = vld [vmem:[%s18398_s1 + $0x9ac] ss:$16 sps:$4 sm:$0xff]  }
 0x2fb   :  { %9125 = vmatpush2.bf16.msra.mxu0 %v12767_v52  ;;  %v12839_v52 = vld [vmem:[%s18398_s1 + $0xa28] ss:$16 sps:$4 sm:$0xff]  }
 0x2fc   :  { %9090 = vmatpush2.bf16.msra.mxu1 %v12764_v51  ;;  %9126 = vmatprep.subr.bf16.mxu0 %v12775_v55  ;;  %v12836_v51 = vld [vmem:[%s18398_s1 + $0x9a8] ss:$16 sps:$4 sm:$0xff]   ;;  %v12847_v55 = vld [vmem:[%s18398_s1 + $0xa0c] ss:$16 sps:$4 sm:$0xff]  }
 0x2fd   :  { %9091 = vmatprep.subr.bf16.mxu1 %v12772_v54  ;;  %v12844_v54 = vld [vmem:[%s18398_s1 + $0x98c] ss:$16 sps:$4 sm:$0xff]  }
 0x2ff   :  { %9127 = vmatpush2.bf16.msra.mxu0 %v12773_v57  ;;  %v12845_v57 = vld [vmem:[%s18398_s1 + $0xa08] ss:$16 sps:$4 sm:$0xff]  }
 0x300   :  { %9092 = vmatpush2.bf16.msra.mxu1 %v12770_v56  ;;  %9128 = vmatprep.subr.bf16.mxu0 %v12778_v58  ;;  %v12842_v56 = vld [vmem:[%s18398_s1 + $0x988] ss:$16 sps:$4 sm:$0xff]   ;;  %v12850_v58 = vld [vmem:[%s18398_s1 + $0x96c] ss:$16 sps:$4 sm:$0xff]  }
 0x301   :  { %9147 = vmatprep.subr.bf16.mxu1 %v12781_v59  ;;  %v12853_v59 = vld [vmem:[%s18398_s1 + $0xbec] ss:$16 sps:$4 sm:$0xff]  }
 0x303   :  { %9094 = vmatmul.mubr.bf16.vlgmr.msra.gmra.mxu1 %v13582_v39  ;;  %9129 = vmatpush2.bf16.msra.mxu0 %v12776_v60  ;;  %v12848_v60 = vld [vmem:[%s18398_s1 + $0x968] ss:$16 sps:$4 sm:$0xff]  }
 0x304   :  { %9148 = vmatpush1.bf16.msra.mxu1 %v12779_v61  ;;  %9130 = vmatprep.subr.bf16.mxu0 %v12784_v0  ;;  %v12851_v61 = vld [vmem:[%s18398_s1 + $0xbe8] ss:$16 sps:$4 sm:$0xff]   ;;  %v12856_v0 = vld [vmem:[%s18398_s1 + $0x94c] ss:$16 sps:$4 sm:$0xff]  }
 0x305   :  { %9149 = vmatprep.subr.bf16.mxu1 %v12787_v1  ;;  %9179 = vmatprep.mubr.bf16.mxu1 %v13583_v8  ;;  %v12859_v1 = vld [vmem:[%s18398_s1 + $0xbcc] ss:$16 sps:$4 sm:$0xff]   ;;  %v12854_v39 = vld [vmem:[%s18398_s1 + $0x948] ss:$16 sps:$4 sm:$0xff]  }
 0x306   :  { %v12863_v8 = vld [vmem:[%s18398_s1 + $0xba8] ss:$16 sps:$4 sm:$0xff]  }
 0x307   :  { %9131 = vmatpush2.bf16.msra.mxu0 %v12782_v3  ;;  %v12857_v3 = vld [vmem:[%s18398_s1 + $0xbc8] ss:$16 sps:$4 sm:$0xff]  }
 0x308   :  { %9150 = vmatpush1.bf16.msra.mxu1 %v12785_v4  ;;  %9132 = vmatprep.subr.bf16.mxu0 %v12790_v5  ;;  %v12862_v4 = vld [vmem:[%s18398_s1 + $0x92c] ss:$16 sps:$4 sm:$0xff]  }
 0x309   :  { %9151 = vmatprep.subr.bf16.mxu1 %v12793_v7  ;;  %v12865_v5 = vld [vmem:[%s18398_s1 + $0xbac] ss:$16 sps:$4 sm:$0xff]   ;;  %v12860_v7 = vld [vmem:[%s18398_s1 + $0x928] ss:$16 sps:$4 sm:$0xff]  }
 0x30b   :  { %9133 = vmatpush2.bf16.msra.mxu0 %v12788_v9  ;;  %v12868_v9 = vld [vmem:[%s18398_s1 + $0x90c] ss:$16 sps:$4 sm:$0xff]  }
 0x30c   :  { %9152 = vmatpush1.bf16.msra.mxu1 %v12791_v10  ;;  %9134 = vmatprep.subr.bf16.mxu0 %v12796_v49  ;;  %v12871_v10 = vld [vmem:[%s18398_s1 + $0xb8c] ss:$16 sps:$4 sm:$0xff]   ;;  %v12866_v49 = vld [vmem:[%s18398_s1 + $0x908] ss:$16 sps:$4 sm:$0xff]  }
 0x30d   :  { %9153 = vmatprep.subr.bf16.mxu1 %v12799_v14  ;;  %v12869_v14 = vld [vmem:[%s18398_s1 + $0xb88] ss:$16 sps:$4 sm:$0xff]  }
 0x30f   :  { %9135 = vmatpush2.bf16.msra.mxu0 %v12794_v15  ;;  %v12874_v15 = vld [vmem:[%s18398_s1 + $0xb6c] ss:$16 sps:$4 sm:$0xff]  }
 0x310   :  { %9154 = vmatpush1.bf16.msra.mxu1 %v12797_v53  ;;  %9190 = vmatprep.subr.bf16.mxu0 %v12805_v17  ;;  %v12877_v53 = vld [vmem:[%s18398_s1 + $0xcec] ss:$16 sps:$4 sm:$0xff]   ;;  %v12875_v17 = vld [vmem:[%s18398_s1 + $0xce8] ss:$16 sps:$4 sm:$0xff]  }
 0x311   :  { %9155 = vmatprep.subr.bf16.mxu1 %v12802_v16  ;;  %v12872_v16 = vld [vmem:[%s18398_s1 + $0xb68] ss:$16 sps:$4 sm:$0xff]  }
 0x312   :  { %9137 = vmatmul.mubr.bf16.vlgmr.msra.gmra.mxu0 %v13584_v24  ;;  %v12881_v24 = vld [vmem:[%s18398_s1 + $0xcc8] ss:$16 sps:$4 sm:$0xff]  }
 0x313   :  { %9191 = vmatpush1.bf16.msra.mxu0 %v12803_v19  ;;  %9222 = vmatprep.mubr.bf16.mxu0 %v13585_v29  ;;  %v12883_v19 = vld [vmem:[%s18398_s1 + $0xccc] ss:$16 sps:$4 sm:$0xff]   ;;  %v12887_v29 = vld [vmem:[%s18398_s1 + $0xca8] ss:$16 sps:$4 sm:$0xff]  }
 0x314   :  { %9156 = vmatpush1.bf16.msra.mxu1 %v12800_v18  ;;  %9192 = vmatprep.subr.bf16.mxu0 %v12811_v23  ;;  %v12880_v18 = vld [vmem:[%s18398_s1 + $0xb4c] ss:$16 sps:$4 sm:$0xff]   ;;  %v12878_v23 = vld [vmem:[%s18398_s1 + $0xb48] ss:$16 sps:$4 sm:$0xff]  }
 0x315   :  { %9157 = vmatprep.subr.bf16.mxu1 %v12808_v20  ;;  %v13586_v20 = vld [vmem:[%s18399_s0 + $0x20] ss:$164 sps:$4 sm:$0xff]  }
 0x317   :  { %9193 = vmatpush1.bf16.msra.mxu0 %v12809_v2  ;;  %v12889_v2 = vld [vmem:[%s18398_s1 + $0xcac] ss:$16 sps:$4 sm:$0xff]  }
 0x318   :  { %9158 = vmatpush1.bf16.msra.mxu1 %v12806_v25  ;;  %9194 = vmatprep.subr.bf16.mxu0 %v12817_v28  ;;  %v12886_v25 = vld [vmem:[%s18398_s1 + $0xb2c] ss:$16 sps:$4 sm:$0xff]   ;;  %v12884_v28 = vld [vmem:[%s18398_s1 + $0xb28] ss:$16 sps:$4 sm:$0xff]  }
 0x319   :  { %9159 = vmatprep.subr.bf16.mxu1 %v12814_v26  ;;  %v13587_v26 = vld [vmem:[%s18399_s0 + $0x34] ss:$164 sps:$4 sm:$0xff]  }
 0x31b   :  { %9195 = vmatpush1.bf16.msra.mxu0 %v12815_v12  ;;  %v12895_v12 = vld [vmem:[%s18398_s1 + $0xc8c] ss:$16 sps:$4 sm:$0xff]  }
 0x31c   :  { %9160 = vmatpush1.bf16.msra.mxu1 %v12812_v30  ;;  %9196 = vmatprep.subr.bf16.mxu0 %v12823_v33  ;;  %v12892_v30 = vld [vmem:[%s18398_s1 + $0xb0c] ss:$16 sps:$4 sm:$0xff]   ;;  %v12893_v33 = vld [vmem:[%s18398_s1 + $0xc88] ss:$16 sps:$4 sm:$0xff]  }
 0x31d   :  { %9161 = vmatprep.subr.bf16.mxu1 %v12820_v31  ;;  %v12890_v31 = vld [vmem:[%s18398_s1 + $0xb08] ss:$16 sps:$4 sm:$0xff]  }
 0x31f   :  { %9197 = vmatpush1.bf16.msra.mxu0 %v12821_v37  ;;  %v12901_v37 = vld [vmem:[%s18398_s1 + $0xeec] ss:$16 sps:$4 sm:$0xff]  }
 0x320   :  { %9162 = vmatpush1.bf16.msra.mxu1 %v12818_v34  ;;  %9198 = vmatprep.subr.bf16.mxu0 %v12829_v40  ;;  %v12898_v34 = vld [vmem:[%s18398_s1 + $0xc6c] ss:$16 sps:$4 sm:$0xff]   ;;  %v12899_v40 = vld [vmem:[%s18398_s1 + $0xee8] ss:$16 sps:$4 sm:$0xff]  }
 0x321   :  { %9163 = vmatprep.subr.bf16.mxu1 %v12826_v38  ;;  %v12896_v38 = vld [vmem:[%s18398_s1 + $0xc68] ss:$16 sps:$4 sm:$0xff]  }
 0x323   :  { %9199 = vmatpush1.bf16.msra.mxu0 %v12827_v42  ;;  %v12907_v42 = vld [vmem:[%s18398_s1 + $0xecc] ss:$16 sps:$4 sm:$0xff]  }
 0x324   :  { %9164 = vmatpush2.bf16.msra.mxu1 %v12824_v41  ;;  %9200 = vmatprep.subr.bf16.mxu0 %v12835_v45  ;;  %v12904_v41 = vld [vmem:[%s18398_s1 + $0xc4c] ss:$16 sps:$4 sm:$0xff]   ;;  %v12902_v45 = vld [vmem:[%s18398_s1 + $0xc48] ss:$16 sps:$4 sm:$0xff]  }
 0x325   :  { %9165 = vmatprep.subr.bf16.mxu1 %v12832_v44  ;;  %v13588_v44 = vld [vmem:[%s18399_s0 + $0x28] ss:$164 sps:$4 sm:$0xff]  }
 0x327   :  { %9201 = vmatpush1.bf16.msra.mxu0 %v12833_v47  ;;  %v12910_v47 = vld [vmem:[%s18398_s1 + $0xc2c] ss:$16 sps:$4 sm:$0xff]  }
 0x328   :  { %9166 = vmatpush2.bf16.msra.mxu1 %v12830_v46  ;;  %9202 = vmatprep.subr.bf16.mxu0 %v12841_v50  ;;  %v12905_v46 = vld [vmem:[%s18398_s1 + $0xec8] ss:$16 sps:$4 sm:$0xff]   ;;  %v13589_v50 = vld [vmem:[%s18399_s0 + $0x3c] ss:$164 sps:$4 sm:$0xff]  }
 0x329   :  { %9167 = vmatprep.subr.bf16.mxu1 %v12838_v48  ;;  %v12913_v48 = vld [vmem:[%s18398_s1 + $0xeac] ss:$16 sps:$4 sm:$0xff]  }
 0x32b   :  { %9203 = vmatpush1.bf16.msra.mxu0 %v12839_v52  ;;  %v12911_v52 = vld [vmem:[%s18398_s1 + $0xea8] ss:$16 sps:$4 sm:$0xff]  }
 0x32c   :  { %9168 = vmatpush2.bf16.msra.mxu1 %v12836_v51  ;;  %9204 = vmatprep.subr.bf16.mxu0 %v12847_v55  ;;  %v12908_v51 = vld [vmem:[%s18398_s1 + $0xc28] ss:$16 sps:$4 sm:$0xff]   ;;  %v12919_v55 = vld [vmem:[%s18398_s1 + $0xe8c] ss:$16 sps:$4 sm:$0xff]  }
 0x32d   :  { %9169 = vmatprep.subr.bf16.mxu1 %v12844_v54  ;;  %v12916_v54 = vld [vmem:[%s18398_s1 + $0xc0c] ss:$16 sps:$4 sm:$0xff]  }
 0x32f   :  { %9205 = vmatpush1.bf16.msra.mxu0 %v12845_v57  ;;  %v12917_v57 = vld [vmem:[%s18398_s1 + $0xe88] ss:$16 sps:$4 sm:$0xff]  }
 0x330   :  { %9170 = vmatpush2.bf16.msra.mxu1 %v12842_v56  ;;  %9206 = vmatprep.subr.bf16.mxu0 %v12853_v59  ;;  %v12914_v56 = vld [vmem:[%s18398_s1 + $0xc08] ss:$16 sps:$4 sm:$0xff]   ;;  %v12925_v59 = vld [vmem:[%s18398_s1 + $0xe6c] ss:$16 sps:$4 sm:$0xff]  }
 0x331   :  { %9171 = vmatprep.subr.bf16.mxu1 %v12850_v58  ;;  %v12922_v58 = vld [vmem:[%s18398_s1 + $0xdec] ss:$16 sps:$4 sm:$0xff]  }
 0x333   :  { %9207 = vmatpush2.bf16.msra.mxu0 %v12851_v61  ;;  %v12923_v61 = vld [vmem:[%s18398_s1 + $0xe68] ss:$16 sps:$4 sm:$0xff]  }
 0x334   :  { %9172 = vmatpush2.bf16.msra.mxu1 %v12848_v60  ;;  %9208 = vmatprep.subr.bf16.mxu0 %v12859_v1  ;;  %v12920_v60 = vld [vmem:[%s18398_s1 + $0xde8] ss:$16 sps:$4 sm:$0xff]   ;;  %v12931_v1 = vld [vmem:[%s18398_s1 + $0xe4c] ss:$16 sps:$4 sm:$0xff]  }
 0x335   :  { %9173 = vmatprep.subr.bf16.mxu1 %v12856_v0  ;;  %v12928_v0 = vld [vmem:[%s18398_s1 + $0xdcc] ss:$16 sps:$4 sm:$0xff]  }
 0x337   :  { %9209 = vmatpush2.bf16.msra.mxu0 %v12857_v3  ;;  %v12929_v3 = vld [vmem:[%s18398_s1 + $0xe48] ss:$16 sps:$4 sm:$0xff]  }
 0x338   :  { %9174 = vmatpush2.bf16.msra.mxu1 %v12854_v39  ;;  %9210 = vmatprep.subr.bf16.mxu0 %v12865_v5  ;;  %v12926_v39 = vld [vmem:[%s18398_s1 + $0xdc8] ss:$16 sps:$4 sm:$0xff]   ;;  %v12937_v5 = vld [vmem:[%s18398_s1 + $0xe2c] ss:$16 sps:$4 sm:$0xff]  }
 0x339   :  { %9175 = vmatprep.subr.bf16.mxu1 %v12862_v4  ;;  %v12934_v4 = vld [vmem:[%s18398_s1 + $0xdac] ss:$16 sps:$4 sm:$0xff]  }
 0x33b   :  { %9211 = vmatpush2.bf16.msra.mxu0 %v12863_v8  ;;  %v12935_v8 = vld [vmem:[%s18398_s1 + $0xe28] ss:$16 sps:$4 sm:$0xff]  }
 0x33c   :  { %9176 = vmatpush2.bf16.msra.mxu1 %v12860_v7  ;;  %9212 = vmatprep.subr.bf16.mxu0 %v12871_v10  ;;  %v12932_v7 = vld [vmem:[%s18398_s1 + $0xda8] ss:$16 sps:$4 sm:$0xff]   ;;  %v12943_v10 = vld [vmem:[%s18398_s1 + $0xe0c] ss:$16 sps:$4 sm:$0xff]  }
 0x33d   :  { %9177 = vmatprep.subr.bf16.mxu1 %v12868_v9  ;;  %v12940_v9 = vld [vmem:[%s18398_s1 + $0xd8c] ss:$16 sps:$4 sm:$0xff]  }
 0x33f   :  { %9213 = vmatpush2.bf16.msra.mxu0 %v12869_v14  ;;  %v12941_v14 = vld [vmem:[%s18398_s1 + $0xe08] ss:$16 sps:$4 sm:$0xff]  }
 0x340   :  { %9178 = vmatpush2.bf16.msra.mxu1 %v12866_v49  ;;  %9214 = vmatprep.subr.bf16.mxu0 %v12874_v15  ;;  %v12938_v49 = vld [vmem:[%s18398_s1 + $0xd88] ss:$16 sps:$4 sm:$0xff]   ;;  %v12946_v15 = vld [vmem:[%s18398_s1 + $0xd6c] ss:$16 sps:$4 sm:$0xff]  }
 0x341   :  { %9233 = vmatprep.subr.bf16.mxu1 %v12877_v53  ;;  %v12949_v53 = vld [vmem:[%s18398_s1 + $0xfec] ss:$16 sps:$4 sm:$0xff]  }
 0x343   :  { %9180 = vmatmul.mubr.bf16.vlgmr.msra.gmra.mxu1 %v13586_v20  ;;  %9215 = vmatpush2.bf16.msra.mxu0 %v12872_v16  ;;  %v12944_v16 = vld [vmem:[%s18398_s1 + $0xd68] ss:$16 sps:$4 sm:$0xff]  }
 0x344   :  { %9234 = vmatpush1.bf16.msra.mxu1 %v12875_v17  ;;  %9216 = vmatprep.subr.bf16.mxu0 %v12880_v18  ;;  %v12947_v17 = vld [vmem:[%s18398_s1 + $0xfe8] ss:$16 sps:$4 sm:$0xff]   ;;  %v12952_v18 = vld [vmem:[%s18398_s1 + $0xd4c] ss:$16 sps:$4 sm:$0xff]  }
 0x345   :  { %9235 = vmatprep.subr.bf16.mxu1 %v12883_v19  ;;  %9265 = vmatprep.mubr.bf16.mxu1 %v13587_v26  ;;  %v12955_v19 = vld [vmem:[%s18398_s1 + $0xfcc] ss:$16 sps:$4 sm:$0xff]   ;;  %v12950_v20 = vld [vmem:[%s18398_s1 + $0xd48] ss:$16 sps:$4 sm:$0xff]  }
 0x346   :  { %v12959_v26 = vld [vmem:[%s18398_s1 + $0xfa8] ss:$16 sps:$4 sm:$0xff]  }
 0x347   :  { %9217 = vmatpush2.bf16.msra.mxu0 %v12878_v23  ;;  %v12953_v23 = vld [vmem:[%s18398_s1 + $0xfc8] ss:$16 sps:$4 sm:$0xff]  }
 0x348   :  { %9236 = vmatpush1.bf16.msra.mxu1 %v12881_v24  ;;  %9218 = vmatprep.subr.bf16.mxu0 %v12886_v25  ;;  %v12958_v24 = vld [vmem:[%s18398_s1 + $0xd2c] ss:$16 sps:$4 sm:$0xff]  }
 0x349   :  { %9237 = vmatprep.subr.bf16.mxu1 %v12889_v2  ;;  %v12961_v25 = vld [vmem:[%s18398_s1 + $0xfac] ss:$16 sps:$4 sm:$0xff]   ;;  %v12956_v2 = vld [vmem:[%s18398_s1 + $0xd28] ss:$16 sps:$4 sm:$0xff]  }
 0x34b   :  { %9219 = vmatpush2.bf16.msra.mxu0 %v12884_v28  ;;  %v12964_v28 = vld [vmem:[%s18398_s1 + $0xd0c] ss:$16 sps:$4 sm:$0xff]  }
 0x34c   :  { %9238 = vmatpush1.bf16.msra.mxu1 %v12887_v29  ;;  %9220 = vmatprep.subr.bf16.mxu0 %v12892_v30  ;;  %v12967_v29 = vld [vmem:[%s18398_s1 + $0xf8c] ss:$16 sps:$4 sm:$0xff]   ;;  %v12962_v30 = vld [vmem:[%s18398_s1 + $0xd08] ss:$16 sps:$4 sm:$0xff]  }
 0x34d   :  { %9239 = vmatprep.subr.bf16.mxu1 %v12895_v12  ;;  %v12965_v12 = vld [vmem:[%s18398_s1 + $0xf88] ss:$16 sps:$4 sm:$0xff]  }
 0x34f   :  { %9221 = vmatpush2.bf16.msra.mxu0 %v12890_v31  ;;  %v12970_v31 = vld [vmem:[%s18398_s1 + $0xf6c] ss:$16 sps:$4 sm:$0xff]  }
 0x350   :  { %9240 = vmatpush1.bf16.msra.mxu1 %v12893_v33  ;;  %9276 = vmatprep.subr.bf16.mxu0 %v12901_v37  ;;  %v12973_v33 = vld [vmem:[%s18398_s1 + $0x10ec] ss:$16 sps:$4 sm:$0xff]   ;;  %v12971_v37 = vld [vmem:[%s18398_s1 + $0x10e8] ss:$16 sps:$4 sm:$0xff]  }
 0x351   :  { %9241 = vmatprep.subr.bf16.mxu1 %v12898_v34  ;;  %v12968_v34 = vld [vmem:[%s18398_s1 + $0xf68] ss:$16 sps:$4 sm:$0xff]  }
 0x352   :  { %9223 = vmatmul.mubr.bf16.vlgmr.msra.gmra.mxu0 %v13588_v44  ;;  %v12977_v44 = vld [vmem:[%s18398_s1 + $0x10c8] ss:$16 sps:$4 sm:$0xff]  }
 0x353   :  { %9277 = vmatpush1.bf16.msra.mxu0 %v12899_v40  ;;  %9308 = vmatprep.mubr.bf16.mxu0 %v13589_v50  ;;  %v12979_v40 = vld [vmem:[%s18398_s1 + $0x10cc] ss:$16 sps:$4 sm:$0xff]   ;;  %v12983_v50 = vld [vmem:[%s18398_s1 + $0x10a8] ss:$16 sps:$4 sm:$0xff]  }
 0x354   :  { %9242 = vmatpush1.bf16.msra.mxu1 %v12896_v38  ;;  %9278 = vmatprep.subr.bf16.mxu0 %v12907_v42  ;;  %v12976_v38 = vld [vmem:[%s18398_s1 + $0xf4c] ss:$16 sps:$4 sm:$0xff]   ;;  %v12974_v42 = vld [vmem:[%s18398_s1 + $0xf48] ss:$16 sps:$4 sm:$0xff]  }
 0x355   :  { %9243 = vmatprep.subr.bf16.mxu1 %v12904_v41  ;;  %v13590_v41 = vld [vmem:[%s18399_s0 + $0x30] ss:$164 sps:$4 sm:$0xff]  }
 0x357   :  { %9279 = vmatpush1.bf16.msra.mxu0 %v12905_v46  ;;  %v12985_v46 = vld [vmem:[%s18398_s1 + $0x10ac] ss:$16 sps:$4 sm:$0xff]  }
 0x358   :  { %9244 = vmatpush1.bf16.msra.mxu1 %v12902_v45  ;;  %9280 = vmatprep.subr.bf16.mxu0 %v12913_v48  ;;  %v12982_v45 = vld [vmem:[%s18398_s1 + $0xf2c] ss:$16 sps:$4 sm:$0xff]   ;;  %v12980_v48 = vld [vmem:[%s18398_s1 + $0xf28] ss:$16 sps:$4 sm:$0xff]  }
 0x359   :  { %9245 = vmatprep.subr.bf16.mxu1 %v12910_v47  ;;  %v13591_v47 = vld [vmem:[%s18399_s0 + $0x44] ss:$164 sps:$4 sm:$0xff]  }
 0x35b   :  { %9281 = vmatpush1.bf16.msra.mxu0 %v12911_v52  ;;  %v12991_v52 = vld [vmem:[%s18398_s1 + $0x108c] ss:$16 sps:$4 sm:$0xff]  }
 0x35c   :  { %9246 = vmatpush1.bf16.msra.mxu1 %v12908_v51  ;;  %9282 = vmatprep.subr.bf16.mxu0 %v12919_v55  ;;  %v12988_v51 = vld [vmem:[%s18398_s1 + $0xf0c] ss:$16 sps:$4 sm:$0xff]   ;;  %v12989_v55 = vld [vmem:[%s18398_s1 + $0x1088] ss:$16 sps:$4 sm:$0xff]  }
 0x35d   :  { %9247 = vmatprep.subr.bf16.mxu1 %v12916_v54  ;;  %v12986_v54 = vld [vmem:[%s18398_s1 + $0xf08] ss:$16 sps:$4 sm:$0xff]  }
 0x35f   :  { %9283 = vmatpush1.bf16.msra.mxu0 %v12917_v57  ;;  %v12997_v57 = vld [vmem:[%s18398_s1 + $0x12ec] ss:$16 sps:$4 sm:$0xff]  }
 0x360   :  { %9248 = vmatpush1.bf16.msra.mxu1 %v12914_v56  ;;  %9284 = vmatprep.subr.bf16.mxu0 %v12925_v59  ;;  %v12994_v56 = vld [vmem:[%s18398_s1 + $0x106c] ss:$16 sps:$4 sm:$0xff]   ;;  %v12995_v59 = vld [vmem:[%s18398_s1 + $0x12e8] ss:$16 sps:$4 sm:$0xff]  }
 0x361   :  { %9249 = vmatprep.subr.bf16.mxu1 %v12922_v58  ;;  %v12992_v58 = vld [vmem:[%s18398_s1 + $0x1068] ss:$16 sps:$4 sm:$0xff]  }
 0x363   :  { %9285 = vmatpush1.bf16.msra.mxu0 %v12923_v61  ;;  %v13003_v61 = vld [vmem:[%s18398_s1 + $0x12cc] ss:$16 sps:$4 sm:$0xff]  }
 0x364   :  { %9250 = vmatpush2.bf16.msra.mxu1 %v12920_v60  ;;  %9286 = vmatprep.subr.bf16.mxu0 %v12931_v1  ;;  %v13000_v60 = vld [vmem:[%s18398_s1 + $0x104c] ss:$16 sps:$4 sm:$0xff]   ;;  %v12998_v1 = vld [vmem:[%s18398_s1 + $0x1048] ss:$16 sps:$4 sm:$0xff]  }
 0x365   :  { %9251 = vmatprep.subr.bf16.mxu1 %v12928_v0  ;;  %v13592_v0 = vld [vmem:[%s18399_s0 + $0x38] ss:$164 sps:$4 sm:$0xff]  }
 0x367   :  { %9287 = vmatpush1.bf16.msra.mxu0 %v12929_v3  ;;  %v13006_v3 = vld [vmem:[%s18398_s1 + $0x102c] ss:$16 sps:$4 sm:$0xff]  }
 0x368   :  { %9252 = vmatpush2.bf16.msra.mxu1 %v12926_v39  ;;  %9288 = vmatprep.subr.bf16.mxu0 %v12937_v5  ;;  %v13001_v39 = vld [vmem:[%s18398_s1 + $0x12c8] ss:$16 sps:$4 sm:$0xff]   ;;  %v13593_v5 = vld [vmem:[%s18399_s0 + $0x4c] ss:$164 sps:$4 sm:$0xff]  }
 0x369   :  { %9253 = vmatprep.subr.bf16.mxu1 %v12934_v4  ;;  %v13009_v4 = vld [vmem:[%s18398_s1 + $0x12ac] ss:$16 sps:$4 sm:$0xff]  }
 0x36b   :  { %9289 = vmatpush1.bf16.msra.mxu0 %v12935_v8  ;;  %v13007_v8 = vld [vmem:[%s18398_s1 + $0x12a8] ss:$16 sps:$4 sm:$0xff]  }
 0x36c   :  { %9254 = vmatpush2.bf16.msra.mxu1 %v12932_v7  ;;  %9290 = vmatprep.subr.bf16.mxu0 %v12943_v10  ;;  %v13004_v7 = vld [vmem:[%s18398_s1 + $0x1028] ss:$16 sps:$4 sm:$0xff]   ;;  %v13015_v10 = vld [vmem:[%s18398_s1 + $0x128c] ss:$16 sps:$4 sm:$0xff]  }
 0x36d   :  { %9255 = vmatprep.subr.bf16.mxu1 %v12940_v9  ;;  %v13012_v9 = vld [vmem:[%s18398_s1 + $0x100c] ss:$16 sps:$4 sm:$0xff]  }
 0x36f   :  { %9291 = vmatpush1.bf16.msra.mxu0 %v12941_v14  ;;  %v13013_v14 = vld [vmem:[%s18398_s1 + $0x1288] ss:$16 sps:$4 sm:$0xff]  }
 0x370   :  { %9256 = vmatpush2.bf16.msra.mxu1 %v12938_v49  ;;  %9292 = vmatprep.subr.bf16.mxu0 %v12949_v53  ;;  %v13010_v49 = vld [vmem:[%s18398_s1 + $0x1008] ss:$16 sps:$4 sm:$0xff]   ;;  %v13021_v53 = vld [vmem:[%s18398_s1 + $0x126c] ss:$16 sps:$4 sm:$0xff]  }
 0x371   :  { %9257 = vmatprep.subr.bf16.mxu1 %v12946_v15  ;;  %v13018_v15 = vld [vmem:[%s18398_s1 + $0x11ec] ss:$16 sps:$4 sm:$0xff]  }
 0x373   :  { %9293 = vmatpush2.bf16.msra.mxu0 %v12947_v17  ;;  %v13019_v17 = vld [vmem:[%s18398_s1 + $0x1268] ss:$16 sps:$4 sm:$0xff]  }
 0x374   :  { %9258 = vmatpush2.bf16.msra.mxu1 %v12944_v16  ;;  %9294 = vmatprep.subr.bf16.mxu0 %v12955_v19  ;;  %v13016_v16 = vld [vmem:[%s18398_s1 + $0x11e8] ss:$16 sps:$4 sm:$0xff]   ;;  %v13027_v19 = vld [vmem:[%s18398_s1 + $0x124c] ss:$16 sps:$4 sm:$0xff]  }
 0x375   :  { %9259 = vmatprep.subr.bf16.mxu1 %v12952_v18  ;;  %v13024_v18 = vld [vmem:[%s18398_s1 + $0x11cc] ss:$16 sps:$4 sm:$0xff]  }
 0x377   :  { %9295 = vmatpush2.bf16.msra.mxu0 %v12953_v23  ;;  %v13025_v23 = vld [vmem:[%s18398_s1 + $0x1248] ss:$16 sps:$4 sm:$0xff]  }
 0x378   :  { %9260 = vmatpush2.bf16.msra.mxu1 %v12950_v20  ;;  %9296 = vmatprep.subr.bf16.mxu0 %v12961_v25  ;;  %v13022_v20 = vld [vmem:[%s18398_s1 + $0x11c8] ss:$16 sps:$4 sm:$0xff]   ;;  %v13033_v25 = vld [vmem:[%s18398_s1 + $0x122c] ss:$16 sps:$4 sm:$0xff]  }
 0x379   :  { %9261 = vmatprep.subr.bf16.mxu1 %v12958_v24  ;;  %v13030_v24 = vld [vmem:[%s18398_s1 + $0x11ac] ss:$16 sps:$4 sm:$0xff]  }
 0x37b   :  { %9297 = vmatpush2.bf16.msra.mxu0 %v12959_v26  ;;  %v13031_v26 = vld [vmem:[%s18398_s1 + $0x1228] ss:$16 sps:$4 sm:$0xff]  }
 0x37c   :  { %9262 = vmatpush2.bf16.msra.mxu1 %v12956_v2  ;;  %9298 = vmatprep.subr.bf16.mxu0 %v12967_v29  ;;  %v13028_v2 = vld [vmem:[%s18398_s1 + $0x11a8] ss:$16 sps:$4 sm:$0xff]   ;;  %v13039_v29 = vld [vmem:[%s18398_s1 + $0x120c] ss:$16 sps:$4 sm:$0xff]  }
 0x37d   :  { %9263 = vmatprep.subr.bf16.mxu1 %v12964_v28  ;;  %v13036_v28 = vld [vmem:[%s18398_s1 + $0x118c] ss:$16 sps:$4 sm:$0xff]  }
 0x37f   :  { %9299 = vmatpush2.bf16.msra.mxu0 %v12965_v12  ;;  %v13037_v12 = vld [vmem:[%s18398_s1 + $0x1208] ss:$16 sps:$4 sm:$0xff]  }
 0x380   :  { %9264 = vmatpush2.bf16.msra.mxu1 %v12962_v30  ;;  %9300 = vmatprep.subr.bf16.mxu0 %v12970_v31  ;;  %v13034_v30 = vld [vmem:[%s18398_s1 + $0x1188] ss:$16 sps:$4 sm:$0xff]   ;;  %v13042_v31 = vld [vmem:[%s18398_s1 + $0x116c] ss:$16 sps:$4 sm:$0xff]  }
 0x381   :  { %9319 = vmatprep.subr.bf16.mxu1 %v12973_v33  ;;  %v13045_v33 = vld [vmem:[%s18398_s1 + $0x13ec] ss:$16 sps:$4 sm:$0xff]  }
 0x383   :  { %9266 = vmatmul.mubr.bf16.vlgmr.msra.gmra.mxu1 %v13590_v41  ;;  %9301 = vmatpush2.bf16.msra.mxu0 %v12968_v34  ;;  %v13040_v34 = vld [vmem:[%s18398_s1 + $0x1168] ss:$16 sps:$4 sm:$0xff]  }
 0x384   :  { %9320 = vmatpush1.bf16.msra.mxu1 %v12971_v37  ;;  %9302 = vmatprep.subr.bf16.mxu0 %v12976_v38  ;;  %v13043_v37 = vld [vmem:[%s18398_s1 + $0x13e8] ss:$16 sps:$4 sm:$0xff]   ;;  %v13048_v38 = vld [vmem:[%s18398_s1 + $0x114c] ss:$16 sps:$4 sm:$0xff]  }
 0x385   :  { %9321 = vmatprep.subr.bf16.mxu1 %v12979_v40  ;;  %9351 = vmatprep.mubr.bf16.mxu1 %v13591_v47  ;;  %v13051_v40 = vld [vmem:[%s18398_s1 + $0x13cc] ss:$16 sps:$4 sm:$0xff]   ;;  %v13046_v41 = vld [vmem:[%s18398_s1 + $0x1148] ss:$16 sps:$4 sm:$0xff]  }
 0x386   :  { %v13055_v47 = vld [vmem:[%s18398_s1 + $0x13a8] ss:$16 sps:$4 sm:$0xff]  }
 0x387   :  { %9303 = vmatpush2.bf16.msra.mxu0 %v12974_v42  ;;  %v13049_v42 = vld [vmem:[%s18398_s1 + $0x13c8] ss:$16 sps:$4 sm:$0xff]  }
 0x388   :  { %9322 = vmatpush1.bf16.msra.mxu1 %v12977_v44  ;;  %9304 = vmatprep.subr.bf16.mxu0 %v12982_v45  ;;  %v13054_v44 = vld [vmem:[%s18398_s1 + $0x112c] ss:$16 sps:$4 sm:$0xff]  }
 0x389   :  { %9323 = vmatprep.subr.bf16.mxu1 %v12985_v46  ;;  %v13057_v45 = vld [vmem:[%s18398_s1 + $0x13ac] ss:$16 sps:$4 sm:$0xff]   ;;  %v13052_v46 = vld [vmem:[%s18398_s1 + $0x1128] ss:$16 sps:$4 sm:$0xff]  }
 0x38b   :  { %9305 = vmatpush2.bf16.msra.mxu0 %v12980_v48  ;;  %v13060_v48 = vld [vmem:[%s18398_s1 + $0x110c] ss:$16 sps:$4 sm:$0xff]  }
 0x38c   :  { %9324 = vmatpush1.bf16.msra.mxu1 %v12983_v50  ;;  %9306 = vmatprep.subr.bf16.mxu0 %v12988_v51  ;;  %v13063_v50 = vld [vmem:[%s18398_s1 + $0x138c] ss:$16 sps:$4 sm:$0xff]   ;;  %v13058_v51 = vld [vmem:[%s18398_s1 + $0x1108] ss:$16 sps:$4 sm:$0xff]  }
 0x38d   :  { %9325 = vmatprep.subr.bf16.mxu1 %v12991_v52  ;;  %v13061_v52 = vld [vmem:[%s18398_s1 + $0x1388] ss:$16 sps:$4 sm:$0xff]  }
 0x38f   :  { %9307 = vmatpush2.bf16.msra.mxu0 %v12986_v54  ;;  %v13066_v54 = vld [vmem:[%s18398_s1 + $0x136c] ss:$16 sps:$4 sm:$0xff]  }
 0x390   :  { %9326 = vmatpush1.bf16.msra.mxu1 %v12989_v55  ;;  %9362 = vmatprep.subr.bf16.mxu0 %v12997_v57  ;;  %v13069_v55 = vld [vmem:[%s18398_s1 + $0x14ec] ss:$16 sps:$4 sm:$0xff]   ;;  %v13067_v57 = vld [vmem:[%s18398_s1 + $0x14e8] ss:$16 sps:$4 sm:$0xff]  }
 0x391   :  { %9327 = vmatprep.subr.bf16.mxu1 %v12994_v56  ;;  %v13064_v56 = vld [vmem:[%s18398_s1 + $0x1368] ss:$16 sps:$4 sm:$0xff]  }
 0x392   :  { %9309 = vmatmul.mubr.bf16.vlgmr.msra.gmra.mxu0 %v13592_v0  ;;  %v13073_v0 = vld [vmem:[%s18398_s1 + $0x14c8] ss:$16 sps:$4 sm:$0xff]  }
 0x393   :  { %9363 = vmatpush1.bf16.msra.mxu0 %v12995_v59  ;;  %9394 = vmatprep.mubr.bf16.mxu0 %v13593_v5  ;;  %v13075_v59 = vld [vmem:[%s18398_s1 + $0x14cc] ss:$16 sps:$4 sm:$0xff]   ;;  %v13079_v5 = vld [vmem:[%s18398_s1 + $0x14a8] ss:$16 sps:$4 sm:$0xff]  }
 0x394   :  { %9328 = vmatpush1.bf16.msra.mxu1 %v12992_v58  ;;  %9364 = vmatprep.subr.bf16.mxu0 %v13003_v61  ;;  %v13072_v58 = vld [vmem:[%s18398_s1 + $0x134c] ss:$16 sps:$4 sm:$0xff]   ;;  %v13070_v61 = vld [vmem:[%s18398_s1 + $0x1348] ss:$16 sps:$4 sm:$0xff]  }
 0x395   :  { %9329 = vmatprep.subr.bf16.mxu1 %v13000_v60  ;;  %v13594_v60 = vld [vmem:[%s18399_s0 + $0x40] ss:$164 sps:$4 sm:$0xff]  }
 0x397   :  { %9365 = vmatpush1.bf16.msra.mxu0 %v13001_v39  ;;  %v13081_v39 = vld [vmem:[%s18398_s1 + $0x14ac] ss:$16 sps:$4 sm:$0xff]  }
 0x398   :  { %9330 = vmatpush1.bf16.msra.mxu1 %v12998_v1  ;;  %9366 = vmatprep.subr.bf16.mxu0 %v13009_v4  ;;  %v13078_v1 = vld [vmem:[%s18398_s1 + $0x132c] ss:$16 sps:$4 sm:$0xff]   ;;  %v13076_v4 = vld [vmem:[%s18398_s1 + $0x1328] ss:$16 sps:$4 sm:$0xff]  }
 0x399   :  { %9331 = vmatprep.subr.bf16.mxu1 %v13006_v3  ;;  %v13595_v3 = vld [vmem:[%s18399_s0 + $0x54] ss:$164 sps:$4 sm:$0xff]  }
 0x39b   :  { %9367 = vmatpush1.bf16.msra.mxu0 %v13007_v8  ;;  %v13087_v8 = vld [vmem:[%s18398_s1 + $0x148c] ss:$16 sps:$4 sm:$0xff]  }
 0x39c   :  { %9332 = vmatpush1.bf16.msra.mxu1 %v13004_v7  ;;  %9368 = vmatprep.subr.bf16.mxu0 %v13015_v10  ;;  %v13084_v7 = vld [vmem:[%s18398_s1 + $0x130c] ss:$16 sps:$4 sm:$0xff]   ;;  %v13085_v10 = vld [vmem:[%s18398_s1 + $0x1488] ss:$16 sps:$4 sm:$0xff]  }
 0x39d   :  { %9333 = vmatprep.subr.bf16.mxu1 %v13012_v9  ;;  %v13082_v9 = vld [vmem:[%s18398_s1 + $0x1308] ss:$16 sps:$4 sm:$0xff]  }
 0x39f   :  { %9369 = vmatpush1.bf16.msra.mxu0 %v13013_v14  ;;  %v13093_v14 = vld [vmem:[%s18398_s1 + $0x16ec] ss:$16 sps:$4 sm:$0xff]  }
 0x3a0   :  { %9334 = vmatpush1.bf16.msra.mxu1 %v13010_v49  ;;  %9370 = vmatprep.subr.bf16.mxu0 %v13021_v53  ;;  %v13090_v49 = vld [vmem:[%s18398_s1 + $0x146c] ss:$16 sps:$4 sm:$0xff]   ;;  %v13091_v53 = vld [vmem:[%s18398_s1 + $0x16e8] ss:$16 sps:$4 sm:$0xff]  }
 0x3a1   :  { %9335 = vmatprep.subr.bf16.mxu1 %v13018_v15  ;;  %v13088_v15 = vld [vmem:[%s18398_s1 + $0x1468] ss:$16 sps:$4 sm:$0xff]  }
 0x3a3   :  { %9371 = vmatpush1.bf16.msra.mxu0 %v13019_v17  ;;  %v13099_v17 = vld [vmem:[%s18398_s1 + $0x16cc] ss:$16 sps:$4 sm:$0xff]  }
 0x3a4   :  { %9336 = vmatpush2.bf16.msra.mxu1 %v13016_v16  ;;  %9372 = vmatprep.subr.bf16.mxu0 %v13027_v19  ;;  %v13096_v16 = vld [vmem:[%s18398_s1 + $0x144c] ss:$16 sps:$4 sm:$0xff]   ;;  %v13094_v19 = vld [vmem:[%s18398_s1 + $0x1448] ss:$16 sps:$4 sm:$0xff]  }
 0x3a5   :  { %9337 = vmatprep.subr.bf16.mxu1 %v13024_v18  ;;  %v13596_v18 = vld [vmem:[%s18399_s0 + $0x48] ss:$164 sps:$4 sm:$0xff]  }
 0x3a7   :  { %9373 = vmatpush1.bf16.msra.mxu0 %v13025_v23  ;;  %v13102_v23 = vld [vmem:[%s18398_s1 + $0x142c] ss:$16 sps:$4 sm:$0xff]  }
 0x3a8   :  { %9338 = vmatpush2.bf16.msra.mxu1 %v13022_v20  ;;  %9374 = vmatprep.subr.bf16.mxu0 %v13033_v25  ;;  %v13097_v20 = vld [vmem:[%s18398_s1 + $0x16c8] ss:$16 sps:$4 sm:$0xff]   ;;  %v13597_v25 = vld [vmem:[%s18399_s0 + $0x5c] ss:$164 sps:$4 sm:$0xff]  }
 0x3a9   :  { %9339 = vmatprep.subr.bf16.mxu1 %v13030_v24  ;;  %v13105_v24 = vld [vmem:[%s18398_s1 + $0x16ac] ss:$16 sps:$4 sm:$0xff]  }
 0x3ab   :  { %9375 = vmatpush1.bf16.msra.mxu0 %v13031_v26  ;;  %v13103_v26 = vld [vmem:[%s18398_s1 + $0x16a8] ss:$16 sps:$4 sm:$0xff]  }
 0x3ac   :  { %9340 = vmatpush2.bf16.msra.mxu1 %v13028_v2  ;;  %9376 = vmatprep.subr.bf16.mxu0 %v13039_v29  ;;  %v13100_v2 = vld [vmem:[%s18398_s1 + $0x1428] ss:$16 sps:$4 sm:$0xff]   ;;  %v13111_v29 = vld [vmem:[%s18398_s1 + $0x168c] ss:$16 sps:$4 sm:$0xff]  }
 0x3ad   :  { %9341 = vmatprep.subr.bf16.mxu1 %v13036_v28  ;;  %v13108_v28 = vld [vmem:[%s18398_s1 + $0x140c] ss:$16 sps:$4 sm:$0xff]  }
 0x3af   :  { %9377 = vmatpush1.bf16.msra.mxu0 %v13037_v12  ;;  %v13109_v12 = vld [vmem:[%s18398_s1 + $0x1688] ss:$16 sps:$4 sm:$0xff]  }
 0x3b0   :  { %9342 = vmatpush2.bf16.msra.mxu1 %v13034_v30  ;;  %9378 = vmatprep.subr.bf16.mxu0 %v13045_v33  ;;  %v13106_v30 = vld [vmem:[%s18398_s1 + $0x1408] ss:$16 sps:$4 sm:$0xff]   ;;  %v13117_v33 = vld [vmem:[%s18398_s1 + $0x166c] ss:$16 sps:$4 sm:$0xff]  }
 0x3b1   :  { %9343 = vmatprep.subr.bf16.mxu1 %v13042_v31  ;;  %v13114_v31 = vld [vmem:[%s18398_s1 + $0x15ec] ss:$16 sps:$4 sm:$0xff]  }
 0x3b3   :  { %9379 = vmatpush2.bf16.msra.mxu0 %v13043_v37  ;;  %v13115_v37 = vld [vmem:[%s18398_s1 + $0x1668] ss:$16 sps:$4 sm:$0xff]  }
 0x3b4   :  { %9344 = vmatpush2.bf16.msra.mxu1 %v13040_v34  ;;  %9380 = vmatprep.subr.bf16.mxu0 %v13051_v40  ;;  %v13112_v34 = vld [vmem:[%s18398_s1 + $0x15e8] ss:$16 sps:$4 sm:$0xff]   ;;  %v13123_v40 = vld [vmem:[%s18398_s1 + $0x164c] ss:$16 sps:$4 sm:$0xff]  }
 0x3b5   :  { %9345 = vmatprep.subr.bf16.mxu1 %v13048_v38  ;;  %v13120_v38 = vld [vmem:[%s18398_s1 + $0x15cc] ss:$16 sps:$4 sm:$0xff]  }
 0x3b7   :  { %9381 = vmatpush2.bf16.msra.mxu0 %v13049_v42  ;;  %v13121_v42 = vld [vmem:[%s18398_s1 + $0x1648] ss:$16 sps:$4 sm:$0xff]  }
 0x3b8   :  { %9346 = vmatpush2.bf16.msra.mxu1 %v13046_v41  ;;  %9382 = vmatprep.subr.bf16.mxu0 %v13057_v45  ;;  %v13118_v41 = vld [vmem:[%s18398_s1 + $0x15c8] ss:$16 sps:$4 sm:$0xff]   ;;  %v13129_v45 = vld [vmem:[%s18398_s1 + $0x162c] ss:$16 sps:$4 sm:$0xff]  }
 0x3b9   :  { %9347 = vmatprep.subr.bf16.mxu1 %v13054_v44  ;;  %v13126_v44 = vld [vmem:[%s18398_s1 + $0x15ac] ss:$16 sps:$4 sm:$0xff]  }
 0x3bb   :  { %9383 = vmatpush2.bf16.msra.mxu0 %v13055_v47  ;;  %v13127_v47 = vld [vmem:[%s18398_s1 + $0x1628] ss:$16 sps:$4 sm:$0xff]  }
 0x3bc   :  { %9348 = vmatpush2.bf16.msra.mxu1 %v13052_v46  ;;  %9384 = vmatprep.subr.bf16.mxu0 %v13063_v50  ;;  %v13124_v46 = vld [vmem:[%s18398_s1 + $0x15a8] ss:$16 sps:$4 sm:$0xff]   ;;  %v13135_v50 = vld [vmem:[%s18398_s1 + $0x160c] ss:$16 sps:$4 sm:$0xff]  }
 0x3bd   :  { %9349 = vmatprep.subr.bf16.mxu1 %v13060_v48  ;;  %v13132_v48 = vld [vmem:[%s18398_s1 + $0x158c] ss:$16 sps:$4 sm:$0xff]  }
 0x3bf   :  { %9385 = vmatpush2.bf16.msra.mxu0 %v13061_v52  ;;  %v13133_v52 = vld [vmem:[%s18398_s1 + $0x1608] ss:$16 sps:$4 sm:$0xff]  }
 0x3c0   :  { %9350 = vmatpush2.bf16.msra.mxu1 %v13058_v51  ;;  %9386 = vmatprep.subr.bf16.mxu0 %v13066_v54  ;;  %v13130_v51 = vld [vmem:[%s18398_s1 + $0x1588] ss:$16 sps:$4 sm:$0xff]   ;;  %v13138_v54 = vld [vmem:[%s18398_s1 + $0x156c] ss:$16 sps:$4 sm:$0xff]  }
 0x3c1   :  { %9405 = vmatprep.subr.bf16.mxu1 %v13069_v55  ;;  %v13141_v55 = vld [vmem:[%s18398_s1 + $0x17ec] ss:$16 sps:$4 sm:$0xff]  }
 0x3c3   :  { %9352 = vmatmul.mubr.bf16.vlgmr.msra.gmra.mxu1 %v13594_v60  ;;  %9387 = vmatpush2.bf16.msra.mxu0 %v13064_v56  ;;  %v13136_v56 = vld [vmem:[%s18398_s1 + $0x1568] ss:$16 sps:$4 sm:$0xff]  }
 0x3c4   :  { %9406 = vmatpush1.bf16.msra.mxu1 %v13067_v57  ;;  %9388 = vmatprep.subr.bf16.mxu0 %v13072_v58  ;;  %v13139_v57 = vld [vmem:[%s18398_s1 + $0x17e8] ss:$16 sps:$4 sm:$0xff]   ;;  %v13144_v58 = vld [vmem:[%s18398_s1 + $0x154c] ss:$16 sps:$4 sm:$0xff]  }
 0x3c5   :  { %9407 = vmatprep.subr.bf16.mxu1 %v13075_v59  ;;  %9437 = vmatprep.mubr.bf16.mxu1 %v13595_v3  ;;  %v13147_v59 = vld [vmem:[%s18398_s1 + $0x17cc] ss:$16 sps:$4 sm:$0xff]   ;;  %v13142_v60 = vld [vmem:[%s18398_s1 + $0x1548] ss:$16 sps:$4 sm:$0xff]  }
 0x3c6   :  { %v13151_v3 = vld [vmem:[%s18398_s1 + $0x17a8] ss:$16 sps:$4 sm:$0xff]  }
 0x3c7   :  { %9389 = vmatpush2.bf16.msra.mxu0 %v13070_v61  ;;  %v13145_v61 = vld [vmem:[%s18398_s1 + $0x17c8] ss:$16 sps:$4 sm:$0xff]  }
 0x3c8   :  { %9408 = vmatpush1.bf16.msra.mxu1 %v13073_v0  ;;  %9390 = vmatprep.subr.bf16.mxu0 %v13078_v1  ;;  %v13150_v0 = vld [vmem:[%s18398_s1 + $0x152c] ss:$16 sps:$4 sm:$0xff]  }
 0x3c9   :  { %9409 = vmatprep.subr.bf16.mxu1 %v13081_v39  ;;  %v13153_v1 = vld [vmem:[%s18398_s1 + $0x17ac] ss:$16 sps:$4 sm:$0xff]   ;;  %v13148_v39 = vld [vmem:[%s18398_s1 + $0x1528] ss:$16 sps:$4 sm:$0xff]  }
 0x3cb   :  { %9391 = vmatpush2.bf16.msra.mxu0 %v13076_v4  ;;  %v13156_v4 = vld [vmem:[%s18398_s1 + $0x150c] ss:$16 sps:$4 sm:$0xff]  }
 0x3cc   :  { %9410 = vmatpush1.bf16.msra.mxu1 %v13079_v5  ;;  %9392 = vmatprep.subr.bf16.mxu0 %v13084_v7  ;;  %v13159_v5 = vld [vmem:[%s18398_s1 + $0x178c] ss:$16 sps:$4 sm:$0xff]   ;;  %v13154_v7 = vld [vmem:[%s18398_s1 + $0x1508] ss:$16 sps:$4 sm:$0xff]  }
 0x3cd   :  { %9411 = vmatprep.subr.bf16.mxu1 %v13087_v8  ;;  %v13157_v8 = vld [vmem:[%s18398_s1 + $0x1788] ss:$16 sps:$4 sm:$0xff]  }
 0x3cf   :  { %9393 = vmatpush2.bf16.msra.mxu0 %v13082_v9  ;;  %v13162_v9 = vld [vmem:[%s18398_s1 + $0x176c] ss:$16 sps:$4 sm:$0xff]  }
 0x3d0   :  { %9412 = vmatpush1.bf16.msra.mxu1 %v13085_v10  ;;  %9448 = vmatprep.subr.bf16.mxu0 %v13093_v14  ;;  %v13165_v10 = vld [vmem:[%s18398_s1 + $0x18ec] ss:$16 sps:$4 sm:$0xff]   ;;  %v13163_v14 = vld [vmem:[%s18398_s1 + $0x18e8] ss:$16 sps:$4 sm:$0xff]  }
 0x3d1   :  { %9413 = vmatprep.subr.bf16.mxu1 %v13090_v49  ;;  %v13160_v49 = vld [vmem:[%s18398_s1 + $0x1768] ss:$16 sps:$4 sm:$0xff]  }
 0x3d2   :  { %9395 = vmatmul.mubr.bf16.vlgmr.msra.gmra.mxu0 %v13596_v18  ;;  %v13169_v18 = vld [vmem:[%s18398_s1 + $0x18c8] ss:$16 sps:$4 sm:$0xff]  }
 0x3d3   :  { %9449 = vmatpush1.bf16.msra.mxu0 %v13091_v53  ;;  %9480 = vmatprep.mubr.bf16.mxu0 %v13597_v25  ;;  %v13171_v53 = vld [vmem:[%s18398_s1 + $0x18cc] ss:$16 sps:$4 sm:$0xff]   ;;  %v13175_v25 = vld [vmem:[%s18398_s1 + $0x18a8] ss:$16 sps:$4 sm:$0xff]  }
 0x3d4   :  { %9414 = vmatpush1.bf16.msra.mxu1 %v13088_v15  ;;  %9450 = vmatprep.subr.bf16.mxu0 %v13099_v17  ;;  %v13168_v15 = vld [vmem:[%s18398_s1 + $0x174c] ss:$16 sps:$4 sm:$0xff]   ;;  %v13166_v17 = vld [vmem:[%s18398_s1 + $0x1748] ss:$16 sps:$4 sm:$0xff]  }
 0x3d5   :  { %9415 = vmatprep.subr.bf16.mxu1 %v13096_v16  ;;  %v13598_v16 = vld [vmem:[%s18399_s0 + $0x50] ss:$164 sps:$4 sm:$0xff]  }
 0x3d7   :  { %9451 = vmatpush1.bf16.msra.mxu0 %v13097_v20  ;;  %v13177_v20 = vld [vmem:[%s18398_s1 + $0x18ac] ss:$16 sps:$4 sm:$0xff]  }
 0x3d8   :  { %9416 = vmatpush1.bf16.msra.mxu1 %v13094_v19  ;;  %9452 = vmatprep.subr.bf16.mxu0 %v13105_v24  ;;  %v13174_v19 = vld [vmem:[%s18398_s1 + $0x172c] ss:$16 sps:$4 sm:$0xff]   ;;  %v13172_v24 = vld [vmem:[%s18398_s1 + $0x1728] ss:$16 sps:$4 sm:$0xff]  }
 0x3d9   :  { %9417 = vmatprep.subr.bf16.mxu1 %v13102_v23  ;;  %v13599_v23 = vld [vmem:[%s18399_s0 + $0x64] ss:$164 sps:$4 sm:$0xff]  }
 0x3db   :  { %9453 = vmatpush1.bf16.msra.mxu0 %v13103_v26  ;;  %v13183_v26 = vld [vmem:[%s18398_s1 + $0x188c] ss:$16 sps:$4 sm:$0xff]  }
 0x3dc   :  { %9418 = vmatpush1.bf16.msra.mxu1 %v13100_v2  ;;  %9454 = vmatprep.subr.bf16.mxu0 %v13111_v29  ;;  %v13180_v2 = vld [vmem:[%s18398_s1 + $0x170c] ss:$16 sps:$4 sm:$0xff]   ;;  %v13181_v29 = vld [vmem:[%s18398_s1 + $0x1888] ss:$16 sps:$4 sm:$0xff]  }
 0x3dd   :  { %9419 = vmatprep.subr.bf16.mxu1 %v13108_v28  ;;  %v13178_v28 = vld [vmem:[%s18398_s1 + $0x1708] ss:$16 sps:$4 sm:$0xff]  }
 0x3df   :  { %9455 = vmatpush1.bf16.msra.mxu0 %v13109_v12  ;;  %v13189_v12 = vld [vmem:[%s18398_s1 + $0x1aec] ss:$16 sps:$4 sm:$0xff]  }
 0x3e0   :  { %9420 = vmatpush1.bf16.msra.mxu1 %v13106_v30  ;;  %9456 = vmatprep.subr.bf16.mxu0 %v13117_v33  ;;  %v13186_v30 = vld [vmem:[%s18398_s1 + $0x186c] ss:$16 sps:$4 sm:$0xff]   ;;  %v13187_v33 = vld [vmem:[%s18398_s1 + $0x1ae8] ss:$16 sps:$4 sm:$0xff]  }
 0x3e1   :  { %9421 = vmatprep.subr.bf16.mxu1 %v13114_v31  ;;  %v13184_v31 = vld [vmem:[%s18398_s1 + $0x1868] ss:$16 sps:$4 sm:$0xff]  }
 0x3e3   :  { %9457 = vmatpush1.bf16.msra.mxu0 %v13115_v37  ;;  %v13195_v37 = vld [vmem:[%s18398_s1 + $0x1acc] ss:$16 sps:$4 sm:$0xff]  }
 0x3e4   :  { %9422 = vmatpush2.bf16.msra.mxu1 %v13112_v34  ;;  %9458 = vmatprep.subr.bf16.mxu0 %v13123_v40  ;;  %v13192_v34 = vld [vmem:[%s18398_s1 + $0x184c] ss:$16 sps:$4 sm:$0xff]   ;;  %v13190_v40 = vld [vmem:[%s18398_s1 + $0x1848] ss:$16 sps:$4 sm:$0xff]  }
 0x3e5   :  { %9423 = vmatprep.subr.bf16.mxu1 %v13120_v38  ;;  %v13600_v38 = vld [vmem:[%s18399_s0 + $0x58] ss:$164 sps:$4 sm:$0xff]  }
 0x3e7   :  { %9459 = vmatpush1.bf16.msra.mxu0 %v13121_v42  ;;  %v13198_v42 = vld [vmem:[%s18398_s1 + $0x182c] ss:$16 sps:$4 sm:$0xff]  }
 0x3e8   :  { %9424 = vmatpush2.bf16.msra.mxu1 %v13118_v41  ;;  %9460 = vmatprep.subr.bf16.mxu0 %v13129_v45  ;;  %v13193_v41 = vld [vmem:[%s18398_s1 + $0x1ac8] ss:$16 sps:$4 sm:$0xff]   ;;  %v13601_v45 = vld [vmem:[%s18399_s0 + $0x6c] ss:$164 sps:$4 sm:$0xff]  }
 0x3e9   :  { %9425 = vmatprep.subr.bf16.mxu1 %v13126_v44  ;;  %v13201_v44 = vld [vmem:[%s18398_s1 + $0x1aac] ss:$16 sps:$4 sm:$0xff]  }
 0x3eb   :  { %9461 = vmatpush1.bf16.msra.mxu0 %v13127_v47  ;;  %v13199_v47 = vld [vmem:[%s18398_s1 + $0x1aa8] ss:$16 sps:$4 sm:$0xff]  }
 0x3ec   :  { %9426 = vmatpush2.bf16.msra.mxu1 %v13124_v46  ;;  %9462 = vmatprep.subr.bf16.mxu0 %v13135_v50  ;;  %v13196_v46 = vld [vmem:[%s18398_s1 + $0x1828] ss:$16 sps:$4 sm:$0xff]   ;;  %v13207_v50 = vld [vmem:[%s18398_s1 + $0x1a8c] ss:$16 sps:$4 sm:$0xff]  }
 0x3ed   :  { %9427 = vmatprep.subr.bf16.mxu1 %v13132_v48  ;;  %v13204_v48 = vld [vmem:[%s18398_s1 + $0x180c] ss:$16 sps:$4 sm:$0xff]  }
 0x3ef   :  { %9463 = vmatpush1.bf16.msra.mxu0 %v13133_v52  ;;  %v13205_v52 = vld [vmem:[%s18398_s1 + $0x1a88] ss:$16 sps:$4 sm:$0xff]  }
 0x3f0   :  { %9428 = vmatpush2.bf16.msra.mxu1 %v13130_v51  ;;  %9464 = vmatprep.subr.bf16.mxu0 %v13141_v55  ;;  %v13202_v51 = vld [vmem:[%s18398_s1 + $0x1808] ss:$16 sps:$4 sm:$0xff]   ;;  %v13213_v55 = vld [vmem:[%s18398_s1 + $0x1a6c] ss:$16 sps:$4 sm:$0xff]  }
 0x3f1   :  { %9429 = vmatprep.subr.bf16.mxu1 %v13138_v54  ;;  %v13210_v54 = vld [vmem:[%s18398_s1 + $0x19ec] ss:$16 sps:$4 sm:$0xff]  }
 0x3f3   :  { %9465 = vmatpush2.bf16.msra.mxu0 %v13139_v57  ;;  %v13211_v57 = vld [vmem:[%s18398_s1 + $0x1a68] ss:$16 sps:$4 sm:$0xff]  }
 0x3f4   :  { %9430 = vmatpush2.bf16.msra.mxu1 %v13136_v56  ;;  %9466 = vmatprep.subr.bf16.mxu0 %v13147_v59  ;;  %v13208_v56 = vld [vmem:[%s18398_s1 + $0x19e8] ss:$16 sps:$4 sm:$0xff]   ;;  %v13219_v59 = vld [vmem:[%s18398_s1 + $0x1a4c] ss:$16 sps:$4 sm:$0xff]  }
 0x3f5   :  { %9431 = vmatprep.subr.bf16.mxu1 %v13144_v58  ;;  %v13216_v58 = vld [vmem:[%s18398_s1 + $0x19cc] ss:$16 sps:$4 sm:$0xff]  }
 0x3f7   :  { %9467 = vmatpush2.bf16.msra.mxu0 %v13145_v61  ;;  %v13217_v61 = vld [vmem:[%s18398_s1 + $0x1a48] ss:$16 sps:$4 sm:$0xff]  }
 0x3f8   :  { %9432 = vmatpush2.bf16.msra.mxu1 %v13142_v60  ;;  %9468 = vmatprep.subr.bf16.mxu0 %v13153_v1  ;;  %v13214_v60 = vld [vmem:[%s18398_s1 + $0x19c8] ss:$16 sps:$4 sm:$0xff]   ;;  %v13225_v1 = vld [vmem:[%s18398_s1 + $0x1a2c] ss:$16 sps:$4 sm:$0xff]  }
 0x3f9   :  { %9433 = vmatprep.subr.bf16.mxu1 %v13150_v0  ;;  %v13222_v0 = vld [vmem:[%s18398_s1 + $0x19ac] ss:$16 sps:$4 sm:$0xff]  }
 0x3fb   :  { %9469 = vmatpush2.bf16.msra.mxu0 %v13151_v3  ;;  %v13223_v3 = vld [vmem:[%s18398_s1 + $0x1a28] ss:$16 sps:$4 sm:$0xff]  }
 0x3fc   :  { %9434 = vmatpush2.bf16.msra.mxu1 %v13148_v39  ;;  %9470 = vmatprep.subr.bf16.mxu0 %v13159_v5  ;;  %v13220_v39 = vld [vmem:[%s18398_s1 + $0x19a8] ss:$16 sps:$4 sm:$0xff]   ;;  %v13231_v5 = vld [vmem:[%s18398_s1 + $0x1a0c] ss:$16 sps:$4 sm:$0xff]  }
 0x3fd   :  { %9435 = vmatprep.subr.bf16.mxu1 %v13156_v4  ;;  %v13228_v4 = vld [vmem:[%s18398_s1 + $0x198c] ss:$16 sps:$4 sm:$0xff]  }
 0x3ff   :  { %9471 = vmatpush2.bf16.msra.mxu0 %v13157_v8  ;;  %v13229_v8 = vld [vmem:[%s18398_s1 + $0x1a08] ss:$16 sps:$4 sm:$0xff]  }
 0x400   :  { %9436 = vmatpush2.bf16.msra.mxu1 %v13154_v7  ;;  %9472 = vmatprep.subr.bf16.mxu0 %v13162_v9  ;;  %v13226_v7 = vld [vmem:[%s18398_s1 + $0x1988] ss:$16 sps:$4 sm:$0xff]   ;;  %v13234_v9 = vld [vmem:[%s18398_s1 + $0x196c] ss:$16 sps:$4 sm:$0xff]  }
 0x401   :  { %9491 = vmatprep.subr.bf16.mxu1 %v13165_v10  ;;  %v13237_v10 = vld [vmem:[%s18398_s1 + $0x1bec] ss:$16 sps:$4 sm:$0xff]  }
 0x403   :  { %9438 = vmatmul.mubr.bf16.vlgmr.msra.gmra.mxu1 %v13598_v16  ;;  %9473 = vmatpush2.bf16.msra.mxu0 %v13160_v49  ;;  %v13232_v49 = vld [vmem:[%s18398_s1 + $0x1968] ss:$16 sps:$4 sm:$0xff]  }
 0x404   :  { %9492 = vmatpush1.bf16.msra.mxu1 %v13163_v14  ;;  %9474 = vmatprep.subr.bf16.mxu0 %v13168_v15  ;;  %v13235_v14 = vld [vmem:[%s18398_s1 + $0x1be8] ss:$16 sps:$4 sm:$0xff]   ;;  %v13240_v15 = vld [vmem:[%s18398_s1 + $0x194c] ss:$16 sps:$4 sm:$0xff]  }
 0x405   :  { %9493 = vmatprep.subr.bf16.mxu1 %v13171_v53  ;;  %9523 = vmatprep.mubr.bf16.mxu1 %v13599_v23  ;;  %v13243_v53 = vld [vmem:[%s18398_s1 + $0x1bcc] ss:$16 sps:$4 sm:$0xff]   ;;  %v13238_v16 = vld [vmem:[%s18398_s1 + $0x1948] ss:$16 sps:$4 sm:$0xff]  }
 0x406   :  { %v13247_v23 = vld [vmem:[%s18398_s1 + $0x1ba8] ss:$16 sps:$4 sm:$0xff]  }
 0x407   :  { %9475 = vmatpush2.bf16.msra.mxu0 %v13166_v17  ;;  %v13241_v17 = vld [vmem:[%s18398_s1 + $0x1bc8] ss:$16 sps:$4 sm:$0xff]  }
 0x408   :  { %9494 = vmatpush1.bf16.msra.mxu1 %v13169_v18  ;;  %9476 = vmatprep.subr.bf16.mxu0 %v13174_v19  ;;  %v13246_v18 = vld [vmem:[%s18398_s1 + $0x192c] ss:$16 sps:$4 sm:$0xff]  }
 0x409   :  { %9495 = vmatprep.subr.bf16.mxu1 %v13177_v20  ;;  %v13249_v19 = vld [vmem:[%s18398_s1 + $0x1bac] ss:$16 sps:$4 sm:$0xff]   ;;  %v13244_v20 = vld [vmem:[%s18398_s1 + $0x1928] ss:$16 sps:$4 sm:$0xff]  }
 0x40b   :  { %9477 = vmatpush2.bf16.msra.mxu0 %v13172_v24  ;;  %v13252_v24 = vld [vmem:[%s18398_s1 + $0x190c] ss:$16 sps:$4 sm:$0xff]  }
 0x40c   :  { %9496 = vmatpush1.bf16.msra.mxu1 %v13175_v25  ;;  %9478 = vmatprep.subr.bf16.mxu0 %v13180_v2  ;;  %v13255_v25 = vld [vmem:[%s18398_s1 + $0x1b8c] ss:$16 sps:$4 sm:$0xff]   ;;  %v13250_v2 = vld [vmem:[%s18398_s1 + $0x1908] ss:$16 sps:$4 sm:$0xff]  }
 0x40d   :  { %9497 = vmatprep.subr.bf16.mxu1 %v13183_v26  ;;  %v13253_v26 = vld [vmem:[%s18398_s1 + $0x1b88] ss:$16 sps:$4 sm:$0xff]  }
 0x40f   :  { %9479 = vmatpush2.bf16.msra.mxu0 %v13178_v28  ;;  %v13258_v28 = vld [vmem:[%s18398_s1 + $0x1b6c] ss:$16 sps:$4 sm:$0xff]  }
 0x410   :  { %9498 = vmatpush1.bf16.msra.mxu1 %v13181_v29  ;;  %9534 = vmatprep.subr.bf16.mxu0 %v13189_v12  ;;  %v13261_v29 = vld [vmem:[%s18398_s1 + $0x1cec] ss:$16 sps:$4 sm:$0xff]   ;;  %v13259_v12 = vld [vmem:[%s18398_s1 + $0x1ce8] ss:$16 sps:$4 sm:$0xff]  }
 0x411   :  { %9499 = vmatprep.subr.bf16.mxu1 %v13186_v30  ;;  %v13256_v30 = vld [vmem:[%s18398_s1 + $0x1b68] ss:$16 sps:$4 sm:$0xff]  }
 0x412   :  { %9481 = vmatmul.mubr.bf16.vlgmr.msra.gmra.mxu0 %v13600_v38  ;;  %v13265_v38 = vld [vmem:[%s18398_s1 + $0x1cc8] ss:$16 sps:$4 sm:$0xff]  }
 0x413   :  { %9535 = vmatpush1.bf16.msra.mxu0 %v13187_v33  ;;  %9566 = vmatprep.mubr.bf16.mxu0 %v13601_v45  ;;  %v13267_v33 = vld [vmem:[%s18398_s1 + $0x1ccc] ss:$16 sps:$4 sm:$0xff]   ;;  %v13271_v45 = vld [vmem:[%s18398_s1 + $0x1ca8] ss:$16 sps:$4 sm:$0xff]  }
 0x414   :  { %9500 = vmatpush1.bf16.msra.mxu1 %v13184_v31  ;;  %9536 = vmatprep.subr.bf16.mxu0 %v13195_v37  ;;  %v13264_v31 = vld [vmem:[%s18398_s1 + $0x1b4c] ss:$16 sps:$4 sm:$0xff]   ;;  %v13262_v37 = vld [vmem:[%s18398_s1 + $0x1b48] ss:$16 sps:$4 sm:$0xff]  }
 0x415   :  { %9501 = vmatprep.subr.bf16.mxu1 %v13192_v34  ;;  %v13602_v34 = vld [vmem:[%s18399_s0 + $0x60] ss:$164 sps:$4 sm:$0xff]  }
 0x417   :  { %9537 = vmatpush1.bf16.msra.mxu0 %v13193_v41  ;;  %v13273_v41 = vld [vmem:[%s18398_s1 + $0x1cac] ss:$16 sps:$4 sm:$0xff]  }
 0x418   :  { %9502 = vmatpush1.bf16.msra.mxu1 %v13190_v40  ;;  %9538 = vmatprep.subr.bf16.mxu0 %v13201_v44  ;;  %v13270_v40 = vld [vmem:[%s18398_s1 + $0x1b2c] ss:$16 sps:$4 sm:$0xff]   ;;  %v13268_v44 = vld [vmem:[%s18398_s1 + $0x1b28] ss:$16 sps:$4 sm:$0xff]  }
 0x419   :  { %9503 = vmatprep.subr.bf16.mxu1 %v13198_v42  ;;  %v13603_v42 = vld [vmem:[%s18399_s0 + $0x74] ss:$164 sps:$4 sm:$0xff]  }
 0x41b   :  { %9539 = vmatpush1.bf16.msra.mxu0 %v13199_v47  ;;  %v13279_v47 = vld [vmem:[%s18398_s1 + $0x1c8c] ss:$16 sps:$4 sm:$0xff]  }
 0x41c   :  { %9504 = vmatpush1.bf16.msra.mxu1 %v13196_v46  ;;  %9540 = vmatprep.subr.bf16.mxu0 %v13207_v50  ;;  %v13276_v46 = vld [vmem:[%s18398_s1 + $0x1b0c] ss:$16 sps:$4 sm:$0xff]   ;;  %v13277_v50 = vld [vmem:[%s18398_s1 + $0x1c88] ss:$16 sps:$4 sm:$0xff]  }
 0x41d   :  { %9505 = vmatprep.subr.bf16.mxu1 %v13204_v48  ;;  %v13274_v48 = vld [vmem:[%s18398_s1 + $0x1b08] ss:$16 sps:$4 sm:$0xff]  }
 0x41f   :  { %9541 = vmatpush1.bf16.msra.mxu0 %v13205_v52  ;;  %v13285_v52 = vld [vmem:[%s18398_s1 + $0x1eec] ss:$16 sps:$4 sm:$0xff]  }
 0x420   :  { %9506 = vmatpush1.bf16.msra.mxu1 %v13202_v51  ;;  %9542 = vmatprep.subr.bf16.mxu0 %v13213_v55  ;;  %v13282_v51 = vld [vmem:[%s18398_s1 + $0x1c6c] ss:$16 sps:$4 sm:$0xff]   ;;  %v13283_v55 = vld [vmem:[%s18398_s1 + $0x1ee8] ss:$16 sps:$4 sm:$0xff]  }
 0x421   :  { %9507 = vmatprep.subr.bf16.mxu1 %v13210_v54  ;;  %v13280_v54 = vld [vmem:[%s18398_s1 + $0x1c68] ss:$16 sps:$4 sm:$0xff]  }
 0x423   :  { %9543 = vmatpush1.bf16.msra.mxu0 %v13211_v57  ;;  %v13291_v57 = vld [vmem:[%s18398_s1 + $0x1ecc] ss:$16 sps:$4 sm:$0xff]  }
 0x424   :  { %9508 = vmatpush2.bf16.msra.mxu1 %v13208_v56  ;;  %9544 = vmatprep.subr.bf16.mxu0 %v13219_v59  ;;  %v13288_v56 = vld [vmem:[%s18398_s1 + $0x1c4c] ss:$16 sps:$4 sm:$0xff]   ;;  %v13286_v59 = vld [vmem:[%s18398_s1 + $0x1c48] ss:$16 sps:$4 sm:$0xff]  }
 0x425   :  { %9509 = vmatprep.subr.bf16.mxu1 %v13216_v58  ;;  %v13604_v58 = vld [vmem:[%s18399_s0 + $0x68] ss:$164 sps:$4 sm:$0xff]  }
 0x427   :  { %9545 = vmatpush1.bf16.msra.mxu0 %v13217_v61  ;;  %v13294_v61 = vld [vmem:[%s18398_s1 + $0x1c2c] ss:$16 sps:$4 sm:$0xff]  }
 0x428   :  { %9510 = vmatpush2.bf16.msra.mxu1 %v13214_v60  ;;  %9546 = vmatprep.subr.bf16.mxu0 %v13225_v1  ;;  %v13289_v60 = vld [vmem:[%s18398_s1 + $0x1ec8] ss:$16 sps:$4 sm:$0xff]   ;;  %v13605_v1 = vld [vmem:[%s18399_s0 + $0x7c] ss:$164 sps:$4 sm:$0xff]  }
 0x429   :  { %9511 = vmatprep.subr.bf16.mxu1 %v13222_v0  ;;  %v13297_v0 = vld [vmem:[%s18398_s1 + $0x1eac] ss:$16 sps:$4 sm:$0xff]  }
 0x42b   :  { %9547 = vmatpush1.bf16.msra.mxu0 %v13223_v3  ;;  %v13295_v3 = vld [vmem:[%s18398_s1 + $0x1ea8] ss:$16 sps:$4 sm:$0xff]  }
 0x42c   :  { %9512 = vmatpush2.bf16.msra.mxu1 %v13220_v39  ;;  %9548 = vmatprep.subr.bf16.mxu0 %v13231_v5  ;;  %v13292_v39 = vld [vmem:[%s18398_s1 + $0x1c28] ss:$16 sps:$4 sm:$0xff]   ;;  %v13303_v5 = vld [vmem:[%s18398_s1 + $0x1e8c] ss:$16 sps:$4 sm:$0xff]  }
 0x42d   :  { %9513 = vmatprep.subr.bf16.mxu1 %v13228_v4  ;;  %v13300_v4 = vld [vmem:[%s18398_s1 + $0x1c0c] ss:$16 sps:$4 sm:$0xff]  }
 0x42f   :  { %9549 = vmatpush1.bf16.msra.mxu0 %v13229_v8  ;;  %v13301_v8 = vld [vmem:[%s18398_s1 + $0x1e88] ss:$16 sps:$4 sm:$0xff]  }
 0x430   :  { %9514 = vmatpush2.bf16.msra.mxu1 %v13226_v7  ;;  %9550 = vmatprep.subr.bf16.mxu0 %v13237_v10  ;;  %v13298_v7 = vld [vmem:[%s18398_s1 + $0x1c08] ss:$16 sps:$4 sm:$0xff]   ;;  %v13309_v10 = vld [vmem:[%s18398_s1 + $0x1e6c] ss:$16 sps:$4 sm:$0xff]  }
 0x431   :  { %9515 = vmatprep.subr.bf16.mxu1 %v13234_v9  ;;  %v13306_v9 = vld [vmem:[%s18398_s1 + $0x1dec] ss:$16 sps:$4 sm:$0xff]  }
 0x433   :  { %9551 = vmatpush2.bf16.msra.mxu0 %v13235_v14  ;;  %v13307_v14 = vld [vmem:[%s18398_s1 + $0x1e68] ss:$16 sps:$4 sm:$0xff]  }
 0x434   :  { %9516 = vmatpush2.bf16.msra.mxu1 %v13232_v49  ;;  %9552 = vmatprep.subr.bf16.mxu0 %v13243_v53  ;;  %v13304_v49 = vld [vmem:[%s18398_s1 + $0x1de8] ss:$16 sps:$4 sm:$0xff]   ;;  %v13315_v53 = vld [vmem:[%s18398_s1 + $0x1e4c] ss:$16 sps:$4 sm:$0xff]  }
 0x435   :  { %9517 = vmatprep.subr.bf16.mxu1 %v13240_v15  ;;  %v13312_v15 = vld [vmem:[%s18398_s1 + $0x1dcc] ss:$16 sps:$4 sm:$0xff]  }
 0x437   :  { %9553 = vmatpush2.bf16.msra.mxu0 %v13241_v17  ;;  %v13313_v17 = vld [vmem:[%s18398_s1 + $0x1e48] ss:$16 sps:$4 sm:$0xff]  }
 0x438   :  { %9518 = vmatpush2.bf16.msra.mxu1 %v13238_v16  ;;  %9554 = vmatprep.subr.bf16.mxu0 %v13249_v19  ;;  %v13310_v16 = vld [vmem:[%s18398_s1 + $0x1dc8] ss:$16 sps:$4 sm:$0xff]   ;;  %v13321_v19 = vld [vmem:[%s18398_s1 + $0x1e2c] ss:$16 sps:$4 sm:$0xff]  }
 0x439   :  { %9519 = vmatprep.subr.bf16.mxu1 %v13246_v18  ;;  %v13318_v18 = vld [vmem:[%s18398_s1 + $0x1dac] ss:$16 sps:$4 sm:$0xff]  }
 0x43b   :  { %9555 = vmatpush2.bf16.msra.mxu0 %v13247_v23  ;;  %v13319_v23 = vld [vmem:[%s18398_s1 + $0x1e28] ss:$16 sps:$4 sm:$0xff]  }
 0x43c   :  { %9520 = vmatpush2.bf16.msra.mxu1 %v13244_v20  ;;  %9556 = vmatprep.subr.bf16.mxu0 %v13255_v25  ;;  %v13316_v20 = vld [vmem:[%s18398_s1 + $0x1da8] ss:$16 sps:$4 sm:$0xff]   ;;  %v13327_v25 = vld [vmem:[%s18398_s1 + $0x1e0c] ss:$16 sps:$4 sm:$0xff]  }
 0x43d   :  { %9521 = vmatprep.subr.bf16.mxu1 %v13252_v24  ;;  %v13324_v24 = vld [vmem:[%s18398_s1 + $0x1d8c] ss:$16 sps:$4 sm:$0xff]  }
 0x43f   :  { %9557 = vmatpush2.bf16.msra.mxu0 %v13253_v26  ;;  %v13325_v26 = vld [vmem:[%s18398_s1 + $0x1e08] ss:$16 sps:$4 sm:$0xff]  }
 0x440   :  { %9522 = vmatpush2.bf16.msra.mxu1 %v13250_v2  ;;  %9558 = vmatprep.subr.bf16.mxu0 %v13258_v28  ;;  %v13322_v2 = vld [vmem:[%s18398_s1 + $0x1d88] ss:$16 sps:$4 sm:$0xff]   ;;  %v13330_v28 = vld [vmem:[%s18398_s1 + $0x1d6c] ss:$16 sps:$4 sm:$0xff]  }
 0x441   :  { %9577 = vmatprep.subr.bf16.mxu1 %v13261_v29  ;;  %v13333_v29 = vld [vmem:[%s18398_s1 + $0x1fec] ss:$16 sps:$4 sm:$0xff]  }
 0x443   :  { %9524 = vmatmul.mubr.bf16.vlgmr.msra.gmra.mxu1 %v13602_v34  ;;  %9559 = vmatpush2.bf16.msra.mxu0 %v13256_v30  ;;  %v13328_v30 = vld [vmem:[%s18398_s1 + $0x1d68] ss:$16 sps:$4 sm:$0xff]  }
 0x444   :  { %9578 = vmatpush1.bf16.msra.mxu1 %v13259_v12  ;;  %9560 = vmatprep.subr.bf16.mxu0 %v13264_v31  ;;  %v13331_v12 = vld [vmem:[%s18398_s1 + $0x1fe8] ss:$16 sps:$4 sm:$0xff]   ;;  %v13336_v31 = vld [vmem:[%s18398_s1 + $0x1d4c] ss:$16 sps:$4 sm:$0xff]  }
 0x445   :  { %9579 = vmatprep.subr.bf16.mxu1 %v13267_v33  ;;  %9609 = vmatprep.mubr.bf16.mxu1 %v13603_v42  ;;  %v13339_v33 = vld [vmem:[%s18398_s1 + $0x1fcc] ss:$16 sps:$4 sm:$0xff]   ;;  %v13334_v34 = vld [vmem:[%s18398_s1 + $0x1d48] ss:$16 sps:$4 sm:$0xff]  }
 0x446   :  { %v13343_v42 = vld [vmem:[%s18398_s1 + $0x1fa8] ss:$16 sps:$4 sm:$0xff]  }
 0x447   :  { %9561 = vmatpush2.bf16.msra.mxu0 %v13262_v37  ;;  %v13337_v37 = vld [vmem:[%s18398_s1 + $0x1fc8] ss:$16 sps:$4 sm:$0xff]  }
 0x448   :  { %9580 = vmatpush1.bf16.msra.mxu1 %v13265_v38  ;;  %9562 = vmatprep.subr.bf16.mxu0 %v13270_v40  ;;  %v13342_v38 = vld [vmem:[%s18398_s1 + $0x1d2c] ss:$16 sps:$4 sm:$0xff]  }
 0x449   :  { %9581 = vmatprep.subr.bf16.mxu1 %v13273_v41  ;;  %v13345_v40 = vld [vmem:[%s18398_s1 + $0x1fac] ss:$16 sps:$4 sm:$0xff]   ;;  %v13340_v41 = vld [vmem:[%s18398_s1 + $0x1d28] ss:$16 sps:$4 sm:$0xff]  }
 0x44b   :  { %9563 = vmatpush2.bf16.msra.mxu0 %v13268_v44  ;;  %v13348_v44 = vld [vmem:[%s18398_s1 + $0x1d0c] ss:$16 sps:$4 sm:$0xff]  }
 0x44c   :  { %9582 = vmatpush1.bf16.msra.mxu1 %v13271_v45  ;;  %9564 = vmatprep.subr.bf16.mxu0 %v13276_v46  ;;  %v13351_v45 = vld [vmem:[%s18398_s1 + $0x1f8c] ss:$16 sps:$4 sm:$0xff]   ;;  %v13346_v46 = vld [vmem:[%s18398_s1 + $0x1d08] ss:$16 sps:$4 sm:$0xff]  }
 0x44d   :  { %9583 = vmatprep.subr.bf16.mxu1 %v13279_v47  ;;  %v13349_v47 = vld [vmem:[%s18398_s1 + $0x1f88] ss:$16 sps:$4 sm:$0xff]  }
 0x44f   :  { %9565 = vmatpush2.bf16.msra.mxu0 %v13274_v48  ;;  %v13354_v48 = vld [vmem:[%s18398_s1 + $0x1f6c] ss:$16 sps:$4 sm:$0xff]  }
 0x450   :  { %9584 = vmatpush1.bf16.msra.mxu1 %v13277_v50  ;;  %9620 = vmatprep.subr.bf16.mxu0 %v13285_v52  ;;  %v13357_v50 = vld [vmem:[%s18398_s1 + $0x20ec] ss:$16 sps:$4 sm:$0xff]   ;;  %v13355_v52 = vld [vmem:[%s18398_s1 + $0x20e8] ss:$16 sps:$4 sm:$0xff]  }
 0x451   :  { %9585 = vmatprep.subr.bf16.mxu1 %v13282_v51  ;;  %v13352_v51 = vld [vmem:[%s18398_s1 + $0x1f68] ss:$16 sps:$4 sm:$0xff]  }
 0x452   :  { %9567 = vmatmul.mubr.bf16.vlgmr.msra.gmra.mxu0 %v13604_v58  ;;  %v13361_v58 = vld [vmem:[%s18398_s1 + $0x20c8] ss:$16 sps:$4 sm:$0xff]  }
 0x453   :  { %9621 = vmatpush1.bf16.msra.mxu0 %v13283_v55  ;;  %9652 = vmatprep.mubr.bf16.mxu0 %v13605_v1  ;;  %v13363_v55 = vld [vmem:[%s18398_s1 + $0x20cc] ss:$16 sps:$4 sm:$0xff]   ;;  %v13367_v1 = vld [vmem:[%s18398_s1 + $0x20a8] ss:$16 sps:$4 sm:$0xff]  }
 0x454   :  { %9586 = vmatpush1.bf16.msra.mxu1 %v13280_v54  ;;  %9622 = vmatprep.subr.bf16.mxu0 %v13291_v57  ;;  %v13360_v54 = vld [vmem:[%s18398_s1 + $0x1f4c] ss:$16 sps:$4 sm:$0xff]   ;;  %v13358_v57 = vld [vmem:[%s18398_s1 + $0x1f48] ss:$16 sps:$4 sm:$0xff]  }
 0x455   :  { %9587 = vmatprep.subr.bf16.mxu1 %v13288_v56  ;;  %v13606_v56 = vld [vmem:[%s18399_s0 + $0x70] ss:$164 sps:$4 sm:$0xff]  }
 0x457   :  { %9623 = vmatpush1.bf16.msra.mxu0 %v13289_v60  ;;  %v13369_v60 = vld [vmem:[%s18398_s1 + $0x20ac] ss:$16 sps:$4 sm:$0xff]  }
 0x458   :  { %9588 = vmatpush1.bf16.msra.mxu1 %v13286_v59  ;;  %9624 = vmatprep.subr.bf16.mxu0 %v13297_v0  ;;  %v13366_v59 = vld [vmem:[%s18398_s1 + $0x1f2c] ss:$16 sps:$4 sm:$0xff]   ;;  %v13364_v0 = vld [vmem:[%s18398_s1 + $0x1f28] ss:$16 sps:$4 sm:$0xff]  }
 0x459   :  { %9589 = vmatprep.subr.bf16.mxu1 %v13294_v61  ;;  %v13607_v61 = vld [vmem:[%s18399_s0 + $0x84] ss:$164 sps:$4 sm:$0xff]  }
 0x45b   :  { %9625 = vmatpush1.bf16.msra.mxu0 %v13295_v3  ;;  %v13375_v3 = vld [vmem:[%s18398_s1 + $0x208c] ss:$16 sps:$4 sm:$0xff]  }
 0x45c   :  { %9590 = vmatpush1.bf16.msra.mxu1 %v13292_v39  ;;  %9626 = vmatprep.subr.bf16.mxu0 %v13303_v5  ;;  %v13372_v39 = vld [vmem:[%s18398_s1 + $0x1f0c] ss:$16 sps:$4 sm:$0xff]   ;;  %v13373_v5 = vld [vmem:[%s18398_s1 + $0x2088] ss:$16 sps:$4 sm:$0xff]  }
 0x45d   :  { %9591 = vmatprep.subr.bf16.mxu1 %v13300_v4  ;;  %v13370_v4 = vld [vmem:[%s18398_s1 + $0x1f08] ss:$16 sps:$4 sm:$0xff]  }
 0x45f   :  { %9627 = vmatpush1.bf16.msra.mxu0 %v13301_v8  ;;  %v13381_v8 = vld [vmem:[%s18398_s1 + $0x22ec] ss:$16 sps:$4 sm:$0xff]  }
 0x460   :  { %9592 = vmatpush1.bf16.msra.mxu1 %v13298_v7  ;;  %9628 = vmatprep.subr.bf16.mxu0 %v13309_v10  ;;  %v13378_v7 = vld [vmem:[%s18398_s1 + $0x206c] ss:$16 sps:$4 sm:$0xff]   ;;  %v13379_v10 = vld [vmem:[%s18398_s1 + $0x22e8] ss:$16 sps:$4 sm:$0xff]  }
 0x461   :  { %9593 = vmatprep.subr.bf16.mxu1 %v13306_v9  ;;  %v13376_v9 = vld [vmem:[%s18398_s1 + $0x2068] ss:$16 sps:$4 sm:$0xff]  }
 0x463   :  { %9629 = vmatpush1.bf16.msra.mxu0 %v13307_v14  ;;  %v13387_v14 = vld [vmem:[%s18398_s1 + $0x22cc] ss:$16 sps:$4 sm:$0xff]  }
 0x464   :  { %9594 = vmatpush2.bf16.msra.mxu1 %v13304_v49  ;;  %9630 = vmatprep.subr.bf16.mxu0 %v13315_v53  ;;  %v13384_v49 = vld [vmem:[%s18398_s1 + $0x204c] ss:$16 sps:$4 sm:$0xff]   ;;  %v13382_v53 = vld [vmem:[%s18398_s1 + $0x2048] ss:$16 sps:$4 sm:$0xff]  }
 0x465   :  { %9595 = vmatprep.subr.bf16.mxu1 %v13312_v15  ;;  %v13608_v15 = vld [vmem:[%s18399_s0 + $0x78] ss:$164 sps:$4 sm:$0xff]  }
 0x467   :  { %9631 = vmatpush1.bf16.msra.mxu0 %v13313_v17  ;;  %v13390_v17 = vld [vmem:[%s18398_s1 + $0x202c] ss:$16 sps:$4 sm:$0xff]  }
 0x468   :  { %9596 = vmatpush2.bf16.msra.mxu1 %v13310_v16  ;;  %9632 = vmatprep.subr.bf16.mxu0 %v13321_v19  ;;  %v13385_v16 = vld [vmem:[%s18398_s1 + $0x22c8] ss:$16 sps:$4 sm:$0xff]   ;;  %v13609_v19 = vld [vmem:[%s18399_s0 + $0x8c] ss:$164 sps:$4 sm:$0xff]  }
 0x469   :  { %9597 = vmatprep.subr.bf16.mxu1 %v13318_v18  ;;  %v13393_v18 = vld [vmem:[%s18398_s1 + $0x22ac] ss:$16 sps:$4 sm:$0xff]  }
 0x46b   :  { %9633 = vmatpush1.bf16.msra.mxu0 %v13319_v23  ;;  %v13391_v23 = vld [vmem:[%s18398_s1 + $0x22a8] ss:$16 sps:$4 sm:$0xff]  }
 0x46c   :  { %9598 = vmatpush2.bf16.msra.mxu1 %v13316_v20  ;;  %9634 = vmatprep.subr.bf16.mxu0 %v13327_v25  ;;  %v13388_v20 = vld [vmem:[%s18398_s1 + $0x2028] ss:$16 sps:$4 sm:$0xff]   ;;  %v13399_v25 = vld [vmem:[%s18398_s1 + $0x228c] ss:$16 sps:$4 sm:$0xff]  }
 0x46d   :  { %9599 = vmatprep.subr.bf16.mxu1 %v13324_v24  ;;  %v13396_v24 = vld [vmem:[%s18398_s1 + $0x200c] ss:$16 sps:$4 sm:$0xff]  }
 0x46f   :  { %9635 = vmatpush1.bf16.msra.mxu0 %v13325_v26  ;;  %v13397_v26 = vld [vmem:[%s18398_s1 + $0x2288] ss:$16 sps:$4 sm:$0xff]  }
 0x470   :  { %9600 = vmatpush2.bf16.msra.mxu1 %v13322_v2  ;;  %9636 = vmatprep.subr.bf16.mxu0 %v13333_v29  ;;  %v13394_v2 = vld [vmem:[%s18398_s1 + $0x2008] ss:$16 sps:$4 sm:$0xff]   ;;  %v13405_v29 = vld [vmem:[%s18398_s1 + $0x226c] ss:$16 sps:$4 sm:$0xff]  }
 0x471   :  { %9601 = vmatprep.subr.bf16.mxu1 %v13330_v28  ;;  %v13402_v28 = vld [vmem:[%s18398_s1 + $0x21ec] ss:$16 sps:$4 sm:$0xff]  }
 0x473   :  { %9637 = vmatpush2.bf16.msra.mxu0 %v13331_v12  ;;  %v13403_v12 = vld [vmem:[%s18398_s1 + $0x2268] ss:$16 sps:$4 sm:$0xff]  }
 0x474   :  { %9602 = vmatpush2.bf16.msra.mxu1 %v13328_v30  ;;  %9638 = vmatprep.subr.bf16.mxu0 %v13339_v33  ;;  %v13400_v30 = vld [vmem:[%s18398_s1 + $0x21e8] ss:$16 sps:$4 sm:$0xff]   ;;  %v13411_v33 = vld [vmem:[%s18398_s1 + $0x224c] ss:$16 sps:$4 sm:$0xff]  }
 0x475   :  { %9603 = vmatprep.subr.bf16.mxu1 %v13336_v31  ;;  %v13408_v31 = vld [vmem:[%s18398_s1 + $0x21cc] ss:$16 sps:$4 sm:$0xff]  }
 0x477   :  { %9639 = vmatpush2.bf16.msra.mxu0 %v13337_v37  ;;  %v17495_v37 = vpop.f32.mrf.mxu0 }
 0x478   :  { %9604 = vmatpush2.bf16.msra.mxu1 %v13334_v34  ;;  %9640 = vmatprep.subr.bf16.mxu0 %v13345_v40  ;;  %v17493_v34 = vpop.f32.mrf.mxu1  ;;  %v13409_v40 = vld [vmem:[%s18398_s1 + $0x2248] ss:$16 sps:$4 sm:$0xff]  }
 0x479   :  { %9605 = vmatprep.subr.bf16.mxu1 %v13342_v38  ;;  %v13406_v38 = vld [vmem:[%s18398_s1 + $0x21c8] ss:$16 sps:$4 sm:$0xff]  }
 0x47b   :  { %9641 = vmatpush2.bf16.msra.mxu0 %v13343_v42  ;;  %v17505_v42 = vpop.f32.mrf.mxu0 }
 0x47c   :  { %9606 = vmatpush2.bf16.msra.mxu1 %v13340_v41  ;;  %9642 = vmatprep.subr.bf16.mxu0 %v13351_v45  ;;  %v17503_v41 = vpop.f32.mrf.mxu1  ;;  %v13417_v45 = vld [vmem:[%s18398_s1 + $0x222c] ss:$16 sps:$4 sm:$0xff]  }
 0x47d   :  { %9607 = vmatprep.subr.bf16.mxu1 %v13348_v44  ;;  %v13414_v44 = vld [vmem:[%s18398_s1 + $0x21ac] ss:$16 sps:$4 sm:$0xff]  }
 0x47f   :  { %9643 = vmatpush2.bf16.msra.mxu0 %v13349_v47  ;;  %v13415_v47 = vld [vmem:[%s18398_s1 + $0x2228] ss:$16 sps:$4 sm:$0xff]  }
 0x480   :  { %9608 = vmatpush2.bf16.msra.mxu1 %v13346_v46  ;;  %9644 = vmatprep.subr.bf16.mxu0 %v13354_v48  ;;  %v13412_v46 = vld [vmem:[%s18398_s1 + $0x21a8] ss:$16 sps:$4 sm:$0xff]   ;;  %v17519_v48 = vpop.f32.mrf.mxu1 }
 0x481   :  { %9663 = vmatprep.subr.bf16.mxu1 %v13357_v50  ;;  %v17521_v50 = vpop.f32.mrf.mxu0 }
 0x483   :  { %9610 = vmatmul.mubr.bf16.vlgmr.msra.gmra.mxu1 %v13606_v56  ;;  %9645 = vmatpush2.bf16.msra.mxu0 %v13352_v51  ;;  %v13420_v51 = vld [vmem:[%s18398_s1 + $0x218c] ss:$16 sps:$4 sm:$0xff]   ;;  %v17535_v56 = vpop.f32.mrf.mxu1 }
 0x484   :  { %9664 = vmatpush1.bf16.msra.mxu1 %v13355_v52  ;;  %9646 = vmatprep.subr.bf16.mxu0 %v13360_v54  ;;  %v13423_v52 = vld [vmem:[%s18398_s1 + $0x220c] ss:$16 sps:$4 sm:$0xff]   ;;  %v13418_v54 = vld [vmem:[%s18398_s1 + $0x2188] ss:$16 sps:$4 sm:$0xff]  }
 0x485   :  { %9665 = vmatprep.subr.bf16.mxu1 %v13363_v55  ;;  %9695 = vmatprep.mubr.bf16.mxu1 %v13607_v61  ;;  %v13421_v55 = vld [vmem:[%s18398_s1 + $0x2208] ss:$16 sps:$4 sm:$0xff]  }
 0x486   :  { %v13427_v61 = vld [vmem:[%s18398_s1 + $0x23e8] ss:$16 sps:$4 sm:$0xff]  }
 0x487   :  { %9647 = vmatpush2.bf16.msra.mxu0 %v13358_v57  ;;  %v17537_v57 = vpop.f32.mrf.mxu0 }
 0x488   :  { %9666 = vmatpush1.bf16.msra.mxu1 %v13361_v58  ;;  %9648 = vmatprep.subr.bf16.mxu0 %v13366_v59  ;;  %v13426_v58 = vld [vmem:[%s18398_s1 + $0x216c] ss:$16 sps:$4 sm:$0xff]  }
 0x489   :  { %9667 = vmatprep.subr.bf16.mxu1 %v13369_v60  ;;  %v13429_v59 = vld [vmem:[%s18398_s1 + $0x23ec] ss:$16 sps:$4 sm:$0xff]   ;;  %v13424_v60 = vld [vmem:[%s18398_s1 + $0x2168] ss:$16 sps:$4 sm:$0xff]  }
 0x48b   :  { %9649 = vmatpush2.bf16.msra.mxu0 %v13364_v0  ;;  %v17551_v0 = vpop.f32.mrf.mxu1 }
 0x48c   :  { %9668 = vmatpush1.bf16.msra.mxu1 %v13367_v1  ;;  %9650 = vmatprep.subr.bf16.mxu0 %v13372_v39  ;;  %v17553_v1 = vpop.f32.mrf.mxu0  ;;  %v13432_v39 = vld [vmem:[%s18398_s1 + $0x214c] ss:$16 sps:$4 sm:$0xff]  }
 0x48d   :  { %9669 = vmatprep.subr.bf16.mxu1 %v13375_v3  ;;  %v13435_v3 = vld [vmem:[%s18398_s1 + $0x23cc] ss:$16 sps:$4 sm:$0xff]  }
 0x48f   :  { %9651 = vmatpush2.bf16.msra.mxu0 %v13370_v4  ;;  %v17561_v4 = vpop.f32.mrf.mxu1 }
 0x490   :  { %9670 = vmatpush1.bf16.msra.mxu1 %v13373_v5  ;;  %9706 = vmatprep.subr.bf16.mxu0 %v13381_v8  ;;  %v17563_v5 = vpop.f32.mrf.mxu0  ;;  %v13433_v8 = vld [vmem:[%s18398_s1 + $0x23c8] ss:$16 sps:$4 sm:$0xff]  }
 0x491   :  { %9671 = vmatprep.subr.bf16.mxu1 %v13378_v7  ;;  %v13430_v7 = vld [vmem:[%s18398_s1 + $0x2148] ss:$16 sps:$4 sm:$0xff]  }
 0x492   :  { %9653 = vmatmul.mubr.bf16.vlgmr.msra.gmra.mxu0 %v13608_v15  ;;  %v13436_v15 = vld [vmem:[%s18398_s1 + $0x2128] ss:$16 sps:$4 sm:$0xff]  }
 0x493   :  { %9707 = vmatpush1.bf16.msra.mxu0 %v13379_v10  ;;  %9738 = vmatprep.mubr.bf16.mxu0 %v13609_v19  ;;  %v13441_v10 = vld [vmem:[%s18398_s1 + $0x23ac] ss:$16 sps:$4 sm:$0xff]  }
 0x494   :  { %9672 = vmatpush1.bf16.msra.mxu1 %v13376_v9  ;;  %9708 = vmatprep.subr.bf16.mxu0 %v13387_v14  ;;  %v13438_v9 = vld [vmem:[%s18398_s1 + $0x212c] ss:$16 sps:$4 sm:$0xff]   ;;  %v17579_v14 = vpop.f32.mrf.mxu0 }
 0x495   :  { %9673 = vmatprep.subr.bf16.mxu1 %v13384_v49  ;;  %v17577_v49 = vpop.f32.mrf.mxu1 }
 0x496   :  { %v17595_v19 = vpop.f32.mrf.mxu0 }
 0x497   :  { %9709 = vmatpush1.bf16.msra.mxu0 %v13385_v16  ;;  %v13444_v16 = vld [vmem:[%s18398_s1 + $0x210c] ss:$16 sps:$4 sm:$0xff]  }
 0x498   :  { %9674 = vmatpush1.bf16.msra.mxu1 %v13382_v53  ;;  %9710 = vmatprep.subr.bf16.mxu0 %v13393_v18  ;;  %v13439_v53 = vld [vmem:[%s18398_s1 + $0x23a8] ss:$16 sps:$4 sm:$0xff]   ;;  %v17593_v18 = vpop.f32.mrf.mxu1 }
 0x499   :  { %9675 = vmatprep.subr.bf16.mxu1 %v13390_v17  ;;  %v13447_v17 = vld [vmem:[%s18398_s1 + $0x238c] ss:$16 sps:$4 sm:$0xff]  }
 0x49b   :  { %9711 = vmatpush1.bf16.msra.mxu0 %v13391_v23  ;;  %v13445_v23 = vld [vmem:[%s18398_s1 + $0x2388] ss:$16 sps:$4 sm:$0xff]  }
 0x49c   :  { %9676 = vmatpush1.bf16.msra.mxu1 %v13388_v20  ;;  %9712 = vmatprep.subr.bf16.mxu0 %v13399_v25  ;;  %v13442_v20 = vld [vmem:[%s18398_s1 + $0x2108] ss:$16 sps:$4 sm:$0xff]   ;;  %v13453_v25 = vld [vmem:[%s18398_s1 + $0x24ec] ss:$16 sps:$4 sm:$0xff]  }
 0x49d   :  { %9677 = vmatprep.subr.bf16.mxu1 %v13396_v24  ;;  %v13450_v24 = vld [vmem:[%s18398_s1 + $0x236c] ss:$16 sps:$4 sm:$0xff]  }
 0x49f   :  { %9713 = vmatpush1.bf16.msra.mxu0 %v13397_v26  ;;  %v17611_v26 = vpop.f32.mrf.mxu0 }
 0x4a0   :  { %9678 = vmatpush1.bf16.msra.mxu1 %v13394_v2  ;;  %9714 = vmatprep.subr.bf16.mxu0 %v13405_v29  ;;  %v17609_v2 = vpop.f32.mrf.mxu1  ;;  %v13451_v29 = vld [vmem:[%s18398_s1 + $0x24e8] ss:$16 sps:$4 sm:$0xff]  }
 0x4a1   :  { %9679 = vmatprep.subr.bf16.mxu1 %v13402_v28  ;;  %v13448_v28 = vld [vmem:[%s18398_s1 + $0x2368] ss:$16 sps:$4 sm:$0xff]  }
 0x4a3   :  { %9715 = vmatpush1.bf16.msra.mxu0 %v13403_v12  ;;  %v17621_v12 = vpop.f32.mrf.mxu0 }
 0x4a4   :  { %9680 = vmatpush2.bf16.msra.mxu1 %v13400_v30  ;;  %9716 = vmatprep.subr.bf16.mxu0 %v13411_v33  ;;  %v17619_v30 = vpop.f32.mrf.mxu1  ;;  %v13459_v33 = vld [vmem:[%s18398_s1 + $0x24cc] ss:$16 sps:$4 sm:$0xff]  }
 0x4a5   :  { %9681 = vmatprep.subr.bf16.mxu1 %v13408_v31  ;;  %v13456_v31 = vld [vmem:[%s18398_s1 + $0x234c] ss:$16 sps:$4 sm:$0xff]  }
 0x4a7   :  { %9717 = vmatpush1.bf16.msra.mxu0 %v13409_v40  ;;  %v13454_v40 = vld [vmem:[%s18398_s1 + $0x2348] ss:$16 sps:$4 sm:$0xff]  }
 0x4a8   :  { %9682 = vmatpush2.bf16.msra.mxu1 %v13406_v38  ;;  %9718 = vmatprep.subr.bf16.mxu0 %v13417_v45  ;;  %v13610_v38 = vld [vmem:[%s18399_s0 + $0x80] ss:$164 sps:$4 sm:$0xff]   ;;  %v17638_v45 = vpop.f32.mrf.mxu1 }
 0x4a9   :  { %9683 = vmatprep.subr.bf16.mxu1 %v13414_v44  ;;  %v13457_v44 = vld [vmem:[%s18398_s1 + $0x24c8] ss:$16 sps:$4 sm:$0xff]  }
 0x4ab   :  { %9719 = vmatpush1.bf16.msra.mxu0 %v13415_v47  ;;  %v13462_v47 = vld [vmem:[%s18398_s1 + $0x232c] ss:$16 sps:$4 sm:$0xff]  }
 0x4ac   :  { %9684 = vmatpush2.bf16.msra.mxu1 %v13412_v46  ;;  %9720 = vmatprep.subr.bf16.mxu0 %v13423_v52  ;;  %v17640_v46 = vpop.f32.mrf.mxu0  ;;  %v13611_v52 = vld [vmem:[%s18399_s0 + $0x94] ss:$164 sps:$4 sm:$0xff]  }
 0x4ad   :  { %9685 = vmatprep.subr.bf16.mxu1 %v13420_v51  ;;  %v13465_v51 = vld [vmem:[%s18398_s1 + $0x24ac] ss:$16 sps:$4 sm:$0xff]  }
 0x4af   :  { %9721 = vmatpush1.bf16.msra.mxu0 %v13421_v55  ;;  %v13463_v55 = vld [vmem:[%s18398_s1 + $0x24a8] ss:$16 sps:$4 sm:$0xff]  }
 0x4b0   :  { %9686 = vmatpush2.bf16.msra.mxu1 %v13418_v54  ;;  %9722 = vmatprep.subr.bf16.mxu0 %v13429_v59  ;;  %v13460_v54 = vld [vmem:[%s18398_s1 + $0x2328] ss:$16 sps:$4 sm:$0xff]   ;;  %v17659_v59 = vpop.f32.mrf.mxu0 }
 0x4b1   :  { %9687 = vmatprep.subr.bf16.mxu1 %v13426_v58  ;;  %v17657_v58 = vpop.f32.mrf.mxu1 }
 0x4b3   :  { %9723 = vmatpush2.bf16.msra.mxu0 %v13427_v61  ;;  %v13471_v61 = vld [vmem:[%s18398_s1 + $0x248c] ss:$16 sps:$4 sm:$0xff]  }
 0x4b4   :  { %9688 = vmatpush2.bf16.msra.mxu1 %v13424_v60  ;;  %9724 = vmatprep.subr.bf16.mxu0 %v13435_v3  ;;  %v13468_v60 = vld [vmem:[%s18398_s1 + $0x230c] ss:$16 sps:$4 sm:$0xff]   ;;  %v13469_v3 = vld [vmem:[%s18398_s1 + $0x2488] ss:$16 sps:$4 sm:$0xff]  }
 0x4b5   :  { %9689 = vmatprep.subr.bf16.mxu1 %v13432_v39  ;;  %v13466_v39 = vld [vmem:[%s18398_s1 + $0x2308] ss:$16 sps:$4 sm:$0xff]  }
 0x4b7   :  { %9725 = vmatpush2.bf16.msra.mxu0 %v13433_v8  ;;  %v17675_v8 = vpop.f32.mrf.mxu0 }
 0x4b8   :  { %9690 = vmatpush2.bf16.msra.mxu1 %v13430_v7  ;;  %9726 = vmatprep.subr.bf16.mxu0 %v13441_v10  ;;  %v17673_v7 = vpop.f32.mrf.mxu1  ;;  %v13477_v10 = vld [vmem:[%s18398_s1 + $0x26ec] ss:$16 sps:$4 sm:$0xff]  }
 0x4b9   :  { %9691 = vmatprep.subr.bf16.mxu1 %v13438_v9  ;;  %v13474_v9 = vld [vmem:[%s18398_s1 + $0x246c] ss:$16 sps:$4 sm:$0xff]  }
 0x4bb   :  { %9727 = vmatpush2.bf16.msra.mxu0 %v13439_v53  ;;  %v17685_v53 = vpop.f32.mrf.mxu0 }
 0x4bc   :  { %9692 = vmatpush2.bf16.msra.mxu1 %v13436_v15  ;;  %9728 = vmatprep.subr.bf16.mxu0 %v13447_v17  ;;  %v17683_v15 = vpop.f32.mrf.mxu1  ;;  %v13475_v17 = vld [vmem:[%s18398_s1 + $0x26e8] ss:$16 sps:$4 sm:$0xff]  }
 0x4bd   :  { %9693 = vmatprep.subr.bf16.mxu1 %v13444_v16  ;;  %v13472_v16 = vld [vmem:[%s18398_s1 + $0x2468] ss:$16 sps:$4 sm:$0xff]  }
 0x4bf   :  { %9729 = vmatpush2.bf16.msra.mxu0 %v13445_v23  ;;  %v13483_v23 = vld [vmem:[%s18398_s1 + $0x26cc] ss:$16 sps:$4 sm:$0xff]  }
 0x4c0   :  { %9694 = vmatpush2.bf16.msra.mxu1 %v13442_v20  ;;  %9730 = vmatprep.subr.bf16.mxu0 %v13450_v24  ;;  %v13480_v20 = vld [vmem:[%s18398_s1 + $0x244c] ss:$16 sps:$4 sm:$0xff]   ;;  %v8109_v24 = vadd.f32 %v14508_v35, %v14523_v43 }
 0x4c1   :  { %9749 = vmatprep.subr.bf16.mxu1 %v13453_v25  ;;  %v17701_v25 = vpop.f32.mrf.mxu1  ;;  %v13486_v35 = vld [vmem:[%s18398_s1 + $0x242c] ss:$16 sps:$4 sm:$0xff]  }
 0x4c2   :  { %v13489_v43 = vld [vmem:[%s18398_s1 + $0x26ac] ss:$16 sps:$4 sm:$0xff]  }
 0x4c3   :  { %9696 = vmatmul.mubr.bf16.vlgmr.msra.gmra.mxu1 %v13610_v38  ;;  %9731 = vmatpush2.bf16.msra.mxu0 %v13448_v28  ;;  %v17703_v28 = vpop.f32.mrf.mxu0  ;;  %v8152_v38 = vadd.f32 %v14510_v36, %v8109_v24  ;;  %v13487_v36 = vld [vmem:[%s18398_s1 + $0x26a8] ss:$16 sps:$4 sm:$0xff]  }
 0x4c4   :  { %9750 = vmatpush1.bf16.msra.mxu1 %v13451_v29  ;;  %9732 = vmatprep.subr.bf16.mxu0 %v13456_v31  ;;  %v13612_v29 = vld [vmem:[%s18399_s0 + $0x88] ss:$164 sps:$4 sm:$0xff]  }
 0x4c5   :  { %9751 = vmatprep.subr.bf16.mxu1 %v13459_v33  ;;  %9781 = vmatprep.mubr.bf16.mxu1 %v13611_v52  ;;  %v13478_v31 = vld [vmem:[%s18398_s1 + $0x2448] ss:$16 sps:$4 sm:$0xff]  }
 0x4c6   :  { %v13481_v33 = vld [vmem:[%s18398_s1 + $0x26c8] ss:$16 sps:$4 sm:$0xff]  }
 0x4c7   :  { %9733 = vmatpush2.bf16.msra.mxu0 %v13454_v40  ;;  %v13613_v40 = vld [vmem:[%s18399_s0 + $0x9c] ss:$164 sps:$4 sm:$0xff]   ;;  %v13484_v52 = vld [vmem:[%s18398_s1 + $0x2428] ss:$16 sps:$4 sm:$0xff]  }
 0x4c8   :  { %9752 = vmatpush1.bf16.msra.mxu1 %v13457_v44  ;;  %9734 = vmatprep.subr.bf16.mxu0 %v13462_v47  ;;  %v17724_v44 = vpop.f32.mrf.mxu1  ;;  %v17726_v47 = vpop.f32.mrf.mxu0 }
 0x4c9   :  { %9753 = vmatprep.subr.bf16.mxu1 %v13465_v51  ;;  %v8195_v51 = vadd.f32 %v14726_v62, %v8152_v38  ;;  %v13495_v62 = vld [vmem:[%s18398_s1 + $0x268c] ss:$16 sps:$4 sm:$0xff]   ;;  %v13505_v38 = vld [vmem:[%s18398_s1 + $0x2648] ss:$16 sps:$4 sm:$0xff]  }
 0x4cb   :  { %9735 = vmatpush2.bf16.msra.mxu0 %v13460_v54  ;;  %v13492_v54 = vld [vmem:[%s18398_s1 + $0x240c] ss:$16 sps:$4 sm:$0xff]  }
 0x4cc   :  { %9754 = vmatpush1.bf16.msra.mxu1 %v13463_v55  ;;  %9736 = vmatprep.subr.bf16.mxu0 %v13468_v60  ;;  %v17741_v55 = vpop.f32.mrf.mxu1  ;;  %v17743_v60 = vpop.f32.mrf.mxu0 }
 0x4cd   :  { %9755 = vmatprep.subr.bf16.mxu1 %v13471_v61  ;;  %v8238_v61 = vadd.f32 %v14728_v63, %v8195_v51  ;;  %v13498_v63 = vld [vmem:[%s18398_s1 + $0x25ec] ss:$16 sps:$4 sm:$0xff]  }
 0x4cf   :  { %9737 = vmatpush2.bf16.msra.mxu0 %v13466_v39  ;;  %v13490_v39 = vld [vmem:[%s18398_s1 + $0x2408] ss:$16 sps:$4 sm:$0xff]  }
 0x4d0   :  { %9756 = vmatpush1.bf16.msra.mxu1 %v13469_v3  ;;  %9792 = vmatprep.subr.bf16.mxu0 %v13477_v10  ;;  %v13493_v3 = vld [vmem:[%s18398_s1 + $0x2688] ss:$16 sps:$4 sm:$0xff]   ;;  %v17754_v10 = vpop.f32.mrf.mxu0 }
 0x4d1   :  { %9757 = vmatprep.subr.bf16.mxu1 %v13474_v9  ;;  %v17752_v9 = vpop.f32.mrf.mxu1 }
 0x4d2   :  { %9739 = vmatmul.mubr.bf16.vlgmr.msra.gmra.mxu0 %v13612_v29  ;;  %v17771_v29 = vpop.f32.mrf.mxu0 }
 0x4d3   :  { %9793 = vmatpush1.bf16.msra.mxu0 %v13475_v17  ;;  %9824 = vmatprep.mubr.bf16.mxu0 %v13613_v40  ;;  %v8281_v17 = vadd.f32 %v14945_v22, %v8238_v61  ;;  %v17769_v24 = vpop.f32.mrf.mxu1  ;;  %v13504_v22 = vld [vmem:[%s18398_s1 + $0x25cc] ss:$16 sps:$4 sm:$0xff]  }
 0x4d4   :  { %9758 = vmatpush1.bf16.msra.mxu1 %v13472_v16  ;;  %9794 = vmatprep.subr.bf16.mxu0 %v13483_v23  ;;  %v13501_v16 = vld [vmem:[%s18398_s1 + $0x266c] ss:$16 sps:$4 sm:$0xff]   ;;  %v13499_v23 = vld [vmem:[%s18398_s1 + $0x2668] ss:$16 sps:$4 sm:$0xff]   ;;  %v17789_v51 = vpop.f32.mrf.mxu0 }
 0x4d5   :  { %9759 = vmatprep.subr.bf16.mxu1 %v13480_v20  ;;  %v13496_v20 = vld [vmem:[%s18398_s1 + $0x25e8] ss:$16 sps:$4 sm:$0xff]   ;;  %v17787_v40 = vpop.f32.mrf.mxu1 }
 0x4d6   :  { %v17806_v61 = vpop.f32.mrf.mxu0 }
 0x4d7   :  { %9795 = vmatpush1.bf16.msra.mxu0 %v13481_v33  ;;  %v8324_v33 = vadd.f32 %v17519_v48, %v8281_v17  ;;  %v13510_v48 = vld [vmem:[%s18398_s1 + $0x25ac] ss:$16 sps:$4 sm:$0xff]   ;;  %v13514_v17 = vld [vmem:[%s18398_s1 + $0x2588] ss:$16 sps:$4 sm:$0xff]  }
 0x4d8   :  { %9760 = vmatpush1.bf16.msra.mxu1 %v13478_v31  ;;  %9796 = vmatprep.subr.bf16.mxu0 %v13489_v43  ;;  %v13507_v31 = vld [vmem:[%s18398_s1 + $0x264c] ss:$16 sps:$4 sm:$0xff]   ;;  %v13502_v43 = vld [vmem:[%s18398_s1 + $0x25c8] ss:$16 sps:$4 sm:$0xff]  }
 0x4d9   :  { %9761 = vmatprep.subr.bf16.mxu1 %v13486_v35  ;;  %v8367_v35 = vadd.f32 %v17521_v50, %v8324_v33  ;;  %v13513_v50 = vld [vmem:[%s18398_s1 + $0x262c] ss:$16 sps:$4 sm:$0xff]  }
 0x4db   :  { %9797 = vmatpush1.bf16.msra.mxu0 %v13487_v36  ;;  %v13508_v36 = vld [vmem:[%s18398_s1 + $0x25a8] ss:$16 sps:$4 sm:$0xff]  }
 0x4dc   :  { %9762 = vmatpush1.bf16.msra.mxu1 %v13484_v52  ;;  %9798 = vmatprep.subr.bf16.mxu0 %v13495_v62  ;;  %v8410_v52 = vadd.f32 %v17577_v49, %v8367_v35  ;;  %v17804_v62 = vpop.f32.mrf.mxu1  ;;  %v13516_v49 = vld [vmem:[%s18398_s1 + $0x258c] ss:$16 sps:$4 sm:$0xff]  }
 0x4dd   :  { %9763 = vmatprep.subr.bf16.mxu1 %v13492_v54  ;;  %v13511_v54 = vld [vmem:[%s18398_s1 + $0x2628] ss:$16 sps:$4 sm:$0xff]  }
 0x4df   :  { %9799 = vmatpush1.bf16.msra.mxu0 %v13493_v3  ;;  %v8453_v3 = vadd.f32 %v17579_v14, %v8410_v52  ;;  %v13522_v14 = vld [vmem:[%s18398_s1 + $0x256c] ss:$16 sps:$4 sm:$0xff]  }
 0x4e0   :  { %9764 = vmatpush1.bf16.msra.mxu1 %v13490_v39  ;;  %9800 = vmatprep.subr.bf16.mxu0 %v13501_v16  ;;  %v13519_v39 = vld [vmem:[%s18398_s1 + $0x260c] ss:$16 sps:$4 sm:$0xff]   ;;  %v17817_v16 = vpop.f32.mrf.mxu0 }
 0x4e1   :  { %9765 = vmatprep.subr.bf16.mxu1 %v13498_v63  ;;  %v17815_v63 = vpop.f32.mrf.mxu1 }
 0x4e2   :  { %v8796_v33 = vpop.f32.mrf.mxu0 }
 0x4e3   :  { %9801 = vmatpush1.bf16.msra.mxu0 %v13499_v23  ;;  %v13525_v23 = vld [vmem:[%s18398_s1 + $0x27ec] ss:$16 sps:$4 sm:$0xff]  }
 0x4e4   :  { %9766 = vmatpush2.bf16.msra.mxu1 %v13496_v20  ;;  %9802 = vmatprep.subr.bf16.mxu0 %v13507_v31  ;;  %v13517_v20 = vld [vmem:[%s18398_s1 + $0x2608] ss:$16 sps:$4 sm:$0xff]   ;;  %v8753_v31 = vpop.f32.mrf.mxu1 }
 0x4e5   :  { %9767 = vmatprep.subr.bf16.mxu1 %v13504_v22  ;;  %v8496_v22 = vadd.f32 %v17638_v45, %v8453_v3  ;;  %v13528_v45 = vld [vmem:[%s18398_s1 + $0x254c] ss:$16 sps:$4 sm:$0xff]  }
 0x4e7   :  { %9803 = vmatpush1.bf16.msra.mxu0 %v13505_v38  ;;  %v8539_v35 = vadd.f32 %v17640_v46, %v8496_v22  ;;  %v13523_v38 = vld [vmem:[%s18398_s1 + $0x27e8] ss:$16 sps:$4 sm:$0xff]   ;;  %v13531_v46 = vld [vmem:[%s18398_s1 + $0x27cc] ss:$16 sps:$4 sm:$0xff]  }
 0x4e8   :  { %9768 = vmatpush2.bf16.msra.mxu1 %v13502_v43  ;;  %9804 = vmatprep.subr.bf16.mxu0 %v13513_v50  ;;  %v13520_v43 = vld [vmem:[%s18398_s1 + $0x2568] ss:$16 sps:$4 sm:$0xff]   ;;  %v17847_v50 = vpop.f32.mrf.mxu0 }
 0x4e9   :  { %9769 = vmatprep.subr.bf16.mxu1 %v13510_v48  ;;  %v17845_v48 = vpop.f32.mrf.mxu1  ;;  %v8582_v52 = vadd.f32 %v17701_v25, %v8539_v35  ;;  %v13537_v25 = vld [vmem:[%s18398_s1 + $0x27ac] ss:$16 sps:$4 sm:$0xff]  }
 0x4ea   :  { %v13543_v35 = vld [vmem:[%s18398_s1 + $0x278c] ss:$16 sps:$4 sm:$0xff]  }
 0x4eb   :  { %9805 = vmatpush1.bf16.msra.mxu0 %v13511_v54  ;;  %v13529_v54 = vld [vmem:[%s18398_s1 + $0x27c8] ss:$16 sps:$4 sm:$0xff]   ;;  %v17863_v3 = vpop.f32.mrf.mxu1 }
 0x4ec   :  { %9770 = vmatpush2.bf16.msra.mxu1 %v13508_v36  ;;  %9806 = vmatprep.subr.bf16.mxu0 %v13519_v39  ;;  %v13526_v36 = vld [vmem:[%s18398_s1 + $0x2548] ss:$16 sps:$4 sm:$0xff]   ;;  %v8625_v39 = vadd.f32 %v17703_v28, %v8582_v52  ;;  %v13540_v28 = vld [vmem:[%s18398_s1 + $0x250c] ss:$16 sps:$4 sm:$0xff]  }
 0x4ed   :  { %9771 = vmatprep.subr.bf16.mxu1 %v13516_v49  ;;  %v13534_v49 = vld [vmem:[%s18398_s1 + $0x252c] ss:$16 sps:$4 sm:$0xff]   ;;  %v13541_v52 = vld [vmem:[%s18398_s1 + $0x2788] ss:$16 sps:$4 sm:$0xff]  }
 0x4ef   :  { %9807 = vmatpush1.bf16.msra.mxu0 %v13517_v20  ;;  %v13532_v20 = vld [vmem:[%s18398_s1 + $0x2528] ss:$16 sps:$4 sm:$0xff]  }
 0x4f0   :  { %9772 = vmatpush2.bf16.msra.mxu1 %v13514_v17  ;;  %9808 = vmatprep.subr.bf16.mxu0 %v13525_v23  ;;  %v17865_v17 = vpop.f32.mrf.mxu0  ;;  %v17873_v23 = vpop.f32.mrf.mxu1 }
 0x4f1   :  { %9773 = vmatprep.subr.bf16.mxu1 %v13522_v14  ;;  %v13535_v14 = vld [vmem:[%s18398_s1 + $0x27a8] ss:$16 sps:$4 sm:$0xff]  }
 0x4f2   :  { %v17875_v22 = vpop.f32.mrf.mxu0 }
 0x4f3   :  { %9809 = vmatpush2.bf16.msra.mxu0 %v13523_v38  ;;  %v8242_v38 = vadd.f32 %v17493_v34, %v14754_v13  ;;  %v13546_v13 = vld [vmem:[%s18398_s1 + $0x276c] ss:$16 sps:$4 sm:$0xff]  }
 0x4f4   :  { %9774 = vmatpush2.bf16.msra.mxu1 %v13520_v43  ;;  %9810 = vmatprep.subr.bf16.mxu0 %v13531_v46  ;;  %v8668_v43 = vadd.f32 %v17769_v24, %v8625_v39  ;;  %v13538_v46 = vld [vmem:[%s18398_s1 + $0x2508] ss:$16 sps:$4 sm:$0xff]   ;;  %v13549_v34 = vld [vmem:[%s18398_s1 + $0x286c] ss:$16 sps:$4 sm:$0xff]   ;;  %v8322_v39 = vadd.f32 %v17503_v41, %v14943_v21  ;;  %v13614_v21 = vld [vmem:[%s18399_s0 + $0x90] ss:$164 sps:$4 sm:$0xff]  }
 0x4f5   :  { %9775 = vmatprep.subr.bf16.mxu1 %v13528_v45  ;;  %v8285_v24 = vadd.f32 %v17495_v37, %v8242_v38  ;;  %v13552_v37 = vld [vmem:[%s18398_s1 + $0x274c] ss:$16 sps:$4 sm:$0xff]   ;;  %v13550_v38 = vld [vmem:[%s18398_s1 + $0x2748] ss:$16 sps:$4 sm:$0xff]  }
 0x4f6   :  { %v8711_v45 = vadd.f32 %v17771_v29, %v8668_v43  ;;  %v8365_v43 = vadd.f32 %v17505_v42, %v8322_v39  ;;  %v8326_v42 = vadd.f32 %v17535_v56, %v14960_v27 }
 0x4f7   :  { %9811 = vmatpush2.bf16.msra.mxu0 %v13529_v54  ;;  %v8882_v54 = vpop.f32.mrf.mxu0 }
 0x4f8   :  { %9776 = vmatpush2.bf16.msra.mxu1 %v13526_v36  ;;  %9812 = vmatprep.subr.bf16.mxu0 %v13537_v25  ;;  %v8839_v36 = vpop.f32.mrf.mxu1  ;;  %v8754_v29 = vadd.f32 %v8753_v31, %v8711_v45  ;;  %v13547_v25 = vld [vmem:[%s18398_s1 + $0x2868] ss:$16 sps:$4 sm:$0xff]   ;;  %v13555_v31 = vld [vmem:[%s18398_s1 + $0x284c] ss:$16 sps:$4 sm:$0xff]   ;;  %v8369_v27 = vadd.f32 %v17537_v57, %v8326_v42  ;;  %v9900_v42 = vld [vmem:[%s18401_s3 + $0x70] sm:$0xff] }
 0x4f9   :  { %9777 = vmatprep.subr.bf16.mxu1 %v13534_v49  ;;  %v13544_v49 = vld [vmem:[%s18398_s1 + $0x2768] ss:$16 sps:$4 sm:$0xff]   ;;  %v13564_v57 = vld [vmem:[%s18398_s1 + $0x270c] ss:$16 sps:$4 sm:$0xff]  }
 0x4fb   :  { %9813 = vmatpush2.bf16.msra.mxu0 %v13535_v14  ;;  %v17910_v14 = vpop.f32.mrf.mxu0 }
 0x4fc   :  { %9778 = vmatpush2.bf16.msra.mxu1 %v13532_v20  ;;  %9814 = vmatprep.subr.bf16.mxu0 %v13543_v35  ;;  %v17908_v20 = vpop.f32.mrf.mxu1  ;;  %v8797_v35 = vadd.f32 %v8796_v33, %v8754_v29 }
 0x4fd   :  { %9779 = vmatprep.subr.bf16.mxu1 %v13540_v28  ;;  %v8328_v28 = vadd.f32 %v17551_v0, %v8285_v24  ;;  %v13553_v0 = vld [vmem:[%s18398_s1 + $0x2848] ss:$16 sps:$4 sm:$0xff]   ;;  %v17934_v45 = vpop.f32.mrf.mxu0 }
 0x4fe   :  { %v17932_v33 = vpop.f32.mrf.mxu1 }
 0x4ff   :  { %9815 = vmatpush2.bf16.msra.mxu0 %v13541_v52  ;;  %v8371_v41 = vadd.f32 %v17553_v1, %v8328_v28  ;;  %v13558_v1 = vld [vmem:[%s18398_s1 + $0x272c] ss:$16 sps:$4 sm:$0xff]   ;;  %v8840_v52 = vadd.f32 %v8839_v36, %v8797_v35 }
 0x500   :  { %9780 = vmatpush2.bf16.msra.mxu1 %v13538_v46  ;;  %9816 = vmatprep.subr.bf16.mxu0 %v13546_v13  ;;  %v13561_v46 = vld [vmem:[%s18398_s1 + $0x282c] ss:$16 sps:$4 sm:$0xff]   ;;  %v8408_v13 = vadd.f32 %v17561_v4, %v8365_v43  ;;  %v17945_v56 = vpop.f32.mrf.mxu1 }
 0x501   :  { %9843 = vmatprep.subr.bf16.mxu1 %v13549_v34  ;;  %v17947_v34 = vpop.f32.mrf.mxu0  ;;  %v8414_v24 = vadd.f32 %v17609_v2, %v8371_v41  ;;  %v8883_v29 = vadd.f32 %v8882_v54, %v8840_v52  ;;  %v13567_v2 = vld [vmem:[%s18398_s1 + $0x280c] ss:$16 sps:$4 sm:$0xff]   ;;  %v8412_v54 = vadd.f32 %v17593_v18, %v8369_v27  ;;  %v9898_v27 = vld [vmem:[%s18401_s3 + $0x60] sm:$0xff] }
 0x502   :  { %v8451_v4 = vadd.f32 %v17563_v5, %v8408_v13  ;;  %v13562_v5 = vld [vmem:[%s18398_s1 + $0x2708] ss:$16 sps:$4 sm:$0xff]  }
 0x503   :  { %9782 = vmatmul.mubr.bf16.vlgmr.msra.gmra.mxu1 %v13614_v21  ;;  %9817 = vmatpush2.bf16.msra.mxu0 %v13544_v49  ;;  %v13556_v49 = vld [vmem:[%s18398_s1 + $0x2728] ss:$16 sps:$4 sm:$0xff]   ;;  %v8457_v36 = vadd.f32 %v17611_v26, %v8414_v24  ;;  %v8968_v39 = vpop.f32.mrf.mxu0  ;;  %v8455_v35 = vadd.f32 %v17595_v19, %v8412_v54 }
 0x504   :  { %9844 = vmatpush1.bf16.msra.mxu1 %v13547_v25  ;;  %9818 = vmatprep.subr.bf16.mxu0 %v13552_v37  ;;  %v8925_v25 = vpop.f32.mrf.mxu1  ;;  %v8494_v28 = vadd.f32 %v17619_v30, %v8451_v4  ;;  %v9917_v43 = vld [vmem:[%s18401_s3 + $0xf8] sm:$0xff] }
 0x505   :  { %9845 = vmatprep.subr.bf16.mxu1 %v13555_v31  ;;  %9867 = vmatprep.mubr.bf16.mxu1 %v13618_v32  ;;  %v13559_v32 = vld [vmem:[%s18398_s1 + $0x2828] ss:$16 sps:$4 sm:$0xff]   ;;  %v8926_v37 = vadd.f32 %v8925_v25, %v8883_v29  ;;  %v8500_v18 = vadd.f32 %v17673_v7, %v8457_v36  ;;  %v9916_v7 = vld [vmem:[%s18401_s3 + $0xf0] sm:$0xff] }
 0x506   :  { %v13565_v31 = vld [vmem:[%s18398_s1 + $0x2808] ss:$16 sps:$4 sm:$0xff]   ;;  %v8537_v21 = vadd.f32 %v17621_v12, %v8494_v28 }
 0x507   :  { %9819 = vmatpush2.bf16.msra.mxu0 %v13550_v38  ;;  %v8969_v26 = vadd.f32 %v8968_v39, %v8926_v37  ;;  %v8543_v41 = vadd.f32 %v17675_v8, %v8500_v18  ;;  %v8498_v38 = vadd.f32 %v17657_v58, %v8455_v35  ;;  %v9901_v19 = vld [vmem:[%s18401_s3 + $0x78] sm:$0xff]  ;;  %v13616_v58 = vld [vmem:[%s18399_s0 + $0xa0] ss:$164 sps:$4 sm:$0xff]   ;;  %v9911_v36 = vld [vmem:[%s18401_s3 + $0xc8] sm:$0xff] }
 0x508   :  { %9846 = vmatpush1.bf16.msra.mxu1 %v13553_v0  ;;  %9820 = vmatprep.subr.bf16.mxu0 %v13558_v1  ;;  %v8580_v0 = vadd.f32 %v17683_v15, %v8537_v21  ;;  %v13615_v8 = vld [vmem:[%s18399_s0 + $0x98] ss:$164 sps:$4 sm:$0xff]   ;;  %v9895_v25 = vld [vmem:[%s18401_s3 + $0x48] sm:$0xff]  ;;  %v9910_v39 = vld [vmem:[%s18401_s3 + $0xc0] sm:$0xff] }
 0x509   :  { %9847 = vmatprep.subr.bf16.mxu1 %v13561_v46  ;;  %v9879_v30 = vmax.f32 %v8969_v26, 0.0  ;;  %v8541_v12 = vadd.f32 %v17659_v59, %v8498_v38  ;;  %v8586_v1 = vadd.f32 %v17741_v55, %v8543_v41  ;;  %v9915_v59 = vld [vmem:[%s18401_s3 + $0xe8] sm:$0xff]  ;;  %v9914_v55 = vld [vmem:[%s18401_s3 + $0xe0] sm:$0xff]  ;;  %v9897_v29 = vld [vmem:[%s18401_s3 + $0x58] sm:$0xff] }
 0x50a   :  { %v8623_v15 = vadd.f32 %v17685_v53, %v8580_v0  ;;  %v9899_v46 = vld [vmem:[%s18401_s3 + $0x68] sm:$0xff]  ;;  %v9913_v53 = vld [vmem:[%s18401_s3 + $0xd8] sm:$0xff]  ;;  %v9892_v26 = vld [vmem:[%s18401_s3 + $0x30] sm:$0xff] }
 0x50b   :  { %9821 = vmatpush2.bf16.msra.mxu0 %v13556_v49  ;;  %v8629_v52 = vadd.f32 %v17743_v60, %v8586_v1  ;;  %v8584_v13 = vadd.f32 %v17724_v44, %v8541_v12  ;;  %v9912_v44 = vld [vmem:[%s18401_s3 + $0xd0] sm:$0xff]  ;;  %v9909_v28 = vld [vmem:[%s18401_s3 + $0xb8] sm:$0xff]  ;;  %v9891_v21 = vld [vmem:[%s18401_s3 + $0x28] sm:$0xff] }
 0x50c   :  { %9848 = vmatpush1.bf16.msra.mxu1 %v13559_v32  ;;  %9822 = vmatprep.subr.bf16.mxu0 %v13564_v57  ;;  %v8666_v24 = vadd.f32 %v17752_v9, %v8623_v15  ;;  %v9949_v32 = vld [vmem:[%s18401_s3 + $0x1f8] sm:$0xff]  ;;  %v9948_v9 = vld [vmem:[%s18401_s3 + $0x1f0] sm:$0xff]  ;;  %v9906_v41 = vld [vmem:[%s18401_s3 + $0xa0] sm:$0xff] }
 0x50d   :  { %9849 = vmatprep.subr.bf16.mxu1 %v13567_v2  ;;  %v8627_v60 = vadd.f32 %v17726_v47, %v8584_v13  ;;  %v8672_v49 = vadd.f32 %v17804_v62, %v8629_v52  ;;  %v9933_v47 = vld [vmem:[%s18401_s3 + $0x178] sm:$0xff]  ;;  %v9896_v62 = vld [vmem:[%s18401_s3 + $0x50] sm:$0xff]  ;;  %v9903_v1 = vld [vmem:[%s18401_s3 + $0x88] sm:$0xff] }
 0x50e   :  { %v8709_v4 = vadd.f32 %v17754_v10, %v8666_v24  ;;  %v9932_v57 = vld [vmem:[%s18401_s3 + $0x170] sm:$0xff]  ;;  %v9947_v10 = vld [vmem:[%s18401_s3 + $0x1e8] sm:$0xff]  ;;  %v9902_v15 = vld [vmem:[%s18401_s3 + $0x80] sm:$0xff] }
 0x50f   :  { %9823 = vmatpush2.bf16.msra.mxu0 %v13562_v5  ;;  %v8715_v2 = vadd.f32 %v17806_v61, %v8672_v49  ;;  %v8670_v54 = vadd.f32 %v17787_v40, %v8627_v60  ;;  %v9931_v61 = vld [vmem:[%s18401_s3 + $0x168] sm:$0xff]  ;;  %v9894_v5 = vld [vmem:[%s18401_s3 + $0x40] sm:$0xff]  ;;  %v9904_v0 = vld [vmem:[%s18401_s3 + $0x90] sm:$0xff] }
 0x510   :  { %9850 = vmatpush1.bf16.msra.mxu1 %v13565_v31  ;;  %11486 = vmatprep.subr.mxu0 %v9917_v43  ;;  %v8752_v37 = vadd.f32 %v17815_v63, %v8709_v4  ;;  %v9886_v52 = vld [vmem:[%s18401_s3] sm:$0xff]  ;;  %v9945_v60 = vld [vmem:[%s18401_s3 + $0x1d8] sm:$0xff] }
 0x511   :  { %11524 = vmatprep.subr.mxu1 %v9949_v32  ;;  %v8713_v40 = vadd.f32 %v17789_v51, %v8670_v54  ;;  %v8758_v31 = vadd.f32 %v17863_v3, %v8715_v2  ;;  %v9893_v51 = vld [vmem:[%s18401_s3 + $0x38] sm:$0xff]  ;;  %v9908_v3 = vld [vmem:[%s18401_s3 + $0xb0] sm:$0xff]  ;;  %v9930_v24 = vld [vmem:[%s18401_s3 + $0x160] sm:$0xff] }
 0x512   :  { %9825 = vmatmul.mubr.bf16.vlgmr.msra.gmra.mxu0 %v13615_v8  ;;  %v8795_v35 = vadd.f32 %v17817_v16, %v8752_v37  ;;  %v9907_v16 = vld [vmem:[%s18401_s3 + $0xa8] sm:$0xff]  ;;  %v9928_v32 = vld [vmem:[%s18401_s3 + $0x150] sm:$0xff]  ;;  %v9942_v4 = vld [vmem:[%s18401_s3 + $0x1c0] sm:$0xff] }
 0x513   :  { %11484 = vmatmul.mubr.msk.bf16.vlgmr.msra.gmra.mxu1 %vm8068_vm0, %v13616_v58  ;;  %11487 = vmatpush3.msra.mxu0 %v9901_v19  ;;  %v8801_v63 = vadd.f32 %v17865_v17, %v8758_v31  ;;  %v8756_v18 = vadd.f32 %v17845_v48, %v8713_v40  ;;  %v8927_v19 = vpop.f32.mrf.mxu1  ;;  %v9924_v54 = vld [vmem:[%s18401_s3 + $0x130] sm:$0xff]  ;;  %v9938_v37 = vld [vmem:[%s18401_s3 + $0x1a0] sm:$0xff]  ;;  %v9937_v31 = vld [vmem:[%s18401_s3 + $0x198] sm:$0xff] }
 0x514   :  { %10021 = vmatprep.mubr.f32.mxu0 %v9879_v30  ;;  %11488 = vmatprep.subr.mxu0 %v9916_v7  ;;  %v8838_v43 = vadd.f32 %v17873_v23, %v8795_v35  ;;  %v8970_v30 = vpop.f32.mrf.mxu0 }
 0x515   :  { %11489 = vmatpush3.msra.mxu0 %v9900_v42  ;;  %11525 = vmatpush3.msra.mxu1 %v9933_v47  ;;  %v8799_v17 = vadd.f32 %v17847_v50, %v8756_v18  ;;  %v8844_v48 = vadd.f32 %v17932_v33, %v8801_v63  ;;  %v9890_v50 = vld [vmem:[%s18401_s3 + $0x20] sm:$0xff]  ;;  %v9905_v33 = vld [vmem:[%s18401_s3 + $0x98] sm:$0xff]  ;;  %v8929_v8 = vpop.f32.mrf.mxu1  ;;  %v9943_v47 = vld [vmem:[%s18401_s3 + $0x1c8] sm:$0xff] }
 0x516   :  { %11490 = vmatprep.subr.mxu0 %v9915_v59  ;;  %11526 = vmatprep.subr.mxu1 %v9948_v9  ;;  %v8881_v38 = vadd.f32 %v17875_v22, %v8838_v43  ;;  %v9889_v22 = vld [vmem:[%s18401_s3 + $0x18] sm:$0xff]  ;;  %v8972_v58 = vpop.f32.mrf.mxu0  ;;  %v9927_v9 = vld [vmem:[%s18401_s3 + $0x148] sm:$0xff]  ;;  %v9936_v63 = vld [vmem:[%s18401_s3 + $0x190] sm:$0xff] }
 0x517   :  { %11491 = vmatpush3.msra.mxu0 %v9899_v46  ;;  %11527 = vmatpush3.msra.mxu1 %v9932_v57  ;;  %v8887_v23 = vadd.f32 %v17934_v45, %v8844_v48  ;;  %v8842_v7 = vadd.f32 %v17908_v20, %v8799_v17  ;;  %v9888_v20 = vld [vmem:[%s18401_s3 + $0x10] sm:$0xff]  ;;  %v18140_v49 = vpop.f32.mrf.mxu1  ;;  %v9941_v57 = vld [vmem:[%s18401_s3 + $0x1b8] sm:$0xff]  ;;  %v9935_v18 = vld [vmem:[%s18401_s3 + $0x188] sm:$0xff] }
 0x518   :  { %11492 = vmatprep.subr.mxu0 %v9914_v55  ;;  %11528 = vmatprep.subr.mxu1 %v9947_v10  ;;  %v8924_v12 = vadd.f32 %v17945_v56, %v8881_v38  ;;  %v9940_v10 = vld [vmem:[%s18401_s3 + $0x1b0] sm:$0xff]  ;;  %v9919_v43 = vld [vmem:[%s18401_s3 + $0x108] sm:$0xff]  ;;  %v9934_v17 = vld [vmem:[%s18401_s3 + $0x180] sm:$0xff] }
 0x519   :  { %11493 = vmatpush3.msra.mxu0 %v9898_v27  ;;  %11529 = vmatpush3.msra.mxu1 %v9931_v61  ;;  %v8885_v45 = vadd.f32 %v17910_v14, %v8842_v7  ;;  %v8930_v42 = vadd.f32 %v8929_v8, %v8887_v23  ;;  %v9887_v14 = vld [vmem:[%s18401_s3 + $0x8] sm:$0xff]  ;;  %v18160_v2 = vpop.f32.mrf.mxu1 }
 0x51a   :  { %11494 = vmatprep.subr.mxu0 %v9913_v53  ;;  %v8967_v59 = vadd.f32 %v17947_v34, %v8924_v12  ;;  %v9946_v53 = vld [vmem:[%s18401_s3 + $0x1e0] sm:$0xff] }
 0x51b   :  { %11495 = vmatpush3.msra.mxu0 %v9897_v29  ;;  %v8973_v56 = vadd.f32 %v8972_v58, %v8930_v42  ;;  %v8928_v46 = vadd.f32 %v8927_v19, %v8885_v45  ;;  %11530 = vmatprep.subr.mxu1 %v9946_v53  ;;  %v9929_v29 = vld [vmem:[%s18401_s3 + $0x158] sm:$0xff]  ;;  %v18174_v61 = vpop.f32.mrf.mxu1 }
 0x51c   :  { %11496 = vmatprep.subr.mxu0 %v9912_v44  ;;  %v9878_v55 = vmax.f32 %v8967_v59, 0.0  ;;  %11531 = vmatpush3.msra.mxu1 %v9930_v24  ;;  %v9944_v44 = vld [vmem:[%s18401_s3 + $0x1d0] sm:$0xff] }
 0x51d   :  { %11497 = vmatpush3.msra.mxu0 %v9896_v62  ;;  %v8971_v34 = vadd.f32 %v8970_v30, %v8928_v46  ;;  %v9883_v13 = vmax.f32 %v8973_v56, 0.0  ;;  %11532 = vmatprep.subr.mxu1 %v9945_v60  ;;  %v9926_v62 = vld [vmem:[%s18401_s3 + $0x140] sm:$0xff]  ;;  %v18182_v40 = vpop.f32.mrf.mxu1 }
 0x51e   :  { %11498 = vmatprep.subr.mxu0 %v9911_v36  ;;  %11533 = vmatpush3.msra.mxu1 %v9929_v29  ;;  %v9925_v36 = vld [vmem:[%s18401_s3 + $0x138] sm:$0xff] }
 0x51f   :  { %11499 = vmatpush3.msra.mxu0 %v9895_v25  ;;  %v9882_v27 = vmax.f32 %v8971_v34, 0.0  ;;  %11534 = vmatprep.subr.mxu1 %v9944_v44  ;;  %v9939_v25 = vld [vmem:[%s18401_s3 + $0x1a8] sm:$0xff]  ;;  %v18192_v35 = vpop.f32.mrf.mxu1 }
 0x520   :  { %11500 = vmatprep.subr.mxu0 %v9910_v39  ;;  %11535 = vmatpush3.msra.mxu1 %v9928_v32  ;;  %v9923_v39 = vld [vmem:[%s18401_s3 + $0x128] sm:$0xff] }
 0x521   :  { %11501 = vmatpush3.msra.mxu0 %v9894_v5  ;;  %11536 = vmatprep.subr.mxu1 %v9943_v47  ;;  %v9922_v5 = vld [vmem:[%s18401_s3 + $0x120] sm:$0xff] }
 0x522   :  { %11502 = vmatprep.subr.mxu0 %v9909_v28  ;;  %11537 = vmatpush3.msra.mxu1 %v9927_v9  ;;  %v18190_v28 = vpop.f32.mrf.mxu0 }
 0x523   :  { %11503 = vmatpush3.msra.mxu0 %v9893_v51  ;;  %11538 = vmatprep.subr.mxu1 %v9942_v4  ;;  %v9921_v51 = vld [vmem:[%s18401_s3 + $0x118] sm:$0xff] }
 0x524   :  { %11504 = vmatprep.subr.mxu0 %v9908_v3  ;;  %11539 = vmatpush3.msra.mxu1 %v9926_v62  ;;  %v9920_v3 = vld [vmem:[%s18401_s3 + $0x110] sm:$0xff] }
 0x525   :  { %11505 = vmatpush3.msra.mxu0 %v9892_v26  ;;  %11540 = vmatprep.subr.mxu1 %v9941_v57  ;;  %v18206_v26 = vpop.f32.mrf.mxu0 }
 0x526   :  { %11506 = vmatprep.subr.mxu0 %v9907_v16  ;;  %11541 = vmatpush3.msra.mxu1 %v9925_v36  ;;  %v18208_v16 = vpop.f32.mrf.mxu1 }
 0x527   :  { %11507 = vmatpush3.msra.mxu0 %v9891_v21  ;;  %11542 = vmatprep.subr.mxu1 %v9940_v10  ;;  %v9918_v21 = vld [vmem:[%s18401_s3 + $0x100] sm:$0xff]  ;;  %v9056_v48 = vpop.f32.mrf.mxu0 }
 0x528   :  { %11508 = vmatprep.subr.mxu0 %v9906_v41  ;;  %11543 = vmatpush3.msra.mxu1 %v9924_v54  ;;  %v18219_v41 = vpop.f32.mrf.mxu1 }
 0x529   :  { %11509 = vmatpush3.msra.mxu0 %v9890_v50  ;;  %11544 = vmatprep.subr.mxu1 %v9939_v25  ;;  %v18221_v38 = vpop.f32.mrf.mxu0  ;;  %v1373_v25 = vsub.s32 2, %v14453_v11 }
 0x52a   :  { %11510 = vmatprep.subr.mxu0 %v9905_v33  ;;  %11545 = vmatpush3.msra.mxu1 %v9923_v39  ;;  %v18223_v19 = vpop.f32.mrf.mxu1 }
 0x52b   :  { %11511 = vmatpush3.msra.mxu0 %v9889_v22  ;;  %11546 = vmatprep.subr.mxu1 %v9938_v37  ;;  %v9138_v30 = vpop.f32.mrf.mxu0 }
 0x52c   :  { %11512 = vmatprep.subr.mxu0 %v9904_v0  ;;  %11547 = vmatpush3.msra.mxu1 %v9922_v5  ;;  %v18225_v50 = vpop.f32.mrf.mxu1  ;;  %v1377_v5 = vsub.s32 3, %v14453_v11 }
 0x52d   :  { %11513 = vmatpush3.msra.mxu0 %v9888_v20  ;;  %11548 = vmatprep.subr.mxu1 %v9937_v31  ;;  %v18227_v23 = vpop.f32.mrf.mxu0 }
 0x52e   :  { %11514 = vmatprep.subr.mxu0 %v9903_v1  ;;  %11549 = vmatpush3.msra.mxu1 %v9921_v51  ;;  %v18229_v33 = vpop.f32.mrf.mxu1 }
 0x52f   :  { %11515 = vmatpush3.msra.mxu0 %v9887_v14  ;;  %11550 = vmatprep.subr.mxu1 %v9936_v63  ;;  %v18231_v7 = vpop.f32.mrf.mxu0  ;;  %v13617_v63 = vld [vmem:[%s18400_s2] sm:$0xf] }
 0x530   :  { %11516 = vmatprep.subr.mxu0 %v9902_v15  ;;  %11551 = vmatpush3.msra.mxu1 %v9920_v3  ;;  %v18233_v22 = vpop.f32.mrf.mxu1  ;;  %v1374_v3 = vrot.slane %v13617_v63, %v1373_v25 }
 0x531   :  { %11517 = vmatpush3.msra.mxu0 %v9886_v52  ;;  %11552 = vmatprep.subr.mxu1 %v9935_v18  ;;  %v18235_v0 = vpop.f32.mrf.mxu0  ;;  %v1378_v18 = vrot.slane %v13617_v63, %v1377_v5 }
 0x532   :  { %10022 = vmatmul.mubr.f32.vlgmr.msra.gmra.mxu0 %v9878_v55  ;;  %11553 = vmatpush3.msra.mxu1 %v9919_v43  ;;  %v18237_v12 = vpop.f32.mrf.mxu1 }
 0x533   :  { %10026 = vmatprep.mubr.f32.mxu0 %v9883_v13  ;;  %11554 = vmatprep.subr.mxu1 %v9934_v17  ;;  %v18239_v45 = vpop.f32.mrf.mxu0  ;;  %v9012_v6 = vadd.f32 %v18160_v2, %v1378_v18  ;;  %v9016_v5 = vadd.f32 %v18182_v40, %v1378_v18 }
 0x534   :  { %11555 = vmatpush3.msra.mxu1 %v9918_v21  ;;  %v18241_v8 = vpop.f32.mrf.mxu1  ;;  %v9010_v21 = vadd.f32 %v18140_v49, %v1374_v3 }
 0x535   :  { %v18243_v58 = vpop.f32.mrf.mxu0 }
 0x536   :  { %10027 = vmatmul.mubr.f32.gmra.mxu0 %v9882_v27  ;;  %v18245_v20 = vpop.f32.mrf.mxu1  ;;  %v9053_v11 = vadd.f32 %v18190_v28, %v9010_v21  ;;  %v9059_v28 = vadd.f32 %v18221_v38, %v9016_v5 }
 0x537   :  { %v18247_v42 = vpop.f32.mrf.mxu0 }
 0x538   :  { %v18249_v1 = vpop.f32.mrf.mxu1  ;;  %v9096_v25 = vadd.f32 %v18192_v35, %v9053_v11  ;;  %v9102_v40 = vadd.f32 %v18223_v19, %v9059_v28 }
 0x539   :  { %v18251_v59 = vpop.f32.mrf.mxu0 }
 0x53a   :  { %v18253_v14 = vpop.f32.mrf.mxu1  ;;  %v9139_v49 = vadd.f32 %v9138_v30, %v9096_v25 }
 0x53b   :  { %v18255_v56 = vpop.f32.mrf.mxu0 }
 0x53c   :  { %v18257_v15 = vpop.f32.mrf.mxu1 }
 0x53d   :  { %v18259_v46 = vpop.f32.mrf.mxu0 }
 0x53e   :  { %v18261_v52 = vpop.f32.mrf.mxu1 }
 0x53f   :  { %v18263_v55 = vpop.f32.mrf.mxu0 }
 0x540   :  { %v18265_v34 = vpop.f32.mrf.mxu1 }
 0x541   :  { %v18267_v13 = vpop.f32.mrf.mxu0 }
 0x542   :  { %v18269_v27 = vpop.f32.mrf.mxu1 }
 0x543   :  { %v18271_v53 = vpop.f32.mrf.mxu0 }
 0x544   :  { %v18273_v24 = vpop.f32.mrf.mxu1 }
 0x545   :  { %v18275_v60 = vpop.f32.mrf.mxu0 }
 0x546   :  { %v18277_v29 = vpop.f32.mrf.mxu1 }
 0x547   :  { %v18279_v44 = vpop.f32.mrf.mxu0 }
 0x548   :  { %v18281_v32 = vpop.f32.mrf.mxu1 }
 0x549   :  { %v18283_v47 = vpop.f32.mrf.mxu0 }
 0x54a   :  { %v18285_v9 = vpop.f32.mrf.mxu1 }
 0x54b   :  { %v18287_v4 = vpop.f32.mrf.mxu0 }
 0x54c   :  { %v18289_v62 = vpop.f32.mrf.mxu1 }
 0x54d   :  { %v18291_v57 = vpop.f32.mrf.mxu0 }
 0x54e   :  { %v18293_v36 = vpop.f32.mrf.mxu1 }
 0x54f   :  { %v18295_v10 = vpop.f32.mrf.mxu0 }
 0x550   :  { %v18297_v54 = vpop.f32.mrf.mxu1 }
 0x551   :  { %18406 = vst [vmem:[#allocation2_spill] sm:$0xff] %v18297_v54  ;;  %v18300_v39 = vpop.f32.mrf.mxu0 }
 0x552   :  { %18407 = vst [vmem:[#allocation3_spill] sm:$0xff] %v18300_v39  ;;  %v18302_v37 = vpop.f32.mrf.mxu1  ;;  %v9055_v39 = vadd.f32 %v18206_v26, %v9012_v6  ;;  %v9182_v6 = vadd.f32 %v18225_v50, %v9139_v49 }
 0x553   :  { %18408 = vst [vmem:[#allocation4_spill] sm:$0xff] %v18302_v37  ;;  %v18305_v31 = vpop.f32.mrf.mxu0 }
 0x554   :  { %v18307_v51 = vpop.f32.mrf.mxu1  ;;  %v9225_v30 = vadd.f32 %v18239_v45, %v9182_v6 }
 0x555   :  { %18409 = vst [vmem:[#allocation5_spill] sm:$0xff] %v18307_v51  ;;  %v18312_v43 = vpop.f32.mrf.mxu0  ;;  %v9014_v51 = vadd.f32 %v18174_v61, %v1374_v3 }
 0x556   :  { %18410 = vst [vmem:[#allocation6_spill] sm:$0xff] %v18312_v43  ;;  %v18314_v17 = vpop.f32.mrf.mxu1 }
 0x557   :  { %18411 = vst [vmem:[#allocation7_spill] sm:$0xff] %v18314_v17  ;;  %v18319_v37 = vpop.f32.mrf.mxu0  ;;  %v9057_v63 = vadd.f32 %v9056_v48, %v9014_v51  ;;  %v9098_v17 = vadd.f32 %v18208_v16, %v9055_v39  ;;  %v9145_v39 = vadd.f32 %v18235_v0, %v9102_v40 }
 0x558   :  { %v18321_v54 = vpop.f32.mrf.mxu1 }
 0x559   :  { %v18328_v43 = vpop.f32.mrf.mxu0  ;;  %v9100_v21 = vadd.f32 %v18219_v41, %v9057_v63  ;;  %v9141_v61 = vadd.f32 %v18227_v23, %v9098_v17  ;;  %v9268_v23 = vadd.f32 %v18241_v8, %v9225_v30  ;;  %v9188_v3 = vadd.f32 %v18237_v12, %v9145_v39  ;;  %v18412_v28 = vld [vmem:[#allocation3_spill] sm:$0xff] }
 0x55a   :  { %v18330_v2 = vpop.f32.mrf.mxu1 }
 0x55b   :  { %v9654_v26 = vpop.f32.mrf.mxu0  ;;  %v9143_v48 = vadd.f32 %v18231_v7, %v9100_v21  ;;  %v9184_v16 = vadd.f32 %v18229_v33, %v9141_v61  ;;  %v9311_v33 = vadd.f32 %v18255_v56, %v9268_v23  ;;  %v9231_v45 = vadd.f32 %v18251_v59, %v9188_v3  ;;  %v18413_v61 = vld [vmem:[#allocation2_spill] sm:$0xff] }
 0x55c   :  { %v18415_v40 = vld [vmem:[#allocation5_spill] sm:$0xff] }
 0x55d   :  { %v9186_v38 = vadd.f32 %v18233_v22, %v9143_v48  ;;  %v9227_v41 = vadd.f32 %v18243_v58, %v9184_v16  ;;  %v9656_v51 = vpop.f32.mrf.mxu0  ;;  %v9354_v58 = vadd.f32 %v18257_v15, %v9311_v33  ;;  %v9274_v17 = vadd.f32 %v18253_v14, %v9231_v45  ;;  %v18414_v6 = vld [vmem:[#allocation6_spill] sm:$0xff]  ;;  %v18416_v48 = vld [vmem:[#allocation4_spill] sm:$0xff] }
 0x55e   :  { %v18417_v16 = vld [vmem:[#allocation7_spill] sm:$0xff] }
 0x55f   :  { %v9229_v19 = vadd.f32 %v18247_v42, %v9186_v38  ;;  %v9270_v7 = vadd.f32 %v18245_v20, %v9227_v41  ;;  %v9658_v18 = vpop.f32.mrf.mxu0  ;;  %v9397_v20 = vadd.f32 %v18271_v53, %v9354_v58  ;;  %v9317_v56 = vadd.f32 %v18267_v13, %v9274_v17 }
 0x561   :  { %v9272_v0 = vadd.f32 %v18249_v1, %v9229_v19  ;;  %v9313_v22 = vadd.f32 %v18259_v46, %v9270_v7  ;;  %v9440_v46 = vadd.f32 %v18273_v24, %v9397_v20  ;;  %v9660_v11 = vpop.f32.mrf.mxu0  ;;  %v9360_v25 = vadd.f32 %v18269_v27, %v9317_v56 }
 0x563   :  { %v9315_v12 = vadd.f32 %v18263_v55, %v9272_v0  ;;  %v9356_v42 = vadd.f32 %v18261_v52, %v9313_v22  ;;  %v9483_v52 = vadd.f32 %v18287_v4, %v9440_v46  ;;  %v9403_v13 = vadd.f32 %v18283_v47, %v9360_v25 }
 0x565   :  { %v9358_v59 = vadd.f32 %v18265_v34, %v9315_v12  ;;  %v9399_v1 = vadd.f32 %v18275_v60, %v9356_v42  ;;  %v9526_v24 = vadd.f32 %v18289_v62, %v9483_v52  ;;  %v9446_v63 = vadd.f32 %v18285_v9, %v9403_v13 }
 0x567   :  { %v9401_v14 = vadd.f32 %v18279_v44, %v9358_v59  ;;  %v9442_v55 = vadd.f32 %v18277_v29, %v9399_v1  ;;  %v9569_v29 = vadd.f32 %v18305_v31, %v9526_v24  ;;  %v9489_v21 = vadd.f32 %v18412_v28, %v9446_v63 }
 0x569   :  { %v9444_v34 = vadd.f32 %v18281_v32, %v9401_v14  ;;  %v9485_v60 = vadd.f32 %v18291_v57, %v9442_v55  ;;  %v9612_v57 = vadd.f32 %v18415_v40, %v9569_v29  ;;  %v9532_v62 = vadd.f32 %v18416_v48, %v9489_v21 }
 0x56b   :  { %v9487_v27 = vadd.f32 %v18295_v10, %v9444_v34  ;;  %v9528_v44 = vadd.f32 %v18293_v36, %v9485_v60  ;;  %v9655_v30 = vadd.f32 %v9654_v26, %v9612_v57  ;;  %v9575_v31 = vadd.f32 %v18328_v43, %v9532_v62 }
 0x56d   :  { %v9530_v47 = vadd.f32 %v18413_v61, %v9487_v27  ;;  %v9571_v32 = vadd.f32 %v18414_v6, %v9528_v44  ;;  %v9618_v3 = vadd.f32 %v18330_v2, %v9575_v31  ;;  %v11485_v44 = vld [vmem:[%s18402_s4] ss:$0 sm:$0xff] }
 0x56f   :  { %v9573_v9 = vadd.f32 %v18319_v37, %v9530_v47  ;;  %v9614_v10 = vadd.f32 %v18417_v16, %v9571_v32  ;;  %v9661_v22 = vadd.f32 %v9660_v11, %v9618_v3 }
 0x571   :  { %v9616_v38 = vadd.f32 %v18321_v54, %v9573_v9  ;;  %v9657_v41 = vadd.f32 %v9656_v51, %v9614_v10 }
 0x573   :  { %v9659_v19 = vadd.f32 %v9658_v18, %v9616_v38 }
 0x583   :  { %v9697_v35 = vpop.f32.mrf.mxu1 }
 0x584   :  { %v9698_v23 = vadd.f32 %v9697_v35, %v9655_v30 }
 0x585   :  { %v9699_v50 = vpop.f32.mrf.mxu1 }
 0x586   :  { %v9700_v7 = vadd.f32 %v9699_v50, %v9657_v41 }
 0x587   :  { %v9701_v8 = vpop.f32.mrf.mxu1 }
 0x588   :  { %v9702_v37 = vadd.f32 %v9701_v8, %v9659_v19 }
 0x589   :  { %v9703_v15 = vpop.f32.mrf.mxu1 }
 0x58a   :  { %v9704_v42 = vadd.f32 %v9703_v15, %v9661_v22 }
 0x592   :  { %v9740_v5 = vpop.f32.mrf.mxu0 }
 0x593   :  { %v9741_v33 = vadd.f32 %v9740_v5, %v9698_v23 }
 0x594   :  { %v9742_v49 = vpop.f32.mrf.mxu0 }
 0x595   :  { %v9743_v58 = vadd.f32 %v9742_v49, %v9700_v7 }
 0x596   :  { %v9744_v36 = vpop.f32.mrf.mxu0 }
 0x597   :  { %v9745_v20 = vadd.f32 %v9744_v36, %v9702_v37 }
 0x598   :  { %v9746_v45 = vpop.f32.mrf.mxu0 }
 0x599   :  { %v9747_v35 = vadd.f32 %v9746_v45, %v9704_v42 }
 0x5c3   :  { %v9783_v53 = vpop.f32.mrf.mxu1 }
 0x5c4   :  { %v9784_v17 = vadd.f32 %v9783_v53, %v9741_v33 }
 0x5c5   :  { %v9785_v4 = vpop.f32.mrf.mxu1 }
 0x5c6   :  { %v9786_v43 = vadd.f32 %v9785_v4, %v9743_v58  ;;  %v18418_v4 = vlaneseq }
 0x5c7   :  { %v9787_v39 = vpop.f32.mrf.mxu1 }
 0x5c8   :  { %v9788_v59 = vadd.f32 %v9787_v39, %v9745_v20  ;;  %v10110_v28 = vand.u32 127, %v18418_v4 }
 0x5c9   :  { %v9789_v0 = vpop.f32.mrf.mxu1 }
 0x5ca   :  { %v9790_v46 = vadd.f32 %v9789_v0, %v9747_v35  ;;  %vm10111_vm1 = vcmp.lt.s32.totalorder %v10110_v28, 6 }
 0x5d2   :  { %v9826_v26 = vpop.f32.mrf.mxu0 }
 0x5d3   :  { %v9869_v12 = vpop.f32.mrf.mxu1  ;;  %v9827_v56 = vadd.f32 %v9826_v26, %v9784_v17 }
 0x5d4   :  { %v9828_v54 = vpop.f32.mrf.mxu0 }
 0x5d5   :  { %v9871_v51 = vpop.f32.mrf.mxu1  ;;  %v9829_v2 = vadd.f32 %v9828_v54, %v9786_v43  ;;  %v9870_v18 = vadd.f32 %v9869_v12, %v9827_v56 }
 0x5d6   :  { %v9830_v50 = vpop.f32.mrf.mxu0 }
 0x5d7   :  { %v9873_v1 = vpop.f32.mrf.mxu1  ;;  %v9872_v25 = vadd.f32 %v9871_v51, %v9829_v2  ;;  %v9831_v11 = vadd.f32 %v9830_v50, %v9788_v59  ;;  %v9880_v52 = vmax.f32 %v9870_v18, 0.0 }
 0x5d8   :  { %v9832_v8 = vpop.f32.mrf.mxu0 }
 0x5d9   :  { %v9881_v14 = vmax.f32 %v9872_v25, 0.0  ;;  %v9833_v55 = vadd.f32 %v9832_v8, %v9790_v46  ;;  %v9874_v5 = vadd.f32 %v9873_v1, %v9831_v11  ;;  %v9875_v15 = vpop.f32.mrf.mxu1 }
 0x5db   :  { %v9876_v53 = vadd.f32 %v9875_v15, %v9833_v55  ;;  %10096 = vmatprep.mubr.f32.mxu1 %v9881_v14  ;;  %v9884_v34 = vmax.f32 %v9874_v5, 0.0 }
 0x5dc   :  { %10097 = vmatmul.mubr.f32.vlgmr.msra.gmra.mxu1 %v9880_v52 }
 0x5dd   :  { %v9885_v13 = vmax.f32 %v9876_v53, 0.0 }
 0x5df   :  { %10101 = vmatprep.mubr.f32.mxu1 %v9885_v13 }
 0x5e0   :  { %10102 = vmatmul.mubr.f32.gmra.mxu1 %v9884_v34 }
 0x5f2   :  { %v11518_v60 = vpop.f32.mrf.mxu0 }
 0x5f4   :  { %v11519_v24 = vpop.f32.mrf.mxu0 }
 0x5f5   :  { %v11520_v27 = vadd.f32 %v11519_v24, %v11518_v60 }
 0x5f6   :  { %v11521_v63 = vpop.f32.mrf.mxu0 }
 0x5f7   :  { %v10024_v61 = vadd.f32 %v11520_v27, %v11485_v44 }
 0x5f8   :  { %v11522_v29 = vpop.f32.mrf.mxu0 }
 0x5f9   :  { %v11523_v47 = vadd.f32 %v11522_v29, %v11521_v63 }
 0x5fb   :  { %v10029_v48 = vadd.f32 %v11523_v47, %v11485_v44 }
 0x69c   :  { %v11556_v49 = vpop.f32.mrf.mxu1 }
 0x69e   :  { %v11557_v21 = vpop.f32.mrf.mxu1 }
 0x69f   :  { %v11558_v6 = vadd.f32 %v11557_v21, %v11556_v49 }
 0x6a0   :  { %v11559_v32 = vpop.f32.mrf.mxu1 }
 0x6a1   :  { %v10099_v40 = vadd.f32 %v11558_v6, %v10024_v61 }
 0x6a2   :  { %v11560_v57 = vpop.f32.mrf.mxu1 }
 0x6a3   :  { %10107 = vst [vmem:[%s18403_s5] sm:$0xff] %v10099_v40  ;;  %v11561_v62 = vadd.f32 %v11560_v57, %v11559_v32  ;;  %v10112_v9 = vsel %vm10111_vm1, %v10099_v40, -inf }
 0x6a4   :  { %10114 = vmax.xlane.f32.xlu0 %v10112_v9 }
 0x6a5   :  { %v10104_v16 = vadd.f32 %v11561_v62, %v10029_v48 }
 0x6a7   :  { %10108 = vst [vmem:[%s18403_s5 + $0x8] sm:$0xff] %v10104_v16  ;;  %v10113_v10 = vsel %vm10111_vm1, %v10104_v16, -inf }
 0x6a8   :  { %10116 = vmax.xlane.f32.xlu0 %v10113_v10 }
 0x72d   :  { %v10115_v30 = vpop.xlane.xlu0 %10114 }
 0x72e   :  { %v10118_v36 = vsub.f32 %v10112_v9, %v10115_v30 }
 0x730   :  { %v10120_v39 = vmul.f32 1.442695, %v10118_v36 }
 0x731   :  { %v10117_v31 = vpop.xlane.xlu0 %10116 }
 0x732   :  { %13568 = vpow2.f32 %v10120_v39  ;;  %v10119_v38 = vsub.f32 %v10113_v10, %v10117_v31 }
 0x734   :  { %v10122_v41 = vmul.f32 1.442695, %v10119_v38 }
 0x736   :  { %13570 = vpow2.f32 %v10122_v41 }
 0x73f   :  { %v13569_v23 = vpop.eup %13568 }
 0x740   :  { %10124 = vadd.xlane.f32.xlu1 %v13569_v23 }
 0x743   :  { %v13571_v3 = vpop.eup %13570 }
 0x744   :  { %10126 = vadd.xlane.f32.xlu1 %v13571_v3 }
 0x7c9   :  { %v10125_v19 = vpop.xlane.xlu1 %10124 }
 0x7ca   :  { %13572 = vlog2.f32 %v10125_v19 }
 0x7cd   :  { %v10127_v7 = vpop.xlane.xlu1 %10126 }
 0x7ce   :  { %13574 = vlog2.f32 %v10127_v7 }
 0x7d7   :  { %v13573_v33 = vpop.eup %13572 }
 0x7d8   :  { %v10129_v45 = vmul.f32 0.6931472, %v13573_v33 }
 0x7da   :  { %v10132_v0 = vadd.f32 %v10129_v45, %v10115_v30 }
 0x7db   :  { %v13575_v22 = vpop.eup %13574 }
 0x7dc   :  { %v10134_v37 = vsub.f32 %v10099_v40, %v10132_v0  ;;  %v10131_v58 = vmul.f32 0.6931472, %v13575_v22 }
 0x7de   :  { %10136 = vst [vmem:[%s18404_s6] sm:$0xff] %v10134_v37  ;;  %v10133_v17 = vadd.f32 %v10131_v58, %v10117_v31 }
 0x7e0   :  { %v10135_v26 = vsub.f32 %v10104_v16, %v10133_v17 }
 0x7e2   :  { %10137 = vst [vmem:[%s18404_s6 + $0x8] sm:$0xff] %v10135_v26 }

</bundles_post_ra>
